<compile_context>
chip_gen: v7x
topology: tpu7x:2x2x1
jax: 0.10.0
libtpu: 0.0.40
codegen_flags: <defaults>
</compile_context>

<pallas_src>
import functools

import jax
import jax.numpy as jnp
import numpy as np
from jax import lax
from jax.experimental import pallas as pl
from jax.experimental.pallas import tpu as pltpu

EPS_GN = 1e-5  # nn.GroupNorm default eps
EPS_LN = 1e-5  # nn.LayerNorm default eps

# Row layout of the packed (1,dim) parameter vectors.
(ROW_GN_G, ROW_GN_B, ROW_B_IN,
 ROW_LN1_G, ROW_LN1_B, ROW_LN2_G, ROW_LN2_B, ROW_LN3_G, ROW_LN3_B,
 ROW_A1_BO, ROW_A2_BO, ROW_FF_B1, ROW_FF_B2, ROW_B_OUT) = range(14)
N_VEC_ROWS = 14

# Stacking order of the (d, d) attention weights.
(IDX_A1_WQ, IDX_A1_WK, IDX_A1_WV, IDX_A1_WO, IDX_A2_WQ, IDX_A2_WO) = range(6)
# Stacking order of the (d_emb, d) attention weights.
(IDX_A2_WK, IDX_A2_WV) = range(2)


# ----------------------------------------------------------------------------
# Kernel helpers (traced inside the Pallas kernel body)
# ----------------------------------------------------------------------------
def _layernorm(h, g, b):
    mu = jnp.mean(h, axis=-1, keepdims=True)
    var = jnp.mean((h - mu) ** 2, axis=-1, keepdims=True)
    return (h - mu) * lax.rsqrt(var + EPS_LN) * g + b


def _mha(q_in, kv_in, wq, wk, wv, wo, bo, *, nheads, scale):
    """Multi-head attention with fused full-width projections.

    q_in: (N, d_q) f32, kv_in: (M, d_kv) f32, weights bf16:
      wq (d_q, d), wk/wv (d_kv, d), wo (d, d_out). Returns (N, d_out) f32.
    """
    bf16 = jnp.bfloat16
    f32 = jnp.float32
    qb = q_in.astype(bf16)
    kvb = qb if kv_in is q_in else kv_in.astype(bf16)

    # Single full-width projections (MXU-friendly), f32 accumulation.
    q = jnp.dot(qb, wq, preferred_element_type=f32)    # (N, d)
    k = jnp.dot(kvb, wk, preferred_element_type=f32)   # (M, d)
    v = jnp.dot(kvb, wv, preferred_element_type=f32)   # (M, d)

    d = q.shape[-1]
    dh = d // nheads

    # Per-head score / softmax / weighted value.  Heads are a short static
    # loop over lane slices at these toy dims (dh=8, N=64); for realistic
    # sizes fold heads into a grid axis / fori_loop instead.
    head_outs = []
    for h in range(nheads):
        lo = h * dh
        qh = q[:, lo:lo + dh].astype(bf16)              # (N, dh)
        kh = k[:, lo:lo + dh].astype(bf16)              # (M, dh)
        vh = v[:, lo:lo + dh].astype(bf16)              # (M, dh)
        sim = lax.dot_general(qh, kh, (((1,), (1,)), ((), ())),
                              preferred_element_type=f32) * scale   # (N, M) f32
        sim = sim - jnp.max(sim, axis=-1, keepdims=True)
        p = jnp.exp(sim)
        p = p * pl.reciprocal(jnp.sum(p, axis=-1, keepdims=True), approx=True)
        head_outs.append(jnp.dot(p.astype(bf16), vh,
                                 preferred_element_type=f32))        # (N, dh)

    # Concatenate heads on the lane axis, then ONE output projection.
    o = jnp.concatenate(head_outs, axis=-1).astype(bf16)             # (N, d)
    return jnp.dot(o, wo, preferred_element_type=f32) + bo           # (N, d_out)


# ----------------------------------------------------------------------------
# The fused Pallas kernel: one grid step == one batch element
# ----------------------------------------------------------------------------
def transformer_block_kernel(
    x_ref, ctx_ref, vec_ref, w_in_ref, w_dd_ref, w_ed_ref,
    ff_w1_ref, ff_w2_ref, w_out_ref,
    o_ref,
    *, nheads, n_groups, scale,
):
    f32 = jnp.float32
    bf16 = jnp.bfloat16

    x = x_ref[0]        # (N, C)  f32 -- also the skip connection
    ctx = ctx_ref[0]    # (M, d_emb) f32
    N, C = x.shape
    d = w_in_ref.shape[-1]
    d_ff = ff_w1_ref.shape[-1]
    cpg = C // n_groups

    # ---- unpack the packed (1, dim) parameter rows ----
    vecs = vec_ref[...]                                 # (N_VEC_ROWS, Wmax) f32

    def vrow(i, width):
        return vecs[i:i + 1, :width]

    gn_g, gn_b = vrow(ROW_GN_G, C), vrow(ROW_GN_B, C)
    b_in = vrow(ROW_B_IN, d)
    ln1_g, ln1_b = vrow(ROW_LN1_G, d), vrow(ROW_LN1_B, d)
    ln2_g, ln2_b = vrow(ROW_LN2_G, d), vrow(ROW_LN2_B, d)
    ln3_g, ln3_b = vrow(ROW_LN3_G, d), vrow(ROW_LN3_B, d)
    a1_bo, a2_bo = vrow(ROW_A1_BO, d), vrow(ROW_A2_BO, d)
    ff_b1, ff_b2 = vrow(ROW_FF_B1, d_ff), vrow(ROW_FF_B2, d)
    b_out = vrow(ROW_B_OUT, C)

    # ---- GroupNorm(n_groups, C): two-pass VPU reduction per channel group ----
    parts = []
    for g in range(n_groups):
        xg = x[:, g * cpg:(g + 1) * cpg]                        # (N, cpg)
        s = jnp.sum(xg, axis=0, keepdims=True)                  # (1, cpg)
        mu = jnp.sum(s, axis=1, keepdims=True) / float(N * cpg)  # (1, 1)
        xc = xg - mu
        sq = jnp.sum(xc * xc, axis=0, keepdims=True)
        var = jnp.sum(sq, axis=1, keepdims=True) / float(N * cpg)
        parts.append(xc * lax.rsqrt(var + EPS_GN))
    xn = jnp.concatenate(parts, axis=-1) * gn_g + gn_b          # (N, C) f32

    # ---- proj_in: (N, C) -> (N, d) ----
    h = jnp.dot(xn.astype(bf16), w_in_ref[...],
                preferred_element_type=f32) + b_in

    # ---- attention weights (bf16, stacked) ----
    a1_wq = w_dd_ref[IDX_A1_WQ]
    a1_wk = w_dd_ref[IDX_A1_WK]
    a1_wv = w_dd_ref[IDX_A1_WV]
    a1_wo = w_dd_ref[IDX_A1_WO]
    a2_wq = w_dd_ref[IDX_A2_WQ]
    a2_wo = w_dd_ref[IDX_A2_WO]
    a2_wk = w_ed_ref[IDX_A2_WK]
    a2_wv = w_ed_ref[IDX_A2_WV]

    # ---- self attention: h = attn1(LN1(h)) + h ----
    hn1 = _layernorm(h, ln1_g, ln1_b)
    h = _mha(hn1, hn1, a1_wq, a1_wk, a1_wv, a1_wo, a1_bo,
             nheads=nheads, scale=scale) + h

    # ---- cross attention with context: h = attn2(LN2(h), ctx) + h ----
    hn2 = _layernorm(h, ln2_g, ln2_b)
    h = _mha(hn2, ctx, a2_wq, a2_wk, a2_wv, a2_wo, a2_bo,
             nheads=nheads, scale=scale) + h

    # ---- feed-forward: h = FF(LN3(h)) + h ----
    hn3 = _layernorm(h, ln3_g, ln3_b)
    ffh = jnp.maximum(
        jnp.dot(hn3.astype(bf16), ff_w1_ref[...],
                preferred_element_type=f32) + ff_b1, 0.0)
    h = jnp.dot(ffh.astype(bf16), ff_w2_ref[...],
                preferred_element_type=f32) + ff_b2 + h

    # ---- proj_out + skip ----
    y = jnp.dot(h.astype(bf16), w_out_ref[...],
                preferred_element_type=f32) + b_out
    o_ref[0] = (y + x).astype(o_ref.dtype)


# ----------------------------------------------------------------------------
# Parameter init (deterministic, PyTorch-style weight shapes)
# ----------------------------------------------------------------------------
def init_params(key, in_c, d, d_emb, nheads):
    counter = iter(range(10_000))

    def nk():
        return jax.random.fold_in(key, next(counter))

    def lin(out_f, in_f, bias=True, s=0.05):
        w = s * jax.random.normal(nk(), (out_f, in_f), jnp.float32)
        b = s * jax.random.normal(nk(), (out_f,), jnp.float32) if bias else None
        return w, b

    def norm(dim):
        g = 1.0 + 0.1 * jax.random.normal(nk(), (dim,), jnp.float32)
        b = 0.1 * jax.random.normal(nk(), (dim,), jnp.float32)
        return g, b

    p = {}
    p["gn_g"], p["gn_b"] = norm(in_c)
    p["w_in"], p["b_in"] = lin(d, in_c)
    p["ln1_g"], p["ln1_b"] = norm(d)
    p["ln2_g"], p["ln2_b"] = norm(d)
    p["ln3_g"], p["ln3_b"] = norm(d)
    p["a1_wq"], _ = lin(d, d, bias=False)
    p["a1_wk"], _ = lin(d, d, bias=False)
    p["a1_wv"], _ = lin(d, d, bias=False)
    p["a1_wo"], p["a1_bo"] = lin(d, d)
    p["a2_wq"], _ = lin(d, d, bias=False)
    p["a2_wk"], _ = lin(d, d_emb, bias=False)
    p["a2_wv"], _ = lin(d, d_emb, bias=False)
    p["a2_wo"], p["a2_bo"] = lin(d, d)
    p["ff_w1"], p["ff_b1"] = lin(4 * d, d)
    p["ff_w2"], p["ff_b2"] = lin(d, 4 * d)
    p["w_out"], p["b_out"] = lin(in_c, d)
    return p


# ----------------------------------------------------------------------------
# Glue: pack params into kernel layout and invoke pallas_call
# ----------------------------------------------------------------------------
def _prep_operands(x_nchw, ctx, p):
    B, C, H, W = x_nchw.shape
    N = H * W
    d = p["w_in"].shape[0]
    d_ff = p["ff_w1"].shape[0]
    bf16 = jnp.bfloat16

    x_tok = x_nchw.reshape(B, C, N).transpose(0, 2, 1)          # (B, N, C) f32

    # Pack all (1, dim) vectors (f32) into one padded array -> single operand.
    wmax = max(C, d, d_ff)

    def pack(vs):
        rows = []
        for v in vs:
            v = v.reshape(1, -1).astype(jnp.float32)
            rows.append(jnp.pad(v, ((0, 0), (0, wmax - v.shape[1]))))
        return jnp.concatenate(rows, axis=0)                    # (N_VEC_ROWS, wmax)

    vecs = pack([p["gn_g"], p["gn_b"], p["b_in"],
                 p["ln1_g"], p["ln1_b"], p["ln2_g"], p["ln2_b"],
                 p["ln3_g"], p["ln3_b"],
                 p["a1_bo"], p["a2_bo"], p["ff_b1"], p["ff_b2"], p["b_out"]])

    # Weights stored bf16 (half the HBM->VMEM traffic), transposed to (in, out).
    w_in = p["w_in"].T.astype(bf16)                              # (C, d)
    w_dd = jnp.stack([p["a1_wq"].T, p["a1_wk"].T, p["a1_wv"].T,
                      p["a1_wo"].T, p["a2_wq"].T, p["a2_wo"].T]).astype(bf16)  # (6, d, d)
    w_ed = jnp.stack([p["a2_wk"].T, p["a2_wv"].T]).astype(bf16)  # (2, d_emb, d)
    ff_w1 = p["ff_w1"].T.astype(bf16)                            # (d, 4d)
    ff_w2 = p["ff_w2"].T.astype(bf16)                            # (4d, d)
    w_out = p["w_out"].T.astype(bf16)                            # (d, C)

    return [x_tok, ctx, vecs, w_in, w_dd, w_ed, ff_w1, ff_w2, w_out]


def transformer_block(x_nchw, context, params, *, nheads, n_groups):
    B, C, H, W = x_nchw.shape
    N = H * W
    d = params["w_in"].shape[0]
    scale = float(d // nheads) ** -0.5
    M, d_emb = context.shape[1], context.shape[2]

    ops = _prep_operands(x_nchw, context, params)

    def invariant(shape):
        nd = len(shape)
        return pl.BlockSpec(shape, lambda b: (0,) * nd)

    in_specs = [
        pl.BlockSpec((1, N, C), lambda b: (b, 0, 0)),        # per-batch tokens
        pl.BlockSpec((1, M, d_emb), lambda b: (b, 0, 0)),    # per-batch context
    ] + [invariant(op.shape) for op in ops[2:]]              # batch-invariant params

    kernel = functools.partial(transformer_block_kernel,
                               nheads=nheads, n_groups=n_groups, scale=scale)

    y_tok = pl.pallas_call(
        kernel,
        out_shape=jax.ShapeDtypeStruct((B, N, C), jnp.float32),
        grid_spec=pltpu.PrefetchScalarGridSpec(
            num_scalar_prefetch=0,
            grid=(B,),
            in_specs=in_specs,
            out_specs=pl.BlockSpec((1, N, C), lambda b: (b, 0, 0)),
        ),
        compiler_params=pltpu.CompilerParams(
            dimension_semantics=("parallel",),
            vmem_limit_bytes=48 * 1024 * 1024,   # explicit budget, large headroom
        ),
    )(*ops)

    return y_tok.transpose(0, 2, 1).reshape(B, C, H, W)


# ----------------------------------------------------------------------------
# Pure-JAX reference (mirrors the PyTorch forward exactly, f32)
# ----------------------------------------------------------------------------
def reference(x_nchw, ctx, p, *, nheads, n_groups):
    B, C, H, W = x_nchw.shape
    N = H * W
    skip = x_nchw
    x = x_nchw.reshape(B, C, N)

    xg = x.reshape(B, n_groups, (C // n_groups) * N)
    mu = xg.mean(-1, keepdims=True)
    var = ((xg - mu) ** 2).mean(-1, keepdims=True)
    xg = (xg - mu) / jnp.sqrt(var + EPS_GN)
    x = xg.reshape(B, C, N) * p["gn_g"][None, :, None] + p["gn_b"][None, :, None]

    x = x.transpose(0, 2, 1)                       # (B, N, C)
    x = x @ p["w_in"].T + p["b_in"]

    def ln(h, g, b):
        mu = h.mean(-1, keepdims=True)
        v = ((h - mu) ** 2).mean(-1, keepdims=True)
        return (h - mu) / jnp.sqrt(v + EPS_LN) * g + b

    def attn(xq, xkv, wq, wk, wv, wo, bo):
        q, k, v = xq @ wq.T, xkv @ wk.T, xkv @ wv.T
        Bq, Nq, D = q.shape
        dh = D // nheads

        def split(t):
            Bt, Nt, _ = t.shape
            return t.reshape(Bt, Nt, nheads, dh).transpose(0, 2, 1, 3)

        q, k, v = split(q), split(k), split(v)
        sim = jnp.einsum("bhnd,bhmd->bhnm", q, k) * (float(D // nheads) ** -0.5)
        a = jax.nn.softmax(sim, axis=-1)
        o = jnp.einsum("bhnm,bhmd->bhnd", a, v)
        o = o.transpose(0, 2, 1, 3).reshape(Bq, Nq, D)
        return o @ wo.T + bo

    xn1 = ln(x, p["ln1_g"], p["ln1_b"])
    x = attn(xn1, xn1, p["a1_wq"], p["a1_wk"], p["a1_wv"], p["a1_wo"], p["a1_bo"]) + x
    xn2 = ln(x, p["ln2_g"], p["ln2_b"])
    x = attn(xn2, ctx, p["a2_wq"], p["a2_wk"], p["a2_wv"], p["a2_wo"], p["a2_bo"]) + x
    xn3 = ln(x, p["ln3_g"], p["ln3_b"])
    ffh = jnp.maximum(xn3 @ p["ff_w1"].T + p["ff_b1"], 0.0)
    x = ffh @ p["ff_w2"].T + p["ff_b2"] + x
    x = x @ p["w_out"].T + p["b_out"]
    x = x.transpose(0, 2, 1).reshape(B, C, H, W)
    return x + skip


# ----------------------------------------------------------------------------
if __name__ == "__main__":
    B, in_c, H, W = 2, 16, 8, 8          # in_c divisible by GroupNorm's 8 groups
    d, d_emb, nheads, M = 64, 64, 8, 8   # N = 64 image tokens, M = 8 context tokens
    n_groups = 8

    key = jax.random.PRNGKey(0)
    kx, kc, kp = jax.random.split(key, 3)
    x = jax.random.normal(kx, (B, in_c, H, W), jnp.float32)
    context = jax.random.normal(kc, (B, M, d_emb), jnp.float32)
    params = init_params(kp, in_c, d, d_emb, nheads)

    y = transformer_block(x, context, params, nheads=nheads, n_groups=n_groups)
    y = jax.block_until_ready(y)

    y_ref = reference(x, context, params, nheads=nheads, n_groups=n_groups)
    assert y.shape == x.shape and y.dtype == x.dtype
    # Kernel matmuls run in bf16 (f32 accumulation); reference is pure f32.
    np.testing.assert_allclose(np.asarray(y), np.asarray(y_ref), rtol=3e-2, atol=3e-2)
    print("KERNEL_OK")
</pallas_src>

<mosaic_0001>
module attributes {stable_mosaic.version = 11 : i64} {
  func.func @transformer_block_kernel(%arg0: i32, %arg1: memref<1x64x16xf32, #tpu.memory_space<vmem>>, %arg2: memref<1x8x64xf32, #tpu.memory_space<vmem>>, %arg3: memref<14x256xf32, #tpu.memory_space<vmem>>, %arg4: memref<16x64xbf16, #tpu.memory_space<vmem>>, %arg5: memref<6x64x64xbf16, #tpu.memory_space<vmem>>, %arg6: memref<2x64x64xbf16, #tpu.memory_space<vmem>>, %arg7: memref<64x256xbf16, #tpu.memory_space<vmem>>, %arg8: memref<256x64xbf16, #tpu.memory_space<vmem>>, %arg9: memref<64x16xbf16, #tpu.memory_space<vmem>>, %arg10: memref<1x64x16xf32, #tpu.memory_space<vmem>>) attributes {dimension_semantics = [#tpu.dimension_semantics<parallel>], iteration_bounds = array<i64: 2>, scalar_prefetch = 0 : i64, scratch_operands = 0 : i64, tpu.core_type = #tpu.core_type<tc>, window_params = [{transform_indices = @transform_0, window_bounds = array<i64: 1, 64, 16>}, {transform_indices = @transform_1, window_bounds = array<i64: 1, 8, 64>}, {pipeline_mode = #tpu.pipeline_mode<synchronous>, transform_indices = @transform_2, window_bounds = array<i64: 14, 256>}, {pipeline_mode = #tpu.pipeline_mode<synchronous>, transform_indices = @transform_3, window_bounds = array<i64: 16, 64>}, {pipeline_mode = #tpu.pipeline_mode<synchronous>, transform_indices = @transform_4, window_bounds = array<i64: 6, 64, 64>}, {pipeline_mode = #tpu.pipeline_mode<synchronous>, transform_indices = @transform_5, window_bounds = array<i64: 2, 64, 64>}, {pipeline_mode = #tpu.pipeline_mode<synchronous>, transform_indices = @transform_6, window_bounds = array<i64: 64, 256>}, {pipeline_mode = #tpu.pipeline_mode<synchronous>, transform_indices = @transform_7, window_bounds = array<i64: 256, 64>}, {pipeline_mode = #tpu.pipeline_mode<synchronous>, transform_indices = @transform_8, window_bounds = array<i64: 64, 16>}, {transform_indices = @transform_9, window_bounds = array<i64: 1, 64, 16>}]} {
    %c0 = arith.constant 0 : index
    %c0_0 = arith.constant 0 : index
    %c0_1 = arith.constant 0 : index
    %0 = vector.load %arg1[%c0, %c0_0, %c0_1] : memref<1x64x16xf32, #tpu.memory_space<vmem>>, vector<1x64x16xf32>
    %1 = vector.shape_cast %0 : vector<1x64x16xf32> to vector<64x16xf32>
    %c0_2 = arith.constant 0 : index
    %c0_3 = arith.constant 0 : index
    %c0_4 = arith.constant 0 : index
    %2 = vector.load %arg2[%c0_2, %c0_3, %c0_4] : memref<1x8x64xf32, #tpu.memory_space<vmem>>, vector<1x8x64xf32>
    %3 = vector.shape_cast %2 : vector<1x8x64xf32> to vector<8x64xf32>
    %c0_5 = arith.constant 0 : index
    %c0_6 = arith.constant 0 : index
    %4 = vector.load %arg3[%c0_5, %c0_6] : memref<14x256xf32, #tpu.memory_space<vmem>>, vector<14x256xf32>
    %5 = vector.extract_strided_slice %4 {offsets = [0, 0], sizes = [1, 16], strides = [1, 1]} : vector<14x256xf32> to vector<1x16xf32>
    %6 = vector.extract_strided_slice %4 {offsets = [1, 0], sizes = [1, 16], strides = [1, 1]} : vector<14x256xf32> to vector<1x16xf32>
    %7 = vector.extract_strided_slice %4 {offsets = [2, 0], sizes = [1, 64], strides = [1, 1]} : vector<14x256xf32> to vector<1x64xf32>
    %8 = vector.extract_strided_slice %4 {offsets = [3, 0], sizes = [1, 64], strides = [1, 1]} : vector<14x256xf32> to vector<1x64xf32>
    %9 = vector.extract_strided_slice %4 {offsets = [4, 0], sizes = [1, 64], strides = [1, 1]} : vector<14x256xf32> to vector<1x64xf32>
    %10 = vector.extract_strided_slice %4 {offsets = [5, 0], sizes = [1, 64], strides = [1, 1]} : vector<14x256xf32> to vector<1x64xf32>
    %11 = vector.extract_strided_slice %4 {offsets = [6, 0], sizes = [1, 64], strides = [1, 1]} : vector<14x256xf32> to vector<1x64xf32>
    %12 = vector.extract_strided_slice %4 {offsets = [7, 0], sizes = [1, 64], strides = [1, 1]} : vector<14x256xf32> to vector<1x64xf32>
    %13 = vector.extract_strided_slice %4 {offsets = [8, 0], sizes = [1, 64], strides = [1, 1]} : vector<14x256xf32> to vector<1x64xf32>
    %14 = vector.extract_strided_slice %4 {offsets = [9, 0], sizes = [1, 64], strides = [1, 1]} : vector<14x256xf32> to vector<1x64xf32>
    %15 = vector.extract_strided_slice %4 {offsets = [10, 0], sizes = [1, 64], strides = [1, 1]} : vector<14x256xf32> to vector<1x64xf32>
    %16 = vector.extract_strided_slice %4 {offsets = [11, 0], sizes = [1, 256], strides = [1, 1]} : vector<14x256xf32> to vector<1x256xf32>
    %17 = vector.extract_strided_slice %4 {offsets = [12, 0], sizes = [1, 64], strides = [1, 1]} : vector<14x256xf32> to vector<1x64xf32>
    %18 = vector.extract_strided_slice %4 {offsets = [13, 0], sizes = [1, 16], strides = [1, 1]} : vector<14x256xf32> to vector<1x16xf32>
    %19 = vector.extract_strided_slice %1 {offsets = [0, 0], sizes = [64, 2], strides = [1, 1]} : vector<64x16xf32> to vector<64x2xf32>
    %cst = arith.constant dense<0.000000e+00> : vector<2xf32>
    %20 = vector.multi_reduction <add>, %19, %cst [0] : vector<64x2xf32> to vector<2xf32>
    %21 = vector.shape_cast %20 : vector<2xf32> to vector<1x2xf32>
    %cst_7 = arith.constant dense<0.000000e+00> : vector<1xf32>
    %22 = vector.multi_reduction <add>, %21, %cst_7 [1] : vector<1x2xf32> to vector<1xf32>
    %23 = vector.shape_cast %22 : vector<1xf32> to vector<1x1xf32>
    %cst_8 = arith.constant 1.280000e+02 : f32
    %24 = vector.broadcast %cst_8 : f32 to vector<1x1xf32>
    %25 = arith.divf %23, %24 : vector<1x1xf32>
    %26 = vector.broadcast %25 : vector<1x1xf32> to vector<64x2xf32>
    %27 = arith.subf %19, %26 : vector<64x2xf32>
    %28 = arith.mulf %27, %27 : vector<64x2xf32>
    %cst_9 = arith.constant dense<0.000000e+00> : vector<2xf32>
    %29 = vector.multi_reduction <add>, %28, %cst_9 [0] : vector<64x2xf32> to vector<2xf32>
    %30 = vector.shape_cast %29 : vector<2xf32> to vector<1x2xf32>
    %cst_10 = arith.constant dense<0.000000e+00> : vector<1xf32>
    %31 = vector.multi_reduction <add>, %30, %cst_10 [1] : vector<1x2xf32> to vector<1xf32>
    %32 = vector.shape_cast %31 : vector<1xf32> to vector<1x1xf32>
    %cst_11 = arith.constant 1.280000e+02 : f32
    %33 = vector.broadcast %cst_11 : f32 to vector<1x1xf32>
    %34 = arith.divf %32, %33 : vector<1x1xf32>
    %cst_12 = arith.constant 9.99999974E-6 : f32
    %35 = vector.broadcast %cst_12 : f32 to vector<1x1xf32>
    %36 = arith.addf %34, %35 : vector<1x1xf32>
    %37 = math.rsqrt %36 : vector<1x1xf32>
    %38 = vector.broadcast %37 : vector<1x1xf32> to vector<64x2xf32>
    %39 = arith.mulf %27, %38 : vector<64x2xf32>
    %40 = vector.extract_strided_slice %1 {offsets = [0, 2], sizes = [64, 2], strides = [1, 1]} : vector<64x16xf32> to vector<64x2xf32>
    %cst_13 = arith.constant dense<0.000000e+00> : vector<2xf32>
    %41 = vector.multi_reduction <add>, %40, %cst_13 [0] : vector<64x2xf32> to vector<2xf32>
    %42 = vector.shape_cast %41 : vector<2xf32> to vector<1x2xf32>
    %cst_14 = arith.constant dense<0.000000e+00> : vector<1xf32>
    %43 = vector.multi_reduction <add>, %42, %cst_14 [1] : vector<1x2xf32> to vector<1xf32>
    %44 = vector.shape_cast %43 : vector<1xf32> to vector<1x1xf32>
    %cst_15 = arith.constant 1.280000e+02 : f32
    %45 = vector.broadcast %cst_15 : f32 to vector<1x1xf32>
    %46 = arith.divf %44, %45 : vector<1x1xf32>
    %47 = vector.broadcast %46 : vector<1x1xf32> to vector<64x2xf32>
    %48 = arith.subf %40, %47 : vector<64x2xf32>
    %49 = arith.mulf %48, %48 : vector<64x2xf32>
    %cst_16 = arith.constant dense<0.000000e+00> : vector<2xf32>
    %50 = vector.multi_reduction <add>, %49, %cst_16 [0] : vector<64x2xf32> to vector<2xf32>
    %51 = vector.shape_cast %50 : vector<2xf32> to vector<1x2xf32>
    %cst_17 = arith.constant dense<0.000000e+00> : vector<1xf32>
    %52 = vector.multi_reduction <add>, %51, %cst_17 [1] : vector<1x2xf32> to vector<1xf32>
    %53 = vector.shape_cast %52 : vector<1xf32> to vector<1x1xf32>
    %cst_18 = arith.constant 1.280000e+02 : f32
    %54 = vector.broadcast %cst_18 : f32 to vector<1x1xf32>
    %55 = arith.divf %53, %54 : vector<1x1xf32>
    %cst_19 = arith.constant 9.99999974E-6 : f32
    %56 = vector.broadcast %cst_19 : f32 to vector<1x1xf32>
    %57 = arith.addf %55, %56 : vector<1x1xf32>
    %58 = math.rsqrt %57 : vector<1x1xf32>
    %59 = vector.broadcast %58 : vector<1x1xf32> to vector<64x2xf32>
    %60 = arith.mulf %48, %59 : vector<64x2xf32>
    %61 = vector.extract_strided_slice %1 {offsets = [0, 4], sizes = [64, 2], strides = [1, 1]} : vector<64x16xf32> to vector<64x2xf32>
    %cst_20 = arith.constant dense<0.000000e+00> : vector<2xf32>
    %62 = vector.multi_reduction <add>, %61, %cst_20 [0] : vector<64x2xf32> to vector<2xf32>
    %63 = vector.shape_cast %62 : vector<2xf32> to vector<1x2xf32>
    %cst_21 = arith.constant dense<0.000000e+00> : vector<1xf32>
    %64 = vector.multi_reduction <add>, %63, %cst_21 [1] : vector<1x2xf32> to vector<1xf32>
    %65 = vector.shape_cast %64 : vector<1xf32> to vector<1x1xf32>
    %cst_22 = arith.constant 1.280000e+02 : f32
    %66 = vector.broadcast %cst_22 : f32 to vector<1x1xf32>
    %67 = arith.divf %65, %66 : vector<1x1xf32>
    %68 = vector.broadcast %67 : vector<1x1xf32> to vector<64x2xf32>
    %69 = arith.subf %61, %68 : vector<64x2xf32>
    %70 = arith.mulf %69, %69 : vector<64x2xf32>
    %cst_23 = arith.constant dense<0.000000e+00> : vector<2xf32>
    %71 = vector.multi_reduction <add>, %70, %cst_23 [0] : vector<64x2xf32> to vector<2xf32>
    %72 = vector.shape_cast %71 : vector<2xf32> to vector<1x2xf32>
    %cst_24 = arith.constant dense<0.000000e+00> : vector<1xf32>
    %73 = vector.multi_reduction <add>, %72, %cst_24 [1] : vector<1x2xf32> to vector<1xf32>
    %74 = vector.shape_cast %73 : vector<1xf32> to vector<1x1xf32>
    %cst_25 = arith.constant 1.280000e+02 : f32
    %75 = vector.broadcast %cst_25 : f32 to vector<1x1xf32>
    %76 = arith.divf %74, %75 : vector<1x1xf32>
    %cst_26 = arith.constant 9.99999974E-6 : f32
    %77 = vector.broadcast %cst_26 : f32 to vector<1x1xf32>
    %78 = arith.addf %76, %77 : vector<1x1xf32>
    %79 = math.rsqrt %78 : vector<1x1xf32>
    %80 = vector.broadcast %79 : vector<1x1xf32> to vector<64x2xf32>
    %81 = arith.mulf %69, %80 : vector<64x2xf32>
    %82 = vector.extract_strided_slice %1 {offsets = [0, 6], sizes = [64, 2], strides = [1, 1]} : vector<64x16xf32> to vector<64x2xf32>
    %cst_27 = arith.constant dense<0.000000e+00> : vector<2xf32>
    %83 = vector.multi_reduction <add>, %82, %cst_27 [0] : vector<64x2xf32> to vector<2xf32>
    %84 = vector.shape_cast %83 : vector<2xf32> to vector<1x2xf32>
    %cst_28 = arith.constant dense<0.000000e+00> : vector<1xf32>
    %85 = vector.multi_reduction <add>, %84, %cst_28 [1] : vector<1x2xf32> to vector<1xf32>
    %86 = vector.shape_cast %85 : vector<1xf32> to vector<1x1xf32>
    %cst_29 = arith.constant 1.280000e+02 : f32
    %87 = vector.broadcast %cst_29 : f32 to vector<1x1xf32>
    %88 = arith.divf %86, %87 : vector<1x1xf32>
    %89 = vector.broadcast %88 : vector<1x1xf32> to vector<64x2xf32>
    %90 = arith.subf %82, %89 : vector<64x2xf32>
    %91 = arith.mulf %90, %90 : vector<64x2xf32>
    %cst_30 = arith.constant dense<0.000000e+00> : vector<2xf32>
    %92 = vector.multi_reduction <add>, %91, %cst_30 [0] : vector<64x2xf32> to vector<2xf32>
    %93 = vector.shape_cast %92 : vector<2xf32> to vector<1x2xf32>
    %cst_31 = arith.constant dense<0.000000e+00> : vector<1xf32>
    %94 = vector.multi_reduction <add>, %93, %cst_31 [1] : vector<1x2xf32> to vector<1xf32>
    %95 = vector.shape_cast %94 : vector<1xf32> to vector<1x1xf32>
    %cst_32 = arith.constant 1.280000e+02 : f32
    %96 = vector.broadcast %cst_32 : f32 to vector<1x1xf32>
    %97 = arith.divf %95, %96 : vector<1x1xf32>
    %cst_33 = arith.constant 9.99999974E-6 : f32
    %98 = vector.broadcast %cst_33 : f32 to vector<1x1xf32>
    %99 = arith.addf %97, %98 : vector<1x1xf32>
    %100 = math.rsqrt %99 : vector<1x1xf32>
    %101 = vector.broadcast %100 : vector<1x1xf32> to vector<64x2xf32>
    %102 = arith.mulf %90, %101 : vector<64x2xf32>
    %103 = vector.extract_strided_slice %1 {offsets = [0, 8], sizes = [64, 2], strides = [1, 1]} : vector<64x16xf32> to vector<64x2xf32>
    %cst_34 = arith.constant dense<0.000000e+00> : vector<2xf32>
    %104 = vector.multi_reduction <add>, %103, %cst_34 [0] : vector<64x2xf32> to vector<2xf32>
    %105 = vector.shape_cast %104 : vector<2xf32> to vector<1x2xf32>
    %cst_35 = arith.constant dense<0.000000e+00> : vector<1xf32>
    %106 = vector.multi_reduction <add>, %105, %cst_35 [1] : vector<1x2xf32> to vector<1xf32>
    %107 = vector.shape_cast %106 : vector<1xf32> to vector<1x1xf32>
    %cst_36 = arith.constant 1.280000e+02 : f32
    %108 = vector.broadcast %cst_36 : f32 to vector<1x1xf32>
    %109 = arith.divf %107, %108 : vector<1x1xf32>
    %110 = vector.broadcast %109 : vector<1x1xf32> to vector<64x2xf32>
    %111 = arith.subf %103, %110 : vector<64x2xf32>
    %112 = arith.mulf %111, %111 : vector<64x2xf32>
    %cst_37 = arith.constant dense<0.000000e+00> : vector<2xf32>
    %113 = vector.multi_reduction <add>, %112, %cst_37 [0] : vector<64x2xf32> to vector<2xf32>
    %114 = vector.shape_cast %113 : vector<2xf32> to vector<1x2xf32>
    %cst_38 = arith.constant dense<0.000000e+00> : vector<1xf32>
    %115 = vector.multi_reduction <add>, %114, %cst_38 [1] : vector<1x2xf32> to vector<1xf32>
    %116 = vector.shape_cast %115 : vector<1xf32> to vector<1x1xf32>
    %cst_39 = arith.constant 1.280000e+02 : f32
    %117 = vector.broadcast %cst_39 : f32 to vector<1x1xf32>
    %118 = arith.divf %116, %117 : vector<1x1xf32>
    %cst_40 = arith.constant 9.99999974E-6 : f32
    %119 = vector.broadcast %cst_40 : f32 to vector<1x1xf32>
    %120 = arith.addf %118, %119 : vector<1x1xf32>
    %121 = math.rsqrt %120 : vector<1x1xf32>
    %122 = vector.broadcast %121 : vector<1x1xf32> to vector<64x2xf32>
    %123 = arith.mulf %111, %122 : vector<64x2xf32>
    %124 = vector.extract_strided_slice %1 {offsets = [0, 10], sizes = [64, 2], strides = [1, 1]} : vector<64x16xf32> to vector<64x2xf32>
    %cst_41 = arith.constant dense<0.000000e+00> : vector<2xf32>
    %125 = vector.multi_reduction <add>, %124, %cst_41 [0] : vector<64x2xf32> to vector<2xf32>
    %126 = vector.shape_cast %125 : vector<2xf32> to vector<1x2xf32>
    %cst_42 = arith.constant dense<0.000000e+00> : vector<1xf32>
    %127 = vector.multi_reduction <add>, %126, %cst_42 [1] : vector<1x2xf32> to vector<1xf32>
    %128 = vector.shape_cast %127 : vector<1xf32> to vector<1x1xf32>
    %cst_43 = arith.constant 1.280000e+02 : f32
    %129 = vector.broadcast %cst_43 : f32 to vector<1x1xf32>
    %130 = arith.divf %128, %129 : vector<1x1xf32>
    %131 = vector.broadcast %130 : vector<1x1xf32> to vector<64x2xf32>
    %132 = arith.subf %124, %131 : vector<64x2xf32>
    %133 = arith.mulf %132, %132 : vector<64x2xf32>
    %cst_44 = arith.constant dense<0.000000e+00> : vector<2xf32>
    %134 = vector.multi_reduction <add>, %133, %cst_44 [0] : vector<64x2xf32> to vector<2xf32>
    %135 = vector.shape_cast %134 : vector<2xf32> to vector<1x2xf32>
    %cst_45 = arith.constant dense<0.000000e+00> : vector<1xf32>
    %136 = vector.multi_reduction <add>, %135, %cst_45 [1] : vector<1x2xf32> to vector<1xf32>
    %137 = vector.shape_cast %136 : vector<1xf32> to vector<1x1xf32>
    %cst_46 = arith.constant 1.280000e+02 : f32
    %138 = vector.broadcast %cst_46 : f32 to vector<1x1xf32>
    %139 = arith.divf %137, %138 : vector<1x1xf32>
    %cst_47 = arith.constant 9.99999974E-6 : f32
    %140 = vector.broadcast %cst_47 : f32 to vector<1x1xf32>
    %141 = arith.addf %139, %140 : vector<1x1xf32>
    %142 = math.rsqrt %141 : vector<1x1xf32>
    %143 = vector.broadcast %142 : vector<1x1xf32> to vector<64x2xf32>
    %144 = arith.mulf %132, %143 : vector<64x2xf32>
    %145 = vector.extract_strided_slice %1 {offsets = [0, 12], sizes = [64, 2], strides = [1, 1]} : vector<64x16xf32> to vector<64x2xf32>
    %cst_48 = arith.constant dense<0.000000e+00> : vector<2xf32>
    %146 = vector.multi_reduction <add>, %145, %cst_48 [0] : vector<64x2xf32> to vector<2xf32>
    %147 = vector.shape_cast %146 : vector<2xf32> to vector<1x2xf32>
    %cst_49 = arith.constant dense<0.000000e+00> : vector<1xf32>
    %148 = vector.multi_reduction <add>, %147, %cst_49 [1] : vector<1x2xf32> to vector<1xf32>
    %149 = vector.shape_cast %148 : vector<1xf32> to vector<1x1xf32>
    %cst_50 = arith.constant 1.280000e+02 : f32
    %150 = vector.broadcast %cst_50 : f32 to vector<1x1xf32>
    %151 = arith.divf %149, %150 : vector<1x1xf32>
    %152 = vector.broadcast %151 : vector<1x1xf32> to vector<64x2xf32>
    %153 = arith.subf %145, %152 : vector<64x2xf32>
    %154 = arith.mulf %153, %153 : vector<64x2xf32>
    %cst_51 = arith.constant dense<0.000000e+00> : vector<2xf32>
    %155 = vector.multi_reduction <add>, %154, %cst_51 [0] : vector<64x2xf32> to vector<2xf32>
    %156 = vector.shape_cast %155 : vector<2xf32> to vector<1x2xf32>
    %cst_52 = arith.constant dense<0.000000e+00> : vector<1xf32>
    %157 = vector.multi_reduction <add>, %156, %cst_52 [1] : vector<1x2xf32> to vector<1xf32>
    %158 = vector.shape_cast %157 : vector<1xf32> to vector<1x1xf32>
    %cst_53 = arith.constant 1.280000e+02 : f32
    %159 = vector.broadcast %cst_53 : f32 to vector<1x1xf32>
    %160 = arith.divf %158, %159 : vector<1x1xf32>
    %cst_54 = arith.constant 9.99999974E-6 : f32
    %161 = vector.broadcast %cst_54 : f32 to vector<1x1xf32>
    %162 = arith.addf %160, %161 : vector<1x1xf32>
    %163 = math.rsqrt %162 : vector<1x1xf32>
    %164 = vector.broadcast %163 : vector<1x1xf32> to vector<64x2xf32>
    %165 = arith.mulf %153, %164 : vector<64x2xf32>
    %166 = vector.extract_strided_slice %1 {offsets = [0, 14], sizes = [64, 2], strides = [1, 1]} : vector<64x16xf32> to vector<64x2xf32>
    %cst_55 = arith.constant dense<0.000000e+00> : vector<2xf32>
    %167 = vector.multi_reduction <add>, %166, %cst_55 [0] : vector<64x2xf32> to vector<2xf32>
    %168 = vector.shape_cast %167 : vector<2xf32> to vector<1x2xf32>
    %cst_56 = arith.constant dense<0.000000e+00> : vector<1xf32>
    %169 = vector.multi_reduction <add>, %168, %cst_56 [1] : vector<1x2xf32> to vector<1xf32>
    %170 = vector.shape_cast %169 : vector<1xf32> to vector<1x1xf32>
    %cst_57 = arith.constant 1.280000e+02 : f32
    %171 = vector.broadcast %cst_57 : f32 to vector<1x1xf32>
    %172 = arith.divf %170, %171 : vector<1x1xf32>
    %173 = vector.broadcast %172 : vector<1x1xf32> to vector<64x2xf32>
    %174 = arith.subf %166, %173 : vector<64x2xf32>
    %175 = arith.mulf %174, %174 : vector<64x2xf32>
    %cst_58 = arith.constant dense<0.000000e+00> : vector<2xf32>
    %176 = vector.multi_reduction <add>, %175, %cst_58 [0] : vector<64x2xf32> to vector<2xf32>
    %177 = vector.shape_cast %176 : vector<2xf32> to vector<1x2xf32>
    %cst_59 = arith.constant dense<0.000000e+00> : vector<1xf32>
    %178 = vector.multi_reduction <add>, %177, %cst_59 [1] : vector<1x2xf32> to vector<1xf32>
    %179 = vector.shape_cast %178 : vector<1xf32> to vector<1x1xf32>
    %cst_60 = arith.constant 1.280000e+02 : f32
    %180 = vector.broadcast %cst_60 : f32 to vector<1x1xf32>
    %181 = arith.divf %179, %180 : vector<1x1xf32>
    %cst_61 = arith.constant 9.99999974E-6 : f32
    %182 = vector.broadcast %cst_61 : f32 to vector<1x1xf32>
    %183 = arith.addf %181, %182 : vector<1x1xf32>
    %184 = math.rsqrt %183 : vector<1x1xf32>
    %185 = vector.broadcast %184 : vector<1x1xf32> to vector<64x2xf32>
    %186 = arith.mulf %174, %185 : vector<64x2xf32>
    %187 = tpu.concatenate %39, %60, %81, %102, %123, %144, %165, %186 in 1 : vector<64x2xf32>, vector<64x2xf32>, vector<64x2xf32>, vector<64x2xf32>, vector<64x2xf32>, vector<64x2xf32>, vector<64x2xf32>, vector<64x2xf32> -> vector<64x16xf32>
    %188 = vector.broadcast %5 : vector<1x16xf32> to vector<64x16xf32>
    %189 = arith.mulf %187, %188 : vector<64x16xf32>
    %190 = vector.broadcast %6 : vector<1x16xf32> to vector<64x16xf32>
    %191 = arith.addf %189, %190 : vector<64x16xf32>
    %192 = arith.truncf %191 : vector<64x16xf32> to vector<64x16xbf16>
    %c0_62 = arith.constant 0 : index
    %c0_63 = arith.constant 0 : index
    %193 = vector.load %arg4[%c0_62, %c0_63] : memref<16x64xbf16, #tpu.memory_space<vmem>>, vector<16x64xbf16>
    %cst_64 = arith.constant dense<0.000000e+00> : vector<64x64xf32>
    %194 = tpu.matmul %192, %193, %cst_64 {dimension_numbers = #tpu.dot_dimension_numbers<[1], [0], [0], [1], [0, 0, 1, 1], [], []>} : vector<64x16xbf16>, vector<16x64xbf16>, vector<64x64xf32> -> vector<64x64xf32>
    %195 = vector.broadcast %7 : vector<1x64xf32> to vector<64x64xf32>
    %196 = arith.addf %194, %195 : vector<64x64xf32>
    %c0_65 = arith.constant 0 : index
    %c0_66 = arith.constant 0 : index
    %c0_67 = arith.constant 0 : index
    %197 = vector.load %arg5[%c0_65, %c0_66, %c0_67] : memref<6x64x64xbf16, #tpu.memory_space<vmem>>, vector<1x64x64xbf16>
    %198 = vector.shape_cast %197 : vector<1x64x64xbf16> to vector<64x64xbf16>
    %c1 = arith.constant 1 : index
    %c0_68 = arith.constant 0 : index
    %c0_69 = arith.constant 0 : index
    %199 = vector.load %arg5[%c1, %c0_68, %c0_69] : memref<6x64x64xbf16, #tpu.memory_space<vmem>>, vector<1x64x64xbf16>
    %200 = vector.shape_cast %199 : vector<1x64x64xbf16> to vector<64x64xbf16>
    %c2 = arith.constant 2 : index
    %c0_70 = arith.constant 0 : index
    %c0_71 = arith.constant 0 : index
    %201 = vector.load %arg5[%c2, %c0_70, %c0_71] : memref<6x64x64xbf16, #tpu.memory_space<vmem>>, vector<1x64x64xbf16>
    %202 = vector.shape_cast %201 : vector<1x64x64xbf16> to vector<64x64xbf16>
    %c3 = arith.constant 3 : index
    %c0_72 = arith.constant 0 : index
    %c0_73 = arith.constant 0 : index
    %203 = vector.load %arg5[%c3, %c0_72, %c0_73] : memref<6x64x64xbf16, #tpu.memory_space<vmem>>, vector<1x64x64xbf16>
    %204 = vector.shape_cast %203 : vector<1x64x64xbf16> to vector<64x64xbf16>
    %c4 = arith.constant 4 : index
    %c0_74 = arith.constant 0 : index
    %c0_75 = arith.constant 0 : index
    %205 = vector.load %arg5[%c4, %c0_74, %c0_75] : memref<6x64x64xbf16, #tpu.memory_space<vmem>>, vector<1x64x64xbf16>
    %206 = vector.shape_cast %205 : vector<1x64x64xbf16> to vector<64x64xbf16>
    %c5 = arith.constant 5 : index
    %c0_76 = arith.constant 0 : index
    %c0_77 = arith.constant 0 : index
    %207 = vector.load %arg5[%c5, %c0_76, %c0_77] : memref<6x64x64xbf16, #tpu.memory_space<vmem>>, vector<1x64x64xbf16>
    %208 = vector.shape_cast %207 : vector<1x64x64xbf16> to vector<64x64xbf16>
    %c0_78 = arith.constant 0 : index
    %c0_79 = arith.constant 0 : index
    %c0_80 = arith.constant 0 : index
    %209 = vector.load %arg6[%c0_78, %c0_79, %c0_80] : memref<2x64x64xbf16, #tpu.memory_space<vmem>>, vector<1x64x64xbf16>
    %210 = vector.shape_cast %209 : vector<1x64x64xbf16> to vector<64x64xbf16>
    %c1_81 = arith.constant 1 : index
    %c0_82 = arith.constant 0 : index
    %c0_83 = arith.constant 0 : index
    %211 = vector.load %arg6[%c1_81, %c0_82, %c0_83] : memref<2x64x64xbf16, #tpu.memory_space<vmem>>, vector<1x64x64xbf16>
    %212 = vector.shape_cast %211 : vector<1x64x64xbf16> to vector<64x64xbf16>
    %cst_84 = arith.constant dense<0.000000e+00> : vector<64xf32>
    %213 = vector.multi_reduction <add>, %196, %cst_84 [1] : vector<64x64xf32> to vector<64xf32>
    %214 = vector.shape_cast %213 : vector<64xf32> to vector<64x1xf32>
    %cst_85 = arith.constant 6.400000e+01 : f32
    %215 = vector.broadcast %cst_85 : f32 to vector<64x1xf32>
    %216 = arith.divf %214, %215 : vector<64x1xf32>
    %217 = vector.broadcast %216 : vector<64x1xf32> to vector<64x64xf32>
    %218 = arith.subf %196, %217 : vector<64x64xf32>
    %219 = arith.mulf %218, %218 : vector<64x64xf32>
    %cst_86 = arith.constant dense<0.000000e+00> : vector<64xf32>
    %220 = vector.multi_reduction <add>, %219, %cst_86 [1] : vector<64x64xf32> to vector<64xf32>
    %221 = vector.shape_cast %220 : vector<64xf32> to vector<64x1xf32>
    %cst_87 = arith.constant 6.400000e+01 : f32
    %222 = vector.broadcast %cst_87 : f32 to vector<64x1xf32>
    %223 = arith.divf %221, %222 : vector<64x1xf32>
    %224 = vector.broadcast %216 : vector<64x1xf32> to vector<64x64xf32>
    %225 = arith.subf %196, %224 : vector<64x64xf32>
    %cst_88 = arith.constant 9.99999974E-6 : f32
    %226 = vector.broadcast %cst_88 : f32 to vector<64x1xf32>
    %227 = arith.addf %223, %226 : vector<64x1xf32>
    %228 = math.rsqrt %227 : vector<64x1xf32>
    %229 = vector.broadcast %228 : vector<64x1xf32> to vector<64x64xf32>
    %230 = arith.mulf %225, %229 : vector<64x64xf32>
    %231 = vector.broadcast %8 : vector<1x64xf32> to vector<64x64xf32>
    %232 = arith.mulf %230, %231 : vector<64x64xf32>
    %233 = vector.broadcast %9 : vector<1x64xf32> to vector<64x64xf32>
    %234 = arith.addf %232, %233 : vector<64x64xf32>
    %235 = arith.truncf %234 : vector<64x64xf32> to vector<64x64xbf16>
    %cst_89 = arith.constant dense<0.000000e+00> : vector<64x64xf32>
    %236 = tpu.matmul %235, %198, %cst_89 {dimension_numbers = #tpu.dot_dimension_numbers<[1], [0], [0], [1], [0, 0, 1, 1], [], []>} : vector<64x64xbf16>, vector<64x64xbf16>, vector<64x64xf32> -> vector<64x64xf32>
    %cst_90 = arith.constant dense<0.000000e+00> : vector<64x64xf32>
    %237 = tpu.matmul %235, %200, %cst_90 {dimension_numbers = #tpu.dot_dimension_numbers<[1], [0], [0], [1], [0, 0, 1, 1], [], []>} : vector<64x64xbf16>, vector<64x64xbf16>, vector<64x64xf32> -> vector<64x64xf32>
    %cst_91 = arith.constant dense<0.000000e+00> : vector<64x64xf32>
    %238 = tpu.matmul %235, %202, %cst_91 {dimension_numbers = #tpu.dot_dimension_numbers<[1], [0], [0], [1], [0, 0, 1, 1], [], []>} : vector<64x64xbf16>, vector<64x64xbf16>, vector<64x64xf32> -> vector<64x64xf32>
    %239 = vector.extract_strided_slice %236 {offsets = [0, 0], sizes = [64, 8], strides = [1, 1]} : vector<64x64xf32> to vector<64x8xf32>
    %240 = arith.truncf %239 : vector<64x8xf32> to vector<64x8xbf16>
    %241 = vector.extract_strided_slice %237 {offsets = [0, 0], sizes = [64, 8], strides = [1, 1]} : vector<64x64xf32> to vector<64x8xf32>
    %242 = arith.truncf %241 : vector<64x8xf32> to vector<64x8xbf16>
    %243 = vector.extract_strided_slice %238 {offsets = [0, 0], sizes = [64, 8], strides = [1, 1]} : vector<64x64xf32> to vector<64x8xf32>
    %244 = arith.truncf %243 : vector<64x8xf32> to vector<64x8xbf16>
    %cst_92 = arith.constant dense<0.000000e+00> : vector<64x64xf32>
    %245 = tpu.matmul %240, %242, %cst_92 {dimension_numbers = #tpu.dot_dimension_numbers<[1], [1], [0], [0], [0, 0, 1, 0], [], []>} : vector<64x8xbf16>, vector<64x8xbf16>, vector<64x64xf32> -> vector<64x64xf32>
    %cst_93 = arith.constant 0.353553385 : f32
    %246 = vector.broadcast %cst_93 : f32 to vector<64x64xf32>
    %247 = arith.mulf %245, %246 : vector<64x64xf32>
    %cst_94 = arith.constant dense<0xFF800000> : vector<64xf32>
    %248 = vector.multi_reduction <maximumf>, %247, %cst_94 [1] : vector<64x64xf32> to vector<64xf32>
    %249 = vector.shape_cast %248 : vector<64xf32> to vector<64x1xf32>
    %250 = vector.broadcast %249 : vector<64x1xf32> to vector<64x64xf32>
    %251 = arith.subf %247, %250 : vector<64x64xf32>
    %252 = math.exp %251 : vector<64x64xf32>
    %cst_95 = arith.constant dense<0.000000e+00> : vector<64xf32>
    %253 = vector.multi_reduction <add>, %252, %cst_95 [1] : vector<64x64xf32> to vector<64xf32>
    %254 = vector.shape_cast %253 : vector<64xf32> to vector<64x1xf32>
    %255 = tpu.reciprocal %254 {approx = true} : vector<64x1xf32> -> vector<64x1xf32>
    %256 = vector.broadcast %255 : vector<64x1xf32> to vector<64x64xf32>
    %257 = arith.mulf %252, %256 : vector<64x64xf32>
    %258 = arith.truncf %257 : vector<64x64xf32> to vector<64x64xbf16>
    %cst_96 = arith.constant dense<0.000000e+00> : vector<64x8xf32>
    %259 = tpu.matmul %258, %244, %cst_96 {dimension_numbers = #tpu.dot_dimension_numbers<[1], [0], [0], [1], [0, 0, 1, 1], [], []>} : vector<64x64xbf16>, vector<64x8xbf16>, vector<64x8xf32> -> vector<64x8xf32>
    %260 = vector.extract_strided_slice %236 {offsets = [0, 8], sizes = [64, 8], strides = [1, 1]} : vector<64x64xf32> to vector<64x8xf32>
    %261 = arith.truncf %260 : vector<64x8xf32> to vector<64x8xbf16>
    %262 = vector.extract_strided_slice %237 {offsets = [0, 8], sizes = [64, 8], strides = [1, 1]} : vector<64x64xf32> to vector<64x8xf32>
    %263 = arith.truncf %262 : vector<64x8xf32> to vector<64x8xbf16>
    %264 = vector.extract_strided_slice %238 {offsets = [0, 8], sizes = [64, 8], strides = [1, 1]} : vector<64x64xf32> to vector<64x8xf32>
    %265 = arith.truncf %264 : vector<64x8xf32> to vector<64x8xbf16>
    %cst_97 = arith.constant dense<0.000000e+00> : vector<64x64xf32>
    %266 = tpu.matmul %261, %263, %cst_97 {dimension_numbers = #tpu.dot_dimension_numbers<[1], [1], [0], [0], [0, 0, 1, 0], [], []>} : vector<64x8xbf16>, vector<64x8xbf16>, vector<64x64xf32> -> vector<64x64xf32>
    %cst_98 = arith.constant 0.353553385 : f32
    %267 = vector.broadcast %cst_98 : f32 to vector<64x64xf32>
    %268 = arith.mulf %266, %267 : vector<64x64xf32>
    %cst_99 = arith.constant dense<0xFF800000> : vector<64xf32>
    %269 = vector.multi_reduction <maximumf>, %268, %cst_99 [1] : vector<64x64xf32> to vector<64xf32>
    %270 = vector.shape_cast %269 : vector<64xf32> to vector<64x1xf32>
    %271 = vector.broadcast %270 : vector<64x1xf32> to vector<64x64xf32>
    %272 = arith.subf %268, %271 : vector<64x64xf32>
    %273 = math.exp %272 : vector<64x64xf32>
    %cst_100 = arith.constant dense<0.000000e+00> : vector<64xf32>
    %274 = vector.multi_reduction <add>, %273, %cst_100 [1] : vector<64x64xf32> to vector<64xf32>
    %275 = vector.shape_cast %274 : vector<64xf32> to vector<64x1xf32>
    %276 = tpu.reciprocal %275 {approx = true} : vector<64x1xf32> -> vector<64x1xf32>
    %277 = vector.broadcast %276 : vector<64x1xf32> to vector<64x64xf32>
    %278 = arith.mulf %273, %277 : vector<64x64xf32>
    %279 = arith.truncf %278 : vector<64x64xf32> to vector<64x64xbf16>
    %cst_101 = arith.constant dense<0.000000e+00> : vector<64x8xf32>
    %280 = tpu.matmul %279, %265, %cst_101 {dimension_numbers = #tpu.dot_dimension_numbers<[1], [0], [0], [1], [0, 0, 1, 1], [], []>} : vector<64x64xbf16>, vector<64x8xbf16>, vector<64x8xf32> -> vector<64x8xf32>
    %281 = vector.extract_strided_slice %236 {offsets = [0, 16], sizes = [64, 8], strides = [1, 1]} : vector<64x64xf32> to vector<64x8xf32>
    %282 = arith.truncf %281 : vector<64x8xf32> to vector<64x8xbf16>
    %283 = vector.extract_strided_slice %237 {offsets = [0, 16], sizes = [64, 8], strides = [1, 1]} : vector<64x64xf32> to vector<64x8xf32>
    %284 = arith.truncf %283 : vector<64x8xf32> to vector<64x8xbf16>
    %285 = vector.extract_strided_slice %238 {offsets = [0, 16], sizes = [64, 8], strides = [1, 1]} : vector<64x64xf32> to vector<64x8xf32>
    %286 = arith.truncf %285 : vector<64x8xf32> to vector<64x8xbf16>
    %cst_102 = arith.constant dense<0.000000e+00> : vector<64x64xf32>
    %287 = tpu.matmul %282, %284, %cst_102 {dimension_numbers = #tpu.dot_dimension_numbers<[1], [1], [0], [0], [0, 0, 1, 0], [], []>} : vector<64x8xbf16>, vector<64x8xbf16>, vector<64x64xf32> -> vector<64x64xf32>
    %cst_103 = arith.constant 0.353553385 : f32
    %288 = vector.broadcast %cst_103 : f32 to vector<64x64xf32>
    %289 = arith.mulf %287, %288 : vector<64x64xf32>
    %cst_104 = arith.constant dense<0xFF800000> : vector<64xf32>
    %290 = vector.multi_reduction <maximumf>, %289, %cst_104 [1] : vector<64x64xf32> to vector<64xf32>
    %291 = vector.shape_cast %290 : vector<64xf32> to vector<64x1xf32>
    %292 = vector.broadcast %291 : vector<64x1xf32> to vector<64x64xf32>
    %293 = arith.subf %289, %292 : vector<64x64xf32>
    %294 = math.exp %293 : vector<64x64xf32>
    %cst_105 = arith.constant dense<0.000000e+00> : vector<64xf32>
    %295 = vector.multi_reduction <add>, %294, %cst_105 [1] : vector<64x64xf32> to vector<64xf32>
    %296 = vector.shape_cast %295 : vector<64xf32> to vector<64x1xf32>
    %297 = tpu.reciprocal %296 {approx = true} : vector<64x1xf32> -> vector<64x1xf32>
    %298 = vector.broadcast %297 : vector<64x1xf32> to vector<64x64xf32>
    %299 = arith.mulf %294, %298 : vector<64x64xf32>
    %300 = arith.truncf %299 : vector<64x64xf32> to vector<64x64xbf16>
    %cst_106 = arith.constant dense<0.000000e+00> : vector<64x8xf32>
    %301 = tpu.matmul %300, %286, %cst_106 {dimension_numbers = #tpu.dot_dimension_numbers<[1], [0], [0], [1], [0, 0, 1, 1], [], []>} : vector<64x64xbf16>, vector<64x8xbf16>, vector<64x8xf32> -> vector<64x8xf32>
    %302 = vector.extract_strided_slice %236 {offsets = [0, 24], sizes = [64, 8], strides = [1, 1]} : vector<64x64xf32> to vector<64x8xf32>
    %303 = arith.truncf %302 : vector<64x8xf32> to vector<64x8xbf16>
    %304 = vector.extract_strided_slice %237 {offsets = [0, 24], sizes = [64, 8], strides = [1, 1]} : vector<64x64xf32> to vector<64x8xf32>
    %305 = arith.truncf %304 : vector<64x8xf32> to vector<64x8xbf16>
    %306 = vector.extract_strided_slice %238 {offsets = [0, 24], sizes = [64, 8], strides = [1, 1]} : vector<64x64xf32> to vector<64x8xf32>
    %307 = arith.truncf %306 : vector<64x8xf32> to vector<64x8xbf16>
    %cst_107 = arith.constant dense<0.000000e+00> : vector<64x64xf32>
    %308 = tpu.matmul %303, %305, %cst_107 {dimension_numbers = #tpu.dot_dimension_numbers<[1], [1], [0], [0], [0, 0, 1, 0], [], []>} : vector<64x8xbf16>, vector<64x8xbf16>, vector<64x64xf32> -> vector<64x64xf32>
    %cst_108 = arith.constant 0.353553385 : f32
    %309 = vector.broadcast %cst_108 : f32 to vector<64x64xf32>
    %310 = arith.mulf %308, %309 : vector<64x64xf32>
    %cst_109 = arith.constant dense<0xFF800000> : vector<64xf32>
    %311 = vector.multi_reduction <maximumf>, %310, %cst_109 [1] : vector<64x64xf32> to vector<64xf32>
    %312 = vector.shape_cast %311 : vector<64xf32> to vector<64x1xf32>
    %313 = vector.broadcast %312 : vector<64x1xf32> to vector<64x64xf32>
    %314 = arith.subf %310, %313 : vector<64x64xf32>
    %315 = math.exp %314 : vector<64x64xf32>
    %cst_110 = arith.constant dense<0.000000e+00> : vector<64xf32>
    %316 = vector.multi_reduction <add>, %315, %cst_110 [1] : vector<64x64xf32> to vector<64xf32>
    %317 = vector.shape_cast %316 : vector<64xf32> to vector<64x1xf32>
    %318 = tpu.reciprocal %317 {approx = true} : vector<64x1xf32> -> vector<64x1xf32>
    %319 = vector.broadcast %318 : vector<64x1xf32> to vector<64x64xf32>
    %320 = arith.mulf %315, %319 : vector<64x64xf32>
    %321 = arith.truncf %320 : vector<64x64xf32> to vector<64x64xbf16>
    %cst_111 = arith.constant dense<0.000000e+00> : vector<64x8xf32>
    %322 = tpu.matmul %321, %307, %cst_111 {dimension_numbers = #tpu.dot_dimension_numbers<[1], [0], [0], [1], [0, 0, 1, 1], [], []>} : vector<64x64xbf16>, vector<64x8xbf16>, vector<64x8xf32> -> vector<64x8xf32>
    %323 = vector.extract_strided_slice %236 {offsets = [0, 32], sizes = [64, 8], strides = [1, 1]} : vector<64x64xf32> to vector<64x8xf32>
    %324 = arith.truncf %323 : vector<64x8xf32> to vector<64x8xbf16>
    %325 = vector.extract_strided_slice %237 {offsets = [0, 32], sizes = [64, 8], strides = [1, 1]} : vector<64x64xf32> to vector<64x8xf32>
    %326 = arith.truncf %325 : vector<64x8xf32> to vector<64x8xbf16>
    %327 = vector.extract_strided_slice %238 {offsets = [0, 32], sizes = [64, 8], strides = [1, 1]} : vector<64x64xf32> to vector<64x8xf32>
    %328 = arith.truncf %327 : vector<64x8xf32> to vector<64x8xbf16>
    %cst_112 = arith.constant dense<0.000000e+00> : vector<64x64xf32>
    %329 = tpu.matmul %324, %326, %cst_112 {dimension_numbers = #tpu.dot_dimension_numbers<[1], [1], [0], [0], [0, 0, 1, 0], [], []>} : vector<64x8xbf16>, vector<64x8xbf16>, vector<64x64xf32> -> vector<64x64xf32>
    %cst_113 = arith.constant 0.353553385 : f32
    %330 = vector.broadcast %cst_113 : f32 to vector<64x64xf32>
    %331 = arith.mulf %329, %330 : vector<64x64xf32>
    %cst_114 = arith.constant dense<0xFF800000> : vector<64xf32>
    %332 = vector.multi_reduction <maximumf>, %331, %cst_114 [1] : vector<64x64xf32> to vector<64xf32>
    %333 = vector.shape_cast %332 : vector<64xf32> to vector<64x1xf32>
    %334 = vector.broadcast %333 : vector<64x1xf32> to vector<64x64xf32>
    %335 = arith.subf %331, %334 : vector<64x64xf32>
    %336 = math.exp %335 : vector<64x64xf32>
    %cst_115 = arith.constant dense<0.000000e+00> : vector<64xf32>
    %337 = vector.multi_reduction <add>, %336, %cst_115 [1] : vector<64x64xf32> to vector<64xf32>
    %338 = vector.shape_cast %337 : vector<64xf32> to vector<64x1xf32>
    %339 = tpu.reciprocal %338 {approx = true} : vector<64x1xf32> -> vector<64x1xf32>
    %340 = vector.broadcast %339 : vector<64x1xf32> to vector<64x64xf32>
    %341 = arith.mulf %336, %340 : vector<64x64xf32>
    %342 = arith.truncf %341 : vector<64x64xf32> to vector<64x64xbf16>
    %cst_116 = arith.constant dense<0.000000e+00> : vector<64x8xf32>
    %343 = tpu.matmul %342, %328, %cst_116 {dimension_numbers = #tpu.dot_dimension_numbers<[1], [0], [0], [1], [0, 0, 1, 1], [], []>} : vector<64x64xbf16>, vector<64x8xbf16>, vector<64x8xf32> -> vector<64x8xf32>
    %344 = vector.extract_strided_slice %236 {offsets = [0, 40], sizes = [64, 8], strides = [1, 1]} : vector<64x64xf32> to vector<64x8xf32>
    %345 = arith.truncf %344 : vector<64x8xf32> to vector<64x8xbf16>
    %346 = vector.extract_strided_slice %237 {offsets = [0, 40], sizes = [64, 8], strides = [1, 1]} : vector<64x64xf32> to vector<64x8xf32>
    %347 = arith.truncf %346 : vector<64x8xf32> to vector<64x8xbf16>
    %348 = vector.extract_strided_slice %238 {offsets = [0, 40], sizes = [64, 8], strides = [1, 1]} : vector<64x64xf32> to vector<64x8xf32>
    %349 = arith.truncf %348 : vector<64x8xf32> to vector<64x8xbf16>
    %cst_117 = arith.constant dense<0.000000e+00> : vector<64x64xf32>
    %350 = tpu.matmul %345, %347, %cst_117 {dimension_numbers = #tpu.dot_dimension_numbers<[1], [1], [0], [0], [0, 0, 1, 0], [], []>} : vector<64x8xbf16>, vector<64x8xbf16>, vector<64x64xf32> -> vector<64x64xf32>
    %cst_118 = arith.constant 0.353553385 : f32
    %351 = vector.broadcast %cst_118 : f32 to vector<64x64xf32>
    %352 = arith.mulf %350, %351 : vector<64x64xf32>
    %cst_119 = arith.constant dense<0xFF800000> : vector<64xf32>
    %353 = vector.multi_reduction <maximumf>, %352, %cst_119 [1] : vector<64x64xf32> to vector<64xf32>
    %354 = vector.shape_cast %353 : vector<64xf32> to vector<64x1xf32>
    %355 = vector.broadcast %354 : vector<64x1xf32> to vector<64x64xf32>
    %356 = arith.subf %352, %355 : vector<64x64xf32>
    %357 = math.exp %356 : vector<64x64xf32>
    %cst_120 = arith.constant dense<0.000000e+00> : vector<64xf32>
    %358 = vector.multi_reduction <add>, %357, %cst_120 [1] : vector<64x64xf32> to vector<64xf32>
    %359 = vector.shape_cast %358 : vector<64xf32> to vector<64x1xf32>
    %360 = tpu.reciprocal %359 {approx = true} : vector<64x1xf32> -> vector<64x1xf32>
    %361 = vector.broadcast %360 : vector<64x1xf32> to vector<64x64xf32>
    %362 = arith.mulf %357, %361 : vector<64x64xf32>
    %363 = arith.truncf %362 : vector<64x64xf32> to vector<64x64xbf16>
    %cst_121 = arith.constant dense<0.000000e+00> : vector<64x8xf32>
    %364 = tpu.matmul %363, %349, %cst_121 {dimension_numbers = #tpu.dot_dimension_numbers<[1], [0], [0], [1], [0, 0, 1, 1], [], []>} : vector<64x64xbf16>, vector<64x8xbf16>, vector<64x8xf32> -> vector<64x8xf32>
    %365 = vector.extract_strided_slice %236 {offsets = [0, 48], sizes = [64, 8], strides = [1, 1]} : vector<64x64xf32> to vector<64x8xf32>
    %366 = arith.truncf %365 : vector<64x8xf32> to vector<64x8xbf16>
    %367 = vector.extract_strided_slice %237 {offsets = [0, 48], sizes = [64, 8], strides = [1, 1]} : vector<64x64xf32> to vector<64x8xf32>
    %368 = arith.truncf %367 : vector<64x8xf32> to vector<64x8xbf16>
    %369 = vector.extract_strided_slice %238 {offsets = [0, 48], sizes = [64, 8], strides = [1, 1]} : vector<64x64xf32> to vector<64x8xf32>
    %370 = arith.truncf %369 : vector<64x8xf32> to vector<64x8xbf16>
    %cst_122 = arith.constant dense<0.000000e+00> : vector<64x64xf32>
    %371 = tpu.matmul %366, %368, %cst_122 {dimension_numbers = #tpu.dot_dimension_numbers<[1], [1], [0], [0], [0, 0, 1, 0], [], []>} : vector<64x8xbf16>, vector<64x8xbf16>, vector<64x64xf32> -> vector<64x64xf32>
    %cst_123 = arith.constant 0.353553385 : f32
    %372 = vector.broadcast %cst_123 : f32 to vector<64x64xf32>
    %373 = arith.mulf %371, %372 : vector<64x64xf32>
    %cst_124 = arith.constant dense<0xFF800000> : vector<64xf32>
    %374 = vector.multi_reduction <maximumf>, %373, %cst_124 [1] : vector<64x64xf32> to vector<64xf32>
    %375 = vector.shape_cast %374 : vector<64xf32> to vector<64x1xf32>
    %376 = vector.broadcast %375 : vector<64x1xf32> to vector<64x64xf32>
    %377 = arith.subf %373, %376 : vector<64x64xf32>
    %378 = math.exp %377 : vector<64x64xf32>
    %cst_125 = arith.constant dense<0.000000e+00> : vector<64xf32>
    %379 = vector.multi_reduction <add>, %378, %cst_125 [1] : vector<64x64xf32> to vector<64xf32>
    %380 = vector.shape_cast %379 : vector<64xf32> to vector<64x1xf32>
    %381 = tpu.reciprocal %380 {approx = true} : vector<64x1xf32> -> vector<64x1xf32>
    %382 = vector.broadcast %381 : vector<64x1xf32> to vector<64x64xf32>
    %383 = arith.mulf %378, %382 : vector<64x64xf32>
    %384 = arith.truncf %383 : vector<64x64xf32> to vector<64x64xbf16>
    %cst_126 = arith.constant dense<0.000000e+00> : vector<64x8xf32>
    %385 = tpu.matmul %384, %370, %cst_126 {dimension_numbers = #tpu.dot_dimension_numbers<[1], [0], [0], [1], [0, 0, 1, 1], [], []>} : vector<64x64xbf16>, vector<64x8xbf16>, vector<64x8xf32> -> vector<64x8xf32>
    %386 = vector.extract_strided_slice %236 {offsets = [0, 56], sizes = [64, 8], strides = [1, 1]} : vector<64x64xf32> to vector<64x8xf32>
    %387 = arith.truncf %386 : vector<64x8xf32> to vector<64x8xbf16>
    %388 = vector.extract_strided_slice %237 {offsets = [0, 56], sizes = [64, 8], strides = [1, 1]} : vector<64x64xf32> to vector<64x8xf32>
    %389 = arith.truncf %388 : vector<64x8xf32> to vector<64x8xbf16>
    %390 = vector.extract_strided_slice %238 {offsets = [0, 56], sizes = [64, 8], strides = [1, 1]} : vector<64x64xf32> to vector<64x8xf32>
    %391 = arith.truncf %390 : vector<64x8xf32> to vector<64x8xbf16>
    %cst_127 = arith.constant dense<0.000000e+00> : vector<64x64xf32>
    %392 = tpu.matmul %387, %389, %cst_127 {dimension_numbers = #tpu.dot_dimension_numbers<[1], [1], [0], [0], [0, 0, 1, 0], [], []>} : vector<64x8xbf16>, vector<64x8xbf16>, vector<64x64xf32> -> vector<64x64xf32>
    %cst_128 = arith.constant 0.353553385 : f32
    %393 = vector.broadcast %cst_128 : f32 to vector<64x64xf32>
    %394 = arith.mulf %392, %393 : vector<64x64xf32>
    %cst_129 = arith.constant dense<0xFF800000> : vector<64xf32>
    %395 = vector.multi_reduction <maximumf>, %394, %cst_129 [1] : vector<64x64xf32> to vector<64xf32>
    %396 = vector.shape_cast %395 : vector<64xf32> to vector<64x1xf32>
    %397 = vector.broadcast %396 : vector<64x1xf32> to vector<64x64xf32>
    %398 = arith.subf %394, %397 : vector<64x64xf32>
    %399 = math.exp %398 : vector<64x64xf32>
    %cst_130 = arith.constant dense<0.000000e+00> : vector<64xf32>
    %400 = vector.multi_reduction <add>, %399, %cst_130 [1] : vector<64x64xf32> to vector<64xf32>
    %401 = vector.shape_cast %400 : vector<64xf32> to vector<64x1xf32>
    %402 = tpu.reciprocal %401 {approx = true} : vector<64x1xf32> -> vector<64x1xf32>
    %403 = vector.broadcast %402 : vector<64x1xf32> to vector<64x64xf32>
    %404 = arith.mulf %399, %403 : vector<64x64xf32>
    %405 = arith.truncf %404 : vector<64x64xf32> to vector<64x64xbf16>
    %cst_131 = arith.constant dense<0.000000e+00> : vector<64x8xf32>
    %406 = tpu.matmul %405, %391, %cst_131 {dimension_numbers = #tpu.dot_dimension_numbers<[1], [0], [0], [1], [0, 0, 1, 1], [], []>} : vector<64x64xbf16>, vector<64x8xbf16>, vector<64x8xf32> -> vector<64x8xf32>
    %407 = tpu.concatenate %259, %280, %301, %322, %343, %364, %385, %406 in 1 : vector<64x8xf32>, vector<64x8xf32>, vector<64x8xf32>, vector<64x8xf32>, vector<64x8xf32>, vector<64x8xf32>, vector<64x8xf32>, vector<64x8xf32> -> vector<64x64xf32>
    %408 = arith.truncf %407 : vector<64x64xf32> to vector<64x64xbf16>
    %cst_132 = arith.constant dense<0.000000e+00> : vector<64x64xf32>
    %409 = tpu.matmul %408, %204, %cst_132 {dimension_numbers = #tpu.dot_dimension_numbers<[1], [0], [0], [1], [0, 0, 1, 1], [], []>} : vector<64x64xbf16>, vector<64x64xbf16>, vector<64x64xf32> -> vector<64x64xf32>
    %410 = vector.broadcast %14 : vector<1x64xf32> to vector<64x64xf32>
    %411 = arith.addf %409, %410 : vector<64x64xf32>
    %412 = arith.addf %411, %196 : vector<64x64xf32>
    %cst_133 = arith.constant dense<0.000000e+00> : vector<64xf32>
    %413 = vector.multi_reduction <add>, %412, %cst_133 [1] : vector<64x64xf32> to vector<64xf32>
    %414 = vector.shape_cast %413 : vector<64xf32> to vector<64x1xf32>
    %cst_134 = arith.constant 6.400000e+01 : f32
    %415 = vector.broadcast %cst_134 : f32 to vector<64x1xf32>
    %416 = arith.divf %414, %415 : vector<64x1xf32>
    %417 = vector.broadcast %416 : vector<64x1xf32> to vector<64x64xf32>
    %418 = arith.subf %412, %417 : vector<64x64xf32>
    %419 = arith.mulf %418, %418 : vector<64x64xf32>
    %cst_135 = arith.constant dense<0.000000e+00> : vector<64xf32>
    %420 = vector.multi_reduction <add>, %419, %cst_135 [1] : vector<64x64xf32> to vector<64xf32>
    %421 = vector.shape_cast %420 : vector<64xf32> to vector<64x1xf32>
    %cst_136 = arith.constant 6.400000e+01 : f32
    %422 = vector.broadcast %cst_136 : f32 to vector<64x1xf32>
    %423 = arith.divf %421, %422 : vector<64x1xf32>
    %424 = vector.broadcast %416 : vector<64x1xf32> to vector<64x64xf32>
    %425 = arith.subf %412, %424 : vector<64x64xf32>
    %cst_137 = arith.constant 9.99999974E-6 : f32
    %426 = vector.broadcast %cst_137 : f32 to vector<64x1xf32>
    %427 = arith.addf %423, %426 : vector<64x1xf32>
    %428 = math.rsqrt %427 : vector<64x1xf32>
    %429 = vector.broadcast %428 : vector<64x1xf32> to vector<64x64xf32>
    %430 = arith.mulf %425, %429 : vector<64x64xf32>
    %431 = vector.broadcast %10 : vector<1x64xf32> to vector<64x64xf32>
    %432 = arith.mulf %430, %431 : vector<64x64xf32>
    %433 = vector.broadcast %11 : vector<1x64xf32> to vector<64x64xf32>
    %434 = arith.addf %432, %433 : vector<64x64xf32>
    %435 = arith.truncf %434 : vector<64x64xf32> to vector<64x64xbf16>
    %436 = arith.truncf %3 : vector<8x64xf32> to vector<8x64xbf16>
    %cst_138 = arith.constant dense<0.000000e+00> : vector<64x64xf32>
    %437 = tpu.matmul %435, %206, %cst_138 {dimension_numbers = #tpu.dot_dimension_numbers<[1], [0], [0], [1], [0, 0, 1, 1], [], []>} : vector<64x64xbf16>, vector<64x64xbf16>, vector<64x64xf32> -> vector<64x64xf32>
    %cst_139 = arith.constant dense<0.000000e+00> : vector<8x64xf32>
    %438 = tpu.matmul %436, %210, %cst_139 {dimension_numbers = #tpu.dot_dimension_numbers<[1], [0], [0], [1], [0, 0, 1, 1], [], []>} : vector<8x64xbf16>, vector<64x64xbf16>, vector<8x64xf32> -> vector<8x64xf32>
    %cst_140 = arith.constant dense<0.000000e+00> : vector<8x64xf32>
    %439 = tpu.matmul %436, %212, %cst_140 {dimension_numbers = #tpu.dot_dimension_numbers<[1], [0], [0], [1], [0, 0, 1, 1], [], []>} : vector<8x64xbf16>, vector<64x64xbf16>, vector<8x64xf32> -> vector<8x64xf32>
    %440 = vector.extract_strided_slice %437 {offsets = [0, 0], sizes = [64, 8], strides = [1, 1]} : vector<64x64xf32> to vector<64x8xf32>
    %441 = arith.truncf %440 : vector<64x8xf32> to vector<64x8xbf16>
    %442 = vector.extract_strided_slice %438 {offsets = [0, 0], sizes = [8, 8], strides = [1, 1]} : vector<8x64xf32> to vector<8x8xf32>
    %443 = arith.truncf %442 : vector<8x8xf32> to vector<8x8xbf16>
    %444 = vector.extract_strided_slice %439 {offsets = [0, 0], sizes = [8, 8], strides = [1, 1]} : vector<8x64xf32> to vector<8x8xf32>
    %445 = arith.truncf %444 : vector<8x8xf32> to vector<8x8xbf16>
    %cst_141 = arith.constant dense<0.000000e+00> : vector<64x8xf32>
    %446 = tpu.matmul %441, %443, %cst_141 {dimension_numbers = #tpu.dot_dimension_numbers<[1], [1], [0], [0], [0, 0, 1, 0], [], []>} : vector<64x8xbf16>, vector<8x8xbf16>, vector<64x8xf32> -> vector<64x8xf32>
    %cst_142 = arith.constant 0.353553385 : f32
    %447 = vector.broadcast %cst_142 : f32 to vector<64x8xf32>
    %448 = arith.mulf %446, %447 : vector<64x8xf32>
    %cst_143 = arith.constant dense<0xFF800000> : vector<64xf32>
    %449 = vector.multi_reduction <maximumf>, %448, %cst_143 [1] : vector<64x8xf32> to vector<64xf32>
    %450 = vector.shape_cast %449 : vector<64xf32> to vector<64x1xf32>
    %451 = vector.broadcast %450 : vector<64x1xf32> to vector<64x8xf32>
    %452 = arith.subf %448, %451 : vector<64x8xf32>
    %453 = math.exp %452 : vector<64x8xf32>
    %cst_144 = arith.constant dense<0.000000e+00> : vector<64xf32>
    %454 = vector.multi_reduction <add>, %453, %cst_144 [1] : vector<64x8xf32> to vector<64xf32>
    %455 = vector.shape_cast %454 : vector<64xf32> to vector<64x1xf32>
    %456 = tpu.reciprocal %455 {approx = true} : vector<64x1xf32> -> vector<64x1xf32>
    %457 = vector.broadcast %456 : vector<64x1xf32> to vector<64x8xf32>
    %458 = arith.mulf %453, %457 : vector<64x8xf32>
    %459 = arith.truncf %458 : vector<64x8xf32> to vector<64x8xbf16>
    %cst_145 = arith.constant dense<0.000000e+00> : vector<64x8xf32>
    %460 = tpu.matmul %459, %445, %cst_145 {dimension_numbers = #tpu.dot_dimension_numbers<[1], [0], [0], [1], [0, 0, 1, 1], [], []>} : vector<64x8xbf16>, vector<8x8xbf16>, vector<64x8xf32> -> vector<64x8xf32>
    %461 = vector.extract_strided_slice %437 {offsets = [0, 8], sizes = [64, 8], strides = [1, 1]} : vector<64x64xf32> to vector<64x8xf32>
    %462 = arith.truncf %461 : vector<64x8xf32> to vector<64x8xbf16>
    %463 = vector.extract_strided_slice %438 {offsets = [0, 8], sizes = [8, 8], strides = [1, 1]} : vector<8x64xf32> to vector<8x8xf32>
    %464 = arith.truncf %463 : vector<8x8xf32> to vector<8x8xbf16>
    %465 = vector.extract_strided_slice %439 {offsets = [0, 8], sizes = [8, 8], strides = [1, 1]} : vector<8x64xf32> to vector<8x8xf32>
    %466 = arith.truncf %465 : vector<8x8xf32> to vector<8x8xbf16>
    %cst_146 = arith.constant dense<0.000000e+00> : vector<64x8xf32>
    %467 = tpu.matmul %462, %464, %cst_146 {dimension_numbers = #tpu.dot_dimension_numbers<[1], [1], [0], [0], [0, 0, 1, 0], [], []>} : vector<64x8xbf16>, vector<8x8xbf16>, vector<64x8xf32> -> vector<64x8xf32>
    %cst_147 = arith.constant 0.353553385 : f32
    %468 = vector.broadcast %cst_147 : f32 to vector<64x8xf32>
    %469 = arith.mulf %467, %468 : vector<64x8xf32>
    %cst_148 = arith.constant dense<0xFF800000> : vector<64xf32>
    %470 = vector.multi_reduction <maximumf>, %469, %cst_148 [1] : vector<64x8xf32> to vector<64xf32>
    %471 = vector.shape_cast %470 : vector<64xf32> to vector<64x1xf32>
    %472 = vector.broadcast %471 : vector<64x1xf32> to vector<64x8xf32>
    %473 = arith.subf %469, %472 : vector<64x8xf32>
    %474 = math.exp %473 : vector<64x8xf32>
    %cst_149 = arith.constant dense<0.000000e+00> : vector<64xf32>
    %475 = vector.multi_reduction <add>, %474, %cst_149 [1] : vector<64x8xf32> to vector<64xf32>
    %476 = vector.shape_cast %475 : vector<64xf32> to vector<64x1xf32>
    %477 = tpu.reciprocal %476 {approx = true} : vector<64x1xf32> -> vector<64x1xf32>
    %478 = vector.broadcast %477 : vector<64x1xf32> to vector<64x8xf32>
    %479 = arith.mulf %474, %478 : vector<64x8xf32>
    %480 = arith.truncf %479 : vector<64x8xf32> to vector<64x8xbf16>
    %cst_150 = arith.constant dense<0.000000e+00> : vector<64x8xf32>
    %481 = tpu.matmul %480, %466, %cst_150 {dimension_numbers = #tpu.dot_dimension_numbers<[1], [0], [0], [1], [0, 0, 1, 1], [], []>} : vector<64x8xbf16>, vector<8x8xbf16>, vector<64x8xf32> -> vector<64x8xf32>
    %482 = vector.extract_strided_slice %437 {offsets = [0, 16], sizes = [64, 8], strides = [1, 1]} : vector<64x64xf32> to vector<64x8xf32>
    %483 = arith.truncf %482 : vector<64x8xf32> to vector<64x8xbf16>
    %484 = vector.extract_strided_slice %438 {offsets = [0, 16], sizes = [8, 8], strides = [1, 1]} : vector<8x64xf32> to vector<8x8xf32>
    %485 = arith.truncf %484 : vector<8x8xf32> to vector<8x8xbf16>
    %486 = vector.extract_strided_slice %439 {offsets = [0, 16], sizes = [8, 8], strides = [1, 1]} : vector<8x64xf32> to vector<8x8xf32>
    %487 = arith.truncf %486 : vector<8x8xf32> to vector<8x8xbf16>
    %cst_151 = arith.constant dense<0.000000e+00> : vector<64x8xf32>
    %488 = tpu.matmul %483, %485, %cst_151 {dimension_numbers = #tpu.dot_dimension_numbers<[1], [1], [0], [0], [0, 0, 1, 0], [], []>} : vector<64x8xbf16>, vector<8x8xbf16>, vector<64x8xf32> -> vector<64x8xf32>
    %cst_152 = arith.constant 0.353553385 : f32
    %489 = vector.broadcast %cst_152 : f32 to vector<64x8xf32>
    %490 = arith.mulf %488, %489 : vector<64x8xf32>
    %cst_153 = arith.constant dense<0xFF800000> : vector<64xf32>
    %491 = vector.multi_reduction <maximumf>, %490, %cst_153 [1] : vector<64x8xf32> to vector<64xf32>
    %492 = vector.shape_cast %491 : vector<64xf32> to vector<64x1xf32>
    %493 = vector.broadcast %492 : vector<64x1xf32> to vector<64x8xf32>
    %494 = arith.subf %490, %493 : vector<64x8xf32>
    %495 = math.exp %494 : vector<64x8xf32>
    %cst_154 = arith.constant dense<0.000000e+00> : vector<64xf32>
    %496 = vector.multi_reduction <add>, %495, %cst_154 [1] : vector<64x8xf32> to vector<64xf32>
    %497 = vector.shape_cast %496 : vector<64xf32> to vector<64x1xf32>
    %498 = tpu.reciprocal %497 {approx = true} : vector<64x1xf32> -> vector<64x1xf32>
    %499 = vector.broadcast %498 : vector<64x1xf32> to vector<64x8xf32>
    %500 = arith.mulf %495, %499 : vector<64x8xf32>
    %501 = arith.truncf %500 : vector<64x8xf32> to vector<64x8xbf16>
    %cst_155 = arith.constant dense<0.000000e+00> : vector<64x8xf32>
    %502 = tpu.matmul %501, %487, %cst_155 {dimension_numbers = #tpu.dot_dimension_numbers<[1], [0], [0], [1], [0, 0, 1, 1], [], []>} : vector<64x8xbf16>, vector<8x8xbf16>, vector<64x8xf32> -> vector<64x8xf32>
    %503 = vector.extract_strided_slice %437 {offsets = [0, 24], sizes = [64, 8], strides = [1, 1]} : vector<64x64xf32> to vector<64x8xf32>
    %504 = arith.truncf %503 : vector<64x8xf32> to vector<64x8xbf16>
    %505 = vector.extract_strided_slice %438 {offsets = [0, 24], sizes = [8, 8], strides = [1, 1]} : vector<8x64xf32> to vector<8x8xf32>
    %506 = arith.truncf %505 : vector<8x8xf32> to vector<8x8xbf16>
    %507 = vector.extract_strided_slice %439 {offsets = [0, 24], sizes = [8, 8], strides = [1, 1]} : vector<8x64xf32> to vector<8x8xf32>
    %508 = arith.truncf %507 : vector<8x8xf32> to vector<8x8xbf16>
    %cst_156 = arith.constant dense<0.000000e+00> : vector<64x8xf32>
    %509 = tpu.matmul %504, %506, %cst_156 {dimension_numbers = #tpu.dot_dimension_numbers<[1], [1], [0], [0], [0, 0, 1, 0], [], []>} : vector<64x8xbf16>, vector<8x8xbf16>, vector<64x8xf32> -> vector<64x8xf32>
    %cst_157 = arith.constant 0.353553385 : f32
    %510 = vector.broadcast %cst_157 : f32 to vector<64x8xf32>
    %511 = arith.mulf %509, %510 : vector<64x8xf32>
    %cst_158 = arith.constant dense<0xFF800000> : vector<64xf32>
    %512 = vector.multi_reduction <maximumf>, %511, %cst_158 [1] : vector<64x8xf32> to vector<64xf32>
    %513 = vector.shape_cast %512 : vector<64xf32> to vector<64x1xf32>
    %514 = vector.broadcast %513 : vector<64x1xf32> to vector<64x8xf32>
    %515 = arith.subf %511, %514 : vector<64x8xf32>
    %516 = math.exp %515 : vector<64x8xf32>
    %cst_159 = arith.constant dense<0.000000e+00> : vector<64xf32>
    %517 = vector.multi_reduction <add>, %516, %cst_159 [1] : vector<64x8xf32> to vector<64xf32>
    %518 = vector.shape_cast %517 : vector<64xf32> to vector<64x1xf32>
    %519 = tpu.reciprocal %518 {approx = true} : vector<64x1xf32> -> vector<64x1xf32>
    %520 = vector.broadcast %519 : vector<64x1xf32> to vector<64x8xf32>
    %521 = arith.mulf %516, %520 : vector<64x8xf32>
    %522 = arith.truncf %521 : vector<64x8xf32> to vector<64x8xbf16>
    %cst_160 = arith.constant dense<0.000000e+00> : vector<64x8xf32>
    %523 = tpu.matmul %522, %508, %cst_160 {dimension_numbers = #tpu.dot_dimension_numbers<[1], [0], [0], [1], [0, 0, 1, 1], [], []>} : vector<64x8xbf16>, vector<8x8xbf16>, vector<64x8xf32> -> vector<64x8xf32>
    %524 = vector.extract_strided_slice %437 {offsets = [0, 32], sizes = [64, 8], strides = [1, 1]} : vector<64x64xf32> to vector<64x8xf32>
    %525 = arith.truncf %524 : vector<64x8xf32> to vector<64x8xbf16>
    %526 = vector.extract_strided_slice %438 {offsets = [0, 32], sizes = [8, 8], strides = [1, 1]} : vector<8x64xf32> to vector<8x8xf32>
    %527 = arith.truncf %526 : vector<8x8xf32> to vector<8x8xbf16>
    %528 = vector.extract_strided_slice %439 {offsets = [0, 32], sizes = [8, 8], strides = [1, 1]} : vector<8x64xf32> to vector<8x8xf32>
    %529 = arith.truncf %528 : vector<8x8xf32> to vector<8x8xbf16>
    %cst_161 = arith.constant dense<0.000000e+00> : vector<64x8xf32>
    %530 = tpu.matmul %525, %527, %cst_161 {dimension_numbers = #tpu.dot_dimension_numbers<[1], [1], [0], [0], [0, 0, 1, 0], [], []>} : vector<64x8xbf16>, vector<8x8xbf16>, vector<64x8xf32> -> vector<64x8xf32>
    %cst_162 = arith.constant 0.353553385 : f32
    %531 = vector.broadcast %cst_162 : f32 to vector<64x8xf32>
    %532 = arith.mulf %530, %531 : vector<64x8xf32>
    %cst_163 = arith.constant dense<0xFF800000> : vector<64xf32>
    %533 = vector.multi_reduction <maximumf>, %532, %cst_163 [1] : vector<64x8xf32> to vector<64xf32>
    %534 = vector.shape_cast %533 : vector<64xf32> to vector<64x1xf32>
    %535 = vector.broadcast %534 : vector<64x1xf32> to vector<64x8xf32>
    %536 = arith.subf %532, %535 : vector<64x8xf32>
    %537 = math.exp %536 : vector<64x8xf32>
    %cst_164 = arith.constant dense<0.000000e+00> : vector<64xf32>
    %538 = vector.multi_reduction <add>, %537, %cst_164 [1] : vector<64x8xf32> to vector<64xf32>
    %539 = vector.shape_cast %538 : vector<64xf32> to vector<64x1xf32>
    %540 = tpu.reciprocal %539 {approx = true} : vector<64x1xf32> -> vector<64x1xf32>
    %541 = vector.broadcast %540 : vector<64x1xf32> to vector<64x8xf32>
    %542 = arith.mulf %537, %541 : vector<64x8xf32>
    %543 = arith.truncf %542 : vector<64x8xf32> to vector<64x8xbf16>
    %cst_165 = arith.constant dense<0.000000e+00> : vector<64x8xf32>
    %544 = tpu.matmul %543, %529, %cst_165 {dimension_numbers = #tpu.dot_dimension_numbers<[1], [0], [0], [1], [0, 0, 1, 1], [], []>} : vector<64x8xbf16>, vector<8x8xbf16>, vector<64x8xf32> -> vector<64x8xf32>
    %545 = vector.extract_strided_slice %437 {offsets = [0, 40], sizes = [64, 8], strides = [1, 1]} : vector<64x64xf32> to vector<64x8xf32>
    %546 = arith.truncf %545 : vector<64x8xf32> to vector<64x8xbf16>
    %547 = vector.extract_strided_slice %438 {offsets = [0, 40], sizes = [8, 8], strides = [1, 1]} : vector<8x64xf32> to vector<8x8xf32>
    %548 = arith.truncf %547 : vector<8x8xf32> to vector<8x8xbf16>
    %549 = vector.extract_strided_slice %439 {offsets = [0, 40], sizes = [8, 8], strides = [1, 1]} : vector<8x64xf32> to vector<8x8xf32>
    %550 = arith.truncf %549 : vector<8x8xf32> to vector<8x8xbf16>
    %cst_166 = arith.constant dense<0.000000e+00> : vector<64x8xf32>
    %551 = tpu.matmul %546, %548, %cst_166 {dimension_numbers = #tpu.dot_dimension_numbers<[1], [1], [0], [0], [0, 0, 1, 0], [], []>} : vector<64x8xbf16>, vector<8x8xbf16>, vector<64x8xf32> -> vector<64x8xf32>
    %cst_167 = arith.constant 0.353553385 : f32
    %552 = vector.broadcast %cst_167 : f32 to vector<64x8xf32>
    %553 = arith.mulf %551, %552 : vector<64x8xf32>
    %cst_168 = arith.constant dense<0xFF800000> : vector<64xf32>
    %554 = vector.multi_reduction <maximumf>, %553, %cst_168 [1] : vector<64x8xf32> to vector<64xf32>
    %555 = vector.shape_cast %554 : vector<64xf32> to vector<64x1xf32>
    %556 = vector.broadcast %555 : vector<64x1xf32> to vector<64x8xf32>
    %557 = arith.subf %553, %556 : vector<64x8xf32>
    %558 = math.exp %557 : vector<64x8xf32>
    %cst_169 = arith.constant dense<0.000000e+00> : vector<64xf32>
    %559 = vector.multi_reduction <add>, %558, %cst_169 [1] : vector<64x8xf32> to vector<64xf32>
    %560 = vector.shape_cast %559 : vector<64xf32> to vector<64x1xf32>
    %561 = tpu.reciprocal %560 {approx = true} : vector<64x1xf32> -> vector<64x1xf32>
    %562 = vector.broadcast %561 : vector<64x1xf32> to vector<64x8xf32>
    %563 = arith.mulf %558, %562 : vector<64x8xf32>
    %564 = arith.truncf %563 : vector<64x8xf32> to vector<64x8xbf16>
    %cst_170 = arith.constant dense<0.000000e+00> : vector<64x8xf32>
    %565 = tpu.matmul %564, %550, %cst_170 {dimension_numbers = #tpu.dot_dimension_numbers<[1], [0], [0], [1], [0, 0, 1, 1], [], []>} : vector<64x8xbf16>, vector<8x8xbf16>, vector<64x8xf32> -> vector<64x8xf32>
    %566 = vector.extract_strided_slice %437 {offsets = [0, 48], sizes = [64, 8], strides = [1, 1]} : vector<64x64xf32> to vector<64x8xf32>
    %567 = arith.truncf %566 : vector<64x8xf32> to vector<64x8xbf16>
    %568 = vector.extract_strided_slice %438 {offsets = [0, 48], sizes = [8, 8], strides = [1, 1]} : vector<8x64xf32> to vector<8x8xf32>
    %569 = arith.truncf %568 : vector<8x8xf32> to vector<8x8xbf16>
    %570 = vector.extract_strided_slice %439 {offsets = [0, 48], sizes = [8, 8], strides = [1, 1]} : vector<8x64xf32> to vector<8x8xf32>
    %571 = arith.truncf %570 : vector<8x8xf32> to vector<8x8xbf16>
    %cst_171 = arith.constant dense<0.000000e+00> : vector<64x8xf32>
    %572 = tpu.matmul %567, %569, %cst_171 {dimension_numbers = #tpu.dot_dimension_numbers<[1], [1], [0], [0], [0, 0, 1, 0], [], []>} : vector<64x8xbf16>, vector<8x8xbf16>, vector<64x8xf32> -> vector<64x8xf32>
    %cst_172 = arith.constant 0.353553385 : f32
    %573 = vector.broadcast %cst_172 : f32 to vector<64x8xf32>
    %574 = arith.mulf %572, %573 : vector<64x8xf32>
    %cst_173 = arith.constant dense<0xFF800000> : vector<64xf32>
    %575 = vector.multi_reduction <maximumf>, %574, %cst_173 [1] : vector<64x8xf32> to vector<64xf32>
    %576 = vector.shape_cast %575 : vector<64xf32> to vector<64x1xf32>
    %577 = vector.broadcast %576 : vector<64x1xf32> to vector<64x8xf32>
    %578 = arith.subf %574, %577 : vector<64x8xf32>
    %579 = math.exp %578 : vector<64x8xf32>
    %cst_174 = arith.constant dense<0.000000e+00> : vector<64xf32>
    %580 = vector.multi_reduction <add>, %579, %cst_174 [1] : vector<64x8xf32> to vector<64xf32>
    %581 = vector.shape_cast %580 : vector<64xf32> to vector<64x1xf32>
    %582 = tpu.reciprocal %581 {approx = true} : vector<64x1xf32> -> vector<64x1xf32>
    %583 = vector.broadcast %582 : vector<64x1xf32> to vector<64x8xf32>
    %584 = arith.mulf %579, %583 : vector<64x8xf32>
    %585 = arith.truncf %584 : vector<64x8xf32> to vector<64x8xbf16>
    %cst_175 = arith.constant dense<0.000000e+00> : vector<64x8xf32>
    %586 = tpu.matmul %585, %571, %cst_175 {dimension_numbers = #tpu.dot_dimension_numbers<[1], [0], [0], [1], [0, 0, 1, 1], [], []>} : vector<64x8xbf16>, vector<8x8xbf16>, vector<64x8xf32> -> vector<64x8xf32>
    %587 = vector.extract_strided_slice %437 {offsets = [0, 56], sizes = [64, 8], strides = [1, 1]} : vector<64x64xf32> to vector<64x8xf32>
    %588 = arith.truncf %587 : vector<64x8xf32> to vector<64x8xbf16>
    %589 = vector.extract_strided_slice %438 {offsets = [0, 56], sizes = [8, 8], strides = [1, 1]} : vector<8x64xf32> to vector<8x8xf32>
    %590 = arith.truncf %589 : vector<8x8xf32> to vector<8x8xbf16>
    %591 = vector.extract_strided_slice %439 {offsets = [0, 56], sizes = [8, 8], strides = [1, 1]} : vector<8x64xf32> to vector<8x8xf32>
    %592 = arith.truncf %591 : vector<8x8xf32> to vector<8x8xbf16>
    %cst_176 = arith.constant dense<0.000000e+00> : vector<64x8xf32>
    %593 = tpu.matmul %588, %590, %cst_176 {dimension_numbers = #tpu.dot_dimension_numbers<[1], [1], [0], [0], [0, 0, 1, 0], [], []>} : vector<64x8xbf16>, vector<8x8xbf16>, vector<64x8xf32> -> vector<64x8xf32>
    %cst_177 = arith.constant 0.353553385 : f32
    %594 = vector.broadcast %cst_177 : f32 to vector<64x8xf32>
    %595 = arith.mulf %593, %594 : vector<64x8xf32>
    %cst_178 = arith.constant dense<0xFF800000> : vector<64xf32>
    %596 = vector.multi_reduction <maximumf>, %595, %cst_178 [1] : vector<64x8xf32> to vector<64xf32>
    %597 = vector.shape_cast %596 : vector<64xf32> to vector<64x1xf32>
    %598 = vector.broadcast %597 : vector<64x1xf32> to vector<64x8xf32>
    %599 = arith.subf %595, %598 : vector<64x8xf32>
    %600 = math.exp %599 : vector<64x8xf32>
    %cst_179 = arith.constant dense<0.000000e+00> : vector<64xf32>
    %601 = vector.multi_reduction <add>, %600, %cst_179 [1] : vector<64x8xf32> to vector<64xf32>
    %602 = vector.shape_cast %601 : vector<64xf32> to vector<64x1xf32>
    %603 = tpu.reciprocal %602 {approx = true} : vector<64x1xf32> -> vector<64x1xf32>
    %604 = vector.broadcast %603 : vector<64x1xf32> to vector<64x8xf32>
    %605 = arith.mulf %600, %604 : vector<64x8xf32>
    %606 = arith.truncf %605 : vector<64x8xf32> to vector<64x8xbf16>
    %cst_180 = arith.constant dense<0.000000e+00> : vector<64x8xf32>
    %607 = tpu.matmul %606, %592, %cst_180 {dimension_numbers = #tpu.dot_dimension_numbers<[1], [0], [0], [1], [0, 0, 1, 1], [], []>} : vector<64x8xbf16>, vector<8x8xbf16>, vector<64x8xf32> -> vector<64x8xf32>
    %608 = tpu.concatenate %460, %481, %502, %523, %544, %565, %586, %607 in 1 : vector<64x8xf32>, vector<64x8xf32>, vector<64x8xf32>, vector<64x8xf32>, vector<64x8xf32>, vector<64x8xf32>, vector<64x8xf32>, vector<64x8xf32> -> vector<64x64xf32>
    %609 = arith.truncf %608 : vector<64x64xf32> to vector<64x64xbf16>
    %cst_181 = arith.constant dense<0.000000e+00> : vector<64x64xf32>
    %610 = tpu.matmul %609, %208, %cst_181 {dimension_numbers = #tpu.dot_dimension_numbers<[1], [0], [0], [1], [0, 0, 1, 1], [], []>} : vector<64x64xbf16>, vector<64x64xbf16>, vector<64x64xf32> -> vector<64x64xf32>
    %611 = vector.broadcast %15 : vector<1x64xf32> to vector<64x64xf32>
    %612 = arith.addf %610, %611 : vector<64x64xf32>
    %613 = arith.addf %612, %412 : vector<64x64xf32>
    %cst_182 = arith.constant dense<0.000000e+00> : vector<64xf32>
    %614 = vector.multi_reduction <add>, %613, %cst_182 [1] : vector<64x64xf32> to vector<64xf32>
    %615 = vector.shape_cast %614 : vector<64xf32> to vector<64x1xf32>
    %cst_183 = arith.constant 6.400000e+01 : f32
    %616 = vector.broadcast %cst_183 : f32 to vector<64x1xf32>
    %617 = arith.divf %615, %616 : vector<64x1xf32>
    %618 = vector.broadcast %617 : vector<64x1xf32> to vector<64x64xf32>
    %619 = arith.subf %613, %618 : vector<64x64xf32>
    %620 = arith.mulf %619, %619 : vector<64x64xf32>
    %cst_184 = arith.constant dense<0.000000e+00> : vector<64xf32>
    %621 = vector.multi_reduction <add>, %620, %cst_184 [1] : vector<64x64xf32> to vector<64xf32>
    %622 = vector.shape_cast %621 : vector<64xf32> to vector<64x1xf32>
    %cst_185 = arith.constant 6.400000e+01 : f32
    %623 = vector.broadcast %cst_185 : f32 to vector<64x1xf32>
    %624 = arith.divf %622, %623 : vector<64x1xf32>
    %625 = vector.broadcast %617 : vector<64x1xf32> to vector<64x64xf32>
    %626 = arith.subf %613, %625 : vector<64x64xf32>
    %cst_186 = arith.constant 9.99999974E-6 : f32
    %627 = vector.broadcast %cst_186 : f32 to vector<64x1xf32>
    %628 = arith.addf %624, %627 : vector<64x1xf32>
    %629 = math.rsqrt %628 : vector<64x1xf32>
    %630 = vector.broadcast %629 : vector<64x1xf32> to vector<64x64xf32>
    %631 = arith.mulf %626, %630 : vector<64x64xf32>
    %632 = vector.broadcast %12 : vector<1x64xf32> to vector<64x64xf32>
    %633 = arith.mulf %631, %632 : vector<64x64xf32>
    %634 = vector.broadcast %13 : vector<1x64xf32> to vector<64x64xf32>
    %635 = arith.addf %633, %634 : vector<64x64xf32>
    %636 = arith.truncf %635 : vector<64x64xf32> to vector<64x64xbf16>
    %c0_187 = arith.constant 0 : index
    %c0_188 = arith.constant 0 : index
    %637 = vector.load %arg7[%c0_187, %c0_188] : memref<64x256xbf16, #tpu.memory_space<vmem>>, vector<64x256xbf16>
    %cst_189 = arith.constant dense<0.000000e+00> : vector<64x256xf32>
    %638 = tpu.matmul %636, %637, %cst_189 {dimension_numbers = #tpu.dot_dimension_numbers<[1], [0], [0], [1], [0, 0, 1, 1], [], []>} : vector<64x64xbf16>, vector<64x256xbf16>, vector<64x256xf32> -> vector<64x256xf32>
    %639 = vector.broadcast %16 : vector<1x256xf32> to vector<64x256xf32>
    %640 = arith.addf %638, %639 : vector<64x256xf32>
    %cst_190 = arith.constant 0.000000e+00 : f32
    %641 = vector.broadcast %cst_190 : f32 to vector<64x256xf32>
    %642 = arith.maximumf %640, %641 : vector<64x256xf32>
    %643 = arith.truncf %642 : vector<64x256xf32> to vector<64x256xbf16>
    %c0_191 = arith.constant 0 : index
    %c0_192 = arith.constant 0 : index
    %644 = vector.load %arg8[%c0_191, %c0_192] : memref<256x64xbf16, #tpu.memory_space<vmem>>, vector<256x64xbf16>
    %cst_193 = arith.constant dense<0.000000e+00> : vector<64x64xf32>
    %645 = tpu.matmul %643, %644, %cst_193 {dimension_numbers = #tpu.dot_dimension_numbers<[1], [0], [0], [1], [0, 0, 1, 1], [], []>} : vector<64x256xbf16>, vector<256x64xbf16>, vector<64x64xf32> -> vector<64x64xf32>
    %646 = vector.broadcast %17 : vector<1x64xf32> to vector<64x64xf32>
    %647 = arith.addf %645, %646 : vector<64x64xf32>
    %648 = arith.addf %647, %613 : vector<64x64xf32>
    %649 = arith.truncf %648 : vector<64x64xf32> to vector<64x64xbf16>
    %c0_194 = arith.constant 0 : index
    %c0_195 = arith.constant 0 : index
    %650 = vector.load %arg9[%c0_194, %c0_195] : memref<64x16xbf16, #tpu.memory_space<vmem>>, vector<64x16xbf16>
    %cst_196 = arith.constant dense<0.000000e+00> : vector<64x16xf32>
    %651 = tpu.matmul %649, %650, %cst_196 {dimension_numbers = #tpu.dot_dimension_numbers<[1], [0], [0], [1], [0, 0, 1, 1], [], []>} : vector<64x64xbf16>, vector<64x16xbf16>, vector<64x16xf32> -> vector<64x16xf32>
    %652 = vector.broadcast %18 : vector<1x16xf32> to vector<64x16xf32>
    %653 = arith.addf %651, %652 : vector<64x16xf32>
    %654 = arith.addf %653, %1 : vector<64x16xf32>
    %c0_197 = arith.constant 0 : index
    %c0_198 = arith.constant 0 : index
    %c0_199 = arith.constant 0 : index
    %655 = vector.load %arg10[%c0_197, %c0_198, %c0_199] : memref<1x64x16xf32, #tpu.memory_space<vmem>>, vector<1x64x16xf32>
    %656 = vector.shape_cast %655 : vector<1x64x16xf32> to vector<64x16xf32>
    %657 = vector.shape_cast %654 : vector<64x16xf32> to vector<1x64x16xf32>
    tpu.vector_store %arg10[%c0_197, %c0_198, %c0_199], %657 {strides = array<i32>} : memref<1x64x16xf32, #tpu.memory_space<vmem>>, vector<1x64x16xf32>,
    return
  }
  func.func @transform_0(%arg0: i32) -> (i32, i32, i32) {
    %c0_i32 = arith.constant 0 : i32
    %c0_i32_0 = arith.constant 0 : i32
    %c0_i32_1 = arith.constant 0 : i32
    return %arg0, %c0_i32, %c0_i32_0 : i32, i32, i32
  }
  func.func @transform_1(%arg0: i32) -> (i32, i32, i32) {
    %c0_i32 = arith.constant 0 : i32
    %c0_i32_0 = arith.constant 0 : i32
    %c0_i32_1 = arith.constant 0 : i32
    return %arg0, %c0_i32, %c0_i32_0 : i32, i32, i32
  }
  func.func @transform_2(%arg0: i32) -> (i32, i32) {
    %c0_i32 = arith.constant 0 : i32
    %c0_i32_0 = arith.constant 0 : i32
    %c0_i32_1 = arith.constant 0 : i32
    return %c0_i32, %c0_i32_0 : i32, i32
  }
  func.func @transform_3(%arg0: i32) -> (i32, i32) {
    %c0_i32 = arith.constant 0 : i32
    %c0_i32_0 = arith.constant 0 : i32
    %c0_i32_1 = arith.constant 0 : i32
    return %c0_i32, %c0_i32_0 : i32, i32
  }
  func.func @transform_4(%arg0: i32) -> (i32, i32, i32) {
    %c0_i32 = arith.constant 0 : i32
    %c0_i32_0 = arith.constant 0 : i32
    %c0_i32_1 = arith.constant 0 : i32
    %c0_i32_2 = arith.constant 0 : i32
    return %c0_i32, %c0_i32_0, %c0_i32_1 : i32, i32, i32
  }
  func.func @transform_5(%arg0: i32) -> (i32, i32, i32) {
    %c0_i32 = arith.constant 0 : i32
    %c0_i32_0 = arith.constant 0 : i32
    %c0_i32_1 = arith.constant 0 : i32
    %c0_i32_2 = arith.constant 0 : i32
    return %c0_i32, %c0_i32_0, %c0_i32_1 : i32, i32, i32
  }
  func.func @transform_6(%arg0: i32) -> (i32, i32) {
    %c0_i32 = arith.constant 0 : i32
    %c0_i32_0 = arith.constant 0 : i32
    %c0_i32_1 = arith.constant 0 : i32
    return %c0_i32, %c0_i32_0 : i32, i32
  }
  func.func @transform_7(%arg0: i32) -> (i32, i32) {
    %c0_i32 = arith.constant 0 : i32
    %c0_i32_0 = arith.constant 0 : i32
    %c0_i32_1 = arith.constant 0 : i32
    return %c0_i32, %c0_i32_0 : i32, i32
  }
  func.func @transform_8(%arg0: i32) -> (i32, i32) {
    %c0_i32 = arith.constant 0 : i32
    %c0_i32_0 = arith.constant 0 : i32
    %c0_i32_1 = arith.constant 0 : i32
    return %c0_i32, %c0_i32_0 : i32, i32
  }
  func.func @transform_9(%arg0: i32) -> (i32, i32, i32) {
    %c0_i32 = arith.constant 0 : i32
    %c0_i32_0 = arith.constant 0 : i32
    %c0_i32_1 = arith.constant 0 : i32
    return %arg0, %c0_i32, %c0_i32_0 : i32, i32, i32
  }
}

</mosaic_0001>

<bundles_post_ra>
// kernel: tpu_custom_call.1
= control target key start
LH: loop header
LB: loop body
LE: loop exit
PB: predicated region body
PF: predicated region fallthrough
CT: control target
= control target key end

     0   :  { %14 = vsyncpa [#allocation3], 0  ;;  %s14097_s0 = inlined_call_operand.vmem [shape: f32[2,64,16], index: 0, kind: input, shape index: {}]   ;;  %s14098_s1 = inlined_call_operand.hbm [shape: f32[2,8,64], index: 1, kind: input, shape index: {}]   ;;  %s14099_s2 = inlined_call_operand.hbm [shape: f32[14,256], index: 2, kind: input, shape index: {}]   ;;  %s14100_s3 = inlined_call_operand.vmem [shape: bf16[16,64], index: 3, kind: input, shape index: {}]   ;;  %s14101_s4 = inlined_call_operand.vmem [shape: bf16[6,64,64], index: 4, kind: input, shape index: {}]   ;;  %s14102_s5 = inlined_call_operand.vmem [shape: bf16[2,64,64], index: 5, kind: input, shape index: {}]   ;;  %s14103_s6 = inlined_call_operand.vmem [shape: bf16[64,256], index: 6, kind: input, shape index: {}]   ;;  %s14104_s7 = inlined_call_operand.vmem [shape: bf16[256,64], index: 7, kind: input, shape index: {}]   ;;  %s14105_s8 = inlined_call_operand.vmem [shape: bf16[64,16], index: 8, kind: input, shape index: {}]   ;;  %s14106_s9 = inlined_call_operand.vmem [shape: f32[2,64,16], index: 9, kind: output, shape index: {}]  }
   0x1   :  { %16 = vsyncpa [#allocation3 + $0x1], 0 }
   0x2   :  { %17 = vsyncpa [#allocation5], 0  ;;  %s10558_s30 = smov 0   ;;  %s10560_s10 = smov 0  }
   0x3   :  { %s10562_s11 = smov 0   ;;  %s10564_s12 = smov 0  }
   0x4 LB: > { %s10577_s13 = sadd.s32 4294967295, %s10479_s12   ;;  %p69_p0 = scmp.ne.s32.totalorder %s10471_s10, %s10467_s30  ;;  %s10479_s12 = sphi %s10564_s12, %s14454_s12   ;;  %s10475_s11 = sphi %s10562_s11, %s14457_s11   ;;  %s10471_s10 = sphi %s10560_s10, %s14456_s10   ;;  %s10467_s30 = sphi %s10558_s30, %s14455_s30  }
   0x5   : > { %p14107_p1 = scmp.eq.s32.totalorder %s10577_s13, 0  ;;  %p8148_p2 = scmp.ge.s32.totalorder %s10479_s12, 1 }
   0x6   : > { %p253_p3 = scmp.lt.s32.totalorder %s10479_s12, 3  ;;  %s10481_s16 = smov [#allocation4]  }
   0x7   : > { %p10585_p4 = por %p14107_p1, %p69_p0  ;;  %s265_s17 = sshll.u32 %s10481_s16, 4  ;;  %s266_s17 = int_to_ptr.vmem [resolvable:$true] %s265_s17 }
   0x8   : > { %p10589_p5 = pnand %p8148_p2, %p253_p3  ;;  %s10602_s19 = sadd.s32 1, %s10479_s12  }
   0x9   : > { %s14222_s14 = scalar_select %p10585_p4, 1, 0 }
   0xa   : > { %s14223_s15 = scalar_select %p10589_p5, 1, 0 }
   0xb   : > { %p9374_p6 = pneg %p10589_p5  ;;  %14225 = sst [smem:[#allocation8_spill]] %s10602_s19 }
   0xc   : > { %s56_s20 = sadd.s32 1, %s10475_s11  ;;  %s53_s21 = ssub.s32 %s10479_s12, %s10602_s19 }
   0xd   : > { %p10597_p7 = pnand %p9374_p6, %p14107_p1  ;;  %s10383_s24 = scalar_lea.hbm %s14099_s2, 512 }
   0xe   : > { %p10384_p8 = scmp.ne.s32.totalorder %s14099_s2, %s10383_s24  ;;  %p10390_p12 = scmp.lt.u32.totalorder %s10383_s24, %s14099_s2 }
   0xf   : > { %p10385_p9 = pneg %p10597_p7 }
  0x11   : > { %p10386_p10 = pnand %p10385_p9, %p10384_p8 }
  0x13   : > { %p10387_p11 = pneg %p10386_p10 }
  0x15   : > { %p10392_p13 = pnand %p10390_p12, %p10387_p11 }
  0x17   : > { %10395 = shalt.err (!%p10392_p13)
}
  0x18   : > { %s10396_s29 = scalar_lea.vmem %s266_s17, 512  ;;  %p10404_p6 = scmp.lt.s32.totalorder %s266_s17, %s266_s17 }
  0x19   : > { %p10397_p0 = scmp.ne.s32.totalorder %s266_s17, %s10396_s29  ;;  %p10405_p1 = scmp.lt.s32.totalorder %s10396_s29, %s10396_s29 }
  0x1b   : > { %p10399_p2 = pnand %p10397_p0, %p10385_p9  ;;  %p10406_p4 = por %p10405_p1, %p10404_p6 }
  0x1d   : > { %p10400_p3 = pneg %p10399_p2 }
  0x1f   : > { %p10407_p5 = pnand %p10406_p4, %p10400_p3 }
  0x21   : > { %10410 = shalt.err (!%p10407_p5)
}
  0x22   : > { %s10482_s30 = smov 256   ;;  %s10483_s16 = smov 16  }
  0x23   : > { %9377 = dma.hbm_to_vmem [thread:$0]  (!%p10597_p7), %s14099_s2, 512, %s266_s17, [#allocation5], %s10482_s30, %s10482_s30, %s10483_s16  }
  0x24   : > { %p54_p8 = scmp.eq.s32.totalorder %s53_s21, 0  ;;  %p63_p9 = scmp.ne.s32.totalorder %s10475_s11, %s10471_s10 }
  0x25   : > { %p64_p1 = scmp.eq.s32.totalorder %s10479_s12, 0  ;;  %p9383_p4 = scmp.lt.s32.totalorder %s10479_s12, 2 }
  0x26   : > { %s10628_s24 = scalar_select %p54_p8, %s10475_s11, %s56_s20  }
  0x27   : > { %p65_p5 = por %p64_p1, %p63_p9  ;;  %s305_s25 = sand.u32 1, %s10475_s11  }
  0x28   : > { %s8151_s26 = sshll.u32 %s305_s25, 3  ;;  %s8152_s27 = sshll.u32 %s10479_s12, 7 }
  0x29   : > { %s10635_s19 = scalar_lea.hbm %s14098_s1, %s8152_s27  ;;  %s309_s17 = scalar_lea.vmem [#allocation2], %s8151_s26 }
  0x2a   : > { %s316_s18 = sshll.u32 %s309_s17, 4  ;;  %p10639_p7 = pnand %p9383_p4, %p65_p5  ;;  %s10637_s18 = int_to_ptr.vmem [resolvable:$true] %s316_s18 }
  0x2b   : > { %s306_s12 = scalar_lea.sflag [#allocation3], %s305_s25  ;;  %s10411_s21 = scalar_lea.hbm %s10635_s19, 128 }
  0x2c   : > { %p10412_p10 = scmp.ne.s32.totalorder %s10635_s19, %s10411_s21  ;;  %p10413_p11 = pneg %p10639_p7 }
  0x2d   : > { %s10416_s22 = scalar_lea.hbm %s14098_s1, 256  ;;  %p10417_p0 = scmp.lt.u32.totalorder %s10635_s19, %s14098_s1 }
  0x2e   : > { %p10414_p12 = pnand %p10413_p11, %p10412_p10  ;;  %p10418_p2 = scmp.lt.u32.totalorder %s10416_s22, %s10411_s21 }
  0x2f   : > { %p10420_p6 = scmp.lt.u32.totalorder %s10411_s21, %s10635_s19 }
  0x30   : > { %p10415_p13 = pneg %p10414_p12  ;;  %p10419_p3 = por %p10418_p2, %p10417_p0 }
  0x32   : > { %p10421_p8 = por %p10420_p6, %p10419_p3 }
  0x34   : > { %p10422_p9 = pnand %p10421_p8, %p10415_p13 }
  0x36   : > { %10425 = shalt.err (!%p10422_p9)
}
  0x37   : > { %s10426_s25 = scalar_lea.vmem %s10637_s18, 128  ;;  %s10484_s27 = smov [#allocation2]  }
  0x38   : > { %p10427_p1 = scmp.ne.s32.totalorder %s10637_s18, %s10426_s25  ;;  %s10431_s28 = sshll.u32 %s10484_s27, 4  ;;  %s10432_s28 = int_to_ptr.vmem [resolvable:$false] %s10431_s28 }
  0x39   : > { %s10433_s29 = scalar_lea.vmem %s10432_s28, 256  ;;  %p10434_p10 = scmp.lt.s32.totalorder %s10637_s18, %s10432_s28 }
  0x3a   : > { %p10429_p4 = pnand %p10427_p1, %p10413_p11  ;;  %p10435_p12 = scmp.lt.s32.totalorder %s10433_s29, %s10426_s25 }
  0x3c   : > { %p10430_p5 = pneg %p10429_p4  ;;  %p10436_p0 = por %p10435_p12, %p10434_p10 }
  0x3e   : > { %p10437_p2 = pnand %p10436_p0, %p10430_p5 }
  0x40   : > { %10440 = shalt.err (!%p10437_p2)
}
  0x41   : > { %9381 = dma.hbm_to_vmem [thread:$0]  (!%p10639_p7), %s10635_s19, 128, %s10637_s18, %s306_s12  }
  0x42   : > { %p14227_p13 = scmp.ne.s32.totalorder %s14223_s15, 0 }
  0x44   : > { %325 = sbr.rel (%p14227_p13) target bundleno = 9730 (0x2602), region = 56 }
  0x4b   : > { %s327_s17 = sand.u32 1, %s10471_s10   ;;  %p14228_p11 = scmp.ne.s32.totalorder %s14222_s14, 0 }
  0x4c   : > { %s10671_s21 = sshll.u32 %s327_s17, 3  ;;  %s328_s30 = scalar_lea.sflag [#allocation3], %s327_s17 }
  0x4d   : > { %s331_s16 = scalar_lea.vmem [#allocation2], %s10671_s21 }
  0x4e   : > { %10458 = dma.done.wait (%p14228_p11), %s328_s30, 128  }
  0x4f   : > { %10460 = vsyncadd (%p14228_p11), %s328_s30, 4294967168  ;;  %p14229_p3 = scmp.eq.s32.totalorder %s10577_s13, 0 }
  0x51   : > { %10462 = dma.done.wait (%p14229_p3), [#allocation5], 512   ;;  %p14230_p7 = pmov %p14229_p3 }
  0x52   : > { %p375_p6 = scmp.lt.s32.totalorder %s10577_s13, 1  ;;  %vm646_vm0 = vcmask 64560   ;;  %vm476_vm1 = vcmask 31760   ;;  %vm731_vm2 = vcmask 80960   ;;  %vm561_vm3 = vcmask 48160   ;;  %s10485_s20 = smov 122  }
  0x53   : > { %10464 = vsyncadd (%p14230_p7), [#allocation5], 4294966784  ;;  %vm901_vm4 = vcmask 113760   ;;  %vm816_vm5 = vcmask 97360   ;;  %vm986_vm6 = vcmask 130160   ;;  %s10486_s12 = smov 126  }
  0x54   : > { %s14459_s13 = smov (!%p375_p6, %s10577_s13), 1  ;;  %s10487_s22 = smov 120   ;;  %vm398_vm7 = vcmask 15360   ;;  %vm1079_vm8 = vcmask 31744   ;;  %vm1088_vm9 = vcmask 48128   ;;  %vm1097_vm10 = vcmask 64512  }
  0x55   : > { %s14165_s15 = sshll.u32 %s14459_s13, 6  ;;  %s10488_s23 = smov 124   ;;  %vm1106_vm11 = vcmask 80896   ;;  %vm1115_vm12 = vcmask 97280   ;;  %vm1124_vm13 = vcmask 113664   ;;  %vm1173_vm14 = vcmask 130048  }
  0x56   : > { %s10692_s14 = scalar_lea.vmem %s14097_s0, %s14165_s15  ;;  %s10489_s26 = smov 116   ;;  %vm1321_vm15 = vcmask 523264  }
  0x57   : > { %v10695_v0 = vld [vmem:[%s10692_s14] sm:$0xff]  ;;  %v10698_v1 = vld [vmem:[%s10692_s14 + $0x8] sm:$0xff]  ;;  %v10701_v2 = vld [vmem:[%s10692_s14 + $0x10] sm:$0xff]  ;;  %s10490_s25 = smov 118   ;;  %s10491_s27 = smov 114  }
  0x58   : > { %v10704_v3 = vld [vmem:[%s10692_s14 + $0x18] sm:$0xff]  ;;  %v10707_v4 = vld [vmem:[%s10692_s14 + $0x20] sm:$0xff]  ;;  %v10710_v5 = vld [vmem:[%s10692_s14 + $0x28] sm:$0xff]  ;;  %v647_v6 = vsel %vm646_vm0, %v10695_v0, 0.0  ;;  %v648_v7 = vsel %vm646_vm0, %v10698_v1, 0.0  ;;  %v650_v8 = vsel %vm646_vm0, %v10701_v2, 0.0 }
  0x59   : > { %v10719_v9 = vld [vmem:[%s10692_s14 + $0x30] sm:$0xff]  ;;  %v10722_v10 = vld [vmem:[%s10692_s14 + $0x38] sm:$0xff]  ;;  %v649_v11 = vadd.f32 %v648_v7, %v647_v6  ;;  %v652_v12 = vsel %vm646_vm0, %v10704_v3, 0.0  ;;  %v654_v13 = vsel %vm646_vm0, %v10707_v4, 0.0  ;;  %v656_v14 = vsel %vm646_vm0, %v10710_v5, 0.0  ;;  %s10492_s17 = smov 112  }
  0x5a   : > { %v658_v15 = vsel %vm646_vm0, %v10719_v9, 0.0  ;;  %v477_v16 = vsel %vm476_vm1, %v10695_v0, 0.0  ;;  %v478_v17 = vsel %vm476_vm1, %v10698_v1, 0.0  ;;  %v660_v19 = vsel %vm646_vm0, %v10722_v10, 0.0  ;;  %s10493_s30 = smov 104   ;;  %s10494_s19 = smov 96  }
  0x5b   : > { %v651_v18 = vadd.f32 %v650_v8, %v649_v11  ;;  %v479_v20 = vadd.f32 %v478_v17, %v477_v16  ;;  %v480_v21 = vsel %vm476_vm1, %v10701_v2, 0.0  ;;  %v482_v22 = vsel %vm476_vm1, %v10704_v3, 0.0  ;;  %s10495_s18 = smov 88   ;;  %s14166_s28 = smov 40  }
  0x5c   : > { %v484_v23 = vsel %vm476_vm1, %v10707_v4, 0.0  ;;  %v486_v24 = vsel %vm476_vm1, %v10710_v5, 0.0  ;;  %v488_v25 = vsel %vm476_vm1, %v10719_v9, 0.0  ;;  %v732_v28 = vsel %vm731_vm2, %v10695_v0, 0.0  ;;  %s10503_s29 = smov 48   ;;  %s14180_s15 = smov 56  }
  0x5d   : > { %v653_v26 = vadd.f32 %v652_v12, %v651_v18  ;;  %v481_v27 = vadd.f32 %v480_v21, %v479_v20  ;;  %v733_v29 = vsel %vm731_vm2, %v10698_v1, 0.0  ;;  %v490_v30 = vsel %vm476_vm1, %v10722_v10, 0.0 }
  0x5e   : > { %v734_v31 = vadd.f32 %v733_v29, %v732_v28  ;;  %v735_v32 = vsel %vm731_vm2, %v10701_v2, 0.0  ;;  %v737_v33 = vsel %vm731_vm2, %v10704_v3, 0.0  ;;  %v739_v36 = vsel %vm731_vm2, %v10707_v4, 0.0 }
  0x5f   : > { %v655_v34 = vadd.f32 %v654_v13, %v653_v26  ;;  %v483_v35 = vadd.f32 %v482_v22, %v481_v27  ;;  %v741_v37 = vsel %vm731_vm2, %v10710_v5, 0.0  ;;  %v743_v39 = vsel %vm731_vm2, %v10719_v9, 0.0 }
  0x60   : > { %v736_v38 = vadd.f32 %v735_v32, %v734_v31  ;;  %v562_v40 = vsel %vm561_vm3, %v10695_v0, 0.0  ;;  %v563_v41 = vsel %vm561_vm3, %v10698_v1, 0.0  ;;  %v565_v45 = vsel %vm561_vm3, %v10701_v2, 0.0 }
  0x61   : > { %v657_v42 = vadd.f32 %v656_v14, %v655_v34  ;;  %v485_v43 = vadd.f32 %v484_v23, %v483_v35  ;;  %v564_v44 = vadd.f32 %v563_v41, %v562_v40  ;;  %v745_v47 = vsel %vm731_vm2, %v10722_v10, 0.0 }
  0x62   : > { %v738_v46 = vadd.f32 %v737_v33, %v736_v38  ;;  %v567_v48 = vsel %vm561_vm3, %v10704_v3, 0.0  ;;  %v569_v49 = vsel %vm561_vm3, %v10707_v4, 0.0  ;;  %v571_v53 = vsel %vm561_vm3, %v10710_v5, 0.0 }
  0x63   : > { %v659_v50 = vadd.f32 %v658_v15, %v657_v42  ;;  %v487_v51 = vadd.f32 %v486_v24, %v485_v43  ;;  %v566_v52 = vadd.f32 %v565_v45, %v564_v44  ;;  %v573_v55 = vsel %vm561_vm3, %v10719_v9, 0.0 }
  0x64   : > { %v740_v54 = vadd.f32 %v739_v36, %v738_v46  ;;  %v902_v56 = vsel %vm901_vm4, %v10695_v0, 0.0  ;;  %v903_v57 = vsel %vm901_vm4, %v10698_v1, 0.0  ;;  %v575_v63 = vsel %vm561_vm3, %v10722_v10, 0.0 }
  0x65   : > { %v661_v58 = vadd.f32 %v660_v19, %v659_v50  ;;  %v489_v59 = vadd.f32 %v488_v25, %v487_v51  ;;  %v568_v60 = vadd.f32 %v567_v48, %v566_v52  ;;  %v904_v61 = vadd.f32 %v903_v57, %v902_v56 }
  0x66   : > { %v742_v62 = vadd.f32 %v741_v37, %v740_v54  ;;  %v905_v6 = vsel %vm901_vm4, %v10701_v2, 0.0  ;;  %v907_v7 = vsel %vm901_vm4, %v10704_v3, 0.0  ;;  %v909_v15 = vsel %vm901_vm4, %v10707_v4, 0.0 }
  0x67   : > { %v662_v8 = vrot.slane %v661_v58, 4  ;;  %v491_v11 = vadd.f32 %v490_v30, %v489_v59  ;;  %v570_v12 = vadd.f32 %v569_v49, %v568_v60  ;;  %v906_v13 = vadd.f32 %v905_v6, %v904_v61 }
  0x68   : > { %v744_v14 = vadd.f32 %v743_v39, %v742_v62  ;;  %v911_v16 = vsel %vm901_vm4, %v10710_v5, 0.0  ;;  %v913_v17 = vsel %vm901_vm4, %v10719_v9, 0.0  ;;  %v817_v23 = vsel %vm816_vm5, %v10695_v0, 0.0 }
  0x69   : > { %v663_v18 = vadd.f32 %v662_v8, %v661_v58  ;;  %v492_v19 = vrot.slane %v491_v11, 4  ;;  %v572_v20 = vadd.f32 %v571_v53, %v570_v12  ;;  %v908_v21 = vadd.f32 %v907_v7, %v906_v13 }
  0x6a   : > { %v746_v22 = vadd.f32 %v745_v47, %v744_v14  ;;  %v818_v24 = vsel %vm816_vm5, %v10698_v1, 0.0  ;;  %v820_v25 = vsel %vm816_vm5, %v10701_v2, 0.0  ;;  %v915_v31 = vsel %vm901_vm4, %v10722_v10, 0.0 }
  0x6b   : > { %v664_v26 = vrot.slane %v663_v18, 2  ;;  %v493_v27 = vadd.f32 %v492_v19, %v491_v11  ;;  %v574_v28 = vadd.f32 %v573_v55, %v572_v20  ;;  %v910_v29 = vadd.f32 %v909_v15, %v908_v21 }
  0x6c   : > { %v747_v30 = vrot.slane %v746_v22, 4  ;;  %v819_v32 = vadd.f32 %v818_v24, %v817_v23  ;;  %v822_v33 = vsel %vm816_vm5, %v10704_v3, 0.0  ;;  %v824_v40 = vsel %vm816_vm5, %v10707_v4, 0.0 }
  0x6d   : > { %v665_v34 = vadd.f32 %v664_v26, %v663_v18  ;;  %v494_v35 = vrot.slane %v493_v27, 2  ;;  %v576_v36 = vadd.f32 %v575_v63, %v574_v28  ;;  %v912_v37 = vadd.f32 %v911_v16, %v910_v29 }
  0x6e   : > { %v748_v38 = vadd.f32 %v747_v30, %v746_v22  ;;  %v821_v39 = vadd.f32 %v820_v25, %v819_v32  ;;  %v826_v41 = vsel %vm816_vm5, %v10710_v5, 0.0  ;;  %v828_v48 = vsel %vm816_vm5, %v10719_v9, 0.0 }
  0x6f   : > { %v666_v42 = vrot.slane %v665_v34, 1  ;;  %v495_v43 = vadd.f32 %v494_v35, %v493_v27  ;;  %v577_v44 = vrot.slane %v576_v36, 4  ;;  %v914_v45 = vadd.f32 %v913_v17, %v912_v37 }
  0x70   : > { %v749_v46 = vrot.slane %v748_v38, 2  ;;  %v823_v47 = vadd.f32 %v822_v33, %v821_v39  ;;  %v987_v49 = vsel %vm986_vm6, %v10695_v0, 0.0  ;;  %v988_v56 = vsel %vm986_vm6, %v10698_v1, 0.0 }
  0x71   : > { %v667_v50 = vadd.f32 %v666_v42, %v665_v34  ;;  %v496_v51 = vrot.slane %v495_v43, 1  ;;  %v578_v52 = vadd.f32 %v577_v44, %v576_v36  ;;  %v916_v53 = vadd.f32 %v915_v31, %v914_v45 }
  0x72   : > { %v750_v54 = vadd.f32 %v749_v46, %v748_v38  ;;  %v825_v55 = vadd.f32 %v824_v40, %v823_v47  ;;  %v990_v57 = vsel %vm986_vm6, %v10701_v2, 0.0  ;;  %v989_v61 = vadd.f32 %v988_v56, %v987_v49 }
  0x73   : > { %669 = vrot.lane.b32.xlu1 %v667_v50, %s10485_s20  ;;  %v497_v58 = vadd.f32 %v496_v51, %v495_v43  ;;  %v579_v59 = vrot.slane %v578_v52, 2  ;;  %v917_v60 = vrot.slane %v916_v53, 4  ;;  %v992_v6 = vsel %vm986_vm6, %v10704_v3, 0.0 }
  0x74   : > { %v751_v62 = vrot.slane %v750_v54, 1  ;;  %v827_v63 = vadd.f32 %v826_v41, %v825_v55  ;;  %v830_v11 = vsel %vm816_vm5, %v10722_v10, 0.0  ;;  %v991_v12 = vadd.f32 %v990_v57, %v989_v61 }
  0x75   : > { %499 = vrot.lane.b32.xlu0 %v497_v58, %s10486_s12  ;;  %v580_v7 = vadd.f32 %v579_v59, %v578_v52  ;;  %v918_v8 = vadd.f32 %v917_v60, %v916_v53  ;;  %v994_v15 = vsel %vm986_vm6, %v10707_v4, 0.0  ;;  %v996_v19 = vsel %vm986_vm6, %v10710_v5, 0.0 }
  0x76   : > { %v752_v13 = vadd.f32 %v751_v62, %v750_v54  ;;  %v829_v14 = vadd.f32 %v828_v48, %v827_v63  ;;  %v993_v18 = vadd.f32 %v992_v6, %v991_v12  ;;  %v998_v25 = vsel %vm986_vm6, %v10719_v9, 0.0 }
  0x77   : > { %v581_v16 = vrot.slane %v580_v7, 1  ;;  %v919_v17 = vrot.slane %v918_v8, 2  ;;  %v1000_v28 = vsel %vm986_vm6, %v10722_v10, 0.0  ;;  %v399_v43 = vsel %vm398_vm7, %v10695_v0, 0.0 }
  0x78   : > { %754 = vrot.lane.b32.xlu1 %v752_v13, %s10487_s22  ;;  %v831_v20 = vadd.f32 %v830_v11, %v829_v14  ;;  %v995_v23 = vadd.f32 %v994_v15, %v993_v18  ;;  %v400_v44 = vsel %vm398_vm7, %v10698_v1, 0.0  ;;  %v402_v46 = vsel %vm398_vm7, %v10701_v2, 0.0 }
  0x79   : > { %v582_v21 = vadd.f32 %v581_v16, %v580_v7  ;;  %v920_v22 = vadd.f32 %v919_v17, %v918_v8  ;;  %v401_v45 = vadd.f32 %v400_v44, %v399_v43  ;;  %v404_v48 = vsel %vm398_vm7, %v10704_v3, 0.0 }
  0x7a   : > { %v832_v24 = vrot.slane %v831_v20, 4  ;;  %v997_v27 = vadd.f32 %v996_v19, %v995_v23  ;;  %v406_v50 = vsel %vm398_vm7, %v10707_v4, 0.0  ;;  %v408_v52 = vsel %vm398_vm7, %v10710_v5, 0.0 }
  0x7b   : > { %584 = vrot.lane.b32.xlu0 %v582_v21, %s10488_s23  ;;  %v921_v26 = vrot.slane %v920_v22, 1  ;;  %v403_v47 = vadd.f32 %v402_v46, %v401_v45  ;;  %v410_v54 = vsel %vm398_vm7, %v10719_v9, 0.0  ;;  %v412_v56 = vsel %vm398_vm7, %v10722_v10, 0.0 }
  0x7c   : > { %v833_v29 = vadd.f32 %v832_v24, %v831_v20  ;;  %v999_v31 = vadd.f32 %v998_v25, %v997_v27 }
  0x7d   : > { %v922_v30 = vadd.f32 %v921_v26, %v920_v22  ;;  %v405_v49 = vadd.f32 %v404_v48, %v403_v47 }
  0x7e   : > { %v834_v32 = vrot.slane %v833_v29, 2  ;;  %v1001_v33 = vadd.f32 %v1000_v28, %v999_v31 }
  0x7f   : > { %924 = vrot.lane.b32.xlu1 %v922_v30, %s10489_s26  ;;  %v407_v51 = vadd.f32 %v406_v50, %v405_v49 }
  0x80   : > { %v835_v34 = vadd.f32 %v834_v32, %v833_v29  ;;  %v1002_v35 = vrot.slane %v1001_v33, 4 }
  0x81   : > { %v409_v53 = vadd.f32 %v408_v52, %v407_v51 }
  0x82   : > { %v836_v36 = vrot.slane %v835_v34, 1  ;;  %v1003_v37 = vadd.f32 %v1002_v35, %v1001_v33 }
  0x83   : > { %v411_v55 = vadd.f32 %v410_v54, %v409_v53 }
  0x84   : > { %v837_v38 = vadd.f32 %v836_v36, %v835_v34  ;;  %v1004_v39 = vrot.slane %v1003_v37, 2 }
  0x85   : > { %v413_v57 = vadd.f32 %v412_v56, %v411_v55 }
  0x86   : > { %839 = vrot.lane.b32.xlu0 %v837_v38, %s10490_s25  ;;  %v1005_v40 = vadd.f32 %v1004_v39, %v1003_v37 }
  0x87   : > { %v414_v58 = vrot.slane %v413_v57, 4 }
  0x88   : > { %v1006_v41 = vrot.slane %v1005_v40, 1 }
  0x89   : > { %v415_v59 = vadd.f32 %v414_v58, %v413_v57 }
  0x8a   : > { %v1007_v42 = vadd.f32 %v1006_v41, %v1005_v40 }
  0x8b   : > { %v416_v60 = vrot.slane %v415_v59, 2 }
  0x8c   : > { %1009 = vrot.lane.b32.xlu0 %v1007_v42, %s10491_s27 }
  0x8d   : > { %v417_v6 = vadd.f32 %v416_v60, %v415_v59 }
  0x8f   : > { %v418_v11 = vrot.slane %v417_v6, 1 }
  0x91   : > { %v419_v15 = vadd.f32 %v418_v11, %v417_v6 }
  0x93   : > { %v420_v18 = vsel %vm398_vm7, %v419_v15, 0.0 }
  0xe5   : > { %v670_v61 = vpop.permute.xlu1 %669 }
  0xe6   : > { %v672_v14 = vsel %vm398_vm7, %v670_v61, 0.0 }
  0xe7   : > { %v500_v62 = vpop.permute.xlu0 %499 }
  0xe8   : > { %v502_v63 = vsel %vm398_vm7, %v500_v62, 0.0 }
  0xe9   : > { %503 = vadd.xlane.f32.xlu1 %v502_v63 }
  0xea   : > { %v755_v7 = vpop.permute.xlu1 %754 }
  0xeb   : > { %v757_v8 = vsel %vm398_vm7, %v755_v7, 0.0 }
  0xed   : > { %v585_v12 = vpop.permute.xlu0 %584  ;;  %758 = vadd.xlane.f32.xlu1 %v757_v8 }
  0xee   : > { %v587_v13 = vsel %vm398_vm7, %v585_v12, 0.0 }
  0xef   : > { %588 = vadd.xlane.f32.xlu0 %v587_v13 }
  0xf1   : > { %v925_v16 = vpop.permute.xlu1 %924 }
  0xf2   : > { %v927_v17 = vsel %vm398_vm7, %v925_v16, 0.0 }
  0xf3   : > { %928 = vadd.xlane.f32.xlu1 %v927_v17  ;;  %673 = vadd.xlane.f32.xlu0 %v672_v14 }
  0xf7   : > { %421 = vadd.xlane.f32.xlu1 %v420_v18 }
  0xf8   : > { %v840_v19 = vpop.permute.xlu0 %839 }
  0xf9   : > { %v842_v20 = vsel %vm398_vm7, %v840_v19, 0.0 }
  0xfa   : > { %843 = vadd.xlane.f32.xlu0 %v842_v20 }
  0xfe   : > { %v1010_v21 = vpop.permute.xlu0 %1009 }
  0xff   : > { %v1012_v22 = vsel %vm398_vm7, %v1010_v21, 0.0 }
 0x100   : > { %1013 = vadd.xlane.f32.xlu0 %v1012_v22 }
 0x176   : > { %v504_v23 = vpop.xlane.xlu1 %503 }
 0x177   : > { %v505_v24 = vmul.f32 0.0078125, %v504_v23 }
 0x179   : > { %v10862_v25 = vsub.f32 %v10695_v0, %v505_v24  ;;  %v10865_v26 = vsub.f32 %v10698_v1, %v505_v24  ;;  %v10868_v27 = vsub.f32 %v10701_v2, %v505_v24  ;;  %v10871_v28 = vsub.f32 %v10704_v3, %v505_v24 }
 0x17a   : > { %v759_v29 = vpop.xlane.xlu1 %758  ;;  %v10874_v30 = vsub.f32 %v10707_v4, %v505_v24  ;;  %v10877_v31 = vsub.f32 %v10710_v5, %v505_v24  ;;  %v10880_v32 = vsub.f32 %v10719_v9, %v505_v24  ;;  %v10889_v38 = vsub.f32 %v10722_v10, %v505_v24 }
 0x17b   : > { %v760_v33 = vmul.f32 0.0078125, %v759_v29  ;;  %v514_v34 = vmul.f32 %v10862_v25, %v10862_v25  ;;  %v515_v35 = vmul.f32 %v10865_v26, %v10865_v26  ;;  %v516_v36 = vmul.f32 %v10868_v27, %v10868_v27 }
 0x17c   : > { %v589_v37 = vpop.xlane.xlu0 %588  ;;  %v517_v39 = vmul.f32 %v10871_v28, %v10871_v28  ;;  %v518_v42 = vmul.f32 %v10874_v30, %v10874_v30  ;;  %v519_v43 = vmul.f32 %v10877_v31, %v10877_v31  ;;  %v520_v46 = vmul.f32 %v10880_v32, %v10880_v32 }
 0x17d   : > { %v522_v40 = vsel %vm476_vm1, %v514_v34, 0.0  ;;  %v523_v41 = vsel %vm476_vm1, %v515_v35, 0.0  ;;  %v590_v45 = vmul.f32 0.0078125, %v589_v37  ;;  %v525_v47 = vsel %vm476_vm1, %v516_v36, 0.0 }
 0x17e   : > { %v524_v44 = vadd.f32 %v523_v41, %v522_v40  ;;  %v10903_v48 = vsub.f32 %v10695_v0, %v760_v33  ;;  %v10906_v50 = vsub.f32 %v10698_v1, %v760_v33  ;;  %v10909_v51 = vsub.f32 %v10701_v2, %v760_v33 }
 0x17f   : > { %v10912_v52 = vsub.f32 %v10704_v3, %v760_v33  ;;  %v521_v53 = vmul.f32 %v10889_v38, %v10889_v38  ;;  %v527_v54 = vsel %vm476_vm1, %v517_v39, 0.0  ;;  %v10918_v55 = vsub.f32 %v10707_v4, %v760_v33 }
 0x180   : > { %v526_v49 = vadd.f32 %v525_v47, %v524_v44  ;;  %v10921_v56 = vsub.f32 %v10710_v5, %v760_v33  ;;  %v529_v58 = vsel %vm476_vm1, %v518_v42, 0.0  ;;  %v531_v59 = vsel %vm476_vm1, %v519_v43, 0.0  ;;  %v929_v61 = vpop.xlane.xlu1 %928  ;;  %v674_v8 = vpop.xlane.xlu0 %673 }
 0x181   : > { %v769_v60 = vmul.f32 %v10903_v48, %v10903_v48  ;;  %v533_v62 = vsel %vm476_vm1, %v520_v46, 0.0  ;;  %v770_v63 = vmul.f32 %v10906_v50, %v10906_v50  ;;  %v771_v6 = vmul.f32 %v10909_v51, %v10909_v51 }
 0x182   : > { %v528_v57 = vadd.f32 %v527_v54, %v526_v49  ;;  %v772_v7 = vmul.f32 %v10912_v52, %v10912_v52  ;;  %v10935_v12 = vsub.f32 %v10719_v9, %v760_v33  ;;  %v10938_v13 = vsub.f32 %v10722_v10, %v760_v33 }
 0x183   : > { %v773_v14 = vmul.f32 %v10918_v55, %v10918_v55  ;;  %v774_v15 = vmul.f32 %v10921_v56, %v10921_v56  ;;  %v777_v16 = vsel %vm731_vm2, %v769_v60, 0.0  ;;  %v778_v17 = vsel %vm731_vm2, %v770_v63, 0.0 }
 0x184   : > { %v530_v11 = vadd.f32 %v529_v58, %v528_v57  ;;  %v780_v18 = vsel %vm731_vm2, %v771_v6, 0.0  ;;  %v10947_v19 = vmul.f32 0.0078125, %v929_v61  ;;  %v535_v21 = vsel %vm476_vm1, %v521_v53, 0.0 }
 0x185   : > { %v779_v22 = vadd.f32 %v778_v17, %v777_v16  ;;  %v10950_v23 = vmul.f32 0.0078125, %v674_v8  ;;  %v782_v24 = vsel %vm731_vm2, %v772_v7, 0.0  ;;  %v10954_v29 = vsub.f32 %v10695_v0, %v590_v45 }
 0x186   : > { %v532_v20 = vadd.f32 %v531_v59, %v530_v11  ;;  %v10957_v33 = vsub.f32 %v10698_v1, %v590_v45  ;;  %v775_v35 = vmul.f32 %v10935_v12, %v10935_v12  ;;  %v10962_v37 = vsub.f32 %v10701_v2, %v590_v45 }
 0x187   : > { %v781_v36 = vadd.f32 %v780_v18, %v779_v22  ;;  %v776_v39 = vmul.f32 %v10938_v13, %v10938_v13  ;;  %v784_v40 = vsel %vm731_vm2, %v773_v14, 0.0  ;;  %v786_v41 = vsel %vm731_vm2, %v774_v15, 0.0  ;;  %v844_v49 = vpop.xlane.xlu0 %843 }
 0x188   : > { %v534_v34 = vadd.f32 %v533_v62, %v532_v20  ;;  %v10969_v42 = vsub.f32 %v10704_v3, %v590_v45  ;;  %v10972_v46 = vsub.f32 %v10707_v4, %v590_v45  ;;  %v599_v47 = vmul.f32 %v10954_v29, %v10954_v29 }
 0x189   : > { %v783_v44 = vadd.f32 %v782_v24, %v781_v36  ;;  %v10977_v53 = vsub.f32 %v10710_v5, %v590_v45  ;;  %v10980_v54 = vsub.f32 %v10719_v9, %v590_v45  ;;  %v600_v57 = vmul.f32 %v10957_v33, %v10957_v33 }
 0x18a   : > { %v536_v43 = vadd.f32 %v535_v21, %v534_v34  ;;  %v601_v58 = vmul.f32 %v10962_v37, %v10962_v37  ;;  %v788_v61 = vsel %vm731_vm2, %v775_v35, 0.0  ;;  %v10988_v62 = vsub.f32 %v10722_v10, %v590_v45 }
 0x18b   : > { %v785_v60 = vadd.f32 %v784_v40, %v783_v44  ;;  %v790_v63 = vsel %vm731_vm2, %v776_v39, 0.0  ;;  %v602_v6 = vmul.f32 %v10969_v42, %v10969_v42  ;;  %v607_v7 = vsel %vm561_vm3, %v599_v47, 0.0 }
 0x18c   : > { %v537_v59 = vrot.slane %v536_v43, 4  ;;  %v608_v8 = vsel %vm561_vm3, %v600_v57, 0.0  ;;  %v10995_v11 = vmul.f32 0.0078125, %v844_v49  ;;  %v603_v17 = vmul.f32 %v10972_v46, %v10972_v46 }
 0x18d   : > { %v787_v15 = vadd.f32 %v786_v41, %v785_v60  ;;  %v609_v16 = vadd.f32 %v608_v8, %v607_v7  ;;  %v604_v45 = vmul.f32 %v10977_v53, %v10977_v53  ;;  %v605_v18 = vmul.f32 %v10980_v54, %v10980_v54 }
 0x18e   : > { %v538_v14 = vadd.f32 %v537_v59, %v536_v43  ;;  %v610_v20 = vsel %vm561_vm3, %v601_v58, 0.0  ;;  %v606_v24 = vmul.f32 %v10988_v62, %v10988_v62  ;;  %v612_v35 = vsel %vm561_vm3, %v602_v6, 0.0 }
 0x18f   : > { %v789_v22 = vadd.f32 %v788_v61, %v787_v15  ;;  %v611_v34 = vadd.f32 %v610_v20, %v609_v16  ;;  %v11009_v36 = vsub.f32 %v10695_v0, %v10947_v19  ;;  %v11013_v39 = vsub.f32 %v10698_v1, %v10947_v19  ;;  %v1014_v16 = vpop.xlane.xlu0 %1013 }
 0x190   : > { %v539_v21 = vrot.slane %v538_v14, 2  ;;  %v11017_v40 = vsub.f32 %v10701_v2, %v10947_v19  ;;  %v11021_v47 = vsub.f32 %v10704_v3, %v10947_v19  ;;  %v614_v49 = vsel %vm561_vm3, %v603_v17, 0.0 }
 0x191   : > { %14231 = vst [vmem:[#allocation9_spill] sm:$0xff] %v11009_v36  ;;  %14232 = vst [vmem:[#allocation10_spill] sm:$0xff] %v11013_v39  ;;  %v791_v43 = vadd.f32 %v790_v63, %v789_v22  ;;  %v613_v44 = vadd.f32 %v612_v35, %v611_v34  ;;  %v616_v57 = vsel %vm561_vm3, %v604_v45, 0.0  ;;  %v618_v58 = vsel %vm561_vm3, %v605_v18, 0.0 }
 0x192   : > { %14233 = vst [vmem:[#allocation11_spill] sm:$0xff] %v11017_v40  ;;  %v540_v41 = vadd.f32 %v539_v21, %v538_v14  ;;  %14234 = vst [vmem:[#allocation12_spill] sm:$0xff] %v11021_v47  ;;  %v11028_v59 = vsub.f32 %v10707_v4, %v10947_v19  ;;  %v939_v63 = vmul.f32 %v11009_v36, %v11009_v36  ;;  %vm4331_vm1 = vcmask 261120  }
 0x193   : > { %v792_v61 = vrot.slane %v791_v43, 4  ;;  %v615_v6 = vadd.f32 %v614_v49, %v613_v44  ;;  %v11034_v7 = vsub.f32 %v10710_v5, %v10947_v19  ;;  %v940_v8 = vmul.f32 %v11013_v39, %v11013_v39  ;;  %v11182_v39 = vld [vmem:[%s10692_s14 + $0x38] sm:$0xff] }
 0x194   : > { %14235 = vst [vmem:[#allocation13_spill] sm:$0xff] %v11028_v59  ;;  %v541_v60 = vrot.slane %v540_v41, 1  ;;  %v941_v14 = vmul.f32 %v11017_v40, %v11017_v40  ;;  %v942_v15 = vmul.f32 %v11021_v47, %v11021_v47  ;;  %v11044_v20 = vsub.f32 %v10719_v9, %v10947_v19 }
 0x195   : > { %14236 = vst [vmem:[#allocation14_spill] sm:$0xff] %v11034_v7  ;;  %v793_v45 = vadd.f32 %v792_v61, %v791_v43  ;;  %v617_v18 = vadd.f32 %v616_v57, %v615_v6  ;;  %v11048_v21 = vsub.f32 %v10722_v10, %v10947_v19  ;;  %v943_v22 = vmul.f32 %v11028_v59, %v11028_v59 }
 0x196   : > { %v542_v17 = vadd.f32 %v541_v60, %v540_v41  ;;  %14237 = vst [vmem:[#allocation15_spill] sm:$0xff] %v11044_v20  ;;  %v947_v34 = vsel %vm901_vm4, %v939_v63, 0.0  ;;  %v948_v35 = vsel %vm901_vm4, %v940_v8, 0.0  ;;  %v950_v49 = vsel %vm901_vm4, %v941_v14, 0.0 }
 0x197   : > { %14238 = vst [vmem:[#allocation16_spill] sm:$0xff] %v11048_v21  ;;  %v794_v41 = vrot.slane %v793_v45, 2  ;;  %v619_v43 = vadd.f32 %v618_v58, %v617_v18  ;;  %v949_v44 = vadd.f32 %v948_v35, %v947_v34  ;;  %v11056_v57 = vmul.f32 0.0078125, %v1014_v16  ;;  %v422_v18 = vpop.xlane.xlu1 %421 }
 0x198   : > { %544 = vrot.lane.b32.xlu0 %v542_v17, %s10486_s12  ;;  %v620_v60 = vsel %vm561_vm3, %v606_v24, 0.0  ;;  %v944_v19 = vmul.f32 %v11034_v7, %v11034_v7  ;;  %v952_v61 = vsel %vm901_vm4, %v942_v15, 0.0  ;;  %v945_v8 = vmul.f32 %v11044_v20, %v11044_v20  ;;  %v11171_v7 = vld [vmem:[%s10692_s14 + $0x30] sm:$0xff]  ;;  %s14176_s12 = smov 72  }
 0x199   : > { %v795_v6 = vadd.f32 %v794_v41, %v793_v45  ;;  %v621_v63 = vadd.f32 %v620_v60, %v619_v43  ;;  %v951_v17 = vadd.f32 %v950_v49, %v949_v44  ;;  %v954_v58 = vsel %vm901_vm4, %v943_v22, 0.0 }
 0x19a   : > { %v11067_v14 = vsub.f32 %v10695_v0, %v10950_v23  ;;  %v11071_v24 = vsub.f32 %v10698_v1, %v10950_v23  ;;  %v11075_v16 = vsub.f32 %v10701_v2, %v10950_v23  ;;  %v946_v34 = vmul.f32 %v11048_v21, %v11048_v21  ;;  %v11159_v21 = vld [vmem:[%s10692_s14 + $0x28] sm:$0xff] }
 0x19b   : > { %v796_v15 = vrot.slane %v795_v6, 1  ;;  %v622_v45 = vrot.slane %v621_v63, 4  ;;  %v953_v35 = vadd.f32 %v952_v61, %v951_v17  ;;  %v956_v22 = vsel %vm901_vm4, %v944_v19, 0.0 }
 0x19c   : > { %v11082_v41 = vsub.f32 %v10704_v3, %v10950_v23  ;;  %v11086_v1 = vsub.f32 %v10707_v4, %v10950_v23  ;;  %v684_v2 = vmul.f32 %v11067_v14, %v11067_v14  ;;  %v685_v60 = vmul.f32 %v11071_v24, %v11071_v24 }
 0x19d   : > { %v797_v43 = vadd.f32 %v796_v15, %v795_v6  ;;  %v623_v44 = vadd.f32 %v622_v45, %v621_v63  ;;  %v955_v49 = vadd.f32 %v954_v58, %v953_v35  ;;  %v11092_v61 = vmul.f32 0.0078125, %v422_v18 }
 0x19e   : > { %v11096_v19 = vsub.f32 %v10710_v5, %v10950_v23  ;;  %v11100_v3 = vsub.f32 %v10719_v9, %v10950_v23  ;;  %v686_v4 = vmul.f32 %v11075_v16, %v11075_v16  ;;  %v958_v17 = vsel %vm901_vm4, %v945_v8, 0.0 }
 0x19f   : > { %799 = vrot.lane.b32.xlu0 %v797_v43, %s10487_s22  ;;  %v624_v6 = vrot.slane %v623_v44, 2  ;;  %v957_v63 = vadd.f32 %v956_v22, %v955_v49  ;;  %v11108_v58 = vsub.f32 %v10722_v10, %v10950_v23  ;;  %v687_v5 = vmul.f32 %v11082_v41, %v11082_v41 }
 0x1a0   : > { %14239 = vst [vmem:[#allocation17_spill] sm:$0xff] %v11100_v3  ;;  %v688_v9 = vmul.f32 %v11086_v1, %v11086_v1  ;;  %v692_v15 = vsel %vm646_vm0, %v684_v2, 0.0  ;;  %v693_v45 = vsel %vm646_vm0, %v685_v60, 0.0  ;;  %v960_v8 = vsel %vm901_vm4, %v946_v34, 0.0  ;;  %v11127_v34 = vld [vmem:[%s10692_s14 + $0x8] sm:$0xff] }
 0x1a1   : > { %14240 = vst [vmem:[#allocation18_spill] sm:$0xff] %v11108_v58  ;;  %v625_v18 = vadd.f32 %v624_v6, %v623_v44  ;;  %v959_v35 = vadd.f32 %v958_v17, %v957_v63  ;;  %v694_v22 = vadd.f32 %v693_v45, %v692_v15  ;;  %v689_v10 = vmul.f32 %v11096_v19, %v11096_v19 }
 0x1a2   : > { %v690_v23 = vmul.f32 %v11100_v3, %v11100_v3  ;;  %v695_v43 = vsel %vm646_vm0, %v686_v4, 0.0  ;;  %v11124_v2 = vsub.f32 %v10695_v0, %v10995_v11  ;;  %v11131_v6 = vsub.f32 %v11127_v34, %v10995_v11  ;;  %v11138_v0 = vld [vmem:[%s10692_s14 + $0x10] sm:$0xff] }
 0x1a3   : > { %v626_v44 = vrot.slane %v625_v18, 1  ;;  %v961_v49 = vadd.f32 %v960_v8, %v959_v35  ;;  %v696_v60 = vadd.f32 %v695_v43, %v694_v22  ;;  %v691_v63 = vmul.f32 %v11108_v58, %v11108_v58  ;;  %v11145_v22 = vld [vmem:[%s10692_s14 + $0x18] sm:$0xff] }
 0x1a4   : > { %14241 = vst [vmem:[#allocation19_spill] sm:$0xff] %v11124_v2  ;;  %14242 = vst [vmem:[#allocation20_spill] sm:$0xff] %v11131_v6  ;;  %v697_v4 = vsel %vm646_vm0, %v687_v5, 0.0  ;;  %v699_v17 = vsel %vm646_vm0, %v688_v9, 0.0  ;;  %v11142_v15 = vsub.f32 %v11138_v0, %v10995_v11  ;;  %v11149_v43 = vsub.f32 %v11145_v22, %v10995_v11  ;;  %v11152_v5 = vld [vmem:[%s10692_s14 + $0x20] sm:$0xff] }
 0x1a5   : > { %v627_v45 = vadd.f32 %v626_v44, %v625_v18  ;;  %v962_v35 = vrot.slane %v961_v49, 4  ;;  %v698_v8 = vadd.f32 %v697_v4, %v696_v60  ;;  %v11156_v9 = vsub.f32 %v11152_v5, %v10995_v11 }
 0x1a6   : > { %14243 = vst [vmem:[#allocation21_spill] sm:$0xff] %v11142_v15  ;;  %14244 = vst [vmem:[#allocation22_spill] sm:$0xff] %v11149_v43  ;;  %v11163_v18 = vsub.f32 %v11159_v21, %v10995_v11  ;;  %v854_v44 = vmul.f32 %v11124_v2, %v11124_v2  ;;  %v855_v60 = vmul.f32 %v11131_v6, %v11131_v6  ;;  %v701_v40 = vsel %vm646_vm0, %v689_v10, 0.0 }
 0x1a7   : > { %14245 = vst [vmem:[#allocation23_spill] sm:$0xff] %v11156_v9  ;;  %629 = vrot.lane.b32.xlu1 %v627_v45, %s10488_s23  ;;  %v963_v4 = vadd.f32 %v962_v35, %v961_v49  ;;  %v700_v20 = vadd.f32 %v699_v17, %v698_v8  ;;  %v11175_v59 = vsub.f32 %v11171_v7, %v10995_v11  ;;  %v703_v2 = vsel %vm646_vm0, %v690_v23, 0.0  ;;  %s14174_s23 = smov 8  }
 0x1a8   : > { %14246 = vst [vmem:[#allocation24_spill] sm:$0xff] %v11163_v18  ;;  %v856_v47 = vmul.f32 %v11142_v15, %v11142_v15  ;;  %v11186_v49 = vsub.f32 %v11182_v39, %v10995_v11  ;;  %v862_v17 = vsel %vm816_vm5, %v854_v44, 0.0  ;;  %v857_v8 = vmul.f32 %v11149_v43, %v11149_v43  ;;  %v10371_v43 = vld [vmem:[%s10692_s14] sm:$0xff] }
 0x1a9   : > { %14247 = vst [vmem:[#allocation25_spill] sm:$0xff] %v11175_v59  ;;  %v964_v45 = vrot.slane %v963_v4, 2  ;;  %v702_v35 = vadd.f32 %v701_v40, %v700_v20  ;;  %v863_v15 = vsel %vm816_vm5, %v855_v60, 0.0  ;;  %v705_v10 = vsel %vm646_vm0, %v691_v63, 0.0 }
 0x1aa   : > { %14248 = vst [vmem:[#allocation26_spill] sm:$0xff] %v11186_v49  ;;  %v858_v23 = vmul.f32 %v11156_v9, %v11156_v9  ;;  %v859_v6 = vmul.f32 %v11163_v18, %v11163_v18  ;;  %v864_v36 = vadd.f32 %v863_v15, %v862_v17  ;;  %v860_v44 = vmul.f32 %v11175_v59, %v11175_v59 }
 0x1ab   : > { %v965_v11 = vadd.f32 %v964_v45, %v963_v4  ;;  %v704_v58 = vadd.f32 %v703_v2, %v702_v35  ;;  %v865_v40 = vsel %vm816_vm5, %v856_v47, 0.0  ;;  %v11202_v60 = vsub.f32 %v10371_v43, %v11056_v57 }
 0x1ac   : > { %v866_v20 = vadd.f32 %v865_v40, %v864_v36  ;;  %v11206_v63 = vsub.f32 %v11127_v34, %v11056_v57  ;;  %v11210_v18 = vsub.f32 %v11138_v0, %v11056_v57  ;;  %v861_v4 = vmul.f32 %v11186_v49, %v11186_v49 }
 0x1ad   : > { %14249 = vst [vmem:[#allocation27_spill] sm:$0xff] %v11202_v60  ;;  %v966_v15 = vrot.slane %v965_v11, 1  ;;  %v706_v2 = vadd.f32 %v705_v10, %v704_v58  ;;  %v867_v47 = vsel %vm816_vm5, %v857_v8, 0.0  ;;  %v869_v17 = vsel %vm816_vm5, %v858_v23, 0.0 }
 0x1ae   : > { %14250 = vst [vmem:[#allocation28_spill] sm:$0xff] %v11206_v63  ;;  %14251 = vst [vmem:[#allocation29_spill] sm:$0xff] %v11210_v18  ;;  %v868_v36 = vadd.f32 %v867_v47, %v866_v20  ;;  %v11218_v45 = vsub.f32 %v11145_v22, %v11056_v57  ;;  %v11222_v35 = vsub.f32 %v11152_v5, %v11056_v57  ;;  %vm4322_vm0 = vcmask 195584  }
 0x1af   : > { %v967_v40 = vadd.f32 %v966_v15, %v965_v11  ;;  %v707_v59 = vrot.slane %v706_v2, 4  ;;  %v1024_v58 = vmul.f32 %v11202_v60, %v11202_v60  ;;  %v1025_v10 = vmul.f32 %v11206_v63, %v11206_v63 }
 0x1b0   : > { %v870_v8 = vadd.f32 %v869_v17, %v868_v36  ;;  %v11230_v23 = vsub.f32 %v11159_v21, %v11056_v57  ;;  %v11234_v20 = vsub.f32 %v11171_v7, %v11056_v57  ;;  %v1026_v47 = vmul.f32 %v11210_v18, %v11210_v18 }
 0x1b1   : > { %969 = vrot.lane.b32.xlu0 %v967_v40, %s10489_s26  ;;  %v708_v11 = vadd.f32 %v707_v59, %v706_v2  ;;  %v871_v15 = vsel %vm816_vm5, %v859_v6, 0.0  ;;  %v873_v60 = vsel %vm816_vm5, %v860_v44, 0.0  ;;  %v875_v36 = vsel %vm816_vm5, %v861_v4, 0.0  ;;  %s14172_s26 = smov 16  }
 0x1b2   : > { %14252 = vst [vmem:[#allocation30_spill] sm:$0xff] %v11230_v23  ;;  %14253 = vst [vmem:[#allocation31_spill] sm:$0xff] %v11234_v20  ;;  %v872_v17 = vadd.f32 %v871_v15, %v870_v8  ;;  %v1027_v63 = vmul.f32 %v11218_v45, %v11218_v45  ;;  %v1032_v49 = vsel %vm986_vm6, %v1024_v58, 0.0  ;;  %v1033_v9 = vsel %vm986_vm6, %v1025_v10, 0.0 }
 0x1b3   : > { %v709_v3 = vrot.slane %v708_v11, 2  ;;  %v11248_v18 = vsub.f32 %v11182_v39, %v11056_v57  ;;  %v1028_v59 = vmul.f32 %v11222_v35, %v11222_v35  ;;  %v1034_v6 = vadd.f32 %v1033_v9, %v1032_v49 }
 0x1b4   : > { %v874_v44 = vadd.f32 %v873_v60, %v872_v17  ;;  %v1029_v2 = vmul.f32 %v11230_v23, %v11230_v23  ;;  %v1030_v4 = vmul.f32 %v11234_v20, %v11234_v20  ;;  %v1035_v40 = vsel %vm986_vm6, %v1026_v47, 0.0 }
 0x1b5   : > { %14254 = vst [vmem:[#allocation32_spill] sm:$0xff] %v11248_v18  ;;  %v710_v58 = vadd.f32 %v709_v3, %v708_v11  ;;  %v1036_v10 = vadd.f32 %v1035_v40, %v1034_v6  ;;  %v11258_v8 = vsub.f32 %v10371_v43, %v11092_v61  ;;  %v11262_v57 = vsub.f32 %v11127_v34, %v11092_v61 }
 0x1b6   : > { %v876_v15 = vadd.f32 %v875_v36, %v874_v44  ;;  %v1037_v9 = vsel %vm986_vm6, %v1027_v63, 0.0  ;;  %v11267_v49 = vsub.f32 %v11138_v0, %v11092_v61  ;;  %v11271_v60 = vsub.f32 %v11145_v22, %v11092_v61 }
 0x1b7   : > { %v711_v3 = vrot.slane %v710_v58, 1  ;;  %v1038_v47 = vadd.f32 %v1037_v9, %v1036_v10  ;;  %v1039_v43 = vsel %vm986_vm6, %v1028_v59, 0.0  ;;  %v11276_v11 = vsub.f32 %v11152_v5, %v11092_v61 }
 0x1b8   : > { %v877_v34 = vrot.slane %v876_v15, 4  ;;  %v11280_v63 = vsub.f32 %v11159_v21, %v11092_v61  ;;  %v433_v0 = vmul.f32 %v11258_v8, %v11258_v8  ;;  %v434_v22 = vmul.f32 %v11262_v57, %v11262_v57 }
 0x1b9   : > { %v712_v36 = vadd.f32 %v711_v3, %v710_v58  ;;  %v1040_v17 = vadd.f32 %v1039_v43, %v1038_v47  ;;  %v435_v59 = vmul.f32 %v11267_v49, %v11267_v49  ;;  %v436_v5 = vmul.f32 %v11271_v60, %v11271_v60 }
 0x1ba   : > { %v878_v6 = vadd.f32 %v877_v34, %v876_v15  ;;  %v1031_v44 = vmul.f32 %v11248_v18, %v11248_v18  ;;  %v1041_v21 = vsel %vm986_vm6, %v1029_v2, 0.0  ;;  %v11295_v40 = vsub.f32 %v11171_v7, %v11092_v61 }
 0x1bb   : > { %714 = vrot.lane.b32.xlu1 %v712_v36, %s10485_s20  ;;  %v1042_v58 = vadd.f32 %v1041_v21, %v1040_v17  ;;  %v437_v10 = vmul.f32 %v11276_v11, %v11276_v11  ;;  %v441_v9 = vsel %vm398_vm7, %v433_v0, 0.0  ;;  %v442_v3 = vsel %vm398_vm7, %v434_v22, 0.0  ;;  %s14178_s20 = smov 80  }
 0x1bc   : > { %v879_v15 = vrot.slane %v878_v6, 2  ;;  %v1043_v47 = vsel %vm986_vm6, %v1030_v4, 0.0  ;;  %v443_v43 = vadd.f32 %v442_v3, %v441_v9  ;;  %v444_v2 = vsel %vm398_vm7, %v435_v59, 0.0 }
 0x1bd   : > { %v1044_v34 = vadd.f32 %v1043_v47, %v1042_v58  ;;  %v11306_v7 = vsub.f32 %v11182_v39, %v11092_v61  ;;  %v438_v36 = vmul.f32 %v11280_v63, %v11280_v63  ;;  %v446_v17 = vsel %vm398_vm7, %v436_v5, 0.0 }
 0x1be   : > { %v880_v21 = vadd.f32 %v879_v15, %v878_v6  ;;  %v1045_v0 = vsel %vm986_vm6, %v1031_v44, 0.0  ;;  %v445_v22 = vadd.f32 %v444_v2, %v443_v43  ;;  %v439_v4 = vmul.f32 %v11295_v40, %v11295_v40 }
 0x1bf   : > { %v1046_v18 = vadd.f32 %v1045_v0, %v1044_v34  ;;  %v448_v59 = vsel %vm398_vm7, %v437_v10, 0.0  ;;  %v440_v39 = vmul.f32 %v11306_v7, %v11306_v7  ;;  %v450_v61 = vsel %vm398_vm7, %v438_v36, 0.0 }
 0x1c0   : > { %v881_v58 = vrot.slane %v880_v21, 1  ;;  %v447_v9 = vadd.f32 %v446_v17, %v445_v22  ;;  %v452_v44 = vsel %vm398_vm7, %v439_v4, 0.0  ;;  %vm4340_vm2 = vcmask 326656  }
 0x1c1   : > { %v1047_v3 = vrot.slane %v1046_v18, 4  ;;  %v454_v2 = vsel %vm398_vm7, %v440_v39, 0.0  ;;  %vm4349_vm3 = vcmask 392192   ;;  %vm4358_vm4 = vcmask 457728  }
 0x1c2   : > { %v882_v47 = vadd.f32 %v881_v58, %v880_v21  ;;  %v449_v5 = vadd.f32 %v448_v59, %v447_v9  ;;  %vm10506_vm5 = vmmov 0   ;;  %vm5047_vm6 = vcmask 1043456  }
 0x1c3   : > { %v1048_v6 = vadd.f32 %v1047_v3, %v1046_v18 }
 0x1c4   : > { %884 = vrot.lane.b32.xlu1 %v882_v47, %s10490_s25  ;;  %v451_v15 = vadd.f32 %v450_v61, %v449_v5  ;;  %s14170_s25 = smov 24  }
 0x1c5   : > { %v1049_v43 = vrot.slane %v1048_v6, 2 }
 0x1c6   : > { %v453_v10 = vadd.f32 %v452_v44, %v451_v15 }
 0x1c7   : > { %v1050_v34 = vadd.f32 %v1049_v43, %v1048_v6 }
 0x1c8   : > { %v455_v17 = vadd.f32 %v454_v2, %v453_v10  ;;  %v9723_v10 = vld [vmem:[%s14100_s3] sm:$0xff]  }
 0x1c9   : > { %v1051_v0 = vrot.slane %v1050_v34, 1  ;;  %8758 = vmatprep.subr.bf16.mxu0 %v9723_v10 }
 0x1ca   : > { %v456_v22 = vrot.slane %v455_v17, 4  ;;  %8759 = vmatpush3.bf16.msra.mxu0 %v9723_v10 }
 0x1cb   : > { %v1052_v20 = vadd.f32 %v1051_v0, %v1050_v34 }
 0x1cc   : > { %v457_v23 = vadd.f32 %v456_v22, %v455_v17 }
 0x1cd   : > { %1054 = vrot.lane.b32.xlu1 %v1052_v20, %s10491_s27  ;;  %s14168_s27 = smov 32  }
 0x1ce   : > { %v458_v36 = vrot.slane %v457_v23, 2 }
 0x1d0   : > { %v459_v21 = vadd.f32 %v458_v36, %v457_v23 }
 0x1d2   : > { %v460_v18 = vrot.slane %v459_v21, 1 }
 0x1d4   : > { %v461_v59 = vadd.f32 %v460_v18, %v459_v21 }
 0x1d6   : > { %v462_v4 = vsel %vm398_vm7, %v461_v59, 0.0 }
 0x1d7   : > { %463 = vadd.xlane.f32.xlu0 %v462_v4 }
 0x20a   : > { %v545_v58 = vpop.permute.xlu0 %544 }
 0x20b   : > { %v547_v9 = vsel %vm398_vm7, %v545_v58, 0.0 }
 0x20c   : > { %548 = vadd.xlane.f32.xlu1 %v547_v9  ;;  %v1133_v9 = vlaneseq }
 0x211   : > { %v800_v3 = vpop.permute.xlu0 %799 }
 0x212   : > { %v802_v39 = vsel %vm398_vm7, %v800_v3, 0.0 }
 0x213   : > { %803 = vadd.xlane.f32.xlu1 %v802_v39 }
 0x219   : > { %v630_v61 = vpop.permute.xlu1 %629 }
 0x21a   : > { %v632_v47 = vsel %vm398_vm7, %v630_v61, 0.0 }
 0x21b   : > { %633 = vadd.xlane.f32.xlu0 %v632_v47  ;;  %v11333_v47 = vshrl.u32 %v1133_v9, 7 }
 0x21d   : > { %14255 = vst [vmem:[#allocation33_spill] sm:$0xff] %v11333_v47 }
 0x223   : > { %v970_v20 = vpop.permute.xlu0 %969 }
 0x224   : > { %v972_v23 = vsel %vm398_vm7, %v970_v20, 0.0 }
 0x225   : > { %973 = vadd.xlane.f32.xlu1 %v972_v23 }
 0x22d   : > { %v715_v5 = vpop.permute.xlu1 %714 }
 0x22e   : > { %v717_v6 = vsel %vm398_vm7, %v715_v5, 0.0 }
 0x22f   : > { %718 = vadd.xlane.f32.xlu0 %v717_v6  ;;  %v14137_v6 = vsub.s32 0, %v11333_v47 }
 0x236   : > { %v885_v44 = vpop.permute.xlu1 %884 }
 0x237   : > { %v887_v15 = vsel %vm398_vm7, %v885_v44, 0.0 }
 0x238   : > { %888 = vadd.xlane.f32.xlu0 %v887_v15  ;;  %v11336_v15 = vld [vmem:[#allocation4] sm:$0xff] }
 0x23f   : > { %v1055_v43 = vpop.permute.xlu1 %1054 }
 0x240   : > { %v1057_v2 = vsel %vm398_vm7, %v1055_v43, 0.0  ;;  %v14139_v43 = vsub.s32 1, %v11333_v47 }
 0x241   : > { %1058 = vadd.xlane.f32.xlu0 %v1057_v2 }
 0x264   : > { %v464_v34 = vpop.xlane.xlu0 %463 }
 0x265   : > { %v465_v0 = vmul.f32 0.0078125, %v464_v34 }
 0x267   : > { %v466_v36 = vadd.f32 1e-05, %v465_v0 }
 0x269   : > { %9788 = vrsqrt.f32 %v466_v36 }
 0x273   : > { %v9789_v44 = vpop.eup %9788 }
 0x274   : > { %v468_v0 = vmul.f32 %v9789_v44, %v11258_v8 }
 0x299   : > { %v549_v17 = vpop.xlane.xlu1 %548 }
 0x29a   : > { %v550_v22 = vmul.f32 0.0078125, %v549_v17  ;;  %v11342_v17 = vrot.slane %v11336_v15, %v14137_v6 }
 0x29c   : > { %v551_v18 = vadd.f32 1e-05, %v550_v22  ;;  %v469_v22 = vmul.f32 %v9789_v44, %v11262_v57 }
 0x29e   : > { %9790 = vrsqrt.f32 %v551_v18 }
 0x2a0   : > { %v804_v21 = vpop.xlane.xlu1 %803 }
 0x2a1   : > { %v805_v4 = vmul.f32 0.0078125, %v804_v21  ;;  %v11350_v21 = vrot.slane %v11336_v15, %v14139_v43 }
 0x2a3   : > { %v806_v3 = vadd.f32 1e-05, %v805_v4 }
 0x2a5   : > { %9792 = vrsqrt.f32 %v806_v3 }
 0x2a8   : > { %v634_v59 = vpop.xlane.xlu0 %633  ;;  %v9791_v2 = vpop.eup %9790 }
 0x2a9   : > { %v635_v58 = vmul.f32 0.0078125, %v634_v59  ;;  %v553_v36 = vmul.f32 %v9791_v2, %v10862_v25  ;;  %v554_v18 = vmul.f32 %v9791_v2, %v10865_v26  ;;  %v555_v59 = vmul.f32 %v9791_v2, %v10868_v27 }
 0x2aa   : > { %v556_v4 = vmul.f32 %v9791_v2, %v10871_v28  ;;  %v558_v8 = vmul.f32 %v9791_v2, %v10877_v31  ;;  %v559_v57 = vmul.f32 %v9791_v2, %v10880_v32  ;;  %v560_v25 = vmul.f32 %v9791_v2, %v10889_v38 }
 0x2ab   : > { %v636_v39 = vadd.f32 1e-05, %v635_v58  ;;  %v557_v58 = vmul.f32 %v9791_v2, %v10874_v30  ;;  %v472_v26 = vmul.f32 %v9789_v44, %v11276_v11  ;;  %v473_v27 = vmul.f32 %v9789_v44, %v11280_v63 }
 0x2ac   : > { %v1071_v30 = vsel %vm398_vm7, %v468_v0, %v553_v36  ;;  %v474_v31 = vmul.f32 %v9789_v44, %v11295_v40  ;;  %v475_v32 = vmul.f32 %v9789_v44, %v11306_v7  ;;  %v1072_v38 = vsel %vm398_vm7, %v469_v22, %v554_v18 }
 0x2ad   : > { %9794 = vrsqrt.f32 %v636_v39  ;;  %v470_v39 = vmul.f32 %v9789_v44, %v11267_v49  ;;  %v1076_v63 = vsel %vm398_vm7, %v473_v27, %v558_v8  ;;  %v14258_v27 = vld [vmem:[#allocation9_spill] sm:$0xff] }
 0x2ae   : > { %v1078_v2 = vsel %vm398_vm7, %v475_v32, %v560_v25  ;;  %v14261_v32 = vld [vmem:[#allocation12_spill] sm:$0xff] }
 0x2af   : > { %v9793_v9 = vpop.eup %9792 }
 0x2b0   : > { %v809_v18 = vmul.f32 %v9793_v9, %v10906_v50 }
 0x2b2   : > { %v974_v61 = vpop.xlane.xlu1 %973 }
 0x2b3   : > { %v975_v23 = vmul.f32 0.0078125, %v974_v61  ;;  %v471_v61 = vmul.f32 %v9789_v44, %v11271_v60  ;;  %v1075_v60 = vsel %vm398_vm7, %v472_v26, %v557_v58  ;;  %v11376_v44 = vmul.f32 %v9793_v9, %v10903_v48 }
 0x2b4   : > { %v813_v48 = vmul.f32 %v9793_v9, %v10921_v56 }
 0x2b5   : > { %v976_v34 = vadd.f32 1e-05, %v975_v23  ;;  %v1073_v23 = vsel %vm398_vm7, %v470_v39, %v555_v59  ;;  %v1074_v49 = vsel %vm398_vm7, %v471_v61, %v556_v4  ;;  %v810_v59 = vmul.f32 %v9793_v9, %v10909_v51  ;;  %v14257_v39 = vld [vmem:[#allocation18_spill] sm:$0xff] }
 0x2b7   : > { %v9795_v28 = vpop.eup %9794 }
 0x2b8   : > { %v638_v40 = vmul.f32 %v9795_v28, %v10954_v29  ;;  %v639_v7 = vmul.f32 %v9795_v28, %v10957_v33  ;;  %v642_v0 = vmul.f32 %v9795_v28, %v10972_v46  ;;  %v643_v22 = vmul.f32 %v9795_v28, %v10977_v53 }
 0x2b9   : > { %v811_v29 = vmul.f32 %v9793_v9, %v10912_v52  ;;  %v812_v33 = vmul.f32 %v9793_v9, %v10918_v55  ;;  %v815_v46 = vmul.f32 %v9793_v9, %v10938_v13  ;;  %v645_v51 = vmul.f32 %v9795_v28, %v10988_v62 }
 0x2ba   : > { %v1080_v53 = vsel %vm1079_vm8, %v1071_v30, %v638_v40  ;;  %v1081_v4 = vsel %vm1079_vm8, %v1072_v38, %v639_v7  ;;  %v14259_v30 = vld [vmem:[#allocation10_spill] sm:$0xff]  ;;  %v14262_v40 = vld [vmem:[#allocation19_spill] sm:$0xff] }
 0x2bc   : > { %v719_v20 = vpop.xlane.xlu0 %718 }
 0x2bd   : > { %v720_v5 = vmul.f32 0.0078125, %v719_v20 }
 0x2bf   : > { %v721_v10 = vadd.f32 1e-05, %v720_v5  ;;  %v1077_v5 = vsel %vm398_vm7, %v474_v31, %v559_v57  ;;  %v14260_v31 = vld [vmem:[#allocation11_spill] sm:$0xff] }
 0x2c1   : > { %9796 = vrsqrt.f32 %v721_v10  ;;  %v640_v10 = vmul.f32 %v9795_v28, %v10962_v37  ;;  %v644_v37 = vmul.f32 %v9795_v28, %v10980_v54  ;;  %v1084_v54 = vsel %vm1079_vm8, %v1075_v60, %v642_v0  ;;  %v14264_v0 = vld [vmem:[#allocation21_spill] sm:$0xff] }
 0x2c2   : > { %9798 = vrsqrt.f32 %v976_v34  ;;  %v641_v34 = vmul.f32 %v9795_v28, %v10969_v42  ;;  %v814_v42 = vmul.f32 %v9793_v9, %v10935_v12  ;;  %v1085_v12 = vsel %vm1079_vm8, %v1076_v63, %v643_v22 }
 0x2c3   : > { %v1082_v50 = vsel %vm1079_vm8, %v1073_v23, %v640_v10  ;;  %v14263_v10 = vld [vmem:[#allocation20_spill] sm:$0xff] }
 0x2c4   : > { %v1083_v56 = vsel %vm1079_vm8, %v1074_v49, %v641_v34 }
 0x2c5   : > { %v889_v3 = vpop.xlane.xlu0 %888 }
 0x2c6   : > { %v890_v20 = vmul.f32 0.0078125, %v889_v3  ;;  %v14256_v3 = vld [vmem:[#allocation17_spill] sm:$0xff] }
 0x2c8   : > { %v891_v11 = vadd.f32 1e-05, %v890_v20  ;;  %v1086_v20 = vsel %vm1079_vm8, %v1077_v5, %v644_v37 }
 0x2ca   : > { %9800 = vrsqrt.f32 %v891_v11 }
 0x2cb   : > { %v9797_v36 = vpop.eup %9796 }
 0x2cc   : > { %v9799_v52 = vpop.eup %9798  ;;  %v723_v55 = vmul.f32 %v9797_v36, %v11067_v14  ;;  %v724_v8 = vmul.f32 %v9797_v36, %v11071_v24  ;;  %v725_v57 = vmul.f32 %v9797_v36, %v11075_v16  ;;  %v726_v25 = vmul.f32 %v9797_v36, %v11082_v41 }
 0x2cd   : > { %v727_v62 = vmul.f32 %v9797_v36, %v11086_v1  ;;  %v728_v9 = vmul.f32 %v9797_v36, %v11096_v19  ;;  %v729_v14 = vmul.f32 %v9797_v36, %v14256_v3  ;;  %v730_v61 = vmul.f32 %v9797_v36, %v14257_v39  ;;  %v14265_v36 = vld [vmem:[#allocation22_spill] sm:$0xff] }
 0x2ce   : > { %v1059_v58 = vpop.xlane.xlu0 %1058  ;;  %v978_v28 = vmul.f32 %v9799_v52, %v14258_v27  ;;  %v1087_v24 = vsel %vm1079_vm8, %v1078_v2, %v645_v51  ;;  %v979_v16 = vmul.f32 %v9799_v52, %v14259_v30  ;;  %v1089_v41 = vsel %vm1088_vm9, %v1080_v53, %v723_v55  ;;  %v14266_v53 = vld [vmem:[#allocation23_spill] sm:$0xff] }
 0x2cf   : > { %v1060_v13 = vmul.f32 0.0078125, %v1059_v58  ;;  %v980_v1 = vmul.f32 %v9799_v52, %v14260_v31  ;;  %v981_v19 = vmul.f32 %v9799_v52, %v14261_v32  ;;  %v1090_v38 = vsel %vm1088_vm9, %v1081_v4, %v724_v8  ;;  %v14268_v58 = vld [vmem:[#allocation25_spill] sm:$0xff]  ;;  %v14272_v27 = vld [vmem:[#allocation15_spill] sm:$0xff] }
 0x2d0   : > { %v1091_v23 = vsel %vm1088_vm9, %v1082_v50, %v725_v57  ;;  %v1092_v49 = vsel %vm1088_vm9, %v1083_v56, %v726_v25  ;;  %v1093_v11 = vsel %vm1088_vm9, %v1084_v54, %v727_v62  ;;  %v1094_v63 = vsel %vm1088_vm9, %v1085_v12, %v728_v9  ;;  %v14267_v50 = vld [vmem:[#allocation24_spill] sm:$0xff]  ;;  %v14269_v56 = vld [vmem:[#allocation26_spill] sm:$0xff] }
 0x2d1   : > { %v1061_v26 = vadd.f32 1e-05, %v1060_v13  ;;  %v1095_v5 = vsel %vm1088_vm9, %v1086_v20, %v729_v14  ;;  %v1096_v2 = vsel %vm1088_vm9, %v1087_v24, %v730_v61  ;;  %v1098_v12 = vsel %vm1097_vm10, %v1089_v41, %v11376_v44  ;;  %v14270_v61 = vld [vmem:[#allocation13_spill] sm:$0xff]  ;;  %v14273_v24 = vld [vmem:[#allocation16_spill] sm:$0xff] }
 0x2d2   : > { %v1099_v13 = vsel %vm1097_vm10, %v1090_v38, %v809_v18  ;;  %v1100_v8 = vsel %vm1097_vm10, %v1091_v23, %v810_v59  ;;  %v1101_v57 = vsel %vm1097_vm10, %v1092_v49, %v811_v29  ;;  %v1102_v25 = vsel %vm1097_vm10, %v1093_v11, %v812_v33 }
 0x2d3   : > { %9802 = vrsqrt.f32 %v1061_v26  ;;  %v1103_v62 = vsel %vm1097_vm10, %v1094_v63, %v813_v48  ;;  %v1104_v9 = vsel %vm1097_vm10, %v1095_v5, %v814_v42  ;;  %v1105_v3 = vsel %vm1097_vm10, %v1096_v2, %v815_v46  ;;  %v14271_v26 = vld [vmem:[#allocation14_spill] sm:$0xff]  ;;  %v14274_v5 = vld [vmem:[#allocation27_spill] sm:$0xff] }
 0x2d4   : > { %v9801_v60 = vpop.eup %9800  ;;  %v982_v42 = vmul.f32 %v9799_v52, %v14270_v61  ;;  %v983_v46 = vmul.f32 %v9799_v52, %v14271_v26  ;;  %v984_v20 = vmul.f32 %v9799_v52, %v14272_v27  ;;  %v985_v30 = vmul.f32 %v9799_v52, %v14273_v24  ;;  %v14275_v52 = vld [vmem:[#allocation28_spill] sm:$0xff] }
 0x2d5   : > { %v893_v7 = vmul.f32 %v9801_v60, %v14262_v40  ;;  %v894_v34 = vmul.f32 %v9801_v60, %v14263_v10  ;;  %v895_v22 = vmul.f32 %v9801_v60, %v14264_v0  ;;  %v896_v37 = vmul.f32 %v9801_v60, %v14265_v36 }
 0x2d6   : > { %v897_v4 = vmul.f32 %v9801_v60, %v14266_v53  ;;  %v898_v51 = vmul.f32 %v9801_v60, %v14267_v50  ;;  %v899_v55 = vmul.f32 %v9801_v60, %v14268_v58  ;;  %v900_v54 = vmul.f32 %v9801_v60, %v14269_v56 }
 0x2d7   : > { %v1107_v14 = vsel %vm1106_vm11, %v1098_v12, %v893_v7  ;;  %v1108_v39 = vsel %vm1106_vm11, %v1099_v13, %v894_v34  ;;  %v1109_v44 = vsel %vm1106_vm11, %v1100_v8, %v895_v22  ;;  %v1110_v18 = vsel %vm1106_vm11, %v1101_v57, %v896_v37  ;;  %v14278_v34 = vld [vmem:[#allocation31_spill] sm:$0xff]  ;;  %v14279_v22 = vld [vmem:[#allocation32_spill] sm:$0xff] }
 0x2d8   : > { %v1111_v59 = vsel %vm1106_vm11, %v1102_v25, %v897_v4  ;;  %v1112_v29 = vsel %vm1106_vm11, %v1103_v62, %v898_v51  ;;  %v1113_v33 = vsel %vm1106_vm11, %v1104_v9, %v899_v55  ;;  %v1114_v48 = vsel %vm1106_vm11, %v1105_v3, %v900_v54 }
 0x2d9   : > { %v1116_v41 = vsel %vm1115_vm12, %v1107_v14, %v978_v28  ;;  %v1117_v31 = vsel %vm1115_vm12, %v1108_v39, %v979_v16  ;;  %v1118_v32 = vsel %vm1115_vm12, %v1109_v44, %v980_v1  ;;  %v1119_v38 = vsel %vm1115_vm12, %v1110_v18, %v981_v19  ;;  %v14276_v28 = vld [vmem:[#allocation29_spill] sm:$0xff]  ;;  %v14277_v19 = vld [vmem:[#allocation30_spill] sm:$0xff] }
 0x2da   : > { %v1120_v49 = vsel %vm1115_vm12, %v1111_v59, %v982_v42  ;;  %v1121_v60 = vsel %vm1115_vm12, %v1112_v29, %v983_v46  ;;  %v1122_v11 = vsel %vm1115_vm12, %v1113_v33, %v984_v20  ;;  %v1123_v63 = vsel %vm1115_vm12, %v1114_v48, %v985_v30 }
 0x2db   : > { %v14138_v42 = vsub.s32 2, %v11333_v47 }
 0x2dd   : > { %v9803_v23 = vpop.eup %9802 }
 0x2de   : > { %v1063_v2 = vmul.f32 %v9803_v23, %v14274_v5  ;;  %v1064_v40 = vmul.f32 %v9803_v23, %v14275_v52  ;;  %v1065_v7 = vmul.f32 %v9803_v23, %v14276_v28  ;;  %v1066_v16 = vmul.f32 %v9803_v23, %v11218_v45 }
 0x2df   : > { %v1067_v1 = vmul.f32 %v9803_v23, %v11222_v35  ;;  %v1068_v10 = vmul.f32 %v9803_v23, %v14277_v19  ;;  %v1069_v0 = vmul.f32 %v9803_v23, %v14278_v34  ;;  %v1070_v36 = vmul.f32 %v9803_v23, %v14279_v22 }
 0x2e0   : > { %v1125_v37 = vsel %vm1124_vm13, %v1116_v41, %v1063_v2  ;;  %v1126_v53 = vsel %vm1124_vm13, %v1117_v31, %v1064_v40  ;;  %v1127_v4 = vsel %vm1124_vm13, %v1118_v32, %v1065_v7  ;;  %v1128_v50 = vsel %vm1124_vm13, %v1119_v38, %v1066_v16 }
 0x2e1   : > { %v1137_v51 = vmul.f32 %v11342_v17, %v1125_v37  ;;  %v1138_v45 = vmul.f32 %v11342_v17, %v1126_v53  ;;  %v1139_v35 = vmul.f32 %v11342_v17, %v1127_v4  ;;  %v1140_v58 = vmul.f32 %v11342_v17, %v1128_v50 }
 0x2e2   : > { %v1129_v55 = vsel %vm1124_vm13, %v1120_v49, %v1067_v1  ;;  %v1130_v56 = vsel %vm1124_vm13, %v1121_v60, %v1068_v10  ;;  %v1131_v54 = vsel %vm1124_vm13, %v1122_v11, %v1069_v0  ;;  %v1132_v12 = vsel %vm1124_vm13, %v1123_v63, %v1070_v36 }
 0x2e3   : > { %v1149_v13 = vadd.f32 %v11350_v21, %v1137_v51  ;;  %v1150_v8 = vadd.f32 %v11350_v21, %v1138_v45  ;;  %v1151_v57 = vadd.f32 %v11350_v21, %v1139_v35  ;;  %v1152_v25 = vadd.f32 %v11350_v21, %v1140_v58 }
 0x2e4   : > { %v1141_v62 = vmul.f32 %v11342_v17, %v1129_v55  ;;  %v1142_v9 = vmul.f32 %v11342_v17, %v1130_v56  ;;  %v1143_v18 = vmul.f32 %v11342_v17, %v1131_v54  ;;  %v1144_v59 = vmul.f32 %v11342_v17, %v1132_v12 }
 0x2e5   : > { %v1157_v3 = vpack.c.bf16 %v1150_v8, %v1149_v13  ;;  %v1158_v14 = vpack.c.bf16 %v1152_v25, %v1151_v57  ;;  %v1166_v17 = vrot.slane %v11336_v15, %v14138_v42 }
 0x2e6   : > { %v1153_v39 = vadd.f32 %v11350_v21, %v1141_v62  ;;  %v1154_v44 = vadd.f32 %v11350_v21, %v1142_v9  ;;  %v1155_v33 = vadd.f32 %v11350_v21, %v1143_v18  ;;  %v1156_v48 = vadd.f32 %v11350_v21, %v1144_v59 }
 0x2e7   : > { %8760 = vmatprep.mubr.msk.bf16.mxu0 %vm1173_vm14, %v1157_v3 }
 0x2e8   : > { %8761 = vmatmul.mubr.msk.bf16.vlgmr.msra.gmra.mrb[0].mxu0 %vm1173_vm14, %v1158_v14  ;;  %v1159_v29 = vpack.c.bf16 %v1154_v44, %v1153_v39  ;;  %v1160_v61 = vpack.c.bf16 %v1156_v48, %v1155_v33 }
 0x2ea   : > { %8764 = vmatprep.mubr.msk.bf16.mxu0 %vm1173_vm14, %v1159_v29 }
 0x2f0   : > { %8765 = vmatmul.mubr.msk.bf16.gmra.mrb[4].mxu0 %vm1173_vm14, %v1160_v61 }
 0x3bb   : > { %v8762_v26 = vpop.f32.mrb[0].mxu0 }
 0x3bc   : > { %v1220_v46 = vpop.f32.mrb[1].mxu0  ;;  %v11498_v30 = vadd.f32 %v8762_v26, %v1166_v17 }
 0x3bd   : > { %v11496_v27 = vadd.f32 %v1220_v46, %v1166_v17  ;;  %v8763_v20 = vpop.f32.mrb[2].mxu0 }
 0x3be   : > { %v1223_v24 = vpop.f32.mrb[3].mxu0  ;;  %14281 = vst [vmem:[#allocation18_spill] sm:$0xff] %v11498_v30  ;;  %v11504_v31 = vadd.f32 %v8763_v20, %v1166_v17  ;;  %v1328_v23 = vsel %vm1321_vm15, %v11498_v30, 0.0 }
 0x3bf   : > { %14280 = vst [vmem:[#allocation17_spill] sm:$0xff] %v11496_v27  ;;  %v11500_v41 = vadd.f32 %v1223_v24, %v1166_v17  ;;  %v1322_v21 = vsel %vm1321_vm15, %v11496_v27, 0.0 }
 0x3c0   : > { %1323 = vadd.xlane.f32.xlu1 %v1322_v21  ;;  %14283 = vst [vmem:[#allocation10_spill] sm:$0xff] %v11504_v31  ;;  %v1331_v63 = vsel %vm1321_vm15, %v11504_v31, 0.0 }
 0x3c1   : > { %14282 = vst [vmem:[#allocation9_spill] sm:$0xff] %v11500_v41  ;;  %v1325_v32 = vsel %vm1321_vm15, %v11500_v41, 0.0 }
 0x3c2   : > { %1326 = vadd.xlane.f32.xlu0 %v1325_v32  ;;  %v9724_v32 = vld [vmem:[%s14101_s4] sm:$0xff]  }
 0x3c3   : > { %v8766_v38 = vpop.f32.mrb[4].mxu0  ;;  %8768 = vmatprep.subr.bf16.mxu1 %v9724_v32 }
 0x3c4   : > { %v1236_v49 = vpop.f32.mrb[5].mxu0  ;;  %1329 = vadd.xlane.f32.xlu1 %v1328_v23  ;;  %v11514_v2 = vadd.f32 %v8766_v38, %v1166_v17  ;;  %v9725_v38 = vld [vmem:[%s14101_s4 + $0x20] sm:$0xff]   ;;  %8769 = vmatpush3.bf16.msra.mxu1 %v9724_v32  ;;  %v9726_v23 = vld [vmem:[%s14101_s4 + $0x8] sm:$0xff]  }
 0x3c5   : > { %v11510_v60 = vadd.f32 %v1236_v49, %v1166_v17  ;;  %v8767_v11 = vpop.f32.mrb[6].mxu0  ;;  %8784 = vmatprep.subr.bf16.mxu0 %v9725_v38  ;;  %v9727_v49 = vld [vmem:[%s14101_s4 + $0x28] sm:$0xff]   ;;  %8770 = vmatprep.subr.bf16.mxu1 %v9726_v23 }
 0x3c6   : > { %v1239_v5 = vpop.f32.mrb[7].mxu0  ;;  %1332 = vadd.xlane.f32.xlu0 %v1331_v63  ;;  %14285 = vst [vmem:[#allocation12_spill] sm:$0xff] %v11514_v2  ;;  %v11520_v28 = vadd.f32 %v8767_v11, %v1166_v17  ;;  %v1340_v16 = vsel %vm1321_vm15, %v11514_v2, 0.0  ;;  %8785 = vmatpush3.bf16.msra.mxu0 %v9725_v38  ;;  %v9728_v11 = vld [vmem:[%s14101_s4 + $0x10] sm:$0xff]  }
 0x3c7   : > { %14284 = vst [vmem:[#allocation11_spill] sm:$0xff] %v11510_v60  ;;  %v11516_v52 = vadd.f32 %v1239_v5, %v1166_v17  ;;  %v1334_v40 = vsel %vm1321_vm15, %v11510_v60, 0.0  ;;  %v9729_v63 = vld [vmem:[%s14101_s4 + $0x30] sm:$0xff]   ;;  %8786 = vmatprep.subr.bf16.mxu0 %v9727_v49  ;;  %v9730_v5 = vld [vmem:[%s14101_s4 + $0x18] sm:$0xff]  }
 0x3c8   : > { %1335 = vadd.xlane.f32.xlu1 %v1334_v40  ;;  %14287 = vst [vmem:[#allocation20_spill] sm:$0xff] %v11520_v28  ;;  %v1343_v1 = vsel %vm1321_vm15, %v11520_v28, 0.0  ;;  %8771 = vmatpush3.bf16.msra.mxu1 %v9726_v23  ;;  %v9731_v40 = vld [vmem:[%s14101_s4 + $0x38] sm:$0xff]  }
 0x3c9   : > { %14286 = vst [vmem:[#allocation19_spill] sm:$0xff] %v11516_v52  ;;  %v1337_v7 = vsel %vm1321_vm15, %v11516_v52, 0.0  ;;  %8772 = vmatprep.subr.bf16.mxu1 %v9728_v11 }
 0x3ca   : > { %1338 = vadd.xlane.f32.xlu0 %v1337_v7  ;;  %8787 = vmatpush3.bf16.msra.mxu0 %v9727_v49  ;;  %v11603_v7 = vld [vmem:[%s14101_s4 + $0x40] sm:$0xff]  }
 0x3cb   : > { %8788 = vmatprep.subr.bf16.mxu0 %v9729_v63 }
 0x3cc   : > { %1341 = vadd.xlane.f32.xlu1 %v1340_v16  ;;  %8773 = vmatpush3.bf16.msra.mxu1 %v9728_v11 }
 0x3cd   : > { %8774 = vmatprep.subr.bf16.mxu1 %v9730_v5 }
 0x3ce   : > { %1344 = vadd.xlane.f32.xlu0 %v1343_v1  ;;  %8789 = vmatpush3.bf16.msra.mxu0 %v9729_v63 }
 0x3cf   : > { %8790 = vmatprep.subr.bf16.mxu0 %v9731_v40 }
 0x3d0   : > { %8775 = vmatpush3.bf16.msra.mxu1 %v9730_v5 }
 0x3d1   : > { %8800 = vmatprep.subr.bf16.mxu1 %v11603_v7 }
 0x3d2   : > { %8791 = vmatpush3.bf16.msra.mxu0 %v9731_v40 }
 0x44d   : > { %v1324_v19 = vpop.xlane.xlu1 %1323 }
 0x44e   : > { %v1347_v10 = vmul.f32 0.015625, %v1324_v19 }
 0x44f   : > { %v1327_v34 = vpop.xlane.xlu0 %1326 }
 0x450   : > { %v11529_v0 = vsub.f32 %v11496_v27, %v1347_v10  ;;  %v1348_v22 = vmul.f32 0.015625, %v1327_v34 }
 0x451   : > { %v1330_v36 = vpop.xlane.xlu1 %1329 }
 0x452   : > { %v11532_v37 = vsub.f32 %v11500_v41, %v1348_v22  ;;  %v1349_v53 = vmul.f32 0.015625, %v1330_v36  ;;  %v1363_v4 = vmul.f32 %v11529_v0, %v11529_v0 }
 0x453   : > { %v1333_v50 = vpop.xlane.xlu0 %1332 }
 0x454   : > { %v11537_v51 = vsub.f32 %v11498_v30, %v1349_v53  ;;  %v1350_v45 = vmul.f32 0.015625, %v1333_v50  ;;  %v1371_v35 = vsel %vm1321_vm15, %v1363_v4, 0.0  ;;  %v1364_v58 = vmul.f32 %v11532_v37, %v11532_v37 }
 0x455   : > { %1372 = vadd.xlane.f32.xlu1 %v1371_v35  ;;  %v1336_v55 = vpop.xlane.xlu1 %1335 }
 0x456   : > { %v11543_v56 = vsub.f32 %v11504_v31, %v1350_v45  ;;  %v1351_v54 = vmul.f32 0.015625, %v1336_v55  ;;  %v1374_v12 = vsel %vm1321_vm15, %v1364_v58, 0.0  ;;  %v1365_v13 = vmul.f32 %v11537_v51, %v11537_v51 }
 0x457   : > { %1375 = vadd.xlane.f32.xlu0 %v1374_v12  ;;  %v1339_v8 = vpop.xlane.xlu0 %1338  ;;  %v11607_v12 = vsub.s32 3, %v11333_v47 }
 0x458   : > { %v11549_v57 = vsub.f32 %v11510_v60, %v1351_v54  ;;  %v1352_v25 = vmul.f32 0.015625, %v1339_v8  ;;  %v1377_v62 = vsel %vm1321_vm15, %v1365_v13, 0.0  ;;  %v1366_v9 = vmul.f32 %v11543_v56, %v11543_v56 }
 0x459   : > { %1378 = vadd.xlane.f32.xlu1 %v1377_v62  ;;  %v1342_v3 = vpop.xlane.xlu1 %1341  ;;  %14288 = vst [vmem:[#allocation21_spill] sm:$0xff] %v11607_v12 }
 0x45a   : > { %v11555_v14 = vsub.f32 %v11516_v52, %v1352_v25  ;;  %v1353_v39 = vmul.f32 0.015625, %v1342_v3  ;;  %v1380_v44 = vsel %vm1321_vm15, %v1366_v9, 0.0  ;;  %v1367_v18 = vmul.f32 %v11549_v57, %v11549_v57 }
 0x45b   : > { %1381 = vadd.xlane.f32.xlu0 %v1380_v44  ;;  %v1345_v59 = vpop.xlane.xlu0 %1344  ;;  %v14136_v44 = vsub.s32 4, %v11333_v47 }
 0x45c   : > { %v11561_v29 = vsub.f32 %v11514_v2, %v1353_v39  ;;  %v1354_v33 = vmul.f32 0.015625, %v1345_v59  ;;  %v1383_v48 = vsel %vm1321_vm15, %v1367_v18, 0.0  ;;  %v1368_v61 = vmul.f32 %v11555_v14, %v11555_v14 }
 0x45d   : > { %1384 = vadd.xlane.f32.xlu1 %v1383_v48  ;;  %v1430_v39 = vrot.slane %v11336_v15, %v11607_v12 }
 0x45e   : > { %v11567_v17 = vsub.f32 %v11520_v28, %v1354_v33  ;;  %v1386_v26 = vsel %vm1321_vm15, %v1368_v61, 0.0  ;;  %v1369_v46 = vmul.f32 %v11561_v29, %v11561_v29 }
 0x45f   : > { %1387 = vadd.xlane.f32.xlu0 %v1386_v26 }
 0x460   : > { %v1389_v20 = vsel %vm1321_vm15, %v1369_v46, 0.0  ;;  %v1370_v24 = vmul.f32 %v11567_v17, %v11567_v17 }
 0x461   : > { %1390 = vadd.xlane.f32.xlu1 %v1389_v20 }
 0x462   : > { %v1392_v21 = vsel %vm1321_vm15, %v1370_v24, 0.0  ;;  %v1442_v24 = vrot.slane %v11336_v15, %v14136_v44 }
 0x463   : > { %1393 = vadd.xlane.f32.xlu0 %v1392_v21 }
 0x4e2   : > { %v1373_v16 = vpop.xlane.xlu1 %1372 }
 0x4e3   : > { %v1395_v1 = vmul.f32 0.015625, %v1373_v16 }
 0x4e4   : > { %v1376_v19 = vpop.xlane.xlu0 %1375 }
 0x4e5   : > { %v1403_v10 = vadd.f32 1e-05, %v1395_v1  ;;  %v1396_v34 = vmul.f32 0.015625, %v1376_v19 }
 0x4e6   : > { %v1379_v22 = vpop.xlane.xlu1 %1378 }
 0x4e7   : > { %9804 = vrsqrt.f32 %v1403_v10  ;;  %v1404_v36 = vadd.f32 1e-05, %v1396_v34  ;;  %v1397_v53 = vmul.f32 0.015625, %v1379_v22 }
 0x4e8   : > { %v1382_v4 = vpop.xlane.xlu0 %1381 }
 0x4e9   : > { %9806 = vrsqrt.f32 %v1404_v36  ;;  %v1405_v50 = vadd.f32 1e-05, %v1397_v53  ;;  %v1398_v45 = vmul.f32 0.015625, %v1382_v4 }
 0x4ea   : > { %v1385_v35 = vpop.xlane.xlu1 %1384 }
 0x4eb   : > { %9808 = vrsqrt.f32 %v1405_v50  ;;  %v1406_v58 = vadd.f32 1e-05, %v1398_v45  ;;  %v1399_v55 = vmul.f32 0.015625, %v1385_v35 }
 0x4ec   : > { %v1388_v54 = vpop.xlane.xlu0 %1387 }
 0x4ed   : > { %9810 = vrsqrt.f32 %v1406_v58  ;;  %v1407_v13 = vadd.f32 1e-05, %v1399_v55  ;;  %v1400_v8 = vmul.f32 0.015625, %v1388_v54  ;;  %v9734_v55 = vld [vmem:[%s14101_s4 + $0x50] sm:$0xff]  }
 0x4ee   : > { %v1391_v25 = vpop.xlane.xlu1 %1390 }
 0x4ef   : > { %9812 = vrsqrt.f32 %v1407_v13  ;;  %v1408_v62 = vadd.f32 1e-05, %v1400_v8  ;;  %v1401_v9 = vmul.f32 0.015625, %v1391_v25 }
 0x4f0   : > { %v1394_v3 = vpop.xlane.xlu0 %1393 }
 0x4f1   : > { %v9805_v18 = vpop.eup %9804  ;;  %9814 = vrsqrt.f32 %v1408_v62  ;;  %v1409_v59 = vadd.f32 1e-05, %v1401_v9  ;;  %v1402_v33 = vmul.f32 0.015625, %v1394_v3 }
 0x4f2   : > { %v1419_v48 = vmul.f32 %v9805_v18, %v11529_v0 }
 0x4f3   : > { %v9807_v61 = vpop.eup %9806  ;;  %9816 = vrsqrt.f32 %v1409_v59  ;;  %v1410_v26 = vadd.f32 1e-05, %v1402_v33 }
 0x4f4   : > { %v1420_v46 = vmul.f32 %v9807_v61, %v11532_v37  ;;  %v1431_v20 = vmul.f32 %v1430_v39, %v1419_v48 }
 0x4f5   : > { %v9809_v21 = vpop.eup %9808  ;;  %9818 = vrsqrt.f32 %v1410_v26 }
 0x4f6   : > { %v1432_v32 = vmul.f32 %v1430_v39, %v1420_v46  ;;  %v1421_v38 = vmul.f32 %v9809_v21, %v11537_v51  ;;  %v1443_v49 = vadd.f32 %v1442_v24, %v1431_v20 }
 0x4f7   : > { %v9811_v23 = vpop.eup %9810 }
 0x4f8   : > { %v1444_v11 = vadd.f32 %v1442_v24, %v1432_v32  ;;  %v1422_v0 = vmul.f32 %v9811_v23, %v11543_v56  ;;  %v1433_v63 = vmul.f32 %v1430_v39, %v1421_v38  ;;  %v9733_v56 = vld [vmem:[%s14101_s4 + $0x48] sm:$0xff]  }
 0x4f9   : > { %v9813_v5 = vpop.eup %9812 }
 0x4fa   : > { %v1451_v40 = vpack.c.bf16 %v1444_v11, %v1443_v49  ;;  %v1434_v16 = vmul.f32 %v1430_v39, %v1422_v0  ;;  %v1423_v37 = vmul.f32 %v9813_v5, %v11549_v57  ;;  %v1445_v19 = vadd.f32 %v1442_v24, %v1433_v63 }
 0x4fb   : > { %v9815_v1 = vpop.eup %9814 }
 0x4fc   : > { %8776 = vmatprep.mubr.msk.bf16.mxu1 %vm1321_vm15, %v1451_v40  ;;  %8792 = vmatprep.mubr.msk.bf16.mxu0 %vm1321_vm15, %v1451_v40  ;;  %v1446_v15 = vadd.f32 %v1442_v24, %v1434_v16  ;;  %v1424_v51 = vmul.f32 %v9815_v1, %v11555_v14  ;;  %v1435_v10 = vmul.f32 %v1430_v39, %v1423_v37 }
 0x4fd   : > { %v9817_v34 = vpop.eup %9816 }
 0x4fe   : > { %v1452_v22 = vpack.c.bf16 %v1446_v15, %v1445_v19  ;;  %v1436_v36 = vmul.f32 %v1430_v39, %v1424_v51  ;;  %v1425_v53 = vmul.f32 %v9817_v34, %v11561_v29  ;;  %v1447_v4 = vadd.f32 %v1442_v24, %v1435_v10 }
 0x4ff   : > { %v9819_v57 = vpop.eup %9818 }
 0x500   : > { %8777 = vmatmul.mubr.msk.bf16.vlgmr.msra.gmra.mrb[0].mxu1 %vm1321_vm15, %v1452_v22  ;;  %8793 = vmatmul.mubr.msk.bf16.vlgmr.msra.gmra.mrb[8].mxu0 %vm1321_vm15, %v1452_v22  ;;  %v1448_v50 = vadd.f32 %v1442_v24, %v1436_v36  ;;  %v1426_v45 = vmul.f32 %v9819_v57, %v11567_v17  ;;  %v1437_v14 = vmul.f32 %v1430_v39, %v1425_v53  ;;  %v9735_v17 = vld [vmem:[%s14101_s4 + $0x58] sm:$0xff]  }
 0x501   : > { %8801 = vmatpush3.bf16.msra.mxu1 %v11603_v7 }
 0x502   : > { %v1453_v35 = vpack.c.bf16 %v1448_v50, %v1447_v4  ;;  %8802 = vmatprep.subr.bf16.mxu1 %v9733_v56  ;;  %v1438_v58 = vmul.f32 %v1430_v39, %v1426_v45  ;;  %v1449_v29 = vadd.f32 %v1442_v24, %v1437_v14 }
 0x504   : > { %8780 = vmatprep.mubr.msk.bf16.mxu1 %vm1321_vm15, %v1453_v35  ;;  %8796 = vmatprep.mubr.msk.bf16.mxu0 %vm1321_vm15, %v1453_v35  ;;  %v1450_v54 = vadd.f32 %v1442_v24, %v1438_v58 }
 0x505   : > { %8803 = vmatpush3.bf16.msra.mxu1 %v9733_v56 }
 0x506   : > { %v1454_v13 = vpack.c.bf16 %v1450_v54, %v1449_v29  ;;  %8804 = vmatprep.subr.bf16.mxu1 %v9734_v55 }
 0x508   : > { %8781 = vmatmul.mubr.msk.bf16.gmra.mrb[4].mxu1 %vm1321_vm15, %v1454_v13  ;;  %8797 = vmatmul.mubr.msk.bf16.gmra.mrb[12].mxu0 %vm1321_vm15, %v1454_v13 }
 0x509   : > { %8805 = vmatpush3.bf16.msra.mxu1 %v9734_v55  ;;  %8808 = vmatprep.mubr.msk.bf16.mxu1 %vm1321_vm15, %v1451_v40 }
 0x50a   : > { %8806 = vmatprep.subr.bf16.mxu1 %v9735_v17 }
 0x50d   : > { %8807 = vmatpush3.bf16.msra.mxu1 %v9735_v17 }
 0x510   : > { %8809 = vmatmul.mubr.msk.bf16.vlgmr.msra.gmra.mrb[8].mxu1 %vm1321_vm15, %v1452_v22 }
 0x511   : > { %8812 = vmatprep.mubr.msk.bf16.mxu1 %vm1321_vm15, %v1453_v35 }
 0x518   : > { %8813 = vmatmul.mubr.msk.bf16.gmra.mrb[12].mxu1 %vm1321_vm15, %v1454_v13 }
 0x5d3   : > { %v8778_v7 = vpop.f32.mrb[0].mxu1  ;;  %v8794_v8 = vpop.f32.mrb[8].mxu0 }
 0x5d4   : > { %v1525_v25 = vpop.f32.mrb[1].mxu1  ;;  %v1614_v62 = vpop.f32.mrb[9].mxu0 }
 0x5d5   : > { %v8779_v9 = vpop.f32.mrb[2].mxu1  ;;  %v8795_v3 = vpop.f32.mrb[10].mxu0 }
 0x5d6   : > { %v11645_v39 = vpack.c.bf16 %v8779_v9, %v8778_v7  ;;  %v11647_v18 = vpack.c.bf16 %v8795_v3, %v8794_v8  ;;  %v1528_v59 = vpop.f32.mrb[3].mxu1  ;;  %v1617_v33 = vpop.f32.mrb[11].mxu0 }
 0x5d7   : > { %v11649_v48 = vpack.c.bf16 %v1528_v59, %v1525_v25  ;;  %v11651_v61 = vpack.c.bf16 %v1617_v33, %v1614_v62 }
 0x5d8   : > { %v1762_v40 = vsel %vm1097_vm10, %v11647_v18, 0 }
 0x5d9   : > { %9320 = vmatprep.subr.msk.bf16.mxu0 %vm1097_vm10, %v11651_v61  ;;  %8824 = vmatprep.mubr.msk.bf16.mxu0 %vm1097_vm10, %v11649_v48  ;;  %v1759_v26 = vsel %vm1097_vm10, %v11651_v61, 0 }
 0x5da   : > { %8817 = vmatpush3.bf16.xpose.msra.mxu0 %v1759_v26 }
 0x5db   : > { %v8782_v46 = vpop.f32.mrb[4].mxu1  ;;  %v8798_v20 = vpop.f32.mrb[12].mxu0  ;;  %9321 = vmatprep.subr.msk.bf16.mxu0 %vm1097_vm10, %v11647_v18 }
 0x5dc   : > { %v1541_v24 = vpop.f32.mrb[5].mxu1  ;;  %v1630_v21 = vpop.f32.mrb[13].mxu0 }
 0x5dd   : > { %v8783_v32 = vpop.f32.mrb[6].mxu1  ;;  %v8799_v38 = vpop.f32.mrb[14].mxu0 }
 0x5de   : > { %v11661_v23 = vpack.c.bf16 %v8783_v32, %v8782_v46  ;;  %v11663_v49 = vpack.c.bf16 %v8799_v38, %v8798_v20  ;;  %v1544_v11 = vpop.f32.mrb[7].mxu1  ;;  %v1633_v0 = vpop.f32.mrb[15].mxu0 }
 0x5df   : > { %v11665_v63 = vpack.c.bf16 %v1544_v11, %v1541_v24  ;;  %v11667_v5 = vpack.c.bf16 %v1633_v0, %v1630_v21 }
 0x5e0   : > { %v1768_v4 = vsel %vm1097_vm10, %v11663_v49, 0 }
 0x5e1   : > { %v1765_v10 = vsel %vm1097_vm10, %v11667_v5, 0 }
 0x5e2   : > { %8819 = vmatpush3.bf16.xpose.msra.mxu0 %v1762_v40 }
 0x5e3   : > { %v8810_v16 = vpop.f32.mrb[8].mxu1  ;;  %9322 = vmatprep.subr.msk.bf16.mxu0 %vm1097_vm10, %v11667_v5 }
 0x5e4   : > { %v1703_v37 = vpop.f32.mrb[9].mxu1 }
 0x5e5   : > { %v8811_v1 = vpop.f32.mrb[10].mxu1 }
 0x5e6   : > { %v11673_v19 = vpack.c.bf16 %v8811_v1, %v8810_v16  ;;  %v1706_v15 = vpop.f32.mrb[11].mxu1 }
 0x5e7   : > { %v11675_v51 = vpack.c.bf16 %v1706_v15, %v1703_v37 }
 0x5e9   : > { %8832 = vmatprep.subr.bf16.mxu1 %v11675_v51 }
 0x5ea   : > { %8821 = vmatpush3.bf16.xpose.msra.mxu0 %v1765_v10  ;;  %8833 = vmatpush3.bf16.msra.mxu1 %v11675_v51 }
 0x5eb   : > { %v8814_v34 = vpop.f32.mrb[12].mxu1  ;;  %9323 = vmatprep.subr.msk.bf16.mxu0 %vm1097_vm10, %v11663_v49  ;;  %8834 = vmatprep.subr.bf16.mxu1 %v11673_v19 }
 0x5ec   : > { %v1719_v22 = vpop.f32.mrb[13].mxu1 }
 0x5ed   : > { %v8815_v36 = vpop.f32.mrb[14].mxu1 }
 0x5ee   : > { %v11684_v56 = vpack.c.bf16 %v8815_v36, %v8814_v34  ;;  %v1722_v53 = vpop.f32.mrb[15].mxu1  ;;  %8835 = vmatpush3.bf16.msra.mxu1 %v11673_v19 }
 0x5ef   : > { %v11687_v57 = vpack.c.bf16 %v1722_v53, %v1719_v22 }
 0x5f1   : > { %8836 = vmatprep.subr.bf16.mxu1 %v11687_v57 }
 0x5f2   : > { %8823 = vmatpush3.bf16.xpose.msra.mxu0 %v1768_v4  ;;  %8837 = vmatpush3.bf16.msra.mxu1 %v11687_v57 }
 0x5f3   : > { %8838 = vmatprep.subr.bf16.mxu1 %v11684_v56 }
 0x5f6   : > { %8839 = vmatpush3.bf16.msra.mxu1 %v11684_v56 }
 0x5f9   : > { %8825 = vmatmul.mubr.msk.bf16.vlgmr.msra.gmra.mrb[16].mxu0 %vm1097_vm10, %v11645_v39 }
 0x5fa   : > { %8828 = vmatprep.mubr.msk.bf16.mxu0 %vm1097_vm10, %v11665_v63 }
 0x601   : > { %8829 = vmatmul.mubr.msk.bf16.gmra.mrb[20].mxu0 %vm1097_vm10, %v11661_v23 }
 0x6cc   : > { %v8826_v50 = vpop.f32.mrb[16].mxu0 }
 0x6cd   : > { %v1804_v45 = vpop.f32.mrb[17].mxu0  ;;  %v1837_v55 = vmul.f32 0.35355338, %v8826_v50 }
 0x6ce   : > { %v1835_v14 = vmul.f32 0.35355338, %v1804_v45  ;;  %v8827_v35 = vpop.f32.mrb[18].mxu0 }
 0x6cf   : > { %v1807_v58 = vpop.f32.mrb[19].mxu0  ;;  %v1838_v13 = vmul.f32 0.35355338, %v8827_v35  ;;  %v1849_v8 = vsel %vm1321_vm15, %v1837_v55, -inf }
 0x6d0   : > { %v1836_v29 = vmul.f32 0.35355338, %v1807_v58  ;;  %v1843_v54 = vsel %vm1321_vm15, %v1835_v14, -inf }
 0x6d1   : > { %1844 = vmax.xlane.f32.xlu1 %v1843_v54  ;;  %v1852_v3 = vsel %vm1321_vm15, %v1838_v13, -inf }
 0x6d2   : > { %v1846_v17 = vsel %vm1321_vm15, %v1836_v29, -inf }
 0x6d3   : > { %1847 = vmax.xlane.f32.xlu0 %v1846_v17 }
 0x6d4   : > { %v8830_v7 = vpop.f32.mrb[20].mxu0 }
 0x6d5   : > { %1850 = vmax.xlane.f32.xlu1 %v1849_v8  ;;  %v1820_v25 = vpop.f32.mrb[21].mxu0  ;;  %v1841_v33 = vmul.f32 0.35355338, %v8830_v7 }
 0x6d6   : > { %v11704_v62 = vmul.f32 0.35355338, %v1820_v25  ;;  %v8831_v9 = vpop.f32.mrb[22].mxu0 }
 0x6d7   : > { %1853 = vmax.xlane.f32.xlu0 %v1852_v3  ;;  %v1823_v59 = vpop.f32.mrb[23].mxu0  ;;  %v1842_v20 = vmul.f32 0.35355338, %v8831_v9  ;;  %v1861_v21 = vsel %vm1321_vm15, %v1841_v33, -inf }
 0x6d8   : > { %v1840_v26 = vmul.f32 0.35355338, %v1823_v59  ;;  %v1855_v46 = vsel %vm1321_vm15, %v11704_v62, -inf }
 0x6d9   : > { %1856 = vmax.xlane.f32.xlu1 %v1855_v46  ;;  %v1864_v32 = vsel %vm1321_vm15, %v1842_v20, -inf }
 0x6da   : > { %v1858_v24 = vsel %vm1321_vm15, %v1840_v26, -inf }
 0x6db   : > { %1859 = vmax.xlane.f32.xlu0 %v1858_v24 }
 0x6dd   : > { %1862 = vmax.xlane.f32.xlu1 %v1861_v21 }
 0x6df   : > { %1865 = vmax.xlane.f32.xlu0 %v1864_v32 }
 0x75e   : > { %v1845_v38 = vpop.xlane.xlu1 %1844 }
 0x75f   : > { %v1867_v11 = vsub.f32 %v1835_v14, %v1845_v38 }
 0x760   : > { %v1848_v0 = vpop.xlane.xlu0 %1847 }
 0x761   : > { %v1868_v16 = vsub.f32 %v1836_v29, %v1848_v0  ;;  %v1875_v1 = vmul.f32 1.442695, %v1867_v11 }
 0x762   : > { %v1851_v40 = vpop.xlane.xlu1 %1850 }
 0x763   : > { %v1869_v37 = vsub.f32 %v1837_v55, %v1851_v40  ;;  %v1877_v22 = vmul.f32 1.442695, %v1868_v16 }
 0x764   : > { %v1854_v15 = vpop.xlane.xlu0 %1853 }
 0x765   : > { %v1879_v10 = vmul.f32 1.442695, %v1869_v37  ;;  %v1870_v34 = vsub.f32 %v1838_v13, %v1854_v15 }
 0x767   : > { %9820 = vpow2.f32 %v1879_v10  ;;  %v1881_v36 = vmul.f32 1.442695, %v1870_v34 }
 0x768   : > { %9822 = vpow2.f32 %v1875_v1  ;;  %v1860_v53 = vpop.xlane.xlu0 %1859 }
 0x769   : > { %9824 = vpow2.f32 %v1881_v36  ;;  %v1872_v4 = vsub.f32 %v1840_v26, %v1860_v53  ;;  %v1857_v26 = vpop.xlane.xlu1 %1856 }
 0x76a   : > { %9826 = vpow2.f32 %v1877_v22  ;;  %v1871_v24 = vsub.f32 %v11704_v62, %v1857_v26 }
 0x76b   : > { %v1885_v35 = vmul.f32 1.442695, %v1872_v4 }
 0x76c   : > { %v1866_v50 = vpop.xlane.xlu0 %1865  ;;  %v1883_v32 = vmul.f32 1.442695, %v1871_v24 }
 0x76d   : > { %v1874_v45 = vsub.f32 %v1842_v20, %v1866_v50  ;;  %v1863_v46 = vpop.xlane.xlu1 %1862 }
 0x76e   : > { %v1873_v20 = vsub.f32 %v1841_v33, %v1863_v46 }
 0x76f   : > { %v1889_v14 = vmul.f32 1.442695, %v1874_v45 }
 0x770   : > { %v1887_v21 = vmul.f32 1.442695, %v1873_v20 }
 0x771   : > { %v9821_v58 = vpop.eup %9820  ;;  %9828 = vpow2.f32 %v1889_v14 }
 0x772   : > { %v9823_v29 = vpop.eup %9822  ;;  %v1897_v55 = vsel %vm1321_vm15, %v9821_v58, 0.0  ;;  %9830 = vpow2.f32 %v1885_v35 }
 0x773   : > { %v9825_v54 = vpop.eup %9824  ;;  %1898 = vadd.xlane.f32.xlu1 %v1897_v55  ;;  %v1891_v7 = vsel %vm1321_vm15, %v9823_v29, 0.0  ;;  %9832 = vpow2.f32 %v1887_v21 }
 0x774   : > { %v1900_v13 = vsel %vm1321_vm15, %v9825_v54, 0.0  ;;  %v9827_v17 = vpop.eup %9826  ;;  %9834 = vpow2.f32 %v1883_v32 }
 0x775   : > { %1901 = vadd.xlane.f32.xlu0 %v1900_v13  ;;  %v1894_v8 = vsel %vm1321_vm15, %v9827_v17, 0.0 }
 0x777   : > { %1892 = vadd.xlane.f32.xlu1 %v1891_v7 }
 0x779   : > { %1895 = vadd.xlane.f32.xlu0 %v1894_v8 }
 0x77b   : > { %v11716_v25 = vpop.eup %9828 }
 0x77c   : > { %v1912_v9 = vsel %vm1321_vm15, %v11716_v25, 0.0  ;;  %v11720_v3 = vpop.eup %9830 }
 0x77d   : > { %1913 = vadd.xlane.f32.xlu0 %v1912_v9  ;;  %v1906_v59 = vsel %vm1321_vm15, %v11720_v3, 0.0  ;;  %v9833_v38 = vpop.eup %9832 }
 0x77e   : > { %v1909_v11 = vsel %vm1321_vm15, %v9833_v38, 0.0  ;;  %v9835_v0 = vpop.eup %9834 }
 0x77f   : > { %v1903_v33 = vsel %vm1321_vm15, %v9835_v0, 0.0 }
 0x781   : > { %1907 = vadd.xlane.f32.xlu0 %v1906_v59 }
 0x788   : > { %2028 = vrot.lane.b32.xlu1 %v11651_v61, %s10487_s22 }
 0x797   : > { %2030 = vrot.lane.b32.xlu0 %v11647_v18, %s10487_s22 }
 0x79b   : > { %2016 = vrot.lane.b32.xlu0 %v11649_v48, %s10487_s22 }
 0x79f   : > { %2020 = vrot.lane.b32.xlu0 %v11665_v63, %s10487_s22 }
 0x7ac   : > { %1910 = vadd.xlane.f32.xlu1 %v1909_v11 }
 0x7b0   : > { %1904 = vadd.xlane.f32.xlu1 %v1903_v33 }
 0x7c1   : > { %2032 = vrot.lane.b32.xlu1 %v11667_v5, %s10487_s22 }
 0x7c5   : > { %2034 = vrot.lane.b32.xlu1 %v11663_v49, %s10487_s22 }
 0x7c9   : > { %2018 = vrot.lane.b32.xlu1 %v11645_v39, %s10487_s22 }
 0x7cd   : > { %2022 = vrot.lane.b32.xlu1 %v11661_v23, %s10487_s22 }
 0x800   : > { %v1899_v62 = vpop.xlane.xlu1 %1898 }
 0x802   : > { %v1902_v40 = vpop.xlane.xlu0 %1901 }
 0x803   : > { %9836 = vrcp.f32 %v1902_v40 }
 0x804   : > { %v1893_v16 = vpop.xlane.xlu1 %1892 }
 0x805   : > { %9838 = vrcp.f32 %v1893_v16 }
 0x806   : > { %9840 = vrcp.f32 %v1899_v62  ;;  %v1896_v37 = vpop.xlane.xlu0 %1895 }
 0x807   : > { %9842 = vrcp.f32 %v1896_v37 }
 0x808   : > { %v2029_v1 = vpop.permute.xlu1 %2028 }
 0x809   : > { %9324 = vmatprep.subr.msk.bf16.mxu1 %vm1097_vm10, %v2029_v1  ;;  %v2049_v13 = vsel %vm1097_vm10, %v2029_v1, 0 }
 0x80a   : > { %v1914_v15 = vpop.xlane.xlu0 %1913 }
 0x80d   : > { %v9837_v10 = vpop.eup %9836 }
 0x80e   : > { %v1926_v53 = vmul.f32 %v9837_v10, %v9825_v54  ;;  %v1908_v4 = vpop.xlane.xlu0 %1907 }
 0x80f   : > { %v9839_v34 = vpop.eup %9838 }
 0x810   : > { %v9841_v22 = vpop.eup %9840  ;;  %v1923_v50 = vmul.f32 %v9839_v34, %v9823_v29 }
 0x811   : > { %v9843_v36 = vpop.eup %9842  ;;  %v1925_v35 = vmul.f32 %v9841_v22, %v9821_v58 }
 0x812   : > { %v1924_v45 = vmul.f32 %v9843_v36, %v9827_v17  ;;  %v2031_v7 = vpop.permute.xlu0 %2030 }
 0x813   : > { %v1932_v55 = vpack.c.bf16 %v1926_v53, %v1925_v35  ;;  %v2052_v8 = vsel %vm1097_vm10, %v2031_v7, 0 }
 0x814   : > { %v1931_v14 = vpack.c.bf16 %v1924_v45, %v1923_v50 }
 0x816   : > { %8840 = vmatprep.mubr.msk.bf16.mxu1 %vm1321_vm15, %v1931_v14  ;;  %v2017_v16 = vpop.permute.xlu0 %2016 }
 0x817   : > { %8841 = vmatmul.mubr.msk.bf16.vlgmr.msra.gmra.mrb[16].mxu1 %vm1321_vm15, %v1932_v55 }
 0x818   : > { %8849 = vmatpush3.bf16.xpose.msra.mxu1 %v2049_v13 }
 0x819   : > { %9325 = vmatprep.subr.msk.bf16.mxu1 %vm1097_vm10, %v2031_v7 }
 0x81a   : > { %v2021_v1 = vpop.permute.xlu0 %2020 }
 0x820   : > { %8851 = vmatpush3.bf16.xpose.msra.mxu1 %v2052_v8 }
 0x839   : > { %v1911_v54 = vpop.xlane.xlu1 %1910 }
 0x83a   : > { %9844 = vrcp.f32 %v1911_v54 }
 0x83b   : > { %9846 = vrcp.f32 %v1908_v4 }
 0x83c   : > { %9848 = vrcp.f32 %v1914_v15 }
 0x83d   : > { %v1905_v58 = vpop.xlane.xlu1 %1904 }
 0x83e   : > { %9850 = vrcp.f32 %v1905_v58 }
 0x841   : > { %v2033_v29 = vpop.permute.xlu1 %2032 }
 0x842   : > { %9326 = vmatprep.subr.msk.bf16.mxu1 %vm1097_vm10, %v2033_v29  ;;  %v2055_v17 = vsel %vm1097_vm10, %v2033_v29, 0 }
 0x843   : > { %8853 = vmatpush3.bf16.xpose.msra.mxu1 %v2055_v17 }
 0x844   : > { %v9845_v9 = vpop.eup %9844 }
 0x845   : > { %v2035_v59 = vpop.permute.xlu1 %2034  ;;  %v9847_v26 = vpop.eup %9846  ;;  %v1929_v24 = vmul.f32 %v9845_v9, %v9833_v38 }
 0x846   : > { %9327 = vmatprep.subr.msk.bf16.mxu1 %vm1097_vm10, %v2035_v59  ;;  %v9849_v46 = vpop.eup %9848  ;;  %v1928_v32 = vmul.f32 %v9847_v26, %v11720_v3  ;;  %v2058_v11 = vsel %vm1097_vm10, %v2035_v59, 0 }
 0x847   : > { %v1930_v33 = vmul.f32 %v9849_v46, %v11716_v25 }
 0x848   : > { %v9851_v20 = vpop.eup %9850 }
 0x849   : > { %v1927_v21 = vmul.f32 %v9851_v20, %v9835_v0  ;;  %v1934_v40 = vpack.c.bf16 %v1930_v33, %v1929_v24  ;;  %v2019_v37 = vpop.permute.xlu1 %2018 }
 0x84b   : > { %8855 = vmatpush3.bf16.xpose.msra.mxu1 %v2058_v11  ;;  %v1933_v62 = vpack.c.bf16 %v1928_v32, %v1927_v21 }
 0x84d   : > { %8844 = vmatprep.mubr.msk.bf16.mxu1 %vm1321_vm15, %v1933_v62  ;;  %v2023_v3 = vpop.permute.xlu1 %2022 }
 0x84e   : > { %8845 = vmatmul.mubr.msk.bf16.gmra.mrb[20].mxu1 %vm1321_vm15, %v1934_v40 }
 0x84f   : > { %8856 = vmatprep.mubr.msk.bf16.mxu1 %vm1097_vm10, %v2017_v16 }
 0x856   : > { %8857 = vmatmul.mubr.msk.bf16.vlgmr.msra.gmra.mrb[24].mxu1 %vm1097_vm10, %v2019_v37 }
 0x857   : > { %8860 = vmatprep.mubr.msk.bf16.mxu1 %vm1097_vm10, %v2021_v1 }
 0x85e   : > { %8861 = vmatmul.mubr.msk.bf16.gmra.mrb[28].mxu1 %vm1097_vm10, %v2023_v3 }
 0x8ea   : > { %v11761_v25 = vpop.f32.mrb[16].mxu1 }
 0x8eb   : > { %14289 = vst [vmem:[#allocation22_spill] sm:$0xff] %v11761_v25  ;;  %v11763_v38 = vpop.f32.mrb[17].mxu1 }
 0x8ec   : > { %14290 = vst [vmem:[#allocation23_spill] sm:$0xff] %v11763_v38  ;;  %v11765_v0 = vpop.f32.mrb[18].mxu1 }
 0x8ed   : > { %14291 = vst [vmem:[#allocation24_spill] sm:$0xff] %v11765_v0  ;;  %v11767_v15 = vpop.f32.mrb[19].mxu1 }
 0x8ee   : > { %14292 = vst [vmem:[#allocation25_spill] sm:$0xff] %v11767_v15 }
 0x921   : > { %v11769_v10 = vpop.f32.mrb[20].mxu1 }
 0x922   : > { %14293 = vst [vmem:[#allocation26_spill] sm:$0xff] %v11769_v10  ;;  %v11771_v34 = vpop.f32.mrb[21].mxu1 }
 0x923   : > { %14294 = vst [vmem:[#allocation13_spill] sm:$0xff] %v11771_v34  ;;  %v11773_v22 = vpop.f32.mrb[22].mxu1 }
 0x924   : > { %14295 = vst [vmem:[#allocation14_spill] sm:$0xff] %v11773_v22  ;;  %v11775_v36 = vpop.f32.mrb[23].mxu1 }
 0x925   : > { %14296 = vst [vmem:[#allocation15_spill] sm:$0xff] %v11775_v36 }
 0x929   : > { %v8858_v53 = vpop.f32.mrb[24].mxu1 }
 0x92a   : > { %v2127_v4 = vmul.f32 0.35355338, %v8858_v53  ;;  %v2094_v50 = vpop.f32.mrb[25].mxu1 }
 0x92b   : > { %v8859_v45 = vpop.f32.mrb[26].mxu1  ;;  %v2125_v35 = vmul.f32 0.35355338, %v2094_v50 }
 0x92c   : > { %v2097_v14 = vpop.f32.mrb[27].mxu1  ;;  %v2139_v55 = vsel %vm1321_vm15, %v2127_v4, -inf  ;;  %v2128_v8 = vmul.f32 0.35355338, %v8859_v45 }
 0x92d   : > { %v2126_v13 = vmul.f32 0.35355338, %v2097_v14  ;;  %2140 = vmax.xlane.f32.xlu0 %v2139_v55  ;;  %v2133_v54 = vsel %vm1321_vm15, %v2125_v35, -inf }
 0x92e   : > { %v2142_v46 = vsel %vm1321_vm15, %v2128_v8, -inf }
 0x92f   : > { %v2136_v7 = vsel %vm1321_vm15, %v2126_v13, -inf }
 0x930   : > { %2137 = vmax.xlane.f32.xlu1 %v2136_v7 }
 0x931   : > { %2134 = vmax.xlane.f32.xlu0 %v2133_v54  ;;  %v8862_v58 = vpop.f32.mrb[28].mxu1 }
 0x932   : > { %v2131_v29 = vmul.f32 0.35355338, %v8862_v58  ;;  %v2110_v17 = vpop.f32.mrb[29].mxu1 }
 0x933   : > { %v8863_v9 = vpop.f32.mrb[30].mxu1  ;;  %v2129_v59 = vmul.f32 0.35355338, %v2110_v17 }
 0x934   : > { %v2113_v26 = vpop.f32.mrb[31].mxu1  ;;  %v2151_v20 = vsel %vm1321_vm15, %v2131_v29, -inf  ;;  %v2132_v32 = vmul.f32 0.35355338, %v8863_v9 }
 0x935   : > { %v11782_v24 = vmul.f32 0.35355338, %v2113_v26  ;;  %2143 = vmax.xlane.f32.xlu0 %v2142_v46  ;;  %2152 = vmax.xlane.f32.xlu1 %v2151_v20  ;;  %v2145_v11 = vsel %vm1321_vm15, %v2129_v59, -inf }
 0x936   : > { %v2154_v33 = vsel %vm1321_vm15, %v2132_v32, -inf }
 0x937   : > { %v2148_v21 = vsel %vm1321_vm15, %v11782_v24, -inf }
 0x939   : > { %2146 = vmax.xlane.f32.xlu1 %v2145_v11  ;;  %2149 = vmax.xlane.f32.xlu0 %v2148_v21 }
 0x93d   : > { %2155 = vmax.xlane.f32.xlu0 %v2154_v33 }
 0x94a   : > { %2229 = vrot.lane.b32.xlu1 %v11675_v51, %s10487_s22 }
 0x94e   : > { %2233 = vrot.lane.b32.xlu1 %v11687_v57, %s10487_s22 }
 0x952   : > { %2235 = vrot.lane.b32.xlu1 %v11684_v56, %s10487_s22 }
 0x953   : > { %2231 = vrot.lane.b32.xlu0 %v11673_v19, %s10487_s22 }
 0x956   : > { %2326 = vrot.lane.b32.xlu1 %v11651_v61, %s10492_s17 }
 0x9ba   : > { %v2141_v62 = vpop.xlane.xlu0 %2140 }
 0x9bb   : > { %v2159_v40 = vsub.f32 %v2127_v4, %v2141_v62 }
 0x9bd   : > { %v2169_v16 = vmul.f32 1.442695, %v2159_v40  ;;  %v2138_v37 = vpop.xlane.xlu1 %2137 }
 0x9be   : > { %v2135_v1 = vpop.xlane.xlu0 %2134  ;;  %v2158_v53 = vsub.f32 %v2126_v13, %v2138_v37 }
 0x9bf   : > { %9852 = vpow2.f32 %v2169_v16  ;;  %v2157_v3 = vsub.f32 %v2125_v35, %v2135_v1 }
 0x9c0   : > { %v2167_v7 = vmul.f32 1.442695, %v2158_v53 }
 0x9c1   : > { %v2165_v50 = vmul.f32 1.442695, %v2157_v3 }
 0x9c2   : > { %v2144_v45 = vpop.xlane.xlu0 %2143  ;;  %v2153_v14 = vpop.xlane.xlu1 %2152 }
 0x9c3   : > { %9854 = vpow2.f32 %v2165_v50  ;;  %v2160_v55 = vsub.f32 %v2128_v8, %v2144_v45  ;;  %v2163_v58 = vsub.f32 %v2131_v29, %v2153_v14 }
 0x9c5   : > { %v2171_v54 = vmul.f32 1.442695, %v2160_v55  ;;  %v2177_v4 = vmul.f32 1.442695, %v2163_v58 }
 0x9c6   : > { %v2147_v17 = vpop.xlane.xlu1 %2146  ;;  %v2150_v9 = vpop.xlane.xlu0 %2149 }
 0x9c7   : > { %9856 = vpow2.f32 %v2171_v54  ;;  %v2161_v46 = vsub.f32 %v2129_v59, %v2147_v17  ;;  %v2162_v54 = vsub.f32 %v11782_v24, %v2150_v9 }
 0x9c8   : > { %9858 = vpow2.f32 %v2167_v7 }
 0x9c9   : > { %v11798_v26 = vpop.eup %9852  ;;  %9860 = vpow2.f32 %v2177_v4  ;;  %v2173_v8 = vmul.f32 1.442695, %v2161_v46  ;;  %v2175_v58 = vmul.f32 1.442695, %v2162_v54 }
 0x9ca   : > { %v2230_v20 = vpop.permute.xlu1 %2229  ;;  %v2156_v21 = vpop.xlane.xlu0 %2155  ;;  %v2187_v35 = vsel %vm1321_vm15, %v11798_v26, 0.0 }
 0x9cb   : > { %2188 = vadd.xlane.f32.xlu1 %v2187_v35  ;;  %8864 = vmatprep.subr.bf16.mxu0 %v2230_v20  ;;  %v2164_v29 = vsub.f32 %v2132_v32, %v2156_v21  ;;  %9862 = vpow2.f32 %v2173_v8 }
 0x9cc   : > { %8865 = vmatpush3.bf16.msra.mxu0 %v2230_v20 }
 0x9cd   : > { %v11802_v13 = vpop.eup %9854  ;;  %v2179_v40 = vmul.f32 1.442695, %v2164_v29 }
 0x9ce   : > { %v2234_v11 = vpop.permute.xlu1 %2233  ;;  %v2232_v33 = vpop.permute.xlu0 %2231  ;;  %v2181_v62 = vsel %vm1321_vm15, %v11802_v13, 0.0 }
 0x9cf   : > { %2182 = vadd.xlane.f32.xlu1 %v2181_v62  ;;  %8866 = vmatprep.subr.bf16.mxu0 %v2232_v33  ;;  %9864 = vpow2.f32 %v2179_v40 }
 0x9d0   : > { %8867 = vmatpush3.bf16.msra.mxu0 %v2232_v33  ;;  %9866 = vpow2.f32 %v2175_v58 }
 0x9d1   : > { %v9857_v59 = vpop.eup %9856  ;;  %8868 = vmatprep.subr.bf16.mxu0 %v2234_v11 }
 0x9d2   : > { %v2236_v16 = vpop.permute.xlu1 %2235  ;;  %v2190_v37 = vsel %vm1321_vm15, %v9857_v59, 0.0  ;;  %v9859_v1 = vpop.eup %9858 }
 0x9d3   : > { %2191 = vadd.xlane.f32.xlu0 %v2190_v37  ;;  %v2184_v32 = vsel %vm1321_vm15, %v9859_v1, 0.0  ;;  %v11808_v3 = vpop.eup %9860 }
 0x9d4   : > { %8869 = vmatpush3.bf16.msra.mxu0 %v2234_v11  ;;  %v2199_v50 = vsel %vm1321_vm15, %v11808_v3, 0.0 }
 0x9d5   : > { %8870 = vmatprep.subr.bf16.mxu0 %v2236_v16  ;;  %v11813_v45 = vpop.eup %9862 }
 0x9d6   : > { %v2327_v53 = vpop.permute.xlu1 %2326  ;;  %v2193_v14 = vsel %vm1321_vm15, %v11813_v45, 0.0 }
 0x9d7   : > { %2185 = vadd.xlane.f32.xlu0 %v2184_v32  ;;  %v2347_v54 = vsel %vm1097_vm10, %v2327_v53, 0 }
 0x9d8   : > { %8871 = vmatpush3.bf16.msra.mxu0 %v2236_v16 }
 0x9d9   : > { %9328 = vmatprep.subr.msk.bf16.mxu0 %vm1097_vm10, %v2327_v53  ;;  %v11817_v55 = vpop.eup %9864 }
 0x9da   : > { %v2202_v7 = vsel %vm1321_vm15, %v11817_v55, 0.0  ;;  %v9867_v17 = vpop.eup %9866 }
 0x9db   : > { %2200 = vadd.xlane.f32.xlu0 %v2199_v50  ;;  %v2196_v4 = vsel %vm1321_vm15, %v9867_v17, 0.0 }
 0x9df   : > { %2194 = vadd.xlane.f32.xlu0 %v2193_v14 }
 0x9e0   : > { %2330 = vrot.lane.b32.xlu1 %v11667_v5, %s10492_s17 }
 0x9e3   : > { %2203 = vadd.xlane.f32.xlu0 %v2202_v7 }
 0x9f9   : > { %2328 = vrot.lane.b32.xlu0 %v11647_v18, %s10492_s17 }
 0x9fd   : > { %2318 = vrot.lane.b32.xlu0 %v11649_v48, %s10492_s17 }
 0xa01   : > { %2322 = vrot.lane.b32.xlu0 %v11665_v63, %s10492_s17 }
 0xa04   : > { %2197 = vadd.xlane.f32.xlu1 %v2196_v4 }
 0xa15   : > { %2332 = vrot.lane.b32.xlu1 %v11663_v49, %s10492_s17 }
 0xa19   : > { %2320 = vrot.lane.b32.xlu1 %v11645_v39, %s10492_s17 }
 0xa1d   : > { %2324 = vrot.lane.b32.xlu1 %v11661_v23, %s10492_s17 }
 0xa58   : > { %v2189_v24 = vpop.xlane.xlu1 %2188 }
 0xa5c   : > { %v2183_v9 = vpop.xlane.xlu1 %2182 }
 0xa60   : > { %v2192_v46 = vpop.xlane.xlu0 %2191  ;;  %v2331_v58 = vpop.permute.xlu1 %2330 }
 0xa61   : > { %9868 = vrcp.f32 %v2192_v46 }
 0xa62   : > { %9870 = vrcp.f32 %v2183_v9 }
 0xa63   : > { %9872 = vrcp.f32 %v2189_v24 }
 0xa64   : > { %v2186_v20 = vpop.xlane.xlu0 %2185 }
 0xa65   : > { %9874 = vrcp.f32 %v2186_v20 }
 0xa68   : > { %v2201_v21 = vpop.xlane.xlu0 %2200 }
 0xa6b   : > { %v9869_v35 = vpop.eup %9868 }
 0xa6c   : > { %v2195_v8 = vpop.xlane.xlu0 %2194  ;;  %v9871_v29 = vpop.eup %9870  ;;  %v2216_v62 = vmul.f32 %v9869_v35, %v9857_v59 }
 0xa6d   : > { %v9873_v11 = vpop.eup %9872  ;;  %v2213_v16 = vmul.f32 %v9871_v29, %v11802_v13 }
 0xa6e   : > { %v2215_v32 = vmul.f32 %v9873_v11, %v11798_v26  ;;  %v2353_v26 = vsel %vm1097_vm10, %v2331_v58, 0 }
 0xa6f   : > { %v9875_v33 = vpop.eup %9874 }
 0xa70   : > { %v2204_v40 = vpop.xlane.xlu0 %2203  ;;  %v2214_v37 = vmul.f32 %v9875_v33, %v9859_v1  ;;  %v2222_v14 = vpack.c.bf16 %v2216_v62, %v2215_v32 }
 0xa71   : > { %9876 = vrcp.f32 %v2204_v40 }
 0xa72   : > { %v2221_v50 = vpack.c.bf16 %v2214_v37, %v2213_v16  ;;  %9878 = vrcp.f32 %v2195_v8 }
 0xa73   : > { %9880 = vrcp.f32 %v2201_v21 }
 0xa74   : > { %8872 = vmatprep.mubr.msk.bf16.mxu0 %vm1321_vm15, %v2221_v50  ;;  %v2329_v7 = vpop.permute.xlu0 %2328 }
 0xa75   : > { %8873 = vmatmul.mubr.msk.bf16.vlgmr.msra.gmra.mrb[24].mxu0 %vm1321_vm15, %v2222_v14  ;;  %v2350_v59 = vsel %vm1097_vm10, %v2329_v7, 0 }
 0xa76   : > { %8881 = vmatpush3.bf16.xpose.msra.mxu0 %v2347_v54 }
 0xa77   : > { %9329 = vmatprep.subr.msk.bf16.mxu0 %vm1097_vm10, %v2329_v7 }
 0xa78   : > { %v2319_v33 = vpop.permute.xlu0 %2318 }
 0xa7b   : > { %v9877_v4 = vpop.eup %9876 }
 0xa7c   : > { %v9879_v24 = vpop.eup %9878  ;;  %v2220_v20 = vmul.f32 %v9877_v4, %v11817_v55  ;;  %v2323_v40 = vpop.permute.xlu0 %2322 }
 0xa7d   : > { %v9881_v9 = vpop.eup %9880  ;;  %v2217_v35 = vmul.f32 %v9879_v24, %v11813_v45 }
 0xa7e   : > { %8883 = vmatpush3.bf16.xpose.msra.mxu0 %v2350_v59  ;;  %v2219_v8 = vmul.f32 %v9881_v9, %v11808_v3 }
 0xa7f   : > { %9330 = vmatprep.subr.msk.bf16.mxu0 %vm1097_vm10, %v2331_v58 }
 0xa80   : > { %v2224_v11 = vpack.c.bf16 %v2220_v20, %v2219_v8 }
 0xa86   : > { %8885 = vmatpush3.bf16.xpose.msra.mxu0 %v2353_v26 }
 0xa91   : > { %v2198_v13 = vpop.xlane.xlu1 %2197 }
 0xa92   : > { %9882 = vrcp.f32 %v2198_v13 }
 0xa95   : > { %v2333_v1 = vpop.permute.xlu1 %2332 }
 0xa96   : > { %9331 = vmatprep.subr.msk.bf16.mxu0 %vm1097_vm10, %v2333_v1  ;;  %v2356_v53 = vsel %vm1097_vm10, %v2333_v1, 0 }
 0xa97   : > { %8887 = vmatpush3.bf16.xpose.msra.mxu0 %v2356_v53 }
 0xa99   : > { %v2321_v62 = vpop.permute.xlu1 %2320 }
 0xa9c   : > { %v9883_v46 = vpop.eup %9882 }
 0xa9d   : > { %v2218_v29 = vmul.f32 %v9883_v46, %v9867_v17  ;;  %v2325_v55 = vpop.permute.xlu1 %2324 }
 0xa9f   : > { %v2223_v21 = vpack.c.bf16 %v2218_v29, %v2217_v35 }
 0xaa1   : > { %8876 = vmatprep.mubr.msk.bf16.mxu0 %vm1321_vm15, %v2223_v21 }
 0xaa2   : > { %8877 = vmatmul.mubr.msk.bf16.gmra.mrb[28].mxu0 %vm1321_vm15, %v2224_v11 }
 0xaa3   : > { %8888 = vmatprep.mubr.msk.bf16.mxu0 %vm1097_vm10, %v2319_v33 }
 0xaaa   : > { %8889 = vmatmul.mubr.msk.bf16.vlgmr.msra.gmra.mrb[32].mxu0 %vm1097_vm10, %v2321_v62 }
 0xaab   : > { %8892 = vmatprep.mubr.msk.bf16.mxu0 %vm1097_vm10, %v2323_v40 }
 0xab2   : > { %8893 = vmatmul.mubr.msk.bf16.gmra.mrb[36].mxu0 %vm1097_vm10, %v2325_v55 }
 0xb48   : > { %v11857_v45 = vpop.f32.mrb[24].mxu0 }
 0xb49   : > { %v11859_v3 = vpop.f32.mrb[25].mxu0 }
 0xb4a   : > { %v11861_v17 = vpop.f32.mrb[26].mxu0 }
 0xb4b   : > { %v11865_v37 = vpop.f32.mrb[27].mxu0 }
 0xb75   : > { %v11869_v50 = vpop.f32.mrb[28].mxu0 }
 0xb76   : > { %v11871_v14 = vpop.f32.mrb[29].mxu0 }
 0xb77   : > { %v11873_v7 = vpop.f32.mrb[30].mxu0 }
 0xb78   : > { %v11877_v59 = vpop.f32.mrb[31].mxu0 }
 0xb7d   : > { %v8890_v26 = vpop.f32.mrb[32].mxu0 }
 0xb7e   : > { %v2425_v13 = vmul.f32 0.35355338, %v8890_v26  ;;  %v2392_v1 = vpop.f32.mrb[33].mxu0 }
 0xb7f   : > { %v8891_v53 = vpop.f32.mrb[34].mxu0  ;;  %v2423_v4 = vmul.f32 0.35355338, %v2392_v1 }
 0xb80   : > { %v2395_v24 = vpop.f32.mrb[35].mxu0  ;;  %v2437_v9 = vsel %vm1321_vm15, %v2425_v13, -inf  ;;  %v2426_v35 = vmul.f32 0.35355338, %v8891_v53 }
 0xb81   : > { %v2424_v46 = vmul.f32 0.35355338, %v2395_v24  ;;  %2438 = vmax.xlane.f32.xlu0 %v2437_v9  ;;  %v2431_v29 = vsel %vm1321_vm15, %v2423_v4, -inf }
 0xb82   : > { %v2440_v55 = vsel %vm1321_vm15, %v2426_v35, -inf }
 0xb83   : > { %v2434_v20 = vsel %vm1321_vm15, %v2424_v46, -inf }
 0xb84   : > { %2435 = vmax.xlane.f32.xlu1 %v2434_v20 }
 0xb85   : > { %2432 = vmax.xlane.f32.xlu0 %v2431_v29  ;;  %v8894_v8 = vpop.f32.mrb[36].mxu0 }
 0xb86   : > { %v2429_v21 = vmul.f32 0.35355338, %v8894_v8  ;;  %v2408_v11 = vpop.f32.mrb[37].mxu0 }
 0xb87   : > { %v8895_v33 = vpop.f32.mrb[38].mxu0  ;;  %v2427_v62 = vmul.f32 0.35355338, %v2408_v11 }
 0xb88   : > { %v2411_v40 = vpop.f32.mrb[39].mxu0  ;;  %v2449_v26 = vsel %vm1321_vm15, %v2429_v21, -inf  ;;  %v2430_v24 = vmul.f32 0.35355338, %v8895_v33 }
 0xb89   : > { %v11886_v1 = vmul.f32 0.35355338, %v2411_v40  ;;  %2441 = vmax.xlane.f32.xlu0 %v2440_v55  ;;  %2450 = vmax.xlane.f32.xlu1 %v2449_v26  ;;  %v2443_v9 = vsel %vm1321_vm15, %v2427_v62, -inf }
 0xb8a   : > { %v2452_v20 = vsel %vm1321_vm15, %v2430_v24, -inf }
 0xb8b   : > { %v2446_v53 = vsel %vm1321_vm15, %v11886_v1, -inf }
 0xb8d   : > { %2444 = vmax.xlane.f32.xlu1 %v2443_v9  ;;  %2447 = vmax.xlane.f32.xlu0 %v2446_v53 }
 0xb91   : > { %2453 = vmax.xlane.f32.xlu0 %v2452_v20 }
 0xb9e   : > { %2523 = vrot.lane.b32.xlu1 %v11675_v51, %s10492_s17 }
 0xba2   : > { %2527 = vrot.lane.b32.xlu1 %v11687_v57, %s10492_s17 }
 0xba6   : > { %2529 = vrot.lane.b32.xlu1 %v11684_v56, %s10492_s17 }
 0xba7   : > { %2525 = vrot.lane.b32.xlu0 %v11673_v19, %s10492_s17 }
 0xbaa   : > { %2620 = vrot.lane.b32.xlu1 %v11651_v61, %s10493_s30 }
 0xc0e   : > { %v2439_v29 = vpop.xlane.xlu0 %2438 }
 0xc0f   : > { %v2457_v8 = vsub.f32 %v2425_v13, %v2439_v29 }
 0xc11   : > { %v2467_v11 = vmul.f32 1.442695, %v2457_v8  ;;  %v2436_v33 = vpop.xlane.xlu1 %2435 }
 0xc12   : > { %v2433_v40 = vpop.xlane.xlu0 %2432  ;;  %v2456_v53 = vsub.f32 %v2424_v46, %v2436_v33 }
 0xc13   : > { %9884 = vpow2.f32 %v2467_v11  ;;  %v2455_v55 = vsub.f32 %v2423_v4, %v2433_v40 }
 0xc14   : > { %v2465_v42 = vmul.f32 1.442695, %v2456_v53 }
 0xc15   : > { %v2463_v26 = vmul.f32 1.442695, %v2455_v55 }
 0xc16   : > { %v2451_v9 = vpop.xlane.xlu1 %2450  ;;  %v2442_v20 = vpop.xlane.xlu0 %2441 }
 0xc17   : > { %9886 = vpow2.f32 %v2463_v26  ;;  %v2458_v44 = vsub.f32 %v2426_v35, %v2442_v20  ;;  %v2461_v43 = vsub.f32 %v2429_v21, %v2451_v9 }
 0xc19   : > { %v2469_v6 = vmul.f32 1.442695, %v2458_v44  ;;  %v2475_v13 = vmul.f32 1.442695, %v2461_v43 }
 0xc1a   : > { %v2445_v58 = vpop.xlane.xlu1 %2444  ;;  %v2448_v54 = vpop.xlane.xlu0 %2447 }
 0xc1b   : > { %9888 = vpow2.f32 %v2469_v6  ;;  %v2459_v29 = vsub.f32 %v2427_v62, %v2445_v58 }
 0xc1c   : > { %9890 = vpow2.f32 %v2465_v42 }
 0xc1d   : > { %v11902_v32 = vpop.eup %9884  ;;  %9892 = vpow2.f32 %v2475_v13  ;;  %v2471_v44 = vmul.f32 1.442695, %v2459_v29 }
 0xc1e   : > { %v2524_v8 = vpop.permute.xlu1 %2523  ;;  %v2454_v11 = vpop.xlane.xlu0 %2453  ;;  %v2485_v4 = vsel %vm1321_vm15, %v11902_v32, 0.0 }
 0xc1f   : > { %8896 = vmatprep.subr.bf16.mxu1 %v2524_v8  ;;  %2486 = vadd.xlane.f32.xlu1 %v2485_v4  ;;  %v2462_v35 = vsub.f32 %v2430_v24, %v2454_v11  ;;  %9894 = vpow2.f32 %v2471_v44 }
 0xc20   : > { %8897 = vmatpush3.bf16.msra.mxu1 %v2524_v8  ;;  %v2460_v8 = vsub.f32 %v11886_v1, %v2448_v54 }
 0xc21   : > { %v11906_v46 = vpop.eup %9886  ;;  %v2477_v58 = vmul.f32 1.442695, %v2462_v35 }
 0xc22   : > { %v2528_v21 = vpop.permute.xlu1 %2527  ;;  %v2526_v6 = vpop.permute.xlu0 %2525  ;;  %v2479_v42 = vsel %vm1321_vm15, %v11906_v46, 0.0  ;;  %v2473_v11 = vmul.f32 1.442695, %v2460_v8 }
 0xc23   : > { %2480 = vadd.xlane.f32.xlu1 %v2479_v42  ;;  %8898 = vmatprep.subr.bf16.mxu1 %v2526_v6  ;;  %9896 = vpow2.f32 %v2477_v58 }
 0xc24   : > { %8899 = vmatpush3.bf16.msra.mxu1 %v2526_v6  ;;  %9898 = vpow2.f32 %v2473_v11 }
 0xc25   : > { %8900 = vmatprep.subr.bf16.mxu1 %v2528_v21  ;;  %v9889_v43 = vpop.eup %9888 }
 0xc26   : > { %v2530_v62 = vpop.permute.xlu1 %2529  ;;  %v2488_v33 = vsel %vm1321_vm15, %v9889_v43, 0.0  ;;  %v9891_v40 = vpop.eup %9890 }
 0xc27   : > { %2489 = vadd.xlane.f32.xlu0 %v2488_v33  ;;  %v2482_v24 = vsel %vm1321_vm15, %v9891_v40, 0.0  ;;  %v11912_v55 = vpop.eup %9892 }
 0xc28   : > { %8901 = vmatpush3.bf16.msra.mxu1 %v2528_v21  ;;  %v2497_v53 = vsel %vm1321_vm15, %v11912_v55, 0.0 }
 0xc29   : > { %8902 = vmatprep.subr.bf16.mxu1 %v2530_v62  ;;  %v11917_v9 = vpop.eup %9894 }
 0xc2a   : > { %v2621_v26 = vpop.permute.xlu1 %2620  ;;  %v2491_v20 = vsel %vm1321_vm15, %v11917_v9, 0.0 }
 0xc2b   : > { %2483 = vadd.xlane.f32.xlu0 %v2482_v24 }
 0xc2c   : > { %8903 = vmatpush3.bf16.msra.mxu1 %v2530_v62 }
 0xc2d   : > { %9332 = vmatprep.subr.msk.bf16.mxu1 %vm1097_vm10, %v2621_v26  ;;  %v11921_v13 = vpop.eup %9896 }
 0xc2e   : > { %v2500_v29 = vsel %vm1321_vm15, %v11921_v13, 0.0  ;;  %v9899_v4 = vpop.eup %9898 }
 0xc2f   : > { %2498 = vadd.xlane.f32.xlu0 %v2497_v53  ;;  %v2494_v44 = vsel %vm1321_vm15, %v9899_v4, 0.0 }
 0xc33   : > { %2492 = vadd.xlane.f32.xlu0 %v2491_v20 }
 0xc34   : > { %2624 = vrot.lane.b32.xlu1 %v11667_v5, %s10493_s30 }
 0xc37   : > { %2501 = vadd.xlane.f32.xlu0 %v2500_v29 }
 0xc4d   : > { %2622 = vrot.lane.b32.xlu0 %v11647_v18, %s10493_s30 }
 0xc51   : > { %2612 = vrot.lane.b32.xlu0 %v11649_v48, %s10493_s30 }
 0xc55   : > { %2616 = vrot.lane.b32.xlu0 %v11665_v63, %s10493_s30 }
 0xc58   : > { %2495 = vadd.xlane.f32.xlu1 %v2494_v44 }
 0xc69   : > { %2626 = vrot.lane.b32.xlu1 %v11663_v49, %s10493_s30 }
 0xc6d   : > { %2614 = vrot.lane.b32.xlu1 %v11645_v39, %s10493_s30 }
 0xc71   : > { %2618 = vrot.lane.b32.xlu1 %v11661_v23, %s10493_s30 }
 0xcac   : > { %v2487_v54 = vpop.xlane.xlu1 %2486 }
 0xcb0   : > { %v2481_v1 = vpop.xlane.xlu1 %2480 }
 0xcb4   : > { %v2490_v35 = vpop.xlane.xlu0 %2489 }
 0xcb5   : > { %9900 = vrcp.f32 %v2490_v35  ;;  %v2625_v35 = vpop.permute.xlu1 %2624 }
 0xcb6   : > { %9902 = vrcp.f32 %v2481_v1  ;;  %v2641_v1 = vsel %vm1097_vm10, %v2621_v26, 0 }
 0xcb7   : > { %9904 = vrcp.f32 %v2487_v54 }
 0xcb8   : > { %v2484_v21 = vpop.xlane.xlu0 %2483 }
 0xcb9   : > { %9906 = vrcp.f32 %v2484_v21 }
 0xcbc   : > { %v2499_v6 = vpop.xlane.xlu0 %2498 }
 0xcbf   : > { %v9901_v42 = vpop.eup %9900 }
 0xcc0   : > { %v2493_v58 = vpop.xlane.xlu0 %2492  ;;  %v9903_v62 = vpop.eup %9902  ;;  %v2514_v53 = vmul.f32 %v9901_v42, %v9889_v43 }
 0xcc1   : > { %v9905_v33 = vpop.eup %9904  ;;  %v2511_v29 = vmul.f32 %v9903_v62, %v11906_v46 }
 0xcc2   : > { %v2513_v11 = vmul.f32 %v9905_v33, %v11902_v32  ;;  %v2647_v32 = vsel %vm1097_vm10, %v2625_v35, 0 }
 0xcc3   : > { %v9907_v24 = vpop.eup %9906 }
 0xcc4   : > { %v2502_v20 = vpop.xlane.xlu0 %2501  ;;  %v2512_v8 = vmul.f32 %v9907_v24, %v9891_v40  ;;  %v2520_v16 = vpack.c.bf16 %v2514_v53, %v2513_v11 }
 0xcc5   : > { %9908 = vrcp.f32 %v2502_v20 }
 0xcc6   : > { %v2519_v44 = vpack.c.bf16 %v2512_v8, %v2511_v29  ;;  %9910 = vrcp.f32 %v2493_v58 }
 0xcc7   : > { %9912 = vrcp.f32 %v2499_v6 }
 0xcc8   : > { %8904 = vmatprep.mubr.msk.bf16.mxu1 %vm1321_vm15, %v2519_v44  ;;  %v2623_v54 = vpop.permute.xlu0 %2622 }
 0xcc9   : > { %8905 = vmatmul.mubr.msk.bf16.vlgmr.msra.gmra.mrb[32].mxu1 %vm1321_vm15, %v2520_v16  ;;  %v2644_v43 = vsel %vm1097_vm10, %v2623_v54, 0 }
 0xcca   : > { %8913 = vmatpush3.bf16.xpose.msra.mxu1 %v2641_v1 }
 0xccb   : > { %9333 = vmatprep.subr.msk.bf16.mxu1 %vm1097_vm10, %v2623_v54 }
 0xccc   : > { %v2613_v29 = vpop.permute.xlu0 %2612 }
 0xccf   : > { %v9909_v26 = vpop.eup %9908 }
 0xcd0   : > { %v9911_v21 = vpop.eup %9910  ;;  %v2518_v33 = vmul.f32 %v9909_v26, %v11921_v13  ;;  %v2617_v11 = vpop.permute.xlu0 %2616 }
 0xcd1   : > { %v9913_v42 = vpop.eup %9912  ;;  %v2515_v24 = vmul.f32 %v9911_v21, %v11917_v9 }
 0xcd2   : > { %8915 = vmatpush3.bf16.xpose.msra.mxu1 %v2644_v43  ;;  %v2517_v58 = vmul.f32 %v9913_v42, %v11912_v55 }
 0xcd3   : > { %9334 = vmatprep.subr.msk.bf16.mxu1 %vm1097_vm10, %v2625_v35 }
 0xcd4   : > { %v2522_v20 = vpack.c.bf16 %v2518_v33, %v2517_v58 }
 0xcda   : > { %8917 = vmatpush3.bf16.xpose.msra.mxu1 %v2647_v32 }
 0xce5   : > { %v2496_v46 = vpop.xlane.xlu1 %2495 }
 0xce6   : > { %9914 = vrcp.f32 %v2496_v46 }
 0xce9   : > { %v2627_v16 = vpop.permute.xlu1 %2626 }
 0xcea   : > { %9335 = vmatprep.subr.msk.bf16.mxu1 %vm1097_vm10, %v2627_v16  ;;  %v2650_v40 = vsel %vm1097_vm10, %v2627_v16, 0 }
 0xceb   : > { %8919 = vmatpush3.bf16.xpose.msra.mxu1 %v2650_v40 }
 0xced   : > { %v2615_v8 = vpop.permute.xlu1 %2614 }
 0xcf0   : > { %v9915_v62 = vpop.eup %9914 }
 0xcf1   : > { %v2516_v53 = vmul.f32 %v9915_v62, %v9899_v4  ;;  %v2619_v13 = vpop.permute.xlu1 %2618 }
 0xcf3   : > { %v2521_v6 = vpack.c.bf16 %v2516_v53, %v2515_v24 }
 0xcf5   : > { %8908 = vmatprep.mubr.msk.bf16.mxu1 %vm1321_vm15, %v2521_v6 }
 0xcf6   : > { %8909 = vmatmul.mubr.msk.bf16.gmra.mrb[36].mxu1 %vm1321_vm15, %v2522_v20 }
 0xcf7   : > { %8920 = vmatprep.mubr.msk.bf16.mxu1 %vm1097_vm10, %v2613_v29 }
 0xcfe   : > { %8921 = vmatmul.mubr.msk.bf16.vlgmr.msra.gmra.mrb[40].mxu1 %vm1097_vm10, %v2615_v8 }
 0xcff   : > { %8924 = vmatprep.mubr.msk.bf16.mxu1 %vm1097_vm10, %v2617_v11 }
 0xd06   : > { %8925 = vmatmul.mubr.msk.bf16.gmra.mrb[44].mxu1 %vm1097_vm10, %v2619_v13 }
 0xd9c   : > { %v11961_v9 = vpop.f32.mrb[32].mxu1 }
 0xd9d   : > { %v11963_v55 = vpop.f32.mrb[33].mxu1 }
 0xd9e   : > { %v11965_v4 = vpop.f32.mrb[34].mxu1 }
 0xd9f   : > { %v11969_v54 = vpop.f32.mrb[35].mxu1 }
 0xdc9   : > { %v11973_v43 = vpop.f32.mrb[36].mxu1 }
 0xdca   : > { %v11975_v35 = vpop.f32.mrb[37].mxu1 }
 0xdcb   : > { %14297 = vst [vmem:[#allocation16_spill] sm:$0xff] %v11975_v35  ;;  %v11977_v32 = vpop.f32.mrb[38].mxu1 }
 0xdcc   : > { %v11981_v16 = vpop.f32.mrb[39].mxu1 }
 0xdcd   : > { %14298 = vst [vmem:[#allocation27_spill] sm:$0xff] %v11981_v16 }
 0xdd1   : > { %v8922_v26 = vpop.f32.mrb[40].mxu1 }
 0xdd2   : > { %v2719_v21 = vmul.f32 0.35355338, %v8922_v26  ;;  %v2686_v42 = vpop.f32.mrb[41].mxu1 }
 0xdd3   : > { %v8923_v62 = vpop.f32.mrb[42].mxu1  ;;  %v2717_v33 = vmul.f32 0.35355338, %v2686_v42 }
 0xdd4   : > { %v2689_v24 = vpop.f32.mrb[43].mxu1  ;;  %v2731_v53 = vsel %vm1321_vm15, %v2719_v21, -inf  ;;  %v2720_v20 = vmul.f32 0.35355338, %v8923_v62 }
 0xdd5   : > { %v2718_v58 = vmul.f32 0.35355338, %v2689_v24  ;;  %2732 = vmax.xlane.f32.xlu0 %v2731_v53  ;;  %v2725_v29 = vsel %vm1321_vm15, %v2717_v33, -inf }
 0xdd6   : > { %v2734_v42 = vsel %vm1321_vm15, %v2720_v20, -inf }
 0xdd7   : > { %v2728_v6 = vsel %vm1321_vm15, %v2718_v58, -inf }
 0xdd8   : > { %2729 = vmax.xlane.f32.xlu1 %v2728_v6 }
 0xdd9   : > { %2726 = vmax.xlane.f32.xlu0 %v2725_v29  ;;  %v8926_v8 = vpop.f32.mrb[44].mxu1 }
 0xdda   : > { %v2723_v11 = vmul.f32 0.35355338, %v8926_v8  ;;  %v2702_v13 = vpop.f32.mrb[45].mxu1 }
 0xddb   : > { %v8927_v40 = vpop.f32.mrb[46].mxu1  ;;  %v2721_v26 = vmul.f32 0.35355338, %v2702_v13 }
 0xddc   : > { %v2705_v46 = vpop.f32.mrb[47].mxu1  ;;  %v2743_v1 = vsel %vm1321_vm15, %v2723_v11, -inf  ;;  %v2724_v24 = vmul.f32 0.35355338, %v8927_v40 }
 0xddd   : > { %v11990_v44 = vmul.f32 0.35355338, %v2705_v46  ;;  %2735 = vmax.xlane.f32.xlu0 %v2734_v42  ;;  %2744 = vmax.xlane.f32.xlu1 %v2743_v1  ;;  %v2737_v53 = vsel %vm1321_vm15, %v2721_v26, -inf }
 0xdde   : > { %v2746_v6 = vsel %vm1321_vm15, %v2724_v24, -inf }
 0xddf   : > { %v2740_v62 = vsel %vm1321_vm15, %v11990_v44, -inf }
 0xde1   : > { %2738 = vmax.xlane.f32.xlu1 %v2737_v53  ;;  %2741 = vmax.xlane.f32.xlu0 %v2740_v62 }
 0xde5   : > { %2747 = vmax.xlane.f32.xlu0 %v2746_v6 }
 0xdf2   : > { %2817 = vrot.lane.b32.xlu1 %v11675_v51, %s10493_s30 }
 0xdf6   : > { %2821 = vrot.lane.b32.xlu1 %v11687_v57, %s10493_s30 }
 0xdfa   : > { %2823 = vrot.lane.b32.xlu1 %v11684_v56, %s10493_s30 }
 0xdfb   : > { %2819 = vrot.lane.b32.xlu0 %v11673_v19, %s10493_s30 }
 0xdfe   : > { %2914 = vrot.lane.b32.xlu1 %v11651_v61, %s10494_s19 }
 0xe62   : > { %v2733_v1 = vpop.xlane.xlu0 %2732 }
 0xe63   : > { %v2751_v46 = vsub.f32 %v2719_v21, %v2733_v1 }
 0xe65   : > { %v2761_v40 = vmul.f32 1.442695, %v2751_v46  ;;  %v2730_v29 = vpop.xlane.xlu1 %2729 }
 0xe66   : > { %v2727_v8 = vpop.xlane.xlu0 %2726  ;;  %v2750_v62 = vsub.f32 %v2718_v58, %v2730_v29 }
 0xe67   : > { %9916 = vpow2.f32 %v2761_v40  ;;  %v2749_v13 = vsub.f32 %v2717_v33, %v2727_v8 }
 0xe68   : > { %v2759_v52 = vmul.f32 1.442695, %v2750_v62 }
 0xe69   : > { %v2757_v42 = vmul.f32 1.442695, %v2749_v13 }
 0xe6a   : > { %v2745_v53 = vpop.xlane.xlu1 %2744  ;;  %v2736_v6 = vpop.xlane.xlu0 %2735 }
 0xe6b   : > { %9918 = vpow2.f32 %v2757_v42  ;;  %v2752_v12 = vsub.f32 %v2720_v20, %v2736_v6  ;;  %v2755_v2 = vsub.f32 %v2723_v11, %v2745_v53 }
 0xe6d   : > { %v2763_v28 = vmul.f32 1.442695, %v2752_v12  ;;  %v2769_v21 = vmul.f32 1.442695, %v2755_v2 }
 0xe6e   : > { %v2739_v60 = vpop.xlane.xlu1 %2738  ;;  %v2742_v31 = vpop.xlane.xlu0 %2741 }
 0xe6f   : > { %9920 = vpow2.f32 %v2763_v28  ;;  %v2753_v1 = vsub.f32 %v2721_v26, %v2739_v60 }
 0xe70   : > { %9922 = vpow2.f32 %v2759_v52 }
 0xe71   : > { %v12006_v41 = vpop.eup %9916  ;;  %9924 = vpow2.f32 %v2769_v21  ;;  %v2765_v12 = vmul.f32 1.442695, %v2753_v1 }
 0xe72   : > { %v2818_v46 = vpop.permute.xlu1 %2817  ;;  %v2748_v40 = vpop.xlane.xlu0 %2747  ;;  %v2779_v33 = vsel %vm1321_vm15, %v12006_v41, 0.0 }
 0xe73   : > { %8928 = vmatprep.subr.bf16.mxu0 %v2818_v46  ;;  %2780 = vadd.xlane.f32.xlu1 %v2779_v33  ;;  %v2756_v20 = vsub.f32 %v2724_v24, %v2748_v40  ;;  %9926 = vpow2.f32 %v2765_v12 }
 0xe74   : > { %8929 = vmatpush3.bf16.msra.mxu0 %v2818_v46  ;;  %v2754_v46 = vsub.f32 %v11990_v44, %v2742_v31 }
 0xe75   : > { %v12010_v58 = vpop.eup %9918  ;;  %v2771_v2 = vmul.f32 1.442695, %v2756_v20 }
 0xe76   : > { %v2822_v11 = vpop.permute.xlu1 %2821  ;;  %v2820_v28 = vpop.permute.xlu0 %2819  ;;  %v2773_v52 = vsel %vm1321_vm15, %v12010_v58, 0.0  ;;  %v2767_v40 = vmul.f32 1.442695, %v2754_v46 }
 0xe77   : > { %2774 = vadd.xlane.f32.xlu1 %v2773_v52  ;;  %8930 = vmatprep.subr.bf16.mxu0 %v2820_v28  ;;  %9928 = vpow2.f32 %v2771_v2 }
 0xe78   : > { %8931 = vmatpush3.bf16.msra.mxu0 %v2820_v28  ;;  %9930 = vpow2.f32 %v2767_v40 }
 0xe79   : > { %8932 = vmatprep.subr.bf16.mxu0 %v2822_v11  ;;  %v9921_v60 = vpop.eup %9920 }
 0xe7a   : > { %v2824_v26 = vpop.permute.xlu1 %2823  ;;  %v2782_v29 = vsel %vm1321_vm15, %v9921_v60, 0.0  ;;  %v9923_v8 = vpop.eup %9922 }
 0xe7b   : > { %2783 = vadd.xlane.f32.xlu0 %v2782_v29  ;;  %v2776_v24 = vsel %vm1321_vm15, %v9923_v8, 0.0  ;;  %v12016_v13 = vpop.eup %9924 }
 0xe7c   : > { %8933 = vmatpush3.bf16.msra.mxu0 %v2822_v11  ;;  %v2791_v62 = vsel %vm1321_vm15, %v12016_v13, 0.0 }
 0xe7d   : > { %8934 = vmatprep.subr.bf16.mxu0 %v2824_v26  ;;  %v12021_v53 = vpop.eup %9926 }
 0xe7e   : > { %v2915_v42 = vpop.permute.xlu1 %2914  ;;  %v2785_v6 = vsel %vm1321_vm15, %v12021_v53, 0.0 }
 0xe7f   : > { %2777 = vadd.xlane.f32.xlu0 %v2776_v24 }
 0xe80   : > { %8935 = vmatpush3.bf16.msra.mxu0 %v2824_v26 }
 0xe81   : > { %9336 = vmatprep.subr.msk.bf16.mxu0 %vm1097_vm10, %v2915_v42  ;;  %v12025_v21 = vpop.eup %9928 }
 0xe82   : > { %v2794_v1 = vsel %vm1321_vm15, %v12025_v21, 0.0  ;;  %v9931_v33 = vpop.eup %9930 }
 0xe83   : > { %2792 = vadd.xlane.f32.xlu0 %v2791_v62  ;;  %v2788_v12 = vsel %vm1321_vm15, %v9931_v33, 0.0 }
 0xe87   : > { %2786 = vadd.xlane.f32.xlu0 %v2785_v6 }
 0xe88   : > { %2918 = vrot.lane.b32.xlu1 %v11667_v5, %s10494_s19 }
 0xe8b   : > { %2795 = vadd.xlane.f32.xlu0 %v2794_v1 }
 0xea1   : > { %2916 = vrot.lane.b32.xlu0 %v11647_v18, %s10494_s19 }
 0xea5   : > { %2906 = vrot.lane.b32.xlu0 %v11649_v48, %s10494_s19 }
 0xea9   : > { %2910 = vrot.lane.b32.xlu0 %v11665_v63, %s10494_s19 }
 0xeac   : > { %2789 = vadd.xlane.f32.xlu1 %v2788_v12 }
 0xebd   : > { %2920 = vrot.lane.b32.xlu1 %v11663_v49, %s10494_s19 }
 0xec1   : > { %2908 = vrot.lane.b32.xlu1 %v11645_v39, %s10494_s19 }
 0xec5   : > { %2912 = vrot.lane.b32.xlu1 %v11661_v23, %s10494_s19 }
 0xf00   : > { %v2781_v31 = vpop.xlane.xlu1 %2780 }
 0xf04   : > { %v2775_v44 = vpop.xlane.xlu1 %2774 }
 0xf08   : > { %v2784_v20 = vpop.xlane.xlu0 %2783 }
 0xf09   : > { %9932 = vrcp.f32 %v2784_v20  ;;  %v2919_v20 = vpop.permute.xlu1 %2918 }
 0xf0a   : > { %9934 = vrcp.f32 %v2775_v44  ;;  %v2935_v44 = vsel %vm1097_vm10, %v2915_v42, 0 }
 0xf0b   : > { %9936 = vrcp.f32 %v2781_v31 }
 0xf0c   : > { %v2778_v11 = vpop.xlane.xlu0 %2777 }
 0xf0d   : > { %9938 = vrcp.f32 %v2778_v11 }
 0xf10   : > { %v2793_v28 = vpop.xlane.xlu0 %2792 }
 0xf13   : > { %v9933_v52 = vpop.eup %9932 }
 0xf14   : > { %v2787_v2 = vpop.xlane.xlu0 %2786  ;;  %v9935_v26 = vpop.eup %9934  ;;  %v2808_v62 = vmul.f32 %v9933_v52, %v9921_v60 }
 0xf15   : > { %v9937_v29 = vpop.eup %9936  ;;  %v2805_v1 = vmul.f32 %v9935_v26, %v12010_v58 }
 0xf16   : > { %v2807_v40 = vmul.f32 %v9937_v29, %v12006_v41  ;;  %v2941_v41 = vsel %vm1097_vm10, %v2919_v20, 0 }
 0xf17   : > { %v9939_v24 = vpop.eup %9938 }
 0xf18   : > { %v2796_v6 = vpop.xlane.xlu0 %2795  ;;  %v2806_v46 = vmul.f32 %v9939_v24, %v9923_v8  ;;  %v2814_v30 = vpack.c.bf16 %v2808_v62, %v2807_v40 }
 0xf19   : > { %9940 = vrcp.f32 %v2796_v6 }
 0xf1a   : > { %v2813_v12 = vpack.c.bf16 %v2806_v46, %v2805_v1  ;;  %9942 = vrcp.f32 %v2787_v2 }
 0xf1b   : > { %9944 = vrcp.f32 %v2793_v28 }
 0xf1c   : > { %8936 = vmatprep.mubr.msk.bf16.mxu0 %vm1321_vm15, %v2813_v12  ;;  %v2917_v31 = vpop.permute.xlu0 %2916 }
 0xf1d   : > { %8937 = vmatmul.mubr.msk.bf16.vlgmr.msra.gmra.mrb[40].mxu0 %vm1321_vm15, %v2814_v30  ;;  %v2938_v60 = vsel %vm1097_vm10, %v2917_v31, 0 }
 0xf1e   : > { %8945 = vmatpush3.bf16.xpose.msra.mxu0 %v2935_v44 }
 0xf1f   : > { %9337 = vmatprep.subr.msk.bf16.mxu0 %vm1097_vm10, %v2917_v31 }
 0xf20   : > { %v2907_v1 = vpop.permute.xlu0 %2906 }
 0xf23   : > { %v9941_v42 = vpop.eup %9940 }
 0xf24   : > { %v9943_v11 = vpop.eup %9942  ;;  %v2812_v29 = vmul.f32 %v9941_v42, %v12025_v21  ;;  %v2911_v40 = vpop.permute.xlu0 %2910 }
 0xf25   : > { %v9945_v52 = vpop.eup %9944  ;;  %v2809_v24 = vmul.f32 %v9943_v11, %v12021_v53 }
 0xf26   : > { %8947 = vmatpush3.bf16.xpose.msra.mxu0 %v2938_v60  ;;  %v2811_v2 = vmul.f32 %v9945_v52, %v12016_v13 }
 0xf27   : > { %9338 = vmatprep.subr.msk.bf16.mxu0 %vm1097_vm10, %v2919_v20 }
 0xf28   : > { %v2816_v6 = vpack.c.bf16 %v2812_v29, %v2811_v2 }
 0xf2e   : > { %8949 = vmatpush3.bf16.xpose.msra.mxu0 %v2941_v41 }
 0xf39   : > { %v2790_v58 = vpop.xlane.xlu1 %2789 }
 0xf3a   : > { %9946 = vrcp.f32 %v2790_v58 }
 0xf3d   : > { %v2921_v30 = vpop.permute.xlu1 %2920 }
 0xf3e   : > { %9339 = vmatprep.subr.msk.bf16.mxu0 %vm1097_vm10, %v2921_v30  ;;  %v2944_v8 = vsel %vm1097_vm10, %v2921_v30, 0 }
 0xf3f   : > { %8951 = vmatpush3.bf16.xpose.msra.mxu0 %v2944_v8 }
 0xf41   : > { %v2909_v46 = vpop.permute.xlu1 %2908 }
 0xf44   : > { %v9947_v26 = vpop.eup %9946 }
 0xf45   : > { %v2810_v62 = vmul.f32 %v9947_v26, %v9931_v33  ;;  %v2913_v21 = vpop.permute.xlu1 %2912 }
 0xf47   : > { %v2815_v28 = vpack.c.bf16 %v2810_v62, %v2809_v24 }
 0xf49   : > { %8940 = vmatprep.mubr.msk.bf16.mxu0 %vm1321_vm15, %v2815_v28 }
 0xf4a   : > { %8941 = vmatmul.mubr.msk.bf16.gmra.mrb[44].mxu0 %vm1321_vm15, %v2816_v6 }
 0xf4b   : > { %8952 = vmatprep.mubr.msk.bf16.mxu0 %vm1097_vm10, %v2907_v1 }
 0xf52   : > { %8953 = vmatmul.mubr.msk.bf16.vlgmr.msra.gmra.mrb[48].mxu0 %vm1097_vm10, %v2909_v46 }
 0xf53   : > { %8956 = vmatprep.mubr.msk.bf16.mxu0 %vm1097_vm10, %v2911_v40 }
 0xf5a   : > { %8957 = vmatmul.mubr.msk.bf16.gmra.mrb[52].mxu0 %vm1097_vm10, %v2913_v21 }
 0xff0   : > { %v12065_v53 = vpop.f32.mrb[40].mxu0 }
 0xff1   : > { %v12067_v13 = vpop.f32.mrb[41].mxu0 }
 0xff2   : > { %v12069_v33 = vpop.f32.mrb[42].mxu0 }
 0xff3   : > { %v12073_v31 = vpop.f32.mrb[43].mxu0 }
0x101d   : > { %v12077_v60 = vpop.f32.mrb[44].mxu0 }
0x101e   : > { %v12079_v20 = vpop.f32.mrb[45].mxu0 }
0x101f   : > { %14299 = vst [vmem:[#allocation28_spill] sm:$0xff] %v12079_v20  ;;  %v12081_v41 = vpop.f32.mrb[46].mxu0 }
0x1020   : > { %v12085_v30 = vpop.f32.mrb[47].mxu0 }
0x1021   : > { %14300 = vst [vmem:[#allocation29_spill] sm:$0xff] %v12085_v30 }
0x1025   : > { %v8954_v42 = vpop.f32.mrb[48].mxu0 }
0x1026   : > { %v3013_v11 = vmul.f32 0.35355338, %v8954_v42  ;;  %v2980_v52 = vpop.f32.mrb[49].mxu0 }
0x1027   : > { %v8955_v26 = vpop.f32.mrb[50].mxu0  ;;  %v3011_v29 = vmul.f32 0.35355338, %v2980_v52 }
0x1028   : > { %v2983_v24 = vpop.f32.mrb[51].mxu0  ;;  %v3025_v62 = vsel %vm1321_vm15, %v3013_v11, -inf  ;;  %v3014_v6 = vmul.f32 0.35355338, %v8955_v26 }
0x1029   : > { %v3012_v2 = vmul.f32 0.35355338, %v2983_v24  ;;  %3026 = vmax.xlane.f32.xlu0 %v3025_v62  ;;  %v3019_v1 = vsel %vm1321_vm15, %v3011_v29, -inf }
0x102a   : > { %v3028_v52 = vsel %vm1321_vm15, %v3014_v6, -inf }
0x102b   : > { %v3022_v28 = vsel %vm1321_vm15, %v3012_v2, -inf }
0x102c   : > { %3023 = vmax.xlane.f32.xlu1 %v3022_v28 }
0x102d   : > { %3020 = vmax.xlane.f32.xlu0 %v3019_v1  ;;  %v8958_v46 = vpop.f32.mrb[52].mxu0 }
0x102e   : > { %v3017_v40 = vmul.f32 0.35355338, %v8958_v46  ;;  %v2996_v21 = vpop.f32.mrb[53].mxu0 }
0x102f   : > { %v8959_v8 = vpop.f32.mrb[54].mxu0  ;;  %v3015_v42 = vmul.f32 0.35355338, %v2996_v21 }
0x1030   : > { %v2999_v58 = vpop.f32.mrb[55].mxu0  ;;  %v3037_v44 = vsel %vm1321_vm15, %v3017_v40, -inf  ;;  %v3018_v24 = vmul.f32 0.35355338, %v8959_v8 }
0x1031   : > { %v12094_v12 = vmul.f32 0.35355338, %v2999_v58  ;;  %3029 = vmax.xlane.f32.xlu0 %v3028_v52  ;;  %3038 = vmax.xlane.f32.xlu1 %v3037_v44  ;;  %v3031_v62 = vsel %vm1321_vm15, %v3015_v42, -inf }
0x1032   : > { %v3040_v28 = vsel %vm1321_vm15, %v3018_v24, -inf }
0x1033   : > { %v3034_v26 = vsel %vm1321_vm15, %v12094_v12, -inf }
0x1035   : > { %3032 = vmax.xlane.f32.xlu1 %v3031_v62  ;;  %3035 = vmax.xlane.f32.xlu0 %v3034_v26 }
0x1039   : > { %3041 = vmax.xlane.f32.xlu0 %v3040_v28 }
0x1046   : > { %3111 = vrot.lane.b32.xlu1 %v11675_v51, %s10494_s19 }
0x104a   : > { %3115 = vrot.lane.b32.xlu1 %v11687_v57, %s10494_s19 }
0x104e   : > { %3117 = vrot.lane.b32.xlu1 %v11684_v56, %s10494_s19 }
0x104f   : > { %3113 = vrot.lane.b32.xlu0 %v11673_v19, %s10494_s19 }
0x1052   : > { %3208 = vrot.lane.b32.xlu1 %v11651_v61, %s10495_s18 }
0x10b6   : > { %v3027_v44 = vpop.xlane.xlu0 %3026 }
0x10b7   : > { %v3045_v58 = vsub.f32 %v3013_v11, %v3027_v44 }
0x10b9   : > { %v3055_v8 = vmul.f32 1.442695, %v3045_v58  ;;  %v3024_v1 = vpop.xlane.xlu1 %3023 }
0x10ba   : > { %v3021_v46 = vpop.xlane.xlu0 %3020  ;;  %v3044_v26 = vsub.f32 %v3012_v2, %v3024_v1 }
0x10bb   : > { %9948 = vpow2.f32 %v3055_v8  ;;  %v3043_v21 = vsub.f32 %v3011_v29, %v3021_v46 }
0x10bc   : > { %v3053_v34 = vmul.f32 1.442695, %v3044_v26 }
0x10bd   : > { %v3051_v52 = vmul.f32 1.442695, %v3043_v21 }
0x10be   : > { %v3039_v62 = vpop.xlane.xlu1 %3038  ;;  %v3030_v28 = vpop.xlane.xlu0 %3029 }
0x10bf   : > { %9950 = vpow2.f32 %v3051_v52  ;;  %v3046_v27 = vsub.f32 %v3014_v6, %v3030_v28  ;;  %v3049_v36 = vsub.f32 %v3017_v40, %v3039_v62 }
0x10c1   : > { %v3057_v47 = vmul.f32 1.442695, %v3046_v27  ;;  %v3063_v11 = vmul.f32 1.442695, %v3049_v36 }
0x10c2   : > { %v3033_v10 = vpop.xlane.xlu1 %3032  ;;  %v3036_v22 = vpop.xlane.xlu0 %3035 }
0x10c3   : > { %9952 = vpow2.f32 %v3057_v47  ;;  %v3047_v44 = vsub.f32 %v3015_v42, %v3033_v10 }
0x10c4   : > { %9954 = vpow2.f32 %v3053_v34 }
0x10c5   : > { %v12110_v38 = vpop.eup %9948  ;;  %9956 = vpow2.f32 %v3063_v11  ;;  %v3059_v27 = vmul.f32 1.442695, %v3047_v44 }
0x10c6   : > { %v3112_v58 = vpop.permute.xlu1 %3111  ;;  %v3042_v8 = vpop.xlane.xlu0 %3041  ;;  %v3073_v29 = vsel %vm1321_vm15, %v12110_v38, 0.0 }
0x10c7   : > { %8960 = vmatprep.subr.bf16.mxu1 %v3112_v58  ;;  %3074 = vadd.xlane.f32.xlu1 %v3073_v29  ;;  %v3050_v6 = vsub.f32 %v3018_v24, %v3042_v8  ;;  %9958 = vpow2.f32 %v3059_v27 }
0x10c8   : > { %8961 = vmatpush3.bf16.msra.mxu1 %v3112_v58  ;;  %v3048_v58 = vsub.f32 %v12094_v12, %v3036_v22 }
0x10c9   : > { %v12114_v2 = vpop.eup %9950  ;;  %v3065_v36 = vmul.f32 1.442695, %v3050_v6 }
0x10ca   : > { %v3116_v40 = vpop.permute.xlu1 %3115  ;;  %v3114_v47 = vpop.permute.xlu0 %3113  ;;  %v3067_v34 = vsel %vm1321_vm15, %v12114_v2, 0.0  ;;  %v3061_v8 = vmul.f32 1.442695, %v3048_v58 }
0x10cb   : > { %3068 = vadd.xlane.f32.xlu1 %v3067_v34  ;;  %8962 = vmatprep.subr.bf16.mxu1 %v3114_v47  ;;  %9960 = vpow2.f32 %v3065_v36 }
0x10cc   : > { %8963 = vmatpush3.bf16.msra.mxu1 %v3114_v47  ;;  %9962 = vpow2.f32 %v3061_v8 }
0x10cd   : > { %8964 = vmatprep.subr.bf16.mxu1 %v3116_v40  ;;  %v9953_v10 = vpop.eup %9952 }
0x10ce   : > { %v3118_v42 = vpop.permute.xlu1 %3117  ;;  %v3076_v1 = vsel %vm1321_vm15, %v9953_v10, 0.0  ;;  %v9955_v46 = vpop.eup %9954 }
0x10cf   : > { %3077 = vadd.xlane.f32.xlu0 %v3076_v1  ;;  %v3070_v24 = vsel %vm1321_vm15, %v9955_v46, 0.0  ;;  %v12120_v21 = vpop.eup %9956 }
0x10d0   : > { %8965 = vmatpush3.bf16.msra.mxu1 %v3116_v40  ;;  %v3085_v26 = vsel %vm1321_vm15, %v12120_v21, 0.0 }
0x10d1   : > { %8966 = vmatprep.subr.bf16.mxu1 %v3118_v42  ;;  %v12125_v62 = vpop.eup %9958 }
0x10d2   : > { %v3209_v52 = vpop.permute.xlu1 %3208  ;;  %v3079_v28 = vsel %vm1321_vm15, %v12125_v62, 0.0 }
0x10d3   : > { %3071 = vadd.xlane.f32.xlu0 %v3070_v24 }
0x10d4   : > { %8967 = vmatpush3.bf16.msra.mxu1 %v3118_v42 }
0x10d5   : > { %9340 = vmatprep.subr.msk.bf16.mxu1 %vm1097_vm10, %v3209_v52  ;;  %v12129_v11 = vpop.eup %9960 }
0x10d6   : > { %v3088_v44 = vsel %vm1321_vm15, %v12129_v11, 0.0  ;;  %v9963_v29 = vpop.eup %9962 }
0x10d7   : > { %3086 = vadd.xlane.f32.xlu0 %v3085_v26  ;;  %v3082_v27 = vsel %vm1321_vm15, %v9963_v29, 0.0 }
0x10db   : > { %3080 = vadd.xlane.f32.xlu0 %v3079_v28 }
0x10dc   : > { %3212 = vrot.lane.b32.xlu1 %v11667_v5, %s10495_s18 }
0x10df   : > { %3089 = vadd.xlane.f32.xlu0 %v3088_v44 }
0x10f5   : > { %3210 = vrot.lane.b32.xlu0 %v11647_v18, %s10495_s18 }
0x10f9   : > { %3200 = vrot.lane.b32.xlu0 %v11649_v48, %s10495_s18 }
0x10fd   : > { %3204 = vrot.lane.b32.xlu0 %v11665_v63, %s10495_s18 }
0x1100   : > { %3083 = vadd.xlane.f32.xlu1 %v3082_v27 }
0x1111   : > { %3214 = vrot.lane.b32.xlu1 %v11663_v49, %s10495_s18 }
0x1115   : > { %3202 = vrot.lane.b32.xlu1 %v11645_v39, %s10495_s18 }
0x1119   : > { %3206 = vrot.lane.b32.xlu1 %v11661_v23, %s10495_s18 }
0x1154   : > { %v3075_v22 = vpop.xlane.xlu1 %3074 }
0x1158   : > { %v3069_v12 = vpop.xlane.xlu1 %3068 }
0x115c   : > { %v3078_v6 = vpop.xlane.xlu0 %3077 }
0x115d   : > { %9964 = vrcp.f32 %v3078_v6  ;;  %v3213_v6 = vpop.permute.xlu1 %3212 }
0x115e   : > { %9966 = vrcp.f32 %v3069_v12  ;;  %v3229_v12 = vsel %vm1097_vm10, %v3209_v52, 0 }
0x115f   : > { %9968 = vrcp.f32 %v3075_v22 }
0x1160   : > { %v3072_v40 = vpop.xlane.xlu0 %3071 }
0x1161   : > { %9970 = vrcp.f32 %v3072_v40 }
0x1164   : > { %v3087_v47 = vpop.xlane.xlu0 %3086 }
0x1167   : > { %v9965_v34 = vpop.eup %9964 }
0x1168   : > { %v3081_v36 = vpop.xlane.xlu0 %3080  ;;  %v9967_v42 = vpop.eup %9966  ;;  %v3102_v26 = vmul.f32 %v9965_v34, %v9953_v10 }
0x1169   : > { %v9969_v1 = vpop.eup %9968  ;;  %v3099_v44 = vmul.f32 %v9967_v42, %v12114_v2 }
0x116a   : > { %v3101_v8 = vmul.f32 %v9969_v1, %v12110_v38  ;;  %v3235_v38 = vsel %vm1097_vm10, %v3213_v6, 0 }
0x116b   : > { %v9971_v24 = vpop.eup %9970 }
0x116c   : > { %v3090_v28 = vpop.xlane.xlu0 %3089  ;;  %v3100_v58 = vmul.f32 %v9971_v24, %v9955_v46  ;;  %v3108_v15 = vpack.c.bf16 %v3102_v26, %v3101_v8 }
0x116d   : > { %9972 = vrcp.f32 %v3090_v28 }
0x116e   : > { %v3107_v27 = vpack.c.bf16 %v3100_v58, %v3099_v44  ;;  %9974 = vrcp.f32 %v3081_v36 }
0x116f   : > { %9976 = vrcp.f32 %v3087_v47 }
0x1170   : > { %8968 = vmatprep.mubr.msk.bf16.mxu1 %vm1321_vm15, %v3107_v27  ;;  %v3211_v22 = vpop.permute.xlu0 %3210 }
0x1171   : > { %8969 = vmatmul.mubr.msk.bf16.vlgmr.msra.gmra.mrb[48].mxu1 %vm1321_vm15, %v3108_v15  ;;  %v3232_v10 = vsel %vm1097_vm10, %v3211_v22, 0 }
0x1172   : > { %8977 = vmatpush3.bf16.xpose.msra.mxu1 %v3229_v12 }
0x1173   : > { %9341 = vmatprep.subr.msk.bf16.mxu1 %vm1097_vm10, %v3211_v22 }
0x1174   : > { %v3201_v44 = vpop.permute.xlu0 %3200 }
0x1177   : > { %v9973_v52 = vpop.eup %9972 }
0x1178   : > { %v9975_v40 = vpop.eup %9974  ;;  %v3106_v1 = vmul.f32 %v9973_v52, %v12129_v11  ;;  %v3205_v8 = vpop.permute.xlu0 %3204 }
0x1179   : > { %v9977_v34 = vpop.eup %9976  ;;  %v3103_v24 = vmul.f32 %v9975_v40, %v12125_v62 }
0x117a   : > { %8979 = vmatpush3.bf16.xpose.msra.mxu1 %v3232_v10  ;;  %v3105_v36 = vmul.f32 %v9977_v34, %v12120_v21 }
0x117b   : > { %9342 = vmatprep.subr.msk.bf16.mxu1 %vm1097_vm10, %v3213_v6 }
0x117c   : > { %v3110_v28 = vpack.c.bf16 %v3106_v1, %v3105_v36 }
0x1182   : > { %8981 = vmatpush3.bf16.xpose.msra.mxu1 %v3235_v38 }
0x118d   : > { %v3084_v2 = vpop.xlane.xlu1 %3083 }
0x118e   : > { %9978 = vrcp.f32 %v3084_v2 }
0x1191   : > { %v3215_v15 = vpop.permute.xlu1 %3214 }
0x1192   : > { %9343 = vmatprep.subr.msk.bf16.mxu1 %vm1097_vm10, %v3215_v15  ;;  %v3238_v46 = vsel %vm1097_vm10, %v3215_v15, 0 }
0x1193   : > { %8983 = vmatpush3.bf16.xpose.msra.mxu1 %v3238_v46 }
0x1195   : > { %v3203_v58 = vpop.permute.xlu1 %3202 }
0x1198   : > { %v9979_v42 = vpop.eup %9978 }
0x1199   : > { %v3104_v26 = vmul.f32 %v9979_v42, %v9963_v29  ;;  %v3207_v11 = vpop.permute.xlu1 %3206 }
0x119b   : > { %v3109_v47 = vpack.c.bf16 %v3104_v26, %v3103_v24 }
0x119d   : > { %8972 = vmatprep.mubr.msk.bf16.mxu1 %vm1321_vm15, %v3109_v47 }
0x119e   : > { %8973 = vmatmul.mubr.msk.bf16.gmra.mrb[52].mxu1 %vm1321_vm15, %v3110_v28 }
0x119f   : > { %8984 = vmatprep.mubr.msk.bf16.mxu1 %vm1097_vm10, %v3201_v44 }
0x11a6   : > { %8985 = vmatmul.mubr.msk.bf16.vlgmr.msra.gmra.mrb[56].mxu1 %vm1097_vm10, %v3203_v58 }
0x11a7   : > { %8988 = vmatprep.mubr.msk.bf16.mxu1 %vm1097_vm10, %v3205_v8 }
0x11ae   : > { %8989 = vmatmul.mubr.msk.bf16.gmra.mrb[60].mxu1 %vm1097_vm10, %v3207_v11 }
0x1244   : > { %v12169_v62 = vpop.f32.mrb[48].mxu1 }
0x1245   : > { %v12171_v21 = vpop.f32.mrb[49].mxu1 }
0x1246   : > { %v12173_v29 = vpop.f32.mrb[50].mxu1 }
0x1247   : > { %v12177_v22 = vpop.f32.mrb[51].mxu1 }
0x1271   : > { %v12181_v10 = vpop.f32.mrb[52].mxu1 }
0x1272   : > { %14301 = vst [vmem:[#allocation30_spill] sm:$0xff] %v12181_v10  ;;  %v12183_v6 = vpop.f32.mrb[53].mxu1 }
0x1273   : > { %14302 = vst [vmem:[#allocation31_spill] sm:$0xff] %v12183_v6  ;;  %v12185_v38 = vpop.f32.mrb[54].mxu1 }
0x1274   : > { %14303 = vst [vmem:[#allocation32_spill] sm:$0xff] %v12185_v38  ;;  %v12189_v15 = vpop.f32.mrb[55].mxu1 }
0x1275   : > { %14304 = vst [vmem:[#allocation34_spill] sm:$0xff] %v12189_v15 }
0x1279   : > { %v8986_v52 = vpop.f32.mrb[56].mxu1 }
0x127a   : > { %v3307_v40 = vmul.f32 0.35355338, %v8986_v52  ;;  %v3274_v34 = vpop.f32.mrb[57].mxu1 }
0x127b   : > { %v8987_v42 = vpop.f32.mrb[58].mxu1  ;;  %v3305_v1 = vmul.f32 0.35355338, %v3274_v34 }
0x127c   : > { %v3277_v24 = vpop.f32.mrb[59].mxu1  ;;  %v3319_v26 = vsel %vm1321_vm15, %v3307_v40, -inf  ;;  %v3308_v28 = vmul.f32 0.35355338, %v8987_v42 }
0x127d   : > { %v3306_v36 = vmul.f32 0.35355338, %v3277_v24  ;;  %3320 = vmax.xlane.f32.xlu0 %v3319_v26  ;;  %v3313_v44 = vsel %vm1321_vm15, %v3305_v1, -inf }
0x127e   : > { %v3322_v34 = vsel %vm1321_vm15, %v3308_v28, -inf }
0x127f   : > { %v3316_v47 = vsel %vm1321_vm15, %v3306_v36, -inf }
0x1280   : > { %3317 = vmax.xlane.f32.xlu1 %v3316_v47 }
0x1281   : > { %3314 = vmax.xlane.f32.xlu0 %v3313_v44  ;;  %v8990_v58 = vpop.f32.mrb[60].mxu1 }
0x1282   : > { %v3311_v8 = vmul.f32 0.35355338, %v8990_v58  ;;  %v3290_v11 = vpop.f32.mrb[61].mxu1 }
0x1283   : > { %v8991_v46 = vpop.f32.mrb[62].mxu1  ;;  %v3309_v52 = vmul.f32 0.35355338, %v3290_v11 }
0x1284   : > { %v3293_v2 = vpop.f32.mrb[63].mxu1  ;;  %v3331_v12 = vsel %vm1321_vm15, %v3311_v8, -inf  ;;  %v3312_v24 = vmul.f32 0.35355338, %v8991_v46 }
0x1285   : > { %v12198_v27 = vmul.f32 0.35355338, %v3293_v2  ;;  %3323 = vmax.xlane.f32.xlu0 %v3322_v34  ;;  %3332 = vmax.xlane.f32.xlu1 %v3331_v12  ;;  %v3325_v26 = vsel %vm1321_vm15, %v3309_v52, -inf }
0x1286   : > { %v3334_v47 = vsel %vm1321_vm15, %v3312_v24, -inf }
0x1287   : > { %v3328_v42 = vsel %vm1321_vm15, %v12198_v27, -inf }
0x1289   : > { %3326 = vmax.xlane.f32.xlu1 %v3325_v26  ;;  %3329 = vmax.xlane.f32.xlu0 %v3328_v42 }
0x128d   : > { %3335 = vmax.xlane.f32.xlu0 %v3334_v47 }
0x129a   : > { %3405 = vrot.lane.b32.xlu1 %v11675_v51, %s10495_s18 }
0x129e   : > { %3409 = vrot.lane.b32.xlu1 %v11687_v57, %s10495_s18 }
0x12a2   : > { %3411 = vrot.lane.b32.xlu1 %v11684_v56, %s10495_s18 }
0x12a3   : > { %3407 = vrot.lane.b32.xlu0 %v11673_v19, %s10495_s18 }
0x12a6   : > { %3502 = vrot.lane.b32.xlu1 %v11651_v61, %s14178_s20 }
0x130a   : > { %v3321_v12 = vpop.xlane.xlu0 %3320 }
0x130b   : > { %v3339_v2 = vsub.f32 %v3307_v40, %v3321_v12 }
0x130d   : > { %v3349_v46 = vmul.f32 1.442695, %v3339_v2  ;;  %v3318_v44 = vpop.xlane.xlu1 %3317 }
0x130e   : > { %v3315_v58 = vpop.xlane.xlu0 %3314  ;;  %v3338_v42 = vsub.f32 %v3306_v36, %v3318_v44 }
0x130f   : > { %9980 = vpow2.f32 %v3349_v46  ;;  %v3337_v11 = vsub.f32 %v3305_v1, %v3315_v58 }
0x1310   : > { %v3347_v6 = vmul.f32 1.442695, %v3338_v42 }
0x1311   : > { %v3345_v34 = vmul.f32 1.442695, %v3337_v11 }
0x1312   : > { %v3333_v26 = vpop.xlane.xlu1 %3332  ;;  %v3324_v47 = vpop.xlane.xlu0 %3323 }
0x1313   : > { %9982 = vpow2.f32 %v3345_v34  ;;  %v3340_v0 = vsub.f32 %v3308_v28, %v3324_v47  ;;  %v3343_v15 = vsub.f32 %v3311_v8, %v3333_v26 }
0x1315   : > { %v3351_v25 = vmul.f32 1.442695, %v3340_v0  ;;  %v3357_v40 = vmul.f32 1.442695, %v3343_v15 }
0x1316   : > { %v3327_v20 = vpop.xlane.xlu1 %3326  ;;  %v3330_v30 = vpop.xlane.xlu0 %3329 }
0x1317   : > { %9984 = vpow2.f32 %v3351_v25  ;;  %v3341_v12 = vsub.f32 %v3309_v52, %v3327_v20 }
0x1318   : > { %9986 = vpow2.f32 %v3347_v6 }
0x1319   : > { %v12214_v10 = vpop.eup %9980  ;;  %9988 = vpow2.f32 %v3357_v40  ;;  %v3353_v0 = vmul.f32 1.442695, %v3341_v12 }
0x131a   : > { %v3406_v2 = vpop.permute.xlu1 %3405  ;;  %v3336_v46 = vpop.xlane.xlu0 %3335  ;;  %v3367_v1 = vsel %vm1321_vm15, %v12214_v10, 0.0 }
0x131b   : > { %8992 = vmatprep.subr.bf16.mxu0 %v3406_v2  ;;  %3368 = vadd.xlane.f32.xlu1 %v3367_v1  ;;  %v3344_v28 = vsub.f32 %v3312_v24, %v3336_v46  ;;  %9990 = vpow2.f32 %v3353_v0 }
0x131c   : > { %8993 = vmatpush3.bf16.msra.mxu0 %v3406_v2  ;;  %v3342_v2 = vsub.f32 %v12198_v27, %v3330_v30 }
0x131d   : > { %v12218_v36 = vpop.eup %9982  ;;  %v3359_v15 = vmul.f32 1.442695, %v3344_v28 }
0x131e   : > { %v3410_v8 = vpop.permute.xlu1 %3409  ;;  %v3408_v25 = vpop.permute.xlu0 %3407  ;;  %v3361_v6 = vsel %vm1321_vm15, %v12218_v36, 0.0  ;;  %v3355_v46 = vmul.f32 1.442695, %v3342_v2 }
0x131f   : > { %3362 = vadd.xlane.f32.xlu1 %v3361_v6  ;;  %8994 = vmatprep.subr.bf16.mxu0 %v3408_v25  ;;  %9992 = vpow2.f32 %v3359_v15 }
0x1320   : > { %8995 = vmatpush3.bf16.msra.mxu0 %v3408_v25  ;;  %9994 = vpow2.f32 %v3355_v46 }
0x1321   : > { %8996 = vmatprep.subr.bf16.mxu0 %v3410_v8  ;;  %v9985_v20 = vpop.eup %9984 }
0x1322   : > { %v3412_v52 = vpop.permute.xlu1 %3411  ;;  %v3370_v44 = vsel %vm1321_vm15, %v9985_v20, 0.0  ;;  %v9987_v58 = vpop.eup %9986 }
0x1323   : > { %3371 = vadd.xlane.f32.xlu0 %v3370_v44  ;;  %v3364_v24 = vsel %vm1321_vm15, %v9987_v58, 0.0  ;;  %v12224_v11 = vpop.eup %9988 }
0x1324   : > { %8997 = vmatpush3.bf16.msra.mxu0 %v3410_v8  ;;  %v3379_v42 = vsel %vm1321_vm15, %v12224_v11, 0.0 }
0x1325   : > { %8998 = vmatprep.subr.bf16.mxu0 %v3412_v52  ;;  %v12229_v26 = vpop.eup %9990 }
0x1326   : > { %v3503_v34 = vpop.permute.xlu1 %3502  ;;  %v3373_v47 = vsel %vm1321_vm15, %v12229_v26, 0.0 }
0x1327   : > { %3365 = vadd.xlane.f32.xlu0 %v3364_v24 }
0x1328   : > { %8999 = vmatpush3.bf16.msra.mxu0 %v3412_v52 }
0x1329   : > { %9344 = vmatprep.subr.msk.bf16.mxu0 %vm1097_vm10, %v3503_v34  ;;  %v12233_v40 = vpop.eup %9992 }
0x132a   : > { %v3382_v12 = vsel %vm1321_vm15, %v12233_v40, 0.0  ;;  %v9995_v1 = vpop.eup %9994 }
0x132b   : > { %3380 = vadd.xlane.f32.xlu0 %v3379_v42  ;;  %v3376_v0 = vsel %vm1321_vm15, %v9995_v1, 0.0 }
0x132f   : > { %3374 = vadd.xlane.f32.xlu0 %v3373_v47 }
0x1330   : > { %3506 = vrot.lane.b32.xlu1 %v11667_v5, %s14178_s20 }
0x1333   : > { %3383 = vadd.xlane.f32.xlu0 %v3382_v12 }
0x1349   : > { %3504 = vrot.lane.b32.xlu0 %v11647_v18, %s14178_s20 }
0x134d   : > { %3494 = vrot.lane.b32.xlu0 %v11649_v48, %s14178_s20 }
0x1351   : > { %3498 = vrot.lane.b32.xlu0 %v11665_v63, %s14178_s20 }
0x1354   : > { %3377 = vadd.xlane.f32.xlu1 %v3376_v0 }
0x1365   : > { %3508 = vrot.lane.b32.xlu1 %v11663_v49, %s14178_s20 }
0x1369   : > { %3496 = vrot.lane.b32.xlu1 %v11645_v39, %s14178_s20 }
0x136d   : > { %3500 = vrot.lane.b32.xlu1 %v11661_v23, %s14178_s20 }
0x13a8   : > { %v3369_v30 = vpop.xlane.xlu1 %3368 }
0x13ac   : > { %v3363_v27 = vpop.xlane.xlu1 %3362 }
0x13b0   : > { %v3372_v28 = vpop.xlane.xlu0 %3371 }
0x13b1   : > { %9996 = vrcp.f32 %v3372_v28  ;;  %v3507_v28 = vpop.permute.xlu1 %3506 }
0x13b2   : > { %9998 = vrcp.f32 %v3363_v27  ;;  %v3523_v27 = vsel %vm1097_vm10, %v3503_v34, 0 }
0x13b3   : > { %10000 = vrcp.f32 %v3369_v30 }
0x13b4   : > { %v3366_v8 = vpop.xlane.xlu0 %3365 }
0x13b5   : > { %10002 = vrcp.f32 %v3366_v8 }
0x13b8   : > { %v3381_v25 = vpop.xlane.xlu0 %3380 }
0x13bb   : > { %v9997_v6 = vpop.eup %9996 }
0x13bc   : > { %v3375_v15 = vpop.xlane.xlu0 %3374  ;;  %v9999_v52 = vpop.eup %9998  ;;  %v3396_v42 = vmul.f32 %v9997_v6, %v9985_v20 }
0x13bd   : > { %v10001_v44 = vpop.eup %10000  ;;  %v3393_v12 = vmul.f32 %v9999_v52, %v12218_v36 }
0x13be   : > { %v3395_v46 = vmul.f32 %v10001_v44, %v12214_v10  ;;  %v3529_v10 = vsel %vm1097_vm10, %v3507_v28, 0 }
0x13bf   : > { %v10003_v24 = vpop.eup %10002 }
0x13c0   : > { %v3384_v47 = vpop.xlane.xlu0 %3383  ;;  %v3394_v2 = vmul.f32 %v10003_v24, %v9987_v58  ;;  %v3402_v38 = vpack.c.bf16 %v3396_v42, %v3395_v46 }
0x13c1   : > { %10004 = vrcp.f32 %v3384_v47 }
0x13c2   : > { %v3401_v0 = vpack.c.bf16 %v3394_v2, %v3393_v12  ;;  %10006 = vrcp.f32 %v3375_v15 }
0x13c3   : > { %10008 = vrcp.f32 %v3381_v25 }
0x13c4   : > { %9000 = vmatprep.mubr.msk.bf16.mxu0 %vm1321_vm15, %v3401_v0  ;;  %v3505_v30 = vpop.permute.xlu0 %3504 }
0x13c5   : > { %9001 = vmatmul.mubr.msk.bf16.vlgmr.msra.gmra.mrb[56].mxu0 %vm1321_vm15, %v3402_v38  ;;  %v3526_v20 = vsel %vm1097_vm10, %v3505_v30, 0 }
0x13c6   : > { %9009 = vmatpush3.bf16.xpose.msra.mxu0 %v3523_v27 }
0x13c7   : > { %9345 = vmatprep.subr.msk.bf16.mxu0 %vm1097_vm10, %v3505_v30 }
0x13c8   : > { %v3495_v12 = vpop.permute.xlu0 %3494 }
0x13cb   : > { %v10005_v34 = vpop.eup %10004 }
0x13cc   : > { %v10007_v8 = vpop.eup %10006  ;;  %v3400_v44 = vmul.f32 %v10005_v34, %v12233_v40  ;;  %v3499_v46 = vpop.permute.xlu0 %3498 }
0x13cd   : > { %v10009_v6 = vpop.eup %10008  ;;  %v3397_v24 = vmul.f32 %v10007_v8, %v12229_v26 }
0x13ce   : > { %9011 = vmatpush3.bf16.xpose.msra.mxu0 %v3526_v20  ;;  %v3399_v15 = vmul.f32 %v10009_v6, %v12224_v11 }
0x13cf   : > { %9346 = vmatprep.subr.msk.bf16.mxu0 %vm1097_vm10, %v3507_v28 }
0x13d0   : > { %v3404_v47 = vpack.c.bf16 %v3400_v44, %v3399_v15 }
0x13d6   : > { %9013 = vmatpush3.bf16.xpose.msra.mxu0 %v3529_v10 }
0x13e1   : > { %v3378_v36 = vpop.xlane.xlu1 %3377 }
0x13e2   : > { %10010 = vrcp.f32 %v3378_v36 }
0x13e5   : > { %v3509_v38 = vpop.permute.xlu1 %3508 }
0x13e6   : > { %9347 = vmatprep.subr.msk.bf16.mxu0 %vm1097_vm10, %v3509_v38  ;;  %v3532_v58 = vsel %vm1097_vm10, %v3509_v38, 0 }
0x13e7   : > { %9015 = vmatpush3.bf16.xpose.msra.mxu0 %v3532_v58 }
0x13e9   : > { %v3497_v2 = vpop.permute.xlu1 %3496 }
0x13ec   : > { %v10011_v52 = vpop.eup %10010 }
0x13ed   : > { %v3398_v42 = vmul.f32 %v10011_v52, %v9995_v1  ;;  %v3501_v40 = vpop.permute.xlu1 %3500 }
0x13ef   : > { %v3403_v25 = vpack.c.bf16 %v3398_v42, %v3397_v24 }
0x13f1   : > { %9004 = vmatprep.mubr.msk.bf16.mxu0 %vm1321_vm15, %v3403_v25 }
0x13f2   : > { %9005 = vmatmul.mubr.msk.bf16.gmra.mrb[60].mxu0 %vm1321_vm15, %v3404_v47 }
0x13f3   : > { %9016 = vmatprep.mubr.msk.bf16.mxu0 %vm1097_vm10, %v3495_v12 }
0x13fa   : > { %9017 = vmatmul.mubr.msk.bf16.vlgmr.msra.gmra.mrb[64].mxu0 %vm1097_vm10, %v3497_v2 }
0x13fb   : > { %9020 = vmatprep.mubr.msk.bf16.mxu0 %vm1097_vm10, %v3499_v46 }
0x1402   : > { %9021 = vmatmul.mubr.msk.bf16.gmra.mrb[68].mxu0 %vm1097_vm10, %v3501_v40 }
0x1498   : > { %v12273_v26 = vpop.f32.mrb[56].mxu0 }
0x1499   : > { %v12275_v11 = vpop.f32.mrb[57].mxu0 }
0x149a   : > { %v12277_v1 = vpop.f32.mrb[58].mxu0 }
0x149b   : > { %v12281_v30 = vpop.f32.mrb[59].mxu0 }
0x14c5   : > { %v12285_v20 = vpop.f32.mrb[60].mxu0 }
0x14c6   : > { %14305 = vst [vmem:[#allocation35_spill] sm:$0xff] %v12285_v20  ;;  %v12287_v28 = vpop.f32.mrb[61].mxu0 }
0x14c7   : > { %14306 = vst [vmem:[#allocation36_spill] sm:$0xff] %v12287_v28  ;;  %v12289_v10 = vpop.f32.mrb[62].mxu0 }
0x14c8   : > { %14307 = vst [vmem:[#allocation37_spill] sm:$0xff] %v12289_v10  ;;  %v12293_v38 = vpop.f32.mrb[63].mxu0 }
0x14c9   : > { %14308 = vst [vmem:[#allocation38_spill] sm:$0xff] %v12293_v38 }
0x14cd   : > { %v9018_v34 = vpop.f32.mrb[64].mxu0 }
0x14ce   : > { %v3601_v8 = vmul.f32 0.35355338, %v9018_v34  ;;  %v3568_v6 = vpop.f32.mrb[65].mxu0 }
0x14cf   : > { %v9019_v52 = vpop.f32.mrb[66].mxu0  ;;  %v3599_v44 = vmul.f32 0.35355338, %v3568_v6 }
0x14d0   : > { %v3571_v24 = vpop.f32.mrb[67].mxu0  ;;  %v3613_v42 = vsel %vm1321_vm15, %v3601_v8, -inf  ;;  %v3602_v47 = vmul.f32 0.35355338, %v9019_v52 }
0x14d1   : > { %v3600_v15 = vmul.f32 0.35355338, %v3571_v24  ;;  %3614 = vmax.xlane.f32.xlu0 %v3613_v42  ;;  %v3607_v12 = vsel %vm1321_vm15, %v3599_v44, -inf }
0x14d2   : > { %v3616_v6 = vsel %vm1321_vm15, %v3602_v47, -inf }
0x14d3   : > { %v3610_v25 = vsel %vm1321_vm15, %v3600_v15, -inf }
0x14d4   : > { %3611 = vmax.xlane.f32.xlu1 %v3610_v25 }
0x14d5   : > { %3608 = vmax.xlane.f32.xlu0 %v3607_v12  ;;  %v9022_v2 = vpop.f32.mrb[68].mxu0 }
0x14d6   : > { %v3605_v46 = vmul.f32 0.35355338, %v9022_v2  ;;  %v3584_v40 = vpop.f32.mrb[69].mxu0 }
0x14d7   : > { %v9023_v58 = vpop.f32.mrb[70].mxu0  ;;  %v3603_v34 = vmul.f32 0.35355338, %v3584_v40 }
0x14d8   : > { %v3587_v36 = vpop.f32.mrb[71].mxu0  ;;  %v3625_v27 = vsel %vm1321_vm15, %v3605_v46, -inf  ;;  %v3606_v24 = vmul.f32 0.35355338, %v9023_v58 }
0x14d9   : > { %v12302_v0 = vmul.f32 0.35355338, %v3587_v36  ;;  %3617 = vmax.xlane.f32.xlu0 %v3616_v6  ;;  %3626 = vmax.xlane.f32.xlu1 %v3625_v27  ;;  %v3619_v42 = vsel %vm1321_vm15, %v3603_v34, -inf }
0x14da   : > { %v3628_v25 = vsel %vm1321_vm15, %v3606_v24, -inf }
0x14db   : > { %v3622_v52 = vsel %vm1321_vm15, %v12302_v0, -inf }
0x14dd   : > { %3620 = vmax.xlane.f32.xlu1 %v3619_v42  ;;  %3623 = vmax.xlane.f32.xlu0 %v3622_v52 }
0x14e1   : > { %3629 = vmax.xlane.f32.xlu0 %v3628_v25 }
0x14ee   : > { %3699 = vrot.lane.b32.xlu1 %v11675_v51, %s14178_s20 }
0x14f2   : > { %3703 = vrot.lane.b32.xlu1 %v11687_v57, %s14178_s20 }
0x14f6   : > { %3705 = vrot.lane.b32.xlu1 %v11684_v56, %s14178_s20 }
0x14f7   : > { %3701 = vrot.lane.b32.xlu0 %v11673_v19, %s14178_s20 }
0x14fa   : > { %3796 = vrot.lane.b32.xlu1 %v11651_v61, %s14176_s12 }
0x155e   : > { %v3615_v27 = vpop.xlane.xlu0 %3614 }
0x155f   : > { %v3633_v36 = vsub.f32 %v3601_v8, %v3615_v27 }
0x1561   : > { %v3643_v58 = vmul.f32 1.442695, %v3633_v36  ;;  %v3612_v12 = vpop.xlane.xlu1 %3611 }
0x1562   : > { %v3609_v2 = vpop.xlane.xlu0 %3608  ;;  %v3632_v52 = vsub.f32 %v3600_v15, %v3612_v12 }
0x1563   : > { %10012 = vpow2.f32 %v3643_v58  ;;  %v3631_v40 = vsub.f32 %v3599_v44, %v3609_v2 }
0x1564   : > { %v3641_v20 = vmul.f32 1.442695, %v3632_v52 }
0x1565   : > { %v3639_v6 = vmul.f32 1.442695, %v3631_v40 }
0x1566   : > { %v3627_v42 = vpop.xlane.xlu1 %3626  ;;  %v3618_v25 = vpop.xlane.xlu0 %3617 }
0x1567   : > { %10014 = vpow2.f32 %v3639_v6  ;;  %v3634_v28 = vsub.f32 %v3602_v47, %v3618_v25  ;;  %v3637_v10 = vsub.f32 %v3605_v46, %v3627_v42 }
0x1569   : > { %v3645_v38 = vmul.f32 1.442695, %v3634_v28  ;;  %v3651_v8 = vmul.f32 1.442695, %v3637_v10 }
0x156a   : > { %v3621_v35 = vpop.xlane.xlu1 %3620  ;;  %v3624_v16 = vpop.xlane.xlu0 %3623 }
0x156b   : > { %10016 = vpow2.f32 %v3645_v38  ;;  %v3635_v27 = vsub.f32 %v3603_v34, %v3621_v35 }
0x156c   : > { %10018 = vpow2.f32 %v3641_v20 }
0x156d   : > { %v12318_v61 = vpop.eup %10012  ;;  %10020 = vpow2.f32 %v3651_v8  ;;  %v3647_v28 = vmul.f32 1.442695, %v3635_v27 }
0x156e   : > { %v3700_v36 = vpop.permute.xlu1 %3699  ;;  %v3630_v58 = vpop.xlane.xlu0 %3629  ;;  %v3661_v44 = vsel %vm1321_vm15, %v12318_v61, 0.0 }
0x156f   : > { %9024 = vmatprep.subr.bf16.mxu1 %v3700_v36  ;;  %3662 = vadd.xlane.f32.xlu1 %v3661_v44  ;;  %v3638_v47 = vsub.f32 %v3606_v24, %v3630_v58  ;;  %10022 = vpow2.f32 %v3647_v28 }
0x1570   : > { %9025 = vmatpush3.bf16.msra.mxu1 %v3700_v36  ;;  %v3636_v36 = vsub.f32 %v12302_v0, %v3624_v16 }
0x1571   : > { %v12322_v15 = vpop.eup %10014  ;;  %v3653_v10 = vmul.f32 1.442695, %v3638_v47 }
0x1572   : > { %v3704_v46 = vpop.permute.xlu1 %3703  ;;  %v3702_v38 = vpop.permute.xlu0 %3701  ;;  %v3655_v20 = vsel %vm1321_vm15, %v12322_v15, 0.0  ;;  %v3649_v58 = vmul.f32 1.442695, %v3636_v36 }
0x1573   : > { %3656 = vadd.xlane.f32.xlu1 %v3655_v20  ;;  %9026 = vmatprep.subr.bf16.mxu1 %v3702_v38  ;;  %10024 = vpow2.f32 %v3653_v10 }
0x1574   : > { %9027 = vmatpush3.bf16.msra.mxu1 %v3702_v38  ;;  %10026 = vpow2.f32 %v3649_v58 }
0x1575   : > { %9028 = vmatprep.subr.bf16.mxu1 %v3704_v46  ;;  %v10017_v35 = vpop.eup %10016 }
0x1576   : > { %v3706_v34 = vpop.permute.xlu1 %3705  ;;  %v3664_v12 = vsel %vm1321_vm15, %v10017_v35, 0.0  ;;  %v10019_v2 = vpop.eup %10018 }
0x1577   : > { %3665 = vadd.xlane.f32.xlu0 %v3664_v12  ;;  %v3658_v24 = vsel %vm1321_vm15, %v10019_v2, 0.0  ;;  %v12328_v40 = vpop.eup %10020 }
0x1578   : > { %9029 = vmatpush3.bf16.msra.mxu1 %v3704_v46  ;;  %v3673_v52 = vsel %vm1321_vm15, %v12328_v40, 0.0 }
0x1579   : > { %9030 = vmatprep.subr.bf16.mxu1 %v3706_v34  ;;  %v12333_v42 = vpop.eup %10022 }
0x157a   : > { %v3797_v6 = vpop.permute.xlu1 %3796  ;;  %v3667_v25 = vsel %vm1321_vm15, %v12333_v42, 0.0 }
0x157b   : > { %3659 = vadd.xlane.f32.xlu0 %v3658_v24 }
0x157c   : > { %9031 = vmatpush3.bf16.msra.mxu1 %v3706_v34 }
0x157d   : > { %9348 = vmatprep.subr.msk.bf16.mxu1 %vm1097_vm10, %v3797_v6  ;;  %v12337_v8 = vpop.eup %10024 }
0x157e   : > { %v3676_v27 = vsel %vm1321_vm15, %v12337_v8, 0.0  ;;  %v10027_v44 = vpop.eup %10026 }
0x157f   : > { %3674 = vadd.xlane.f32.xlu0 %v3673_v52 }
0x1583   : > { %3668 = vadd.xlane.f32.xlu0 %v3667_v25  ;;  %v3817_v25 = vsel %vm1097_vm10, %v3797_v6, 0 }
0x1584   : > { %3800 = vrot.lane.b32.xlu1 %v11667_v5, %s14176_s12  ;;  %v3670_v5 = vsel %vm1321_vm15, %v10027_v44, 0.0 }
0x1587   : > { %3677 = vadd.xlane.f32.xlu0 %v3676_v27 }
0x159d   : > { %3798 = vrot.lane.b32.xlu0 %v11647_v18, %s14176_s12 }
0x15a1   : > { %3788 = vrot.lane.b32.xlu0 %v11649_v48, %s14176_s12 }
0x15a5   : > { %3792 = vrot.lane.b32.xlu0 %v11665_v63, %s14176_s12 }
0x15a8   : > { %3671 = vadd.xlane.f32.xlu1 %v3670_v5 }
0x15b9   : > { %3802 = vrot.lane.b32.xlu1 %v11663_v49, %s14176_s12 }
0x15bd   : > { %3790 = vrot.lane.b32.xlu1 %v11645_v39, %s14176_s12 }
0x15c1   : > { %3794 = vrot.lane.b32.xlu1 %v11661_v23, %s14176_s12 }
0x15fc   : > { %v3663_v18 = vpop.xlane.xlu1 %3662 }
0x1600   : > { %v3657_v16 = vpop.xlane.xlu1 %3656 }
0x1604   : > { %v3666_v0 = vpop.xlane.xlu0 %3665  ;;  %v3801_v27 = vpop.permute.xlu1 %3800 }
0x1605   : > { %10028 = vrcp.f32 %v3666_v0 }
0x1606   : > { %10030 = vrcp.f32 %v3657_v16 }
0x1607   : > { %10032 = vrcp.f32 %v3663_v18 }
0x1608   : > { %v3660_v48 = vpop.xlane.xlu0 %3659 }
0x1609   : > { %10034 = vrcp.f32 %v3660_v48 }
0x160c   : > { %v3675_v63 = vpop.xlane.xlu0 %3674 }
0x160f   : > { %v10029_v28 = vpop.eup %10028 }
0x1610   : > { %v3669_v47 = vpop.xlane.xlu0 %3668  ;;  %v10031_v46 = vpop.eup %10030  ;;  %v3690_v20 = vmul.f32 %v10029_v28, %v10017_v35 }
0x1611   : > { %v10033_v38 = vpop.eup %10032  ;;  %v3687_v39 = vmul.f32 %v10031_v46, %v12322_v15 }
0x1612   : > { %v3689_v23 = vmul.f32 %v10033_v38, %v12318_v61  ;;  %v3823_v61 = vsel %vm1097_vm10, %v3801_v27, 0 }
0x1613   : > { %v10035_v49 = vpop.eup %10034 }
0x1614   : > { %v3678_v10 = vpop.xlane.xlu0 %3677  ;;  %v3688_v34 = vmul.f32 %v10035_v49, %v10019_v2  ;;  %v3696_v24 = vpack.c.bf16 %v3690_v20, %v3689_v23 }
0x1615   : > { %10036 = vrcp.f32 %v3678_v10 }
0x1616   : > { %v3695_v12 = vpack.c.bf16 %v3688_v34, %v3687_v39  ;;  %10038 = vrcp.f32 %v3669_v47 }
0x1617   : > { %10040 = vrcp.f32 %v3675_v63 }
0x1618   : > { %9032 = vmatprep.mubr.msk.bf16.mxu1 %vm1321_vm15, %v3695_v12  ;;  %v3799_v52 = vpop.permute.xlu0 %3798 }
0x1619   : > { %9033 = vmatmul.mubr.msk.bf16.vlgmr.msra.gmra.mrb[64].mxu1 %vm1321_vm15, %v3696_v24  ;;  %v3820_v35 = vsel %vm1097_vm10, %v3799_v52, 0 }
0x161a   : > { %9041 = vmatpush3.bf16.xpose.msra.mxu1 %v3817_v25 }
0x161b   : > { %9349 = vmatprep.subr.msk.bf16.mxu1 %vm1097_vm10, %v3799_v52 }
0x161c   : > { %v3789_v46 = vpop.permute.xlu0 %3788 }
0x161f   : > { %v10037_v36 = vpop.eup %10036 }
0x1620   : > { %v10039_v58 = vpop.eup %10038  ;;  %v3694_v16 = vmul.f32 %v10037_v36, %v12337_v8  ;;  %v3793_v49 = vpop.permute.xlu0 %3792 }
0x1621   : > { %v10041_v5 = vpop.eup %10040  ;;  %v3691_v0 = vmul.f32 %v10039_v58, %v12333_v42 }
0x1622   : > { %9043 = vmatpush3.bf16.xpose.msra.mxu1 %v3820_v35  ;;  %v3693_v28 = vmul.f32 %v10041_v5, %v12328_v40 }
0x1623   : > { %9350 = vmatprep.subr.msk.bf16.mxu1 %vm1097_vm10, %v3801_v27 }
0x1624   : > { %v3698_v47 = vpack.c.bf16 %v3694_v16, %v3693_v28 }
0x162a   : > { %9045 = vmatpush3.bf16.xpose.msra.mxu1 %v3823_v61 }
0x1635   : > { %v3672_v15 = vpop.xlane.xlu1 %3671 }
0x1636   : > { %10042 = vrcp.f32 %v3672_v15 }
0x1639   : > { %v3803_v2 = vpop.permute.xlu1 %3802 }
0x163a   : > { %9351 = vmatprep.subr.msk.bf16.mxu1 %vm1097_vm10, %v3803_v2  ;;  %v3826_v6 = vsel %vm1097_vm10, %v3803_v2, 0 }
0x163b   : > { %9047 = vmatpush3.bf16.xpose.msra.mxu1 %v3826_v6 }
0x163d   : > { %v3791_v38 = vpop.permute.xlu1 %3790 }
0x1640   : > { %v10043_v18 = vpop.eup %10042 }
0x1641   : > { %v3692_v48 = vmul.f32 %v10043_v18, %v10027_v44  ;;  %v3795_v8 = vpop.permute.xlu1 %3794 }
0x1643   : > { %v3697_v63 = vpack.c.bf16 %v3692_v48, %v3691_v0 }
0x1645   : > { %9036 = vmatprep.mubr.msk.bf16.mxu1 %vm1321_vm15, %v3697_v63 }
0x1646   : > { %9037 = vmatmul.mubr.msk.bf16.gmra.mrb[68].mxu1 %vm1321_vm15, %v3698_v47 }
0x1647   : > { %9048 = vmatprep.mubr.msk.bf16.mxu1 %vm1097_vm10, %v3789_v46 }
0x164e   : > { %9049 = vmatmul.mubr.msk.bf16.vlgmr.msra.gmra.mrb[72].mxu1 %vm1097_vm10, %v3791_v38 }
0x164f   : > { %9052 = vmatprep.mubr.msk.bf16.mxu1 %vm1097_vm10, %v3793_v49 }
0x1656   : > { %9053 = vmatmul.mubr.msk.bf16.gmra.mrb[76].mxu1 %vm1097_vm10, %v3795_v8 }
0x16ec   : > { %v12377_v42 = vpop.f32.mrb[64].mxu1 }
0x16ed   : > { %v12379_v40 = vpop.f32.mrb[65].mxu1 }
0x16ee   : > { %v12381_v44 = vpop.f32.mrb[66].mxu1 }
0x16ef   : > { %v12385_v10 = vpop.f32.mrb[67].mxu1 }
0x1719   : > { %v12389_v34 = vpop.f32.mrb[68].mxu1 }
0x171a   : > { %v12391_v23 = vpop.f32.mrb[69].mxu1 }
0x171b   : > { %14309 = vst [vmem:[#allocation39_spill] sm:$0xff] %v12391_v23  ;;  %v12393_v12 = vpop.f32.mrb[70].mxu1 }
0x171c   : > { %v12397_v52 = vpop.f32.mrb[71].mxu1 }
0x1721   : > { %v9050_v35 = vpop.f32.mrb[72].mxu1 }
0x1722   : > { %v3862_v27 = vpop.f32.mrb[73].mxu1  ;;  %v3895_v6 = vmul.f32 0.35355338, %v9050_v35 }
0x1723   : > { %v3893_v61 = vmul.f32 0.35355338, %v3862_v27  ;;  %v9051_v15 = vpop.f32.mrb[74].mxu1 }
0x1724   : > { %v3865_v2 = vpop.f32.mrb[75].mxu1  ;;  %v3896_v18 = vmul.f32 0.35355338, %v9051_v15  ;;  %v3907_v0 = vsel %vm1321_vm15, %v3895_v6, -inf }
0x1725   : > { %v3894_v36 = vmul.f32 0.35355338, %v3865_v2  ;;  %v3901_v58 = vsel %vm1321_vm15, %v3893_v61, -inf }
0x1726   : > { %3902 = vmax.xlane.f32.xlu0 %v3901_v58  ;;  %v3910_v49 = vsel %vm1321_vm15, %v3896_v18, -inf }
0x1727   : > { %v3904_v5 = vsel %vm1321_vm15, %v3894_v36, -inf }
0x1728   : > { %3905 = vmax.xlane.f32.xlu1 %v3904_v5 }
0x1729   : > { %v9054_v16 = vpop.f32.mrb[76].mxu1 }
0x172a   : > { %3908 = vmax.xlane.f32.xlu0 %v3907_v0  ;;  %v3878_v48 = vpop.f32.mrb[77].mxu1  ;;  %v3899_v46 = vmul.f32 0.35355338, %v9054_v16 }
0x172b   : > { %v3897_v28 = vmul.f32 0.35355338, %v3878_v48  ;;  %v9055_v63 = vpop.f32.mrb[78].mxu1 }
0x172c   : > { %v3881_v47 = vpop.f32.mrb[79].mxu1  ;;  %v3900_v35 = vmul.f32 0.35355338, %v9055_v63  ;;  %v3919_v27 = vsel %vm1321_vm15, %v3899_v46, -inf }
0x172d   : > { %v3898_v38 = vmul.f32 0.35355338, %v3881_v47  ;;  %v3913_v8 = vsel %vm1321_vm15, %v3897_v28, -inf }
0x172e   : > { %3911 = vmax.xlane.f32.xlu0 %v3910_v49  ;;  %3914 = vmax.xlane.f32.xlu1 %v3913_v8  ;;  %v3922_v2 = vsel %vm1321_vm15, %v3900_v35, -inf }
0x172f   : > { %v3916_v15 = vsel %vm1321_vm15, %v3898_v38, -inf }
0x1732   : > { %3920 = vmax.xlane.f32.xlu1 %v3919_v27  ;;  %3917 = vmax.xlane.f32.xlu0 %v3916_v15 }
0x1736   : > { %3923 = vmax.xlane.f32.xlu0 %v3922_v2 }
0x1743   : > { %3993 = vrot.lane.b32.xlu1 %v11675_v51, %s14176_s12 }
0x17b3   : > { %v3903_v58 = vpop.xlane.xlu0 %3902 }
0x17b4   : > { %v3925_v5 = vsub.f32 %v3893_v61, %v3903_v58 }
0x17b5   : > { %v3906_v16 = vpop.xlane.xlu1 %3905 }
0x17b6   : > { %v3933_v47 = vmul.f32 1.442695, %v3925_v5  ;;  %v3926_v63 = vsub.f32 %v3894_v36, %v3906_v16 }
0x17b7   : > { %v3909_v0 = vpop.xlane.xlu0 %3908 }
0x17b8   : > { %v3927_v48 = vsub.f32 %v3895_v6, %v3909_v0  ;;  %v3935_v39 = vmul.f32 1.442695, %v3926_v63 }
0x17ba   : > { %v3937_v49 = vmul.f32 1.442695, %v3927_v48 }
0x17bb   : > { %v3915_v8 = vpop.xlane.xlu1 %3914  ;;  %v3912_v25 = vpop.xlane.xlu0 %3911 }
0x17bc   : > { %10044 = vpow2.f32 %v3937_v49  ;;  %v3928_v24 = vsub.f32 %v3896_v18, %v3912_v25  ;;  %v3929_v27 = vsub.f32 %v3897_v28, %v3915_v8 }
0x17bd   : > { %10046 = vpow2.f32 %v3933_v47 }
0x17be   : > { %v3939_v15 = vmul.f32 1.442695, %v3928_v24  ;;  %v3941_v51 = vmul.f32 1.442695, %v3929_v27 }
0x17bf   : > { %v3921_v2 = vpop.xlane.xlu1 %3920  ;;  %v3918_v20 = vpop.xlane.xlu0 %3917 }
0x17c0   : > { %v3931_v23 = vsub.f32 %v3899_v46, %v3921_v2  ;;  %10048 = vpow2.f32 %v3939_v15  ;;  %v3930_v58 = vsub.f32 %v3898_v38, %v3918_v20  ;;  %v14310_v15 = vpack.i.bf16 %v11861_v17, %v11857_v45 }
0x17c1   : > { %10050 = vpow2.f32 %v3935_v39  ;;  %v14311_v2 = vpack.i.bf16 %v11965_v4, %v11961_v9  ;;  %v14315_v45 = vpack.i.bf16 %v12173_v29, %v12169_v62  ;;  %v14317_v17 = vpack.i.bf16 %v12277_v1, %v12273_v26  ;;  %v14329_v62 = vld [vmem:[#allocation32_spill] sm:$0xff]  ;;  %v14339_v26 = vld [vmem:[#allocation31_spill] sm:$0xff]  ;;  %v14341_v1 = vld [vmem:[#allocation38_spill] sm:$0xff] }
0x17c2   : > { %v3945_v61 = vmul.f32 1.442695, %v3931_v23  ;;  %v3943_v24 = vmul.f32 1.442695, %v3930_v58  ;;  %v14319_v9 = vpack.i.bf16 %v12381_v44, %v12377_v42  ;;  %v14321_v4 = vpack.i.bf16 %v11873_v7, %v11869_v50  ;;  %v14326_v7 = vld [vmem:[#allocation27_spill] sm:$0xff]  ;;  %v14333_v29 = vld [vmem:[#allocation28_spill] sm:$0xff] }
0x17c3   : > { %v3994_v6 = vpop.permute.xlu1 %3993  ;;  %v3924_v5 = vpop.xlane.xlu0 %3923  ;;  %v14325_v50 = vpack.i.bf16 %v12081_v41, %v12077_v60  ;;  %v14338_v41 = vld [vmem:[#allocation34_spill] sm:$0xff] }
0x17c4   : > { %10052 = vpow2.f32 %v3945_v61  ;;  %v3932_v36 = vsub.f32 %v3900_v35, %v3924_v5  ;;  %9056 = vmatprep.subr.bf16.mxu0 %v3994_v6 }
0x17c5   : > { %9057 = vmatpush3.bf16.msra.mxu0 %v3994_v6  ;;  %10054 = vpow2.f32 %v3941_v51 }
0x17c6   : > { %v12411_v16 = vpop.eup %10044  ;;  %v3947_v25 = vmul.f32 1.442695, %v3932_v36 }
0x17c7   : > { %v3955_v18 = vsel %vm1321_vm15, %v12411_v16, 0.0  ;;  %v12415_v28 = vpop.eup %10046 }
0x17c8   : > { %10056 = vpow2.f32 %v3947_v25  ;;  %3956 = vadd.xlane.f32.xlu1 %v3955_v18  ;;  %v3949_v20 = vsel %vm1321_vm15, %v12415_v28, 0.0 }
0x17c9   : > { %10058 = vpow2.f32 %v3943_v24 }
0x17ca   : > { %v12417_v39 = vpop.eup %10048 }
0x17cb   : > { %v3958_v23 = vsel %vm1321_vm15, %v12417_v39, 0.0  ;;  %v12423_v46 = vpop.eup %10050 }
0x17cc   : > { %3950 = vadd.xlane.f32.xlu1 %v3949_v20  ;;  %3959 = vadd.xlane.f32.xlu0 %v3958_v23  ;;  %v3952_v48 = vsel %vm1321_vm15, %v12423_v46, 0.0 }
0x17ce   : > { %v12425_v38 = vpop.eup %10052 }
0x17cf   : > { %v3967_v35 = vsel %vm1321_vm15, %v12425_v38, 0.0  ;;  %v12429_v0 = vpop.eup %10054 }
0x17d0   : > { %3968 = vadd.xlane.f32.xlu1 %v3967_v35  ;;  %3953 = vadd.xlane.f32.xlu0 %v3952_v48  ;;  %v3961_v49 = vsel %vm1321_vm15, %v12429_v0, 0.0 }
0x17d2   : > { %v12433_v47 = vpop.eup %10056 }
0x17d3   : > { %v3970_v63 = vsel %vm1321_vm15, %v12433_v47, 0.0  ;;  %v12439_v8 = vpop.eup %10058 }
0x17d4   : > { %3962 = vadd.xlane.f32.xlu1 %v3961_v49  ;;  %3971 = vadd.xlane.f32.xlu0 %v3970_v63  ;;  %v3964_v27 = vsel %vm1321_vm15, %v12439_v8, 0.0 }
0x17d8   : > { %3965 = vadd.xlane.f32.xlu0 %v3964_v27 }
0x17e5   : > { %3997 = vrot.lane.b32.xlu1 %v11687_v57, %s14176_s12  ;;  %v14312_v57 = vpack.i.bf16 %v11865_v37, %v11859_v3  ;;  %v14316_v3 = vpack.i.bf16 %v12073_v31, %v12067_v13  ;;  %v14318_v37 = vpack.i.bf16 %v12177_v22, %v12171_v21  ;;  %v14324_v13 = vpack.i.bf16 %v11877_v59, %v11871_v14  ;;  %v14330_v21 = vld [vmem:[#allocation30_spill] sm:$0xff]  ;;  %v14335_v59 = vld [vmem:[#allocation37_spill] sm:$0xff]  ;;  %v14336_v22 = vld [vmem:[#allocation35_spill] sm:$0xff] }
0x17e6   : > { %v14337_v60 = vpack.i.bf16 %v14335_v59, %v14336_v22 }
0x17e9   : > { %3999 = vrot.lane.b32.xlu1 %v11684_v56, %s14176_s12  ;;  %v14313_v56 = vpack.i.bf16 %v12069_v33, %v12065_v53  ;;  %v14323_v53 = vpack.i.bf16 %v11977_v32, %v11973_v43  ;;  %v14327_v33 = vld [vmem:[#allocation16_spill] sm:$0xff]  ;;  %v14331_v43 = vpack.i.bf16 %v14329_v62, %v14330_v21  ;;  %v14332_v32 = vld [vmem:[#allocation29_spill] sm:$0xff] }
0x17ea   : > { %v14328_v31 = vpack.i.bf16 %v14326_v7, %v14327_v33  ;;  %v14334_v14 = vpack.i.bf16 %v14332_v32, %v14333_v29  ;;  %v14345_v33 = vld [vmem:[#allocation39_spill] sm:$0xff] }
0x17ed   : > { %9449 = vrot.lane.b32.xlu1 %v14310_v15, %s14174_s23 }
0x17ee   : > { %3995 = vrot.lane.b32.xlu0 %v11673_v19, %s14176_s12  ;;  %v14314_v19 = vpack.i.bf16 %v11969_v54, %v11963_v55  ;;  %v14320_v55 = vpack.i.bf16 %v12281_v30, %v12275_v11  ;;  %v14322_v54 = vpack.i.bf16 %v12385_v10, %v12379_v40  ;;  %v14340_v11 = vpack.i.bf16 %v14338_v41, %v14339_v26  ;;  %v14342_v30 = vld [vmem:[#allocation36_spill] sm:$0xff] }
0x17ef   : > { %v14343_v42 = vpack.i.bf16 %v14341_v1, %v14342_v30 }
0x17f1   : > { %9459 = vrot.lane.b32.xlu1 %v14311_v2, %s14172_s26 }
0x17f2   : > { %9444 = vrot.lane.b32.xlu0 %v14312_v57, %s14174_s23 }
0x17f5   : > { %9469 = vrot.lane.b32.xlu1 %v14313_v56, %s14170_s25 }
0x17f6   : > { %9454 = vrot.lane.b32.xlu0 %v14314_v19, %s14172_s26 }
0x17f9   : > { %9479 = vrot.lane.b32.xlu1 %v14315_v45, %s14168_s27 }
0x17fa   : > { %9464 = vrot.lane.b32.xlu0 %v14316_v3, %s14170_s25 }
0x17fd   : > { %9489 = vrot.lane.b32.xlu1 %v14317_v17, %s14166_s28 }
0x17fe   : > { %9474 = vrot.lane.b32.xlu0 %v14318_v37, %s14168_s27 }
0x1801   : > { %9499 = vrot.lane.b32.xlu1 %v14319_v9, %s10503_s29 }
0x1802   : > { %9484 = vrot.lane.b32.xlu0 %v14320_v55, %s14166_s28 }
0x1805   : > { %9509 = vrot.lane.b32.xlu1 %v14321_v4, %s14174_s23 }
0x1806   : > { %9494 = vrot.lane.b32.xlu0 %v14322_v54, %s10503_s29 }
0x1809   : > { %9519 = vrot.lane.b32.xlu1 %v14323_v53, %s14172_s26 }
0x180a   : > { %9504 = vrot.lane.b32.xlu0 %v14324_v13, %s14174_s23 }
0x180d   : > { %9529 = vrot.lane.b32.xlu1 %v14325_v50, %s14170_s25  ;;  %v14344_v50 = vpack.i.bf16 %v12393_v12, %v12389_v34 }
0x180e   : > { %9514 = vrot.lane.b32.xlu0 %v14328_v31, %s14172_s26  ;;  %v14346_v31 = vpack.i.bf16 %v12397_v52, %v14345_v33 }
0x1811   : > { %9539 = vrot.lane.b32.xlu1 %v14331_v43, %s14168_s27 }
0x1812   : > { %9524 = vrot.lane.b32.xlu0 %v14334_v14, %s14170_s25 }
0x1815   : > { %9549 = vrot.lane.b32.xlu1 %v14337_v60, %s14166_s28 }
0x1816   : > { %9534 = vrot.lane.b32.xlu0 %v14340_v11, %s14168_s27 }
0x181a   : > { %9544 = vrot.lane.b32.xlu0 %v14343_v42, %s14166_s28  ;;  %s14375_s28 = smov 72  }
0x1855   : > { %v3957_v40 = vpop.xlane.xlu1 %3956 }
0x1859   : > { %v3951_v44 = vpop.xlane.xlu1 %3950  ;;  %v3960_v10 = vpop.xlane.xlu0 %3959 }
0x185a   : > { %10060 = vrcp.f32 %v3951_v44 }
0x185d   : > { %v3969_v51 = vpop.xlane.xlu1 %3968  ;;  %v3954_v61 = vpop.xlane.xlu0 %3953 }
0x185e   : > { %10062 = vrcp.f32 %v3954_v61 }
0x185f   : > { %10064 = vrcp.f32 %v3960_v10 }
0x1860   : > { %10066 = vrcp.f32 %v3957_v40 }
0x1861   : > { %v3972_v58 = vpop.xlane.xlu0 %3971  ;;  %v3963_v6 = vpop.xlane.xlu1 %3962 }
0x1862   : > { %10068 = vrcp.f32 %v3963_v6 }
0x1864   : > { %v10061_v36 = vpop.eup %10060 }
0x1865   : > { %v3966_v5 = vpop.xlane.xlu0 %3965  ;;  %v3998_v24 = vpop.permute.xlu1 %3997  ;;  %v3981_v20 = vmul.f32 %v10061_v36, %v12415_v28  ;;  %v14347_v36 = vld [vmem:[#allocation22_spill] sm:$0xff] }
0x1866   : > { %10070 = vrcp.f32 %v3966_v5 }
0x1867   : > { %10072 = vrcp.f32 %v3972_v58 }
0x1868   : > { %v10063_v25 = vpop.eup %10062  ;;  %10074 = vrcp.f32 %v3969_v51 }
0x1869   : > { %v3996_v18 = vpop.permute.xlu0 %3995  ;;  %v3982_v23 = vmul.f32 %v10063_v25, %v12423_v46  ;;  %v10065_v48 = vpop.eup %10064 }
0x186a   : > { %9058 = vmatprep.subr.bf16.mxu0 %v3996_v18  ;;  %v10067_v49 = vpop.eup %10066  ;;  %v4000_v27 = vpop.permute.xlu1 %3999  ;;  %v3984_v2 = vmul.f32 %v10065_v48, %v12417_v39 }
0x186b   : > { %9059 = vmatpush3.bf16.msra.mxu0 %v3996_v18  ;;  %v3989_v35 = vpack.c.bf16 %v3982_v23, %v3981_v20  ;;  %v3983_v46 = vmul.f32 %v10067_v49, %v12411_v16  ;;  %v9736_v16 = vld [vmem:[%s14101_s4 + $0x60] sm:$0xff]  }
0x186c   : > { %9060 = vmatprep.subr.bf16.mxu0 %v3998_v24  ;;  %v10069_v63 = vpop.eup %10068 }
0x186d   : > { %9064 = vmatprep.mubr.msk.bf16.mxu0 %vm1321_vm15, %v3989_v35  ;;  %v3985_v57 = vmul.f32 %v10069_v63, %v12429_v0  ;;  %v3990_v56 = vpack.c.bf16 %v3984_v2, %v3983_v46  ;;  %v9737_v0 = vld [vmem:[%s14101_s4 + $0x68] sm:$0xff]   ;;  %v9445_v14 = vpop.permute.xlu0 %9444 }
0x186e   : > { %v9450_v29 = vpop.permute.xlu1 %9449  ;;  %v9447_v61 = vunpack.i.h.bf16 %v9445_v14  ;;  %v9446_v58 = vunpack.i.l.bf16 %v9445_v14  ;;  %v14348_v46 = vld [vmem:[#allocation24_spill] sm:$0xff] }
0x186f   : > { %9061 = vmatpush3.bf16.msra.mxu0 %v3998_v24  ;;  %v9451_v10 = vunpack.i.l.bf16 %v9450_v29  ;;  %v9452_v51 = vunpack.i.h.bf16 %v9450_v29 }
0x1870   : > { %v10071_v15 = vpop.eup %10070  ;;  %9062 = vmatprep.subr.bf16.mxu0 %v4000_v27 }
0x1871   : > { %v3986_v28 = vmul.f32 %v10071_v15, %v12439_v8  ;;  %v10073_v19 = vpop.eup %10072  ;;  %v9455_v22 = vpop.permute.xlu0 %9454  ;;  %v4308_v25 = vsel %vm1097_vm10, %v14347_v36, %v9451_v10  ;;  %v14352_v36 = vld [vmem:[#allocation26_spill] sm:$0xff] }
0x1872   : > { %v10075_v3 = vpop.eup %10074  ;;  %v3988_v17 = vmul.f32 %v10073_v19, %v12433_v47  ;;  %v9738_v47 = vld [vmem:[%s14101_s4 + $0x70] sm:$0xff]   ;;  %v9460_v59 = vpop.permute.xlu1 %9459  ;;  %v9457_v18 = vunpack.i.h.bf16 %v9455_v22  ;;  %v9456_v20 = vunpack.i.l.bf16 %v9455_v22 }
0x1873   : > { %9063 = vmatpush3.bf16.msra.mxu0 %v4000_v27  ;;  %v3991_v45 = vpack.c.bf16 %v3986_v28, %v3985_v57  ;;  %v3987_v39 = vmul.f32 %v10075_v3, %v12425_v38  ;;  %v9739_v38 = vld [vmem:[%s14101_s4 + $0x78] sm:$0xff]   ;;  %v9461_v6 = vunpack.i.l.bf16 %v9460_v59  ;;  %v9462_v24 = vunpack.i.h.bf16 %v9460_v59 }
0x1874   : > { %9072 = vmatprep.subr.bf16.mxu0 %v9736_v16  ;;  %v4309_v57 = vsel %vm1097_vm10, %v14348_v46, %v9452_v51 }
0x1875   : > { %v3992_v37 = vpack.c.bf16 %v3988_v17, %v3987_v39  ;;  %v9465_v12 = vpop.permute.xlu0 %9464  ;;  %v4316_v17 = vsel %vm1173_vm14, %v4308_v25, %v9461_v6  ;;  %v4317_v39 = vsel %vm1173_vm14, %v4309_v57, %v9462_v24  ;;  %v14351_v6 = vld [vmem:[#allocation14_spill] sm:$0xff]  ;;  %v14353_v24 = vld [vmem:[#allocation15_spill] sm:$0xff] }
0x1876   : > { %9065 = vmatmul.mubr.msk.bf16.vlgmr.msra.gmra.mrb[72].mxu0 %vm1321_vm15, %v3990_v56  ;;  %v9470_v34 = vpop.permute.xlu1 %9469  ;;  %v9467_v49 = vunpack.i.h.bf16 %v9465_v12  ;;  %v9466_v63 = vunpack.i.l.bf16 %v9465_v12  ;;  %v14349_v56 = vld [vmem:[#allocation25_spill] sm:$0xff] }
0x1877   : > { %9068 = vmatprep.mubr.msk.bf16.mxu0 %vm1321_vm15, %v3991_v45  ;;  %9073 = vmatpush3.bf16.msra.mxu0 %v9736_v16  ;;  %v9472_v35 = vunpack.i.h.bf16 %v9470_v34  ;;  %v9471_v48 = vunpack.i.l.bf16 %v9470_v34  ;;  %v4307_v19 = vsel %vm1097_vm10, %v14349_v56, %v9447_v61  ;;  %v14350_v45 = vld [vmem:[#allocation23_spill] sm:$0xff] }
0x1878   : > { %9074 = vmatprep.subr.bf16.mxu0 %v9737_v0  ;;  %v4306_v3 = vsel %vm1097_vm10, %v14350_v45, %v9446_v58  ;;  %v4315_v16 = vsel %vm1173_vm14, %v4307_v19, %v9457_v18 }
0x1879   : > { %v9475_v41 = vpop.permute.xlu0 %9474 }
0x187a   : > { %v9480_v60 = vpop.permute.xlu1 %9479  ;;  %v9477_v2 = vunpack.i.h.bf16 %v9475_v41  ;;  %v9476_v28 = vunpack.i.l.bf16 %v9475_v41 }
0x187b   : > { %9075 = vmatpush3.bf16.msra.mxu0 %v9737_v0  ;;  %v9482_v27 = vunpack.i.h.bf16 %v9480_v60  ;;  %v9481_v15 = vunpack.i.l.bf16 %v9480_v60 }
0x187c   : > { %9076 = vmatprep.subr.bf16.mxu0 %v9738_v47 }
0x187d   : > { %v12575_v52 = vpop.permute.xlu0 %9484 }
0x187e   : > { %9069 = vmatmul.mubr.msk.bf16.gmra.mrb[76].mxu0 %vm1321_vm15, %v3992_v37  ;;  %v12573_v26 = vpop.permute.xlu1 %9489  ;;  %v4314_v37 = vsel %vm1173_vm14, %v4306_v3, %v9456_v20  ;;  %v9487_v33 = vunpack.i.h.bf16 %v12575_v52  ;;  %v14354_v20 = vld [vmem:[#allocation13_spill] sm:$0xff] }
0x187f   : > { %9077 = vmatpush3.bf16.msra.mxu0 %v9738_v47  ;;  %v9491_v0 = vunpack.i.l.bf16 %v12573_v26  ;;  %v4325_v47 = vsel %vm4322_vm0, %v4316_v17, %v9471_v48 }
0x1880   : > { %9078 = vmatprep.subr.bf16.mxu0 %v9739_v38 }
0x1881   : > { %v12579_v1 = vpop.permute.xlu0 %9494 }
0x1882   : > { %v12577_v11 = vpop.permute.xlu1 %9499  ;;  %v9496_v29 = vunpack.i.l.bf16 %v12579_v1 }
0x1883   : > { %9079 = vmatpush3.bf16.msra.mxu0 %v9739_v38  ;;  %v4326_v38 = vsel %vm4322_vm0, %v4317_v39, %v9472_v35 }
0x1885   : > { %v12583_v42 = vpop.permute.xlu0 %9504 }
0x1886   : > { %v12581_v30 = vpop.permute.xlu1 %9509  ;;  %v9507_v22 = vunpack.i.h.bf16 %v12583_v42  ;;  %v9506_v34 = vunpack.i.l.bf16 %v12583_v42 }
0x1887   : > { %v9512_v14 = vunpack.i.h.bf16 %v12581_v30  ;;  %v9511_v59 = vunpack.i.l.bf16 %v12581_v30 }
0x1888   : > { %v4311_v18 = vsel %vm1097_vm10, %v14353_v24, %v9507_v22  ;;  %v4310_v35 = vsel %vm1097_vm10, %v14354_v20, %v9506_v34  ;;  %v14355_v20 = vld [vmem:[#allocation33_spill] sm:$0xff] }
0x1889   : > { %v12587_v44 = vpop.permute.xlu0 %9514  ;;  %v4312_v25 = vsel %vm1097_vm10, %v14352_v36, %v9511_v59 }
0x188a   : > { %v12585_v40 = vpop.permute.xlu1 %9519  ;;  %v9517_v41 = vunpack.i.h.bf16 %v12587_v44 }
0x188b   : > { %v9522_v12 = vunpack.i.h.bf16 %v12585_v40  ;;  %v9521_v60 = vunpack.i.l.bf16 %v12585_v40 }
0x188d   : > { %v12593_v23 = vpop.permute.xlu0 %9524  ;;  %v4320_v48 = vsel %vm1173_vm14, %v4312_v25, %v9521_v60 }
0x188e   : > { %v12589_v5 = vpop.permute.xlu1 %9529 }
0x188f   : > { %v9531_v40 = vunpack.i.l.bf16 %v12589_v5 }
0x1891   : > { %v4329_v57 = vsel %vm4322_vm0, %v4320_v48, %v9531_v40 }
0x1949   : > { %v9066_v8 = vpop.f32.mrb[72].mxu0 }
0x194a   : > { %v4051_v9 = vpop.f32.mrb[73].mxu0 }
0x194b   : > { %v9067_v55 = vpop.f32.mrb[74].mxu0 }
0x194c   : > { %v9553_v4 = vpack.i.bf16 %v9067_v55, %v9066_v8  ;;  %v4054_v54 = vpop.f32.mrb[75].mxu0  ;;  %v4323_v8 = vsel %vm4322_vm0, %v4314_v37, %v9466_v63  ;;  %v12610_v55 = vpop.permute.xlu1 %9539 }
0x194d   : > { %v9558_v53 = vpack.i.bf16 %v4054_v54, %v4051_v9  ;;  %v4324_v9 = vsel %vm4322_vm0, %v4315_v16, %v9467_v49  ;;  %v4335_v54 = vsel %vm4331_vm1, %v4326_v38, %v9482_v27  ;;  %v4319_v27 = vsel %vm1173_vm14, %v4311_v18, %v9517_v41  ;;  %v396_v18 = vld [vmem:[#allocation4 + $0x10] sm:$0x3f] }
0x194e   : > { %9554 = vrot.lane.b32.xlu1 %v9553_v4, %s14180_s15  ;;  %v4334_v4 = vsel %vm4331_vm1, %v4325_v47, %v9481_v15  ;;  %v9532_v15 = vunpack.i.h.bf16 %v12589_v5  ;;  %v9542_v56 = vunpack.i.h.bf16 %v12610_v55  ;;  %v9541_v17 = vunpack.i.l.bf16 %v12610_v55 }
0x194f   : > { %9559 = vrot.lane.b32.xlu0 %v9558_v53, %s14180_s15  ;;  %v4332_v53 = vsel %vm4331_vm1, %v4323_v8, %v9476_v28  ;;  %v9526_v28 = vunpack.i.l.bf16 %v12593_v23 }
0x1950   : > { %v9550_v10 = vpop.permute.xlu1 %9549 }
0x1951   : > { %v9070_v13 = vpop.f32.mrb[76].mxu0  ;;  %v9551_v38 = vunpack.i.l.bf16 %v9550_v10 }
0x1952   : > { %9569 = vrot.lane.b32.xlu1 %v14344_v50, %s10503_s29  ;;  %v4067_v7 = vpop.f32.mrb[77].mxu0  ;;  %v12616_v50 = vpop.permute.xlu0 %9534 }
0x1953   : > { %9564 = vrot.lane.b32.xlu0 %v14346_v31, %s10503_s29  ;;  %v9071_v62 = vpop.f32.mrb[78].mxu0  ;;  %v9486_v31 = vunpack.i.l.bf16 %v12575_v52  ;;  %v9537_v39 = vunpack.i.h.bf16 %v12616_v50  ;;  %v9536_v5 = vunpack.i.l.bf16 %v12616_v50 }
0x1954   : > { %v9578_v21 = vpack.i.bf16 %v9071_v62, %v9070_v13  ;;  %v4070_v43 = vpop.f32.mrb[79].mxu0  ;;  %v4333_v13 = vsel %vm4331_vm1, %v4324_v9, %v9477_v2  ;;  %v9501_v62 = vunpack.i.l.bf16 %v12577_v11  ;;  %v9527_v2 = vunpack.i.h.bf16 %v12593_v23 }
0x1955   : > { %v9573_v32 = vpack.i.bf16 %v4070_v43, %v4067_v7  ;;  %v9492_v7 = vunpack.i.h.bf16 %v12573_v26  ;;  %v9502_v43 = vunpack.i.h.bf16 %v12577_v11  ;;  %v9516_v26 = vunpack.i.l.bf16 %v12587_v44 }
0x1956   : > { %9579 = vrot.lane.b32.xlu1 %v9578_v21, %s14180_s15  ;;  %v4343_v21 = vsel %vm4340_vm2, %v4334_v4, %v9491_v0  ;;  %v4341_v11 = vsel %vm4340_vm2, %v4332_v53, %v9486_v31  ;;  %v9545_v58 = vpop.permute.xlu0 %9544  ;;  %v4313_v44 = vsel %vm1097_vm10, %v14351_v6, %v9512_v14  ;;  %v9552_v0 = vunpack.i.h.bf16 %v9550_v10 }
0x1957   : > { %9574 = vrot.lane.b32.xlu0 %v9573_v32, %s14180_s15  ;;  %v9497_v32 = vunpack.i.h.bf16 %v12579_v1  ;;  %v4344_v52 = vsel %vm4340_vm2, %v4335_v54, %v9492_v7  ;;  %v4342_v1 = vsel %vm4340_vm2, %v4333_v13, %v9487_v33  ;;  %v4352_v30 = vsel %vm4349_vm3, %v4343_v21, %v9501_v62  ;;  %s14373_s15 = smov 80  }
0x1958   : > { %v4353_v51 = vsel %vm4349_vm3, %v4344_v52, %v9502_v43  ;;  %v4350_v42 = vsel %vm4349_vm3, %v4341_v11, %v9496_v29  ;;  %v4321_v49 = vsel %vm1173_vm14, %v4313_v44, %v9522_v12  ;;  %v4318_v63 = vsel %vm1173_vm14, %v4310_v35, %v9516_v26 }
0x1959   : > { %v4351_v61 = vsel %vm4349_vm3, %v4342_v1, %v9497_v32  ;;  %v4330_v55 = vsel %vm4322_vm0, %v4321_v49, %v9532_v15  ;;  %v9547_v53 = vunpack.i.h.bf16 %v9545_v58  ;;  %v9546_v13 = vunpack.i.l.bf16 %v9545_v58 }
0x195a   : > { %v4327_v50 = vsel %vm4322_vm0, %v4318_v63, %v9526_v28  ;;  %v4328_v31 = vsel %vm4322_vm0, %v4319_v27, %v9527_v2  ;;  %v4338_v43 = vsel %vm4331_vm1, %v4329_v57, %v9541_v17  ;;  %v4339_v32 = vsel %vm4331_vm1, %v4330_v55, %v9542_v56  ;;  %v14361_v17 = vld [vmem:[#allocation9_spill] sm:$0xff]  ;;  %v14365_v55 = vld [vmem:[#allocation11_spill] sm:$0xff] }
0x195b   : > { %v4336_v59 = vsel %vm4331_vm1, %v4327_v50, %v9536_v5  ;;  %v4337_v22 = vsel %vm4331_vm1, %v4328_v31, %v9537_v39  ;;  %v4347_v34 = vsel %vm4340_vm2, %v4338_v43, %v9551_v38  ;;  %v4348_v12 = vsel %vm4340_vm2, %v4339_v32, %v9552_v0  ;;  %v14363_v0 = vld [vmem:[#allocation10_spill] sm:$0xff]  ;;  %v14371_v32 = vld [vmem:[#allocation20_spill] sm:$0xff] }
0x195c   : > { %v4345_v41 = vsel %vm4340_vm2, %v4336_v59, %v9546_v13  ;;  %v4346_v26 = vsel %vm4340_vm2, %v4337_v22, %v9547_v53  ;;  %v14356_v35 = vsub.s32 1, %v14355_v20 }
0x195e   : > { %v4374_v48 = vrot.slane %v396_v18, %v14356_v35 }
0x19c0   : > { %v9555_v46 = vpop.permute.xlu1 %9554 }
0x19c1   : > { %v9557_v19 = vunpack.i.h.bf16 %v9555_v46  ;;  %v9556_v45 = vunpack.i.l.bf16 %v9555_v46  ;;  %v9560_v3 = vpop.permute.xlu0 %9559  ;;  %v14357_v46 = vld [vmem:[#allocation17_spill] sm:$0xff] }
0x19c2   : > { %v9562_v37 = vunpack.i.h.bf16 %v9560_v3  ;;  %v9561_v16 = vunpack.i.l.bf16 %v9560_v3 }
0x19c3   : > { %v4362_v23 = vsel %vm4358_vm4, %v4353_v51, %v9557_v19  ;;  %v4361_v47 = vsel %vm4358_vm4, %v4352_v30, %v9556_v45  ;;  %v14359_v45 = vld [vmem:[#allocation18_spill] sm:$0xff] }
0x19c4   : > { %v4368_v8 = vpack.c.bf16 %v4362_v23, %v4361_v47  ;;  %v4359_v9 = vsel %vm4358_vm4, %v4350_v42, %v9561_v16  ;;  %v4360_v4 = vsel %vm4358_vm4, %v4351_v61, %v9562_v37  ;;  %v9570_v54 = vpop.permute.xlu1 %9569 }
0x19c5   : > { %v9565_v7 = vpop.permute.xlu0 %9564  ;;  %v4367_v33 = vpack.c.bf16 %v4360_v4, %v4359_v9  ;;  %v9572_v62 = vunpack.i.h.bf16 %v9570_v54  ;;  %v9571_v21 = vunpack.i.l.bf16 %v9570_v54 }
0x19c6   : > { %v9567_v29 = vunpack.i.h.bf16 %v9565_v7  ;;  %v9566_v14 = vunpack.i.l.bf16 %v9565_v7 }
0x19c7   : > { %9080 = vmatprep.mubr.msk.bf16.mxu0 %vm1321_vm15, %v4367_v33  ;;  %v4357_v30 = vsel %vm4349_vm3, %v4348_v12, %v9572_v62  ;;  %v4356_v10 = vsel %vm4349_vm3, %v4347_v34, %v9571_v21  ;;  %v14367_v33 = vld [vmem:[#allocation12_spill] sm:$0xff]  ;;  %v14369_v62 = vld [vmem:[#allocation19_spill] sm:$0xff] }
0x19c8   : > { %v9580_v60 = vpop.permute.xlu1 %9579  ;;  %9081 = vmatmul.mubr.msk.bf16.vlgmr.msra.gmra.mrb[80].mxu0 %vm1321_vm15, %v4368_v8  ;;  %v4354_v61 = vsel %vm4349_vm3, %v4345_v41, %v9566_v14  ;;  %v4355_v40 = vsel %vm4349_vm3, %v4346_v26, %v9567_v29 }
0x19c9   : > { %v9582_v52 = vunpack.i.h.bf16 %v9580_v60  ;;  %v9581_v11 = vunpack.i.l.bf16 %v9580_v60  ;;  %v9575_v1 = vpop.permute.xlu0 %9574 }
0x19ca   : > { %v9577_v51 = vunpack.i.h.bf16 %v9575_v1  ;;  %v9576_v42 = vunpack.i.l.bf16 %v9575_v1 }
0x19cb   : > { %v4366_v58 = vsel %vm4358_vm4, %v4357_v30, %v9582_v52  ;;  %v4365_v6 = vsel %vm4358_vm4, %v4356_v10, %v9581_v11 }
0x19cc   : > { %v4363_v44 = vsel %vm4358_vm4, %v4354_v61, %v9576_v42  ;;  %v4364_v36 = vsel %vm4358_vm4, %v4355_v40, %v9577_v51  ;;  %v4370_v25 = vpack.c.bf16 %v4366_v58, %v4365_v6 }
0x19cd   : > { %v4369_v24 = vpack.c.bf16 %v4364_v36, %v4363_v44 }
0x19cf   : > { %9084 = vmatprep.mubr.msk.bf16.mxu0 %vm1321_vm15, %v4369_v24 }
0x19d0   : > { %9085 = vmatmul.mubr.msk.bf16.gmra.mrb[84].mxu0 %vm1321_vm15, %v4370_v25 }
0x1a9b   : > { %v9082_v49 = vpop.f32.mrb[80].mxu0 }
0x1a9c   : > { %v4445_v63 = vpop.f32.mrb[81].mxu0  ;;  %v4454_v27 = vadd.f32 %v9082_v49, %v4374_v48 }
0x1a9d   : > { %v4446_v15 = vadd.f32 %v4445_v63, %v4374_v48  ;;  %v9083_v2 = vpop.f32.mrb[82].mxu0 }
0x1a9e   : > { %v4448_v28 = vpop.f32.mrb[83].mxu0  ;;  %v4457_v19 = vadd.f32 %v9083_v2, %v4374_v48  ;;  %v12695_v3 = vadd.f32 %v4454_v27, %v14359_v45 }
0x1a9f   : > { %v12692_v57 = vadd.f32 %v4446_v15, %v14357_v46  ;;  %v4449_v56 = vadd.f32 %v4448_v28, %v4374_v48 }
0x1aa0   : > { %14360 = vst [vmem:[#allocation16_spill] sm:$0xff] %v12695_v3  ;;  %v12705_v23 = vadd.f32 %v4457_v19, %v14363_v0  ;;  %v4490_v4 = vsel %vm1321_vm15, %v12695_v3, 0.0 }
0x1aa1   : > { %14358 = vst [vmem:[#allocation27_spill] sm:$0xff] %v12692_v57  ;;  %v12698_v39 = vadd.f32 %v4449_v56, %v14361_v17  ;;  %v4484_v37 = vsel %vm1321_vm15, %v12692_v57, 0.0 }
0x1aa2   : > { %4485 = vadd.xlane.f32.xlu0 %v4484_v37  ;;  %14364 = vst [vmem:[#allocation30_spill] sm:$0xff] %v12705_v23  ;;  %v4493_v7 = vsel %vm1321_vm15, %v12705_v23, 0.0 }
0x1aa3   : > { %14362 = vst [vmem:[#allocation32_spill] sm:$0xff] %v12698_v39  ;;  %v9086_v16 = vpop.f32.mrb[84].mxu0  ;;  %v4487_v5 = vsel %vm1321_vm15, %v12698_v39, 0.0 }
0x1aa4   : > { %v4461_v47 = vpop.f32.mrb[85].mxu0  ;;  %4488 = vadd.xlane.f32.xlu1 %v4487_v5  ;;  %v4470_v38 = vadd.f32 %v9086_v16, %v4374_v48 }
0x1aa5   : > { %v4462_v8 = vadd.f32 %v4461_v47, %v4374_v48  ;;  %v9087_v9 = vpop.f32.mrb[86].mxu0 }
0x1aa6   : > { %v4464_v54 = vpop.f32.mrb[87].mxu0  ;;  %4491 = vadd.xlane.f32.xlu0 %v4490_v4  ;;  %v12715_v50 = vadd.f32 %v4470_v38, %v14367_v33  ;;  %v4473_v31 = vadd.f32 %v9087_v9, %v4374_v48  ;;  %v10505_v9 = vmov 0.0   ;;  %v9741_v4 = vld [vmem:[%s14101_s4 + $0x80] sm:$0xff]   ;;  %v9746_v33 = vld [vmem:[%s14102_s5 + $0x18] sm:$0xff]  }
0x1aa7   : > { %v12710_v53 = vadd.f32 %v4462_v8, %v14365_v55  ;;  %v4465_v13 = vadd.f32 %v4464_v54, %v4374_v48  ;;  %v9740_v8 = vld [vmem:[%s14102_s5] sm:$0xff]   ;;  %9104 = vmatprep.subr.bf16.mxu0 %v10505_v9  ;;  %v9742_v54 = vld [vmem:[%s14102_s5 + $0x8] sm:$0xff]   ;;  %9088 = vmatprep.subr.bf16.mxu1 %v9741_v4 }
0x1aa8   : > { %14368 = vst [vmem:[#allocation28_spill] sm:$0xff] %v12715_v50  ;;  %v12723_v29 = vadd.f32 %v4473_v31, %v14371_v32  ;;  %v4502_v14 = vsel %vm1321_vm15, %v12715_v50, 0.0  ;;  %9105 = vmatpush3.bf16.msra.mxu0 %v9740_v8  ;;  %9089 = vmatpush3.bf16.msra.mxu1 %v9741_v4  ;;  %v9743_v55 = vld [vmem:[%s14101_s4 + $0x88] sm:$0xff]  }
0x1aa9   : > { %14366 = vst [vmem:[#allocation29_spill] sm:$0xff] %v12710_v53  ;;  %v12718_v21 = vadd.f32 %v4465_v13, %v14369_v62  ;;  %v4496_v43 = vsel %vm1321_vm15, %v12710_v53, 0.0  ;;  %9106 = vmatprep.subr.bf16.mxu0 %v10505_v9  ;;  %v9744_v13 = vld [vmem:[%s14102_s5 + $0x10] sm:$0xff]   ;;  %9090 = vmatprep.subr.bf16.mxu1 %v9743_v55  ;;  %v394_v31 = vld [vmem:[%s331_s16] sm:$0xff]  ;;  %v9747_v62 = vld [vmem:[%s14101_s4 + $0x98] sm:$0xff]   ;;  %s14453_s16 = sshll.u32 %s14459_s13, 6 }
0x1aaa   : > { %4497 = vadd.xlane.f32.xlu1 %v4496_v43  ;;  %4494 = vadd.xlane.f32.xlu0 %v4493_v7  ;;  %14372 = vst [vmem:[#allocation35_spill] sm:$0xff] %v12723_v29  ;;  %v4505_v22 = vsel %vm1321_vm15, %v12723_v29, 0.0  ;;  %v9745_v7 = vld [vmem:[%s14101_s4 + $0x90] sm:$0xff]   ;;  %v12809_v43 = vpack.c.bf16 %v394_v31, %v394_v31  ;;  %s14058_s23 = scalar_lea.vmem %s14106_s9, %s14453_s16 }
0x1aab   : > { %14370 = vst [vmem:[#allocation37_spill] sm:$0xff] %v12718_v21  ;;  %v4499_v59 = vsel %vm1321_vm15, %v12718_v21, 0.0  ;;  %9112 = vmatprep.mubr.msk.bf16.mxu0 %vm10506_vm5, %v10505_v9 }
0x1aac   : > { %9107 = vmatpush3.bf16.msra.mxu0 %v9742_v54  ;;  %9091 = vmatpush3.bf16.msra.mxu1 %v9743_v55 }
0x1aad   : > { %9108 = vmatprep.subr.bf16.mxu0 %v10505_v9  ;;  %9092 = vmatprep.subr.bf16.mxu1 %v9745_v7 }
0x1aae   : > { %4503 = vadd.xlane.f32.xlu1 %v4502_v14  ;;  %4500 = vadd.xlane.f32.xlu0 %v4499_v59 }
0x1ab0   : > { %9109 = vmatpush3.bf16.msra.mxu0 %v9744_v13  ;;  %9093 = vmatpush3.bf16.msra.mxu1 %v9745_v7 }
0x1ab1   : > { %9110 = vmatprep.subr.bf16.mxu0 %v10505_v9  ;;  %9094 = vmatprep.subr.bf16.mxu1 %v9747_v62 }
0x1ab2   : > { %4506 = vadd.xlane.f32.xlu0 %v4505_v22 }
0x1ab4   : > { %9111 = vmatpush3.bf16.msra.mxu0 %v9746_v33  ;;  %9095 = vmatpush3.bf16.msra.mxu1 %v9747_v62 }
0x1ab5   : > { %9116 = vmatprep.subr.bf16.mxu1 %v10505_v9 }
0x1ab7   : > { %9113 = vmatmul.mubr.msk.bf16.vlgmr.msra.gmra.mrb[88].mxu0 %vm1321_vm15, %v12809_v43 }
0x1b2f   : > { %v4486_v34 = vpop.xlane.xlu0 %4485 }
0x1b30   : > { %v4508_v12 = vmul.f32 0.015625, %v4486_v34 }
0x1b31   : > { %v4489_v60 = vpop.xlane.xlu1 %4488 }
0x1b32   : > { %v12732_v41 = vsub.f32 %v12692_v57, %v4508_v12  ;;  %v4509_v26 = vmul.f32 0.015625, %v4489_v60 }
0x1b33   : > { %v4492_v52 = vpop.xlane.xlu0 %4491 }
0x1b34   : > { %v12735_v11 = vsub.f32 %v12698_v39, %v4509_v26  ;;  %v4510_v1 = vmul.f32 0.015625, %v4492_v52  ;;  %v4524_v30 = vmul.f32 %v12732_v41, %v12732_v41 }
0x1b36   : > { %v12740_v10 = vsub.f32 %v12695_v3, %v4510_v1  ;;  %v4532_v51 = vsel %vm1321_vm15, %v4524_v30, 0.0  ;;  %v4525_v42 = vmul.f32 %v12735_v11, %v12735_v11 }
0x1b37   : > { %v4498_v61 = vpop.xlane.xlu1 %4497  ;;  %4533 = vadd.xlane.f32.xlu1 %v4532_v51  ;;  %v4495_v40 = vpop.xlane.xlu0 %4494 }
0x1b38   : > { %v4512_v58 = vmul.f32 0.015625, %v4498_v61  ;;  %v4511_v6 = vmul.f32 0.015625, %v4495_v40  ;;  %v4535_v44 = vsel %vm1321_vm15, %v4525_v42, 0.0  ;;  %v4526_v36 = vmul.f32 %v12740_v10, %v12740_v10 }
0x1b39   : > { %4536 = vadd.xlane.f32.xlu0 %v4535_v44  ;;  %v14182_v61 = vsub.s32 5, %v14355_v20 }
0x1b3a   : > { %v12749_v25 = vsub.f32 %v12710_v53, %v4512_v58  ;;  %v12752_v24 = vsub.f32 %v12705_v23, %v4511_v6  ;;  %v4538_v18 = vsel %vm1321_vm15, %v4526_v36, 0.0 }
0x1b3b   : > { %v4504_v35 = vpop.xlane.xlu1 %4503  ;;  %4539 = vadd.xlane.f32.xlu1 %v4538_v18  ;;  %v4501_v48 = vpop.xlane.xlu0 %4500 }
0x1b3c   : > { %v4514_v49 = vmul.f32 0.015625, %v4504_v35  ;;  %v4513_v63 = vmul.f32 0.015625, %v4501_v48  ;;  %v4528_v27 = vmul.f32 %v12749_v25, %v12749_v25  ;;  %v4527_v15 = vmul.f32 %v12752_v24, %v12752_v24  ;;  %v10372_v35 = vld [vmem:[#allocation4] sm:$0xff] }
0x1b3d   : > { %v4591_v48 = vrot.slane %v10372_v35, %v14182_v61 }
0x1b3e   : > { %v12760_v2 = vsub.f32 %v12715_v50, %v4514_v49  ;;  %v12763_v28 = vsub.f32 %v12718_v21, %v4513_v63  ;;  %v4544_v46 = vsel %vm1321_vm15, %v4528_v27, 0.0  ;;  %v4541_v56 = vsel %vm1321_vm15, %v4527_v15, 0.0 }
0x1b3f   : > { %4545 = vadd.xlane.f32.xlu1 %v4544_v46  ;;  %4542 = vadd.xlane.f32.xlu0 %v4541_v56  ;;  %v4507_v19 = vpop.xlane.xlu0 %4506  ;;  %v4602_v49 = vsub.s32 6, %v14355_v20 }
0x1b40   : > { %v4515_v45 = vmul.f32 0.015625, %v4507_v19  ;;  %v4530_v17 = vmul.f32 %v12760_v2, %v12760_v2  ;;  %v4529_v37 = vmul.f32 %v12763_v28, %v12763_v28 }
0x1b42   : > { %v12772_v16 = vsub.f32 %v12723_v29, %v4515_v45  ;;  %v4550_v5 = vsel %vm1321_vm15, %v4530_v17, 0.0  ;;  %v4547_v0 = vsel %vm1321_vm15, %v4529_v37, 0.0  ;;  %v4603_v17 = vrot.slane %v10372_v35, %v4602_v49 }
0x1b43   : > { %4551 = vadd.xlane.f32.xlu1 %v4550_v5  ;;  %4548 = vadd.xlane.f32.xlu0 %v4547_v0 }
0x1b44   : > { %v4531_v47 = vmul.f32 %v12772_v16, %v12772_v16 }
0x1b46   : > { %v4553_v38 = vsel %vm1321_vm15, %v4531_v47, 0.0 }
0x1b47   : > { %4554 = vadd.xlane.f32.xlu0 %v4553_v38 }
0x1bc4   : > { %v4534_v32 = vpop.xlane.xlu1 %4533 }
0x1bc5   : > { %v4556_v14 = vmul.f32 0.015625, %v4534_v32 }
0x1bc6   : > { %v4537_v59 = vpop.xlane.xlu0 %4536 }
0x1bc7   : > { %v4564_v22 = vadd.f32 1e-05, %v4556_v14  ;;  %v4557_v34 = vmul.f32 0.015625, %v4537_v59 }
0x1bc8   : > { %v4540_v12 = vpop.xlane.xlu1 %4539 }
0x1bc9   : > { %10076 = vrsqrt.f32 %v4564_v22  ;;  %v4565_v60 = vadd.f32 1e-05, %v4557_v34  ;;  %v4558_v26 = vmul.f32 0.015625, %v4540_v12  ;;  %v9748_v12 = vld [vmem:[%s14102_s5 + $0x20] sm:$0xff]  }
0x1bcb   : > { %10078 = vrsqrt.f32 %v4565_v60  ;;  %v4566_v52 = vadd.f32 1e-05, %v4558_v26 }
0x1bcc   : > { %v4546_v1 = vpop.xlane.xlu1 %4545  ;;  %v4543_v30 = vpop.xlane.xlu0 %4542 }
0x1bcd   : > { %10080 = vrsqrt.f32 %v4566_v52  ;;  %v4560_v51 = vmul.f32 0.015625, %v4546_v1  ;;  %v4559_v42 = vmul.f32 0.015625, %v4543_v30 }
0x1bcf   : > { %v4568_v40 = vadd.f32 1e-05, %v4560_v51  ;;  %v4567_v58 = vadd.f32 1e-05, %v4559_v42 }
0x1bd0   : > { %v4552_v6 = vpop.xlane.xlu1 %4551  ;;  %v4549_v44 = vpop.xlane.xlu0 %4548 }
0x1bd1   : > { %10082 = vrsqrt.f32 %v4568_v40  ;;  %v4562_v36 = vmul.f32 0.015625, %v4552_v6  ;;  %v4561_v18 = vmul.f32 0.015625, %v4549_v44  ;;  %v9751_v6 = vld [vmem:[%s14102_s5 + $0x38] sm:$0xff]   ;;  %v4779_v44 = vpop.f32.mrb[88].mxu0 }
0x1bd2   : > { %10084 = vrsqrt.f32 %v4567_v58 }
0x1bd3   : > { %v10077_v63 = vpop.eup %10076  ;;  %v4570_v27 = vadd.f32 1e-05, %v4562_v36  ;;  %v4569_v15 = vadd.f32 1e-05, %v4561_v18  ;;  %v12851_v36 = vpack.c.bf16 %v4779_v44, %v4779_v44  ;;  %v9114_v18 = vpop.f32.mrb[89].mxu0 }
0x1bd4   : > { %v4555_v46 = vpop.xlane.xlu0 %4554  ;;  %v4580_v56 = vmul.f32 %v10077_v63, %v12732_v41  ;;  %v4782_v35 = vpop.f32.mrb[90].mxu0 }
0x1bd5   : > { %v10079_v19 = vpop.eup %10078  ;;  %10086 = vrsqrt.f32 %v4570_v27  ;;  %v4563_v45 = vmul.f32 0.015625, %v4555_v46  ;;  %9352 = vmatprep.subr.msk.bf16.mxu0 %vm1097_vm10, %v12851_v36  ;;  %5129 = vrot.lane.b32.xlu1 %v12851_v36, %s10487_s22  ;;  %v4868_v49 = vsel %vm1097_vm10, %v12851_v36, 0 }
0x1bd6   : > { %10088 = vrsqrt.f32 %v4569_v15  ;;  %v4581_v37 = vmul.f32 %v10079_v19, %v12735_v11  ;;  %v4592_v5 = vmul.f32 %v4591_v48, %v4580_v56  ;;  %9129 = vmatpush3.bf16.xpose.msra.mxu0 %v4868_v49 }
0x1bd7   : > { %v10081_v0 = vpop.eup %10080  ;;  %v4571_v47 = vadd.f32 1e-05, %v4563_v45 }
0x1bd8   : > { %v4593_v38 = vmul.f32 %v4591_v48, %v4581_v37  ;;  %v4582_v8 = vmul.f32 %v10081_v0, %v12740_v10  ;;  %v4604_v4 = vadd.f32 %v4603_v17, %v4592_v5 }
0x1bd9   : > { %10090 = vrsqrt.f32 %v4571_v47 }
0x1bda   : > { %v4605_v54 = vadd.f32 %v4603_v17, %v4593_v38  ;;  %v4594_v41 = vmul.f32 %v4591_v48, %v4582_v8 }
0x1bdb   : > { %v10083_v55 = vpop.eup %10082 }
0x1bdc   : > { %v10085_v13 = vpop.eup %10084  ;;  %v4612_v7 = vpack.c.bf16 %v4605_v54, %v4604_v4  ;;  %v4584_v31 = vmul.f32 %v10083_v55, %v12749_v25  ;;  %v4606_v59 = vadd.f32 %v4603_v17, %v4594_v41 }
0x1bdd   : > { %v4583_v33 = vmul.f32 %v10085_v13, %v12752_v24 }
0x1bde   : > { %9096 = vmatprep.mubr.msk.bf16.mxu1 %vm1321_vm15, %v4612_v7  ;;  %v4596_v34 = vmul.f32 %v4591_v48, %v4584_v31 }
0x1bdf   : > { %v10087_v11 = vpop.eup %10086  ;;  %v4595_v62 = vmul.f32 %v4591_v48, %v4583_v33 }
0x1be0   : > { %v10089_v32 = vpop.eup %10088  ;;  %v4586_v14 = vmul.f32 %v10087_v11, %v12760_v2  ;;  %v4608_v1 = vadd.f32 %v4603_v17, %v4596_v34 }
0x1be1   : > { %v4607_v10 = vadd.f32 %v4603_v17, %v4595_v62  ;;  %v4585_v22 = vmul.f32 %v10089_v32, %v12763_v28  ;;  %v9749_v28 = vld [vmem:[%s14102_s5 + $0x28] sm:$0xff]  }
0x1be2   : > { %v4598_v52 = vmul.f32 %v4591_v48, %v4586_v14 }
0x1be3   : > { %v10091_v60 = vpop.eup %10090  ;;  %v4613_v24 = vpack.c.bf16 %v4607_v10, %v4606_v59  ;;  %v4597_v26 = vmul.f32 %v4591_v48, %v4585_v22 }
0x1be4   : > { %v4587_v25 = vmul.f32 %v10091_v60, %v12772_v16  ;;  %v4610_v42 = vadd.f32 %v4603_v17, %v4598_v52  ;;  %v9750_v16 = vld [vmem:[%s14102_s5 + $0x30] sm:$0xff]  }
0x1be5   : > { %9097 = vmatmul.mubr.msk.bf16.vlgmr.msra.gmra.mrb[80].mxu1 %vm1321_vm15, %v4613_v24  ;;  %v4609_v30 = vadd.f32 %v4603_v17, %v4597_v26 }
0x1be6   : > { %v4599_v2 = vmul.f32 %v4591_v48, %v4587_v25  ;;  %9117 = vmatpush3.bf16.msra.mxu1 %v9748_v12  ;;  %v9115_v48 = vpop.f32.mrb[91].mxu0 }
0x1be7   : > { %v4614_v51 = vpack.c.bf16 %v4609_v30, %v4608_v1  ;;  %9118 = vmatprep.subr.bf16.mxu1 %v10505_v9 }
0x1be8   : > { %v4611_v40 = vadd.f32 %v4603_v17, %v4599_v2 }
0x1be9   : > { %9100 = vmatprep.mubr.msk.bf16.mxu1 %vm1321_vm15, %v4614_v51 }
0x1bea   : > { %v4615_v58 = vpack.c.bf16 %v4611_v40, %v4610_v42  ;;  %9119 = vmatpush3.bf16.msra.mxu1 %v9749_v28 }
0x1beb   : > { %9120 = vmatprep.subr.bf16.mxu1 %v10505_v9 }
0x1bed   : > { %9101 = vmatmul.mubr.msk.bf16.gmra.mrb[84].mxu1 %vm1321_vm15, %v4615_v58 }
0x1bee   : > { %9121 = vmatpush3.bf16.msra.mxu1 %v9750_v16  ;;  %9124 = vmatprep.mubr.msk.bf16.mxu1 %vm10506_vm5, %v10505_v9 }
0x1bef   : > { %9122 = vmatprep.subr.bf16.mxu1 %v10505_v9 }
0x1bf2   : > { %9123 = vmatpush3.bf16.msra.mxu1 %v9751_v6 }
0x1bf5   : > { %9125 = vmatmul.mubr.msk.bf16.vlgmr.msra.gmra.mrb[88].mxu1 %vm1321_vm15, %v12809_v43 }
0x1c47   : > { %v5130_v9 = vpop.permute.xlu1 %5129 }
0x1c48   : > { %9354 = vmatprep.subr.msk.bf16.mxu0 %vm1097_vm10, %v5130_v9  ;;  %v5144_v19 = vsel %vm1097_vm10, %v5130_v9, 0 }
0x1cb8   : > { %v9098_v43 = vpop.f32.mrb[80].mxu1 }
0x1cb9   : > { %v4687_v63 = vpop.f32.mrb[81].mxu1 }
0x1cba   : > { %v9099_v27 = vpop.f32.mrb[82].mxu1 }
0x1cbb   : > { %v4850_v15 = vpack.c.bf16 %v9099_v27, %v9098_v43  ;;  %v4690_v46 = vpop.f32.mrb[83].mxu1 }
0x1cbc   : > { %v4849_v56 = vpack.c.bf16 %v4690_v46, %v4687_v63 }
0x1cbd   : > { %5122 = vrot.lane.b32.xlu1 %v4850_v15, %s10487_s22 }
0x1cbe   : > { %5120 = vrot.lane.b32.xlu0 %v4849_v56, %s10487_s22  ;;  %9130 = vmatprep.mubr.msk.bf16.mxu0 %vm1097_vm10, %v4849_v56 }
0x1cbf   : > { %9131 = vmatmul.mubr.msk.bf16.vlgmr.msra.gmra.mrb[92].mxu0 %vm1097_vm10, %v4850_v15 }
0x1cc0   : > { %v9102_v45 = vpop.f32.mrb[84].mxu1  ;;  %9149 = vmatpush3.bf16.xpose.msra.mxu0 %v5144_v19 }
0x1cc1   : > { %v4703_v17 = vpop.f32.mrb[85].mxu1 }
0x1cc2   : > { %v9103_v37 = vpop.f32.mrb[86].mxu1 }
0x1cc3   : > { %v4852_v5 = vpack.c.bf16 %v9103_v37, %v9102_v45  ;;  %v4706_v0 = vpop.f32.mrb[87].mxu1 }
0x1cc4   : > { %v4851_v47 = vpack.c.bf16 %v4706_v0, %v4703_v17 }
0x1cc5   : > { %5126 = vrot.lane.b32.xlu0 %v4852_v5, %s10487_s22 }
0x1cc6   : > { %5124 = vrot.lane.b32.xlu1 %v4851_v47, %s10487_s22  ;;  %9134 = vmatprep.mubr.msk.bf16.mxu0 %vm1097_vm10, %v4851_v47 }
0x1cc7   : > { %9135 = vmatmul.mubr.msk.bf16.gmra.mrb[96].mxu0 %vm1097_vm10, %v4852_v5 }
0x1cc8   : > { %v4843_v38 = vpop.f32.mrb[88].mxu1 }
0x1cc9   : > { %5394 = vrot.lane.b32.xlu0 %v4849_v56, %s10492_s17  ;;  %v9126_v8 = vpop.f32.mrb[89].mxu1  ;;  %v12898_v55 = vpack.c.bf16 %v4843_v38, %v4843_v38 }
0x1cca   : > { %5402 = vrot.lane.b32.xlu1 %v12851_v36, %s10492_s17  ;;  %v4846_v4 = vpop.f32.mrb[90].mxu1 }
0x1ccb   : > { %v9127_v54 = vpop.f32.mrb[91].mxu1  ;;  %14374 = vst [vmem:[#allocation34_spill] sm:$0xff] %v12898_v55  ;;  %9353 = vmatprep.subr.msk.bf16.mxu1 %vm5047_vm6, %v12898_v55  ;;  %v5049_v13 = vsel %vm5047_vm6, %v12898_v55, 0 }
0x1ccc   : > { %9139 = vmatpush3.bf16.msra.mxu1 %v5049_v13 }
0x1ccd   : > { %5398 = vrot.lane.b32.xlu0 %v4851_v47, %s10492_s17 }
0x1cce   : > { %5396 = vrot.lane.b32.xlu1 %v4850_v15, %s10492_s17 }
0x1cd1   : > { %5674 = vrot.lane.b32.xlu0 %v12851_v36, %s10493_s30 }
0x1cd2   : > { %5400 = vrot.lane.b32.xlu1 %v4852_v5, %s10492_s17 }
0x1cd5   : > { %5668 = vrot.lane.b32.xlu0 %v4850_v15, %s10493_s30 }
0x1cd6   : > { %5666 = vrot.lane.b32.xlu1 %v4849_v56, %s10493_s30 }
0x1cd9   : > { %5672 = vrot.lane.b32.xlu0 %v4852_v5, %s10493_s30 }
0x1cda   : > { %5670 = vrot.lane.b32.xlu1 %v4851_v47, %s10493_s30 }
0x1cdd   : > { %5938 = vrot.lane.b32.xlu0 %v4849_v56, %s10494_s19 }
0x1cde   : > { %5946 = vrot.lane.b32.xlu1 %v12851_v36, %s10494_s19 }
0x1ce1   : > { %5942 = vrot.lane.b32.xlu0 %v4851_v47, %s10494_s19 }
0x1ce2   : > { %5940 = vrot.lane.b32.xlu1 %v4850_v15, %s10494_s19 }
0x1ce5   : > { %6218 = vrot.lane.b32.xlu0 %v12851_v36, %s10495_s18 }
0x1ce6   : > { %5944 = vrot.lane.b32.xlu1 %v4852_v5, %s10494_s19 }
0x1ce9   : > { %6212 = vrot.lane.b32.xlu0 %v4850_v15, %s10495_s18 }
0x1cea   : > { %6210 = vrot.lane.b32.xlu1 %v4849_v56, %s10495_s18 }
0x1ced   : > { %6216 = vrot.lane.b32.xlu0 %v4852_v5, %s10495_s18 }
0x1cee   : > { %6214 = vrot.lane.b32.xlu1 %v4851_v47, %s10495_s18 }
0x1cf1   : > { %6482 = vrot.lane.b32.xlu0 %v4849_v56, %s14373_s15 }
0x1cf2   : > { %6490 = vrot.lane.b32.xlu1 %v12851_v36, %s14373_s15 }
0x1cf5   : > { %6486 = vrot.lane.b32.xlu0 %v4851_v47, %s14373_s15 }
0x1cf6   : > { %6484 = vrot.lane.b32.xlu1 %v4850_v15, %s14373_s15 }
0x1cf9   : > { %6762 = vrot.lane.b32.xlu0 %v12851_v36, %s14375_s28 }
0x1cfa   : > { %6488 = vrot.lane.b32.xlu1 %v4852_v5, %s14373_s15 }
0x1cfd   : > { %6756 = vrot.lane.b32.xlu0 %v4850_v15, %s14375_s28 }
0x1cfe   : > { %6754 = vrot.lane.b32.xlu1 %v4849_v56, %s14375_s28 }
0x1d01   : > { %6760 = vrot.lane.b32.xlu0 %v4852_v5, %s14375_s28 }
0x1d02   : > { %6758 = vrot.lane.b32.xlu1 %v4851_v47, %s14375_s28 }
0x1d05   : > { %5312 = vrot.lane.b32.xlu0 %v12898_v55, %s10487_s22  ;;  %s14433_s22 = smov 8  }
0x1d06   : > { %5584 = vrot.lane.b32.xlu1 %v12898_v55, %s10492_s17  ;;  %s14434_s17 = smov 16  }
0x1d09   : > { %5856 = vrot.lane.b32.xlu0 %v12898_v55, %s10493_s30  ;;  %s14435_s30 = smov 24  }
0x1d0a   : > { %6128 = vrot.lane.b32.xlu1 %v12898_v55, %s10494_s19  ;;  %s14436_s19 = smov 32  }
0x1d0d   : > { %6400 = vrot.lane.b32.xlu0 %v12898_v55, %s10495_s18  ;;  %s14437_s18 = smov 40  }
0x1d2f   : > { %v5123_v41 = vpop.permute.xlu1 %5122 }
0x1d30   : > { %v5121_v7 = vpop.permute.xlu0 %5120 }
0x1d31   : > { %9150 = vmatprep.mubr.msk.bf16.mxu0 %vm1097_vm10, %v5121_v7 }
0x1d32   : > { %9151 = vmatmul.mubr.msk.bf16.vlgmr.msra.gmra.mrb[100].mxu0 %vm1097_vm10, %v5123_v41 }
0x1d37   : > { %v5127_v33 = vpop.permute.xlu0 %5126 }
0x1d38   : > { %v5125_v31 = vpop.permute.xlu1 %5124 }
0x1d39   : > { %9154 = vmatprep.mubr.msk.bf16.mxu0 %vm1097_vm10, %v5125_v31 }
0x1d3a   : > { %9155 = vmatmul.mubr.msk.bf16.gmra.mrb[104].mxu0 %vm1097_vm10, %v5127_v33 }
0x1d3b   : > { %v5395_v11 = vpop.permute.xlu0 %5394 }
0x1d3c   : > { %v5403_v62 = vpop.permute.xlu1 %5402  ;;  %9170 = vmatprep.mubr.msk.bf16.mxu0 %vm1097_vm10, %v5395_v11 }
0x1d3d   : > { %9356 = vmatprep.subr.msk.bf16.mxu0 %vm1097_vm10, %v5403_v62  ;;  %v5417_v32 = vsel %vm1097_vm10, %v5403_v62, 0 }
0x1d3e   : > { %9169 = vmatpush3.bf16.xpose.msra.mxu0 %v5417_v32 }
0x1d3f   : > { %v5399_v14 = vpop.permute.xlu0 %5398 }
0x1d40   : > { %v5397_v59 = vpop.permute.xlu1 %5396 }
0x1d43   : > { %v5675_v10 = vpop.permute.xlu0 %5674 }
0x1d44   : > { %v5401_v22 = vpop.permute.xlu1 %5400  ;;  %9358 = vmatprep.subr.msk.bf16.mxu0 %vm1097_vm10, %v5675_v10  ;;  %v5689_v34 = vsel %vm1097_vm10, %v5675_v10, 0 }
0x1d45   : > { %9171 = vmatmul.mubr.msk.bf16.vlgmr.msra.gmra.mrb[108].mxu0 %vm1097_vm10, %v5397_v59 }
0x1d46   : > { %9174 = vmatprep.mubr.msk.bf16.mxu0 %vm1097_vm10, %v5399_v14  ;;  %9189 = vmatpush3.bf16.xpose.msra.mxu0 %v5689_v34 }
0x1d47   : > { %v5669_v12 = vpop.permute.xlu0 %5668 }
0x1d48   : > { %v5667_v60 = vpop.permute.xlu1 %5666 }
0x1d4b   : > { %v5673_v24 = vpop.permute.xlu0 %5672 }
0x1d4c   : > { %v5671_v26 = vpop.permute.xlu1 %5670 }
0x1d4d   : > { %9175 = vmatmul.mubr.msk.bf16.gmra.mrb[112].mxu0 %vm1097_vm10, %v5401_v22 }
0x1d4e   : > { %9190 = vmatprep.mubr.msk.bf16.mxu0 %vm1097_vm10, %v5667_v60 }
0x1d4f   : > { %v5939_v25 = vpop.permute.xlu0 %5938 }
0x1d50   : > { %v5947_v52 = vpop.permute.xlu1 %5946 }
0x1d51   : > { %9360 = vmatprep.subr.msk.bf16.mxu0 %vm1097_vm10, %v5947_v52  ;;  %v5961_v2 = vsel %vm1097_vm10, %v5947_v52, 0 }
0x1d53   : > { %v5943_v1 = vpop.permute.xlu0 %5942 }
0x1d54   : > { %v5941_v30 = vpop.permute.xlu1 %5940 }
0x1d55   : > { %9191 = vmatmul.mubr.msk.bf16.vlgmr.msra.gmra.mrb[116].mxu0 %vm1097_vm10, %v5669_v12 }
0x1d56   : > { %9209 = vmatpush3.bf16.xpose.msra.mxu0 %v5961_v2  ;;  %9194 = vmatprep.mubr.msk.bf16.mxu0 %vm1097_vm10, %v5671_v26 }
0x1d57   : > { %v6219_v28 = vpop.permute.xlu0 %6218 }
0x1d58   : > { %v5945_v51 = vpop.permute.xlu1 %5944  ;;  %9362 = vmatprep.subr.msk.bf16.mxu0 %vm1097_vm10, %v6219_v28  ;;  %v6233_v36 = vsel %vm1097_vm10, %v6219_v28, 0 }
0x1d5b   : > { %v6213_v42 = vpop.permute.xlu0 %6212 }
0x1d5c   : > { %v6211_v40 = vpop.permute.xlu1 %6210 }
0x1d5d   : > { %9195 = vmatmul.mubr.msk.bf16.gmra.mrb[120].mxu0 %vm1097_vm10, %v5673_v24 }
0x1d5e   : > { %9210 = vmatprep.mubr.msk.bf16.mxu0 %vm1097_vm10, %v5939_v25 }
0x1d5f   : > { %v6217_v58 = vpop.permute.xlu0 %6216 }
0x1d60   : > { %v6215_v16 = vpop.permute.xlu1 %6214 }
0x1d63   : > { %v6483_v6 = vpop.permute.xlu0 %6482 }
0x1d64   : > { %v6491_v44 = vpop.permute.xlu1 %6490 }
0x1d65   : > { %9211 = vmatmul.mubr.msk.bf16.vlgmr.msra.gmra.mrb[124].mxu0 %vm1097_vm10, %v5941_v30  ;;  %v6505_v9 = vsel %vm1097_vm10, %v6491_v44, 0 }
0x1d66   : > { %9229 = vmatpush3.bf16.xpose.msra.mxu0 %v6233_v36  ;;  %9214 = vmatprep.mubr.msk.bf16.mxu0 %vm1097_vm10, %v5943_v1 }
0x1d67   : > { %9364 = vmatprep.subr.msk.bf16.mxu0 %vm1097_vm10, %v6491_v44  ;;  %v6487_v18 = vpop.permute.xlu0 %6486 }
0x1d68   : > { %v6485_v63 = vpop.permute.xlu1 %6484 }
0x1d6b   : > { %v6763_v35 = vpop.permute.xlu0 %6762 }
0x1d6c   : > { %v6777_v27 = vsel %vm1097_vm10, %v6763_v35, 0  ;;  %v6489_v15 = vpop.permute.xlu1 %6488 }
0x1d6d   : > { %9215 = vmatmul.mubr.msk.bf16.gmra.mrb[128].mxu0 %vm1097_vm10, %v5945_v51 }
0x1d6e   : > { %9230 = vmatprep.mubr.msk.bf16.mxu0 %vm1097_vm10, %v6211_v40 }
0x1d6f   : > { %v6757_v48 = vpop.permute.xlu0 %6756 }
0x1d70   : > { %v6755_v46 = vpop.permute.xlu1 %6754 }
0x1d73   : > { %v6761_v49 = vpop.permute.xlu0 %6760 }
0x1d74   : > { %v6759_v5 = vpop.permute.xlu1 %6758 }
0x1d75   : > { %9231 = vmatmul.mubr.msk.bf16.vlgmr.msra.gmra.mrb[132].mxu0 %vm1097_vm10, %v6213_v42 }
0x1d76   : > { %9249 = vmatpush3.bf16.xpose.msra.mxu0 %v6505_v9  ;;  %9234 = vmatprep.mubr.msk.bf16.mxu0 %vm1097_vm10, %v6215_v16 }
0x1d77   : > { %9366 = vmatprep.subr.msk.bf16.mxu0 %vm1097_vm10, %v6763_v35  ;;  %v12951_v43 = vpop.permute.xlu0 %5312 }
0x1d78   : > { %9355 = vmatprep.subr.msk.bf16.mxu1 %vm5047_vm6, %v12951_v43 }
0x1d7d   : > { %9235 = vmatmul.mubr.msk.bf16.gmra.mrb[136].mxu0 %vm1097_vm10, %v6217_v58 }
0x1d7e   : > { %9250 = vmatprep.mubr.msk.bf16.mxu0 %vm1097_vm10, %v6483_v6 }
0x1d85   : > { %9251 = vmatmul.mubr.msk.bf16.vlgmr.msra.gmra.mrb[140].mxu0 %vm1097_vm10, %v6485_v63 }
0x1d86   : > { %9269 = vmatpush3.bf16.xpose.msra.mxu0 %v6777_v27  ;;  %9254 = vmatprep.mubr.msk.bf16.mxu0 %vm1097_vm10, %v6487_v18 }
0x1d8d   : > { %9255 = vmatmul.mubr.msk.bf16.gmra.mrb[144].mxu0 %vm1097_vm10, %v6489_v15  ;;  %v13029_v15 = vpop.permute.xlu0 %5856 }
0x1d8e   : > { %9270 = vmatprep.mubr.msk.bf16.mxu0 %vm1097_vm10, %v6755_v46  ;;  %14376 = vst [vmem:[#allocation31_spill] sm:$0xff] %v13029_v15 }
0x1d92   : > { %v9132_v56 = vpop.f32.mrb[92].mxu0 }
0x1d93   : > { %v12962_v19 = vmul.f32 0.35355338, %v9132_v56  ;;  %v4904_v45 = vpop.f32.mrb[93].mxu0 }
0x1d94   : > { %v12964_v17 = vmul.f32 0.35355338, %v4904_v45  ;;  %v9133_v37 = vpop.f32.mrb[94].mxu0  ;;  %v13033_v45 = vpop.permute.xlu1 %5584 }
0x1d95   : > { %v4907_v0 = vpop.f32.mrb[95].mxu0  ;;  %9271 = vmatmul.mubr.msk.bf16.vlgmr.msra.gmra.mrb[148].mxu0 %vm1097_vm10, %v6757_v48  ;;  %v4949_v47 = vsel %vm1097_vm10, %v12962_v19, -inf  ;;  %v12969_v38 = vmul.f32 0.35355338, %v9133_v37 }
0x1d96   : > { %v12971_v8 = vmul.f32 0.35355338, %v4907_v0  ;;  %4950 = vmax.xlane.f32.xlu0 %v4949_v47  ;;  %9274 = vmatprep.mubr.msk.bf16.mxu0 %vm1097_vm10, %v6759_v5  ;;  %v4943_v4 = vsel %vm1097_vm10, %v12964_v17, -inf }
0x1d97   : > { %4944 = vmax.xlane.f32.xlu1 %v4943_v4  ;;  %v4952_v7 = vsel %vm1097_vm10, %v12969_v38, -inf }
0x1d98   : > { %v4946_v54 = vsel %vm1097_vm10, %v12971_v8, -inf }
0x1d9a   : > { %v9136_v13 = vpop.f32.mrb[96].mxu0  ;;  %4947 = vmax.xlane.f32.xlu0 %v4946_v54 }
0x1d9b   : > { %v12980_v41 = vmul.f32 0.35355338, %v9136_v13  ;;  %v4920_v33 = vpop.f32.mrb[97].mxu0  ;;  %4953 = vmax.xlane.f32.xlu1 %v4952_v7  ;;  %v13045_v7 = vpop.permute.xlu0 %6400 }
0x1d9c   : > { %v9137_v31 = vpop.f32.mrb[98].mxu0  ;;  %v12982_v11 = vmul.f32 0.35355338, %v4920_v33  ;;  %14377 = vst [vmem:[#allocation38_spill] sm:$0xff] %v13045_v7 }
0x1d9d   : > { %v12984_v62 = vmul.f32 0.35355338, %v9137_v31  ;;  %v4923_v32 = vpop.f32.mrb[99].mxu0  ;;  %9275 = vmatmul.mubr.msk.bf16.gmra.mrb[152].mxu0 %vm1097_vm10, %v6761_v49  ;;  %v4961_v14 = vsel %vm1097_vm10, %v12980_v41, -inf  ;;  %v13049_v31 = vpop.permute.xlu1 %6128 }
0x1d9e   : > { %4962 = vmax.xlane.f32.xlu0 %v4961_v14  ;;  %v12989_v59 = vmul.f32 0.35355338, %v4923_v32  ;;  %v4955_v22 = vsel %vm1097_vm10, %v12982_v11, -inf  ;;  %14378 = vst [vmem:[#allocation36_spill] sm:$0xff] %v13049_v31 }
0x1d9f   : > { %v4964_v10 = vsel %vm1097_vm10, %v12984_v62, -inf }
0x1da0   : > { %4965 = vmax.xlane.f32.xlu1 %v4964_v10  ;;  %v4958_v34 = vsel %vm1097_vm10, %v12989_v59, -inf }
0x1da2   : > { %4956 = vmax.xlane.f32.xlu0 %v4955_v22 }
0x1da4   : > { %4959 = vmax.xlane.f32.xlu1 %v4958_v34 }
0x1e05   : > { %v9152_v12 = vpop.f32.mrb[100].mxu0 }
0x1e06   : > { %v12997_v60 = vmul.f32 0.35355338, %v9152_v12  ;;  %v5180_v24 = vpop.f32.mrb[101].mxu0 }
0x1e07   : > { %v9153_v26 = vpop.f32.mrb[102].mxu0  ;;  %v12999_v25 = vmul.f32 0.35355338, %v5180_v24 }
0x1e08   : > { %v13001_v52 = vmul.f32 0.35355338, %v9153_v26  ;;  %v5183_v1 = vpop.f32.mrb[103].mxu0  ;;  %v5225_v30 = vsel %vm1097_vm10, %v12997_v60, -inf }
0x1e09   : > { %5226 = vmax.xlane.f32.xlu0 %v5225_v30  ;;  %v13005_v2 = vmul.f32 0.35355338, %v5183_v1  ;;  %v5219_v51 = vsel %vm1097_vm10, %v12999_v25, -inf }
0x1e0a   : > { %v5228_v28 = vsel %vm1097_vm10, %v13001_v52, -inf }
0x1e0b   : > { %5229 = vmax.xlane.f32.xlu1 %v5228_v28  ;;  %v5222_v16 = vsel %vm1097_vm10, %v13005_v2, -inf }
0x1e0d   : > { %5220 = vmax.xlane.f32.xlu0 %v5219_v51  ;;  %v9156_v42 = vpop.f32.mrb[104].mxu0 }
0x1e0e   : > { %v13011_v40 = vmul.f32 0.35355338, %v9156_v42  ;;  %v5196_v58 = vpop.f32.mrb[105].mxu0 }
0x1e0f   : > { %5223 = vmax.xlane.f32.xlu1 %v5222_v16  ;;  %v9157_v6 = vpop.f32.mrb[106].mxu0  ;;  %v13015_v44 = vmul.f32 0.35355338, %v5196_v58 }
0x1e10   : > { %v13017_v36 = vmul.f32 0.35355338, %v9157_v6  ;;  %v5199_v18 = vpop.f32.mrb[107].mxu0  ;;  %v5237_v35 = vsel %vm1097_vm10, %v13011_v40, -inf }
0x1e11   : > { %5238 = vmax.xlane.f32.xlu0 %v5237_v35  ;;  %v13021_v48 = vmul.f32 0.35355338, %v5199_v18  ;;  %v5231_v9 = vsel %vm1097_vm10, %v13015_v44, -inf }
0x1e12   : > { %v5240_v49 = vsel %vm1097_vm10, %v13017_v36, -inf }
0x1e13   : > { %5241 = vmax.xlane.f32.xlu1 %v5240_v49  ;;  %v5234_v63 = vsel %vm1097_vm10, %v13021_v48, -inf }
0x1e15   : > { %5232 = vmax.xlane.f32.xlu0 %v5231_v9 }
0x1e17   : > { %5235 = vmax.xlane.f32.xlu1 %v5234_v63 }
0x1e18   : > { %v9172_v27 = vpop.f32.mrb[108].mxu0 }
0x1e19   : > { %v13031_v46 = vmul.f32 0.35355338, %v9172_v27  ;;  %v5453_v56 = vpop.f32.mrb[109].mxu0 }
0x1e1a   : > { %v9173_v37 = vpop.f32.mrb[110].mxu0  ;;  %v13035_v5 = vmul.f32 0.35355338, %v5453_v56 }
0x1e1b   : > { %v13037_v0 = vmul.f32 0.35355338, %v9173_v37  ;;  %v5456_v47 = vpop.f32.mrb[111].mxu0  ;;  %v5498_v4 = vsel %vm1097_vm10, %v13031_v46, -inf }
0x1e1c   : > { %5499 = vmax.xlane.f32.xlu0 %v5498_v4  ;;  %v13041_v54 = vmul.f32 0.35355338, %v5456_v47  ;;  %v5492_v33 = vsel %vm1097_vm10, %v13035_v5, -inf }
0x1e1d   : > { %v5501_v13 = vsel %vm1097_vm10, %v13037_v0, -inf }
0x1e1e   : > { %5502 = vmax.xlane.f32.xlu1 %v5501_v13  ;;  %v5495_v22 = vsel %vm1097_vm10, %v13041_v54, -inf }
0x1e20   : > { %5493 = vmax.xlane.f32.xlu0 %v5492_v33  ;;  %v9176_v32 = vpop.f32.mrb[112].mxu0 }
0x1e21   : > { %v13051_v14 = vmul.f32 0.35355338, %v9176_v32  ;;  %v5469_v10 = vpop.f32.mrb[113].mxu0 }
0x1e22   : > { %5496 = vmax.xlane.f32.xlu1 %v5495_v22  ;;  %v9177_v34 = vpop.f32.mrb[114].mxu0  ;;  %v13055_v12 = vmul.f32 0.35355338, %v5469_v10 }
0x1e23   : > { %v13057_v24 = vmul.f32 0.35355338, %v9177_v34  ;;  %v5472_v26 = vpop.f32.mrb[115].mxu0  ;;  %v4951_v1 = vpop.xlane.xlu0 %4950  ;;  %v5510_v30 = vsel %vm1097_vm10, %v13051_v14, -inf }
0x1e24   : > { %v4945_v28 = vpop.xlane.xlu1 %4944  ;;  %5511 = vmax.xlane.f32.xlu0 %v5510_v30  ;;  %v13061_v51 = vmul.f32 0.35355338, %v5472_v26  ;;  %v4969_v58 = vsub.f32 %v12962_v19, %v4951_v1  ;;  %v5504_v16 = vsel %vm1097_vm10, %v13055_v12, -inf }
0x1e25   : > { %v5513_v42 = vsel %vm1097_vm10, %v13057_v24, -inf  ;;  %v4967_v37 = vsub.f32 %v12964_v17, %v4945_v28 }
0x1e26   : > { %5514 = vmax.xlane.f32.xlu1 %v5513_v42  ;;  %v5507_v27 = vsel %vm1097_vm10, %v13061_v51, -inf  ;;  %v4979_v56 = vmul.f32 1.442695, %v4969_v58 }
0x1e27   : > { %v4948_v35 = vpop.xlane.xlu0 %4947  ;;  %v4975_v17 = vmul.f32 1.442695, %v4967_v37 }
0x1e28   : > { %v4954_v6 = vpop.xlane.xlu1 %4953  ;;  %5505 = vmax.xlane.f32.xlu0 %v5504_v16  ;;  %v9192_v18 = vpop.f32.mrb[116].mxu0  ;;  %10092 = vpow2.f32 %v4979_v56 }
0x1e29   : > { %v4970_v49 = vsub.f32 %v12969_v38, %v4954_v6  ;;  %v13069_v9 = vmul.f32 0.35355338, %v9192_v18  ;;  %v5725_v63 = vpop.f32.mrb[117].mxu0  ;;  %v4968_v38 = vsub.f32 %v12971_v8, %v4948_v35 }
0x1e2a   : > { %5508 = vmax.xlane.f32.xlu1 %v5507_v27  ;;  %v9193_v19 = vpop.f32.mrb[118].mxu0  ;;  %v13074_v47 = vmul.f32 0.35355338, %v5725_v63 }
0x1e2b   : > { %v13076_v4 = vmul.f32 0.35355338, %v9193_v19  ;;  %v5728_v13 = vpop.f32.mrb[119].mxu0  ;;  %v5770_v33 = vsel %vm1097_vm10, %v13069_v9, -inf  ;;  %v4981_v32 = vmul.f32 1.442695, %v4970_v49  ;;  %v4963_v30 = vpop.xlane.xlu0 %4962 }
0x1e2c   : > { %5771 = vmax.xlane.f32.xlu0 %v5770_v33  ;;  %v13081_v10 = vmul.f32 0.35355338, %v5728_v13  ;;  %v5764_v34 = vsel %vm1097_vm10, %v13074_v47, -inf  ;;  %v4977_v26 = vmul.f32 1.442695, %v4968_v38  ;;  %v4973_v56 = vsub.f32 %v12980_v41, %v4963_v30 }
0x1e2d   : > { %v5773_v22 = vsel %vm1097_vm10, %v13076_v4, -inf  ;;  %10094 = vpow2.f32 %v4981_v32  ;;  %v4966_v16 = vpop.xlane.xlu1 %4965 }
0x1e2e   : > { %5774 = vmax.xlane.f32.xlu1 %v5773_v22  ;;  %v5767_v42 = vsel %vm1097_vm10, %v13081_v10, -inf  ;;  %10096 = vpow2.f32 %v4975_v17  ;;  %v4974_v33 = vsub.f32 %v12984_v62, %v4966_v16 }
0x1e2f   : > { %10098 = vpow2.f32 %v4977_v26  ;;  %v4957_v37 = vpop.xlane.xlu0 %4956  ;;  %v4987_v26 = vmul.f32 1.442695, %v4973_v56 }
0x1e30   : > { %5765 = vmax.xlane.f32.xlu0 %v5764_v34  ;;  %v9196_v1 = vpop.f32.mrb[120].mxu0  ;;  %v4971_v41 = vsub.f32 %v12982_v11, %v4957_v37  ;;  %v4989_v62 = vmul.f32 1.442695, %v4974_v33 }
0x1e31   : > { %v13087_v28 = vmul.f32 0.35355338, %v9196_v1  ;;  %v5741_v8 = vpop.f32.mrb[121].mxu0  ;;  %v4960_v32 = vpop.xlane.xlu1 %4959  ;;  %10100 = vpow2.f32 %v4987_v26 }
0x1e32   : > { %5768 = vmax.xlane.f32.xlu1 %v5767_v42  ;;  %v9197_v58 = vpop.f32.mrb[122].mxu0  ;;  %v13091_v6 = vmul.f32 0.35355338, %v5741_v8  ;;  %v13104_v13 = vpop.eup %10092  ;;  %10102 = vpow2.f32 %v4989_v62 }
0x1e33   : > { %v13093_v18 = vmul.f32 0.35355338, %v9197_v58  ;;  %v5744_v35 = vpop.f32.mrb[123].mxu0  ;;  %v5782_v49 = vsel %vm1097_vm10, %v13087_v28, -inf  ;;  %v4997_v8 = vsel %vm1097_vm10, %v13104_v13, 0.0  ;;  %v4972_v58 = vsub.f32 %v12989_v59, %v4960_v32 }
0x1e34   : > { %5783 = vmax.xlane.f32.xlu0 %v5782_v49  ;;  %v13097_v63 = vmul.f32 0.35355338, %v5744_v35  ;;  %v5776_v19 = vsel %vm1097_vm10, %v13091_v6, -inf  ;;  %v4983_v49 = vmul.f32 1.442695, %v4971_v41 }
0x1e35   : > { %v5785_v27 = vsel %vm1097_vm10, %v13093_v18, -inf  ;;  %v4985_v56 = vmul.f32 1.442695, %v4972_v58 }
0x1e36   : > { %5786 = vmax.xlane.f32.xlu1 %v5785_v27  ;;  %v5779_v17 = vsel %vm1097_vm10, %v13097_v63, -inf  ;;  %10104 = vpow2.f32 %v4983_v49 }
0x1e37   : > { %v13109_v34 = vpop.eup %10094  ;;  %10106 = vpow2.f32 %v4985_v56 }
0x1e38   : > { %5777 = vmax.xlane.f32.xlu0 %v5776_v19  ;;  %v9212_v38 = vpop.f32.mrb[124].mxu0  ;;  %v13114_v42 = vpop.eup %10096  ;;  %v5000_v16 = vsel %vm1097_vm10, %v13109_v34, 0.0 }
0x1e39   : > { %v5997_v22 = vpop.f32.mrb[125].mxu0  ;;  %v13119_v35 = vpop.eup %10098  ;;  %v13121_v11 = vmul.f32 0.35355338, %v9212_v38  ;;  %v4991_v27 = vsel %vm1097_vm10, %v13114_v42, 0.0 }
0x1e3a   : > { %5780 = vmax.xlane.f32.xlu1 %v5779_v17  ;;  %v9213_v1 = vpop.f32.mrb[126].mxu0  ;;  %v4994_v33 = vsel %vm1097_vm10, %v13119_v35, 0.0  ;;  %v13129_v17 = vmul.f32 0.35355338, %v5997_v22 }
0x1e3b   : > { %v6000_v30 = vpop.f32.mrb[127].mxu0  ;;  %v13125_v19 = vmul.f32 0.35355338, %v9213_v1  ;;  %v6042_v26 = vsel %vm1097_vm10, %v13121_v11, -inf  ;;  %v13139_v62 = vpop.eup %10100 }
0x1e3c   : > { %4998 = vadd.xlane.f32.xlu0 %v4997_v8  ;;  %v13133_v41 = vmul.f32 0.35355338, %v6000_v30  ;;  %v6036_v8 = vsel %vm1097_vm10, %v13129_v17, -inf  ;;  %v13143_v49 = vpop.eup %10102  ;;  %v5009_v56 = vsel %vm1097_vm10, %v13139_v62, 0.0 }
0x1e3d   : > { %v6045_v1 = vsel %vm1097_vm10, %v13125_v19, -inf }
0x1e3e   : > { %5001 = vadd.xlane.f32.xlu1 %v5000_v16  ;;  %v6039_v16 = vsel %vm1097_vm10, %v13133_v41, -inf }
0x1e40   : > { %v9216_v37 = vpop.f32.mrb[128].mxu0  ;;  %4992 = vadd.xlane.f32.xlu0 %v4991_v27 }
0x1e41   : > { %v6013_v59 = vpop.f32.mrb[129].mxu0 }
0x1e42   : > { %v9217_v32 = vpop.f32.mrb[130].mxu0  ;;  %4995 = vadd.xlane.f32.xlu1 %v4994_v33  ;;  %v13147_v33 = vpop.eup %10104  ;;  %v13161_v53 = vmul.f32 0.35355338, %v6013_v59 }
0x1e43   : > { %v6016_v38 = vpop.f32.mrb[131].mxu0  ;;  %v5003_v61 = vsel %vm1097_vm10, %v13147_v33, 0.0 }
0x1e44   : > { %6043 = vmax.xlane.f32.xlu0 %v6042_v26  ;;  %v5012_v26 = vsel %vm1097_vm10, %v13143_v49, 0.0  ;;  %v6048_v39 = vsel %vm1097_vm10, %v13161_v53, -inf }
0x1e46   : > { %6046 = vmax.xlane.f32.xlu1 %v6045_v1  ;;  %v13151_v1 = vpop.eup %10106 }
0x1e47   : > { %v5006_v50 = vsel %vm1097_vm10, %v13151_v1, 0.0 }
0x1e48   : > { %v9232_v58 = vpop.f32.mrb[132].mxu0  ;;  %6037 = vmax.xlane.f32.xlu0 %v6036_v8  ;;  %v13153_v8 = vmul.f32 0.35355338, %v9216_v37 }
0x1e49   : > { %v6269_v22 = vpop.f32.mrb[133].mxu0 }
0x1e4a   : > { %v9233_v27 = vpop.f32.mrb[134].mxu0  ;;  %6040 = vmax.xlane.f32.xlu1 %v6039_v16  ;;  %v13157_v16 = vmul.f32 0.35355338, %v9217_v32  ;;  %v6054_v37 = vsel %vm1097_vm10, %v13153_v8, -inf  ;;  %v13169_v32 = vmul.f32 0.35355338, %v9232_v58 }
0x1e4b   : > { %v6272_v30 = vpop.f32.mrb[135].mxu0 }
0x1e4c   : > { %5010 = vadd.xlane.f32.xlu0 %v5009_v56  ;;  %v6314_v58 = vsel %vm1097_vm10, %v13169_v32, -inf }
0x1e4e   : > { %5013 = vadd.xlane.f32.xlu1 %v5012_v26  ;;  %v13165_v26 = vmul.f32 0.35355338, %v6016_v38  ;;  %v13177_v38 = vmul.f32 0.35355338, %v6269_v22 }
0x1e50   : > { %v9236_v29 = vpop.f32.mrb[136].mxu0  ;;  %5004 = vadd.xlane.f32.xlu0 %v5003_v61  ;;  %v6057_v61 = vsel %vm1097_vm10, %v13157_v16, -inf  ;;  %v6051_v57 = vsel %vm1097_vm10, %v13165_v26, -inf  ;;  %14380 = vst [vmem:[#allocation22_spill] sm:$0xff] %v13177_v38  ;;  %v6308_v7 = vsel %vm1097_vm10, %v13177_v38, -inf }
0x1e51   : > { %v6285_v21 = vpop.f32.mrb[137].mxu0 }
0x1e52   : > { %v9237_v56 = vpop.f32.mrb[138].mxu0  ;;  %5007 = vadd.xlane.f32.xlu1 %v5006_v50  ;;  %v13173_v50 = vmul.f32 0.35355338, %v9233_v27  ;;  %v13185_v27 = vmul.f32 0.35355338, %v9236_v29 }
0x1e53   : > { %v6288_v23 = vpop.f32.mrb[139].mxu0 }
0x1e54   : > { %6055 = vmax.xlane.f32.xlu0 %v6054_v37  ;;  %14379 = vst [vmem:[#allocation39_spill] sm:$0xff] %v13173_v50  ;;  %14382 = vst [vmem:[#allocation25_spill] sm:$0xff] %v13185_v27  ;;  %v6326_v29 = vsel %vm1097_vm10, %v13185_v27, -inf }
0x1e56   : > { %6058 = vmax.xlane.f32.xlu1 %v6057_v61  ;;  %v13181_v61 = vmul.f32 0.35355338, %v6272_v30  ;;  %v13193_v30 = vmul.f32 0.35355338, %v6285_v21 }
0x1e58   : > { %v9252_v3 = vpop.f32.mrb[140].mxu0  ;;  %6049 = vmax.xlane.f32.xlu0 %v6048_v39  ;;  %14381 = vst [vmem:[#allocation24_spill] sm:$0xff] %v13181_v61  ;;  %v6317_v39 = vsel %vm1097_vm10, %v13173_v50, -inf  ;;  %v6311_v15 = vsel %vm1097_vm10, %v13181_v61, -inf  ;;  %14384 = vst [vmem:[#allocation14_spill] sm:$0xff] %v13193_v30  ;;  %v6320_v61 = vsel %vm1097_vm10, %v13193_v30, -inf }
0x1e59   : > { %v6541_v59 = vpop.f32.mrb[141].mxu0 }
0x1e5a   : > { %v9253_v37 = vpop.f32.mrb[142].mxu0  ;;  %6052 = vmax.xlane.f32.xlu1 %v6051_v57  ;;  %v13189_v57 = vmul.f32 0.35355338, %v9237_v56  ;;  %v13201_v56 = vmul.f32 0.35355338, %v9252_v3 }
0x1e5b   : > { %v6544_v20 = vpop.f32.mrb[143].mxu0  ;;  %v13205_v21 = vmul.f32 0.35355338, %v9253_v37 }
0x1e5c   : > { %6315 = vmax.xlane.f32.xlu0 %v6314_v58  ;;  %14383 = vst [vmem:[#allocation23_spill] sm:$0xff] %v13189_v57  ;;  %14386 = vst [vmem:[#allocation15_spill] sm:$0xff] %v13201_v56  ;;  %v6586_v3 = vsel %vm1097_vm10, %v13201_v56, -inf }
0x1e5e   : > { %6318 = vmax.xlane.f32.xlu1 %v6317_v39  ;;  %v13197_v39 = vmul.f32 0.35355338, %v6288_v23  ;;  %v13209_v23 = vmul.f32 0.35355338, %v6541_v59 }
0x1e60   : > { %v9256_v31 = vpop.f32.mrb[144].mxu0  ;;  %6309 = vmax.xlane.f32.xlu0 %v6308_v7  ;;  %14385 = vst [vmem:[#allocation26_spill] sm:$0xff] %v13197_v39  ;;  %v6329_v7 = vsel %vm1097_vm10, %v13189_v57, -inf  ;;  %v6323_v27 = vsel %vm1097_vm10, %v13197_v39, -inf  ;;  %v6580_v39 = vsel %vm1097_vm10, %v13209_v23, -inf }
0x1e61   : > { %v6557_v22 = vpop.f32.mrb[145].mxu0  ;;  %v13217_v37 = vmul.f32 0.35355338, %v9256_v31 }
0x1e62   : > { %v9257_v58 = vpop.f32.mrb[146].mxu0  ;;  %6312 = vmax.xlane.f32.xlu1 %v6311_v15 }
0x1e63   : > { %v6560_v55 = vpop.f32.mrb[147].mxu0  ;;  %14388 = vst [vmem:[#allocation17_spill] sm:$0xff] %v13217_v37  ;;  %v13221_v59 = vmul.f32 0.35355338, %v9257_v58  ;;  %v6598_v31 = vsel %vm1097_vm10, %v13217_v37, -inf }
0x1e64   : > { %6327 = vmax.xlane.f32.xlu0 %v6326_v29 }
0x1e66   : > { %6330 = vmax.xlane.f32.xlu1 %v6329_v7  ;;  %v13213_v7 = vmul.f32 0.35355338, %v6544_v20  ;;  %v13225_v20 = vmul.f32 0.35355338, %v6557_v22 }
0x1e68   : > { %v9272_v38 = vpop.f32.mrb[148].mxu0  ;;  %6321 = vmax.xlane.f32.xlu0 %v6320_v61  ;;  %14387 = vst [vmem:[#allocation13_spill] sm:$0xff] %v13213_v7  ;;  %v6589_v61 = vsel %vm1097_vm10, %v13205_v21, -inf  ;;  %v6583_v56 = vsel %vm1097_vm10, %v13213_v7, -inf  ;;  %v6592_v7 = vsel %vm1097_vm10, %v13225_v20, -inf }
0x1e69   : > { %v6813_v15 = vpop.f32.mrb[149].mxu0  ;;  %v13233_v58 = vmul.f32 0.35355338, %v9272_v38 }
0x1e6a   : > { %v9273_v29 = vpop.f32.mrb[150].mxu0  ;;  %6324 = vmax.xlane.f32.xlu1 %v6323_v27  ;;  %v13241_v37 = vmul.f32 0.35355338, %v6813_v15 }
0x1e6b   : > { %v6816_v50 = vpop.f32.mrb[151].mxu0 }
0x1e6c   : > { %6587 = vmax.xlane.f32.xlu0 %v6586_v3  ;;  %14389 = vst [vmem:[#allocation18_spill] sm:$0xff] %v13241_v37 }
0x1e6e   : > { %6590 = vmax.xlane.f32.xlu1 %v6589_v61  ;;  %v13229_v61 = vmul.f32 0.35355338, %v6560_v55  ;;  %v6858_v55 = vsel %vm1097_vm10, %v13233_v58, -inf }
0x1e70   : > { %v9276_v57 = vpop.f32.mrb[152].mxu0  ;;  %6581 = vmax.xlane.f32.xlu0 %v6580_v39  ;;  %v6601_v39 = vsel %vm1097_vm10, %v13221_v59, -inf  ;;  %v6595_v22 = vsel %vm1097_vm10, %v13229_v61, -inf }
0x1e71   : > { %v6829_v27 = vpop.f32.mrb[153].mxu0 }
0x1e72   : > { %v9277_v3 = vpop.f32.mrb[154].mxu0  ;;  %6584 = vmax.xlane.f32.xlu1 %v6583_v56  ;;  %v13237_v56 = vmul.f32 0.35355338, %v9273_v29  ;;  %v6852_v29 = vsel %vm1097_vm10, %v13241_v37, -inf }
0x1e73   : > { %v6832_v30 = vpop.f32.mrb[155].mxu0 }
0x1e74   : > { %6599 = vmax.xlane.f32.xlu0 %v6598_v31  ;;  %v13245_v31 = vmul.f32 0.35355338, %v6816_v50  ;;  %v6861_v38 = vsel %vm1097_vm10, %v13237_v56, -inf }
0x1e76   : > { %6602 = vmax.xlane.f32.xlu1 %v6601_v39  ;;  %14390 = vst [vmem:[#allocation9_spill] sm:$0xff] %v13245_v31  ;;  %v13249_v39 = vmul.f32 0.35355338, %v9276_v57  ;;  %v6855_v15 = vsel %vm1097_vm10, %v13245_v31, -inf }
0x1e78   : > { %6593 = vmax.xlane.f32.xlu0 %v6592_v7  ;;  %14391 = vst [vmem:[#allocation10_spill] sm:$0xff] %v13249_v39  ;;  %v13253_v7 = vmul.f32 0.35355338, %v9277_v3  ;;  %v6870_v50 = vsel %vm1097_vm10, %v13249_v39, -inf }
0x1e7a   : > { %6596 = vmax.xlane.f32.xlu1 %v6595_v22  ;;  %14392 = vst [vmem:[#allocation11_spill] sm:$0xff] %v13253_v7  ;;  %v13257_v22 = vmul.f32 0.35355338, %v6829_v27  ;;  %v6873_v57 = vsel %vm1097_vm10, %v13253_v7, -inf }
0x1e7c   : > { %6859 = vmax.xlane.f32.xlu0 %v6858_v55  ;;  %14393 = vst [vmem:[#allocation12_spill] sm:$0xff] %v13257_v22  ;;  %v13261_v55 = vmul.f32 0.35355338, %v6832_v30  ;;  %v6864_v3 = vsel %vm1097_vm10, %v13257_v22, -inf }
0x1e7e   : > { %6862 = vmax.xlane.f32.xlu1 %v6861_v38  ;;  %14394 = vst [vmem:[#allocation19_spill] sm:$0xff] %v13261_v55  ;;  %v6867_v38 = vsel %vm1097_vm10, %v13261_v55, -inf }
0x1e80   : > { %6853 = vmax.xlane.f32.xlu0 %v6852_v29 }
0x1e82   : > { %6856 = vmax.xlane.f32.xlu1 %v6855_v15 }
0x1e84   : > { %6871 = vmax.xlane.f32.xlu0 %v6870_v50 }
0x1e86   : > { %6874 = vmax.xlane.f32.xlu1 %v6873_v57 }
0x1e88   : > { %6865 = vmax.xlane.f32.xlu0 %v6864_v3 }
0x1e8a   : > { %6868 = vmax.xlane.f32.xlu1 %v6867_v38 }
0x1e96   : > { %v5227_v27 = vpop.xlane.xlu0 %5226 }
0x1e97   : > { %v5245_v29 = vsub.f32 %v12997_v60, %v5227_v27 }
0x1e98   : > { %v5230_v15 = vpop.xlane.xlu1 %5229 }
0x1e99   : > { %v5255_v39 = vmul.f32 1.442695, %v5245_v29  ;;  %v5246_v30 = vsub.f32 %v13001_v52, %v5230_v15 }
0x1e9a   : > { %v5221_v50 = vpop.xlane.xlu0 %5220 }
0x1e9b   : > { %10108 = vpow2.f32 %v5255_v39  ;;  %v5257_v31 = vmul.f32 1.442695, %v5246_v30  ;;  %v5243_v57 = vsub.f32 %v12999_v25, %v5221_v50 }
0x1e9c   : > { %v5224_v7 = vpop.xlane.xlu1 %5223 }
0x1e9d   : > { %10110 = vpow2.f32 %v5257_v31  ;;  %v5251_v22 = vmul.f32 1.442695, %v5243_v57  ;;  %v5244_v3 = vsub.f32 %v13005_v2, %v5224_v7 }
0x1e9e   : > { %v5239_v37 = vpop.xlane.xlu0 %5238 }
0x1e9f   : > { %10112 = vpow2.f32 %v5251_v22  ;;  %v5253_v38 = vmul.f32 1.442695, %v5244_v3  ;;  %v5249_v55 = vsub.f32 %v13011_v40, %v5239_v37 }
0x1ea0   : > { %v5242_v60 = vpop.xlane.xlu1 %5241 }
0x1ea1   : > { %10114 = vpow2.f32 %v5253_v38  ;;  %v5263_v27 = vmul.f32 1.442695, %v5249_v55  ;;  %v5250_v52 = vsub.f32 %v13017_v36, %v5242_v60 }
0x1ea2   : > { %v5233_v29 = vpop.xlane.xlu0 %5232 }
0x1ea3   : > { %10116 = vpow2.f32 %v5263_v27  ;;  %v5265_v39 = vmul.f32 1.442695, %v5250_v52  ;;  %v5247_v25 = vsub.f32 %v13015_v44, %v5233_v29 }
0x1ea4   : > { %v5236_v15 = vpop.xlane.xlu1 %5235 }
0x1ea5   : > { %v13276_v31 = vpop.eup %10108  ;;  %10118 = vpow2.f32 %v5265_v39  ;;  %v5259_v2 = vmul.f32 1.442695, %v5247_v25  ;;  %v5248_v7 = vsub.f32 %v13021_v48, %v5236_v15 }
0x1ea6   : > { %v5273_v40 = vsel %vm1097_vm10, %v13276_v31, 0.0 }
0x1ea7   : > { %v13281_v37 = vpop.eup %10110  ;;  %10120 = vpow2.f32 %v5259_v2  ;;  %v5261_v22 = vmul.f32 1.442695, %v5248_v7  ;;  %5274 = vadd.xlane.f32.xlu0 %v5273_v40 }
0x1ea8   : > { %v5276_v36 = vsel %vm1097_vm10, %v13281_v37, 0.0 }
0x1ea9   : > { %v13285_v55 = vpop.eup %10112  ;;  %10122 = vpow2.f32 %v5261_v22  ;;  %5277 = vadd.xlane.f32.xlu1 %v5276_v36  ;;  %v5500_v44 = vpop.xlane.xlu0 %5499 }
0x1eaa   : > { %v5518_v30 = vsub.f32 %v13031_v46, %v5500_v44  ;;  %v5267_v48 = vsel %vm1097_vm10, %v13285_v55, 0.0 }
0x1eab   : > { %v13290_v50 = vpop.eup %10114  ;;  %v5503_v57 = vpop.xlane.xlu1 %5502  ;;  %5268 = vadd.xlane.f32.xlu0 %v5267_v48 }
0x1eac   : > { %v5528_v3 = vmul.f32 1.442695, %v5518_v30  ;;  %v5519_v38 = vsub.f32 %v13037_v0, %v5503_v57  ;;  %v5270_v60 = vsel %vm1097_vm10, %v13290_v50, 0.0 }
0x1ead   : > { %v13295_v27 = vpop.eup %10116  ;;  %5271 = vadd.xlane.f32.xlu1 %v5270_v60  ;;  %v5494_v52 = vpop.xlane.xlu0 %5493 }
0x1eae   : > { %10124 = vpow2.f32 %v5528_v3  ;;  %v5530_v29 = vmul.f32 1.442695, %v5519_v38  ;;  %v5516_v46 = vsub.f32 %v13035_v5, %v5494_v52  ;;  %v5285_v39 = vsel %vm1097_vm10, %v13295_v27, 0.0 }
0x1eaf   : > { %v13300_v25 = vpop.eup %10118  ;;  %v5497_v15 = vpop.xlane.xlu1 %5496  ;;  %5286 = vadd.xlane.f32.xlu0 %v5285_v39 }
0x1eb0   : > { %10126 = vpow2.f32 %v5530_v29  ;;  %v5524_v0 = vmul.f32 1.442695, %v5516_v46  ;;  %v5517_v2 = vsub.f32 %v13041_v54, %v5497_v15  ;;  %v5288_v7 = vsel %vm1097_vm10, %v13300_v25, 0.0 }
0x1eb1   : > { %v13305_v40 = vpop.eup %10120  ;;  %5289 = vadd.xlane.f32.xlu1 %v5288_v7  ;;  %v5512_v22 = vpop.xlane.xlu0 %5511 }
0x1eb2   : > { %10128 = vpow2.f32 %v5524_v0  ;;  %v5526_v5 = vmul.f32 1.442695, %v5517_v2  ;;  %v5522_v36 = vsub.f32 %v13051_v14, %v5512_v22  ;;  %v5279_v44 = vsel %vm1097_vm10, %v13305_v40, 0.0 }
0x1eb3   : > { %v13310_v30 = vpop.eup %10122  ;;  %v5515_v48 = vpop.xlane.xlu1 %5514  ;;  %5280 = vadd.xlane.f32.xlu0 %v5279_v44 }
0x1eb4   : > { %10130 = vpow2.f32 %v5526_v5  ;;  %v5536_v54 = vmul.f32 1.442695, %v5522_v36  ;;  %v5523_v57 = vsub.f32 %v13057_v24, %v5515_v48  ;;  %v5282_v3 = vsel %vm1097_vm10, %v13310_v30, 0.0 }
0x1eb5   : > { %5283 = vadd.xlane.f32.xlu1 %v5282_v3  ;;  %v5506_v38 = vpop.xlane.xlu0 %5505 }
0x1eb6   : > { %10132 = vpow2.f32 %v5536_v54  ;;  %v5538_v60 = vmul.f32 1.442695, %v5523_v57  ;;  %v5520_v14 = vsub.f32 %v13055_v12, %v5506_v38 }
0x1eb7   : > { %v5509_v52 = vpop.xlane.xlu1 %5508 }
0x1eb8   : > { %v13316_v29 = vpop.eup %10124  ;;  %10134 = vpow2.f32 %v5538_v60  ;;  %v5532_v46 = vmul.f32 1.442695, %v5520_v14  ;;  %v5521_v39 = vsub.f32 %v13061_v51, %v5509_v52 }
0x1eb9   : > { %v5772_v15 = vpop.xlane.xlu0 %5771  ;;  %v5546_v24 = vsel %vm1097_vm10, %v13316_v29, 0.0 }
0x1eba   : > { %v13321_v0 = vpop.eup %10126  ;;  %10136 = vpow2.f32 %v5532_v46  ;;  %v5534_v2 = vmul.f32 1.442695, %v5521_v39  ;;  %v5790_v7 = vsub.f32 %v13069_v9, %v5772_v15  ;;  %5547 = vadd.xlane.f32.xlu0 %v5546_v24 }
0x1ebb   : > { %v5775_v22 = vpop.xlane.xlu1 %5774  ;;  %v5549_v12 = vsel %vm1097_vm10, %v13321_v0, 0.0 }
0x1ebc   : > { %v13326_v5 = vpop.eup %10128  ;;  %10138 = vpow2.f32 %v5534_v2  ;;  %v5800_v36 = vmul.f32 1.442695, %v5790_v7  ;;  %5550 = vadd.xlane.f32.xlu1 %v5549_v12  ;;  %v5791_v51 = vsub.f32 %v13076_v4, %v5775_v22 }
0x1ebd   : > { %v5766_v44 = vpop.xlane.xlu0 %5765  ;;  %v5540_v48 = vsel %vm1097_vm10, %v13326_v5, 0.0 }
0x1ebe   : > { %v13331_v54 = vpop.eup %10130  ;;  %10140 = vpow2.f32 %v5800_v36  ;;  %v5788_v9 = vsub.f32 %v13074_v47, %v5766_v44  ;;  %5541 = vadd.xlane.f32.xlu0 %v5540_v48  ;;  %v5802_v14 = vmul.f32 1.442695, %v5791_v51 }
0x1ebf   : > { %v5769_v57 = vpop.xlane.xlu1 %5768  ;;  %v5543_v3 = vsel %vm1097_vm10, %v13331_v54, 0.0 }
0x1ec0   : > { %v13336_v38 = vpop.eup %10132  ;;  %v5796_v60 = vmul.f32 1.442695, %v5788_v9  ;;  %5544 = vadd.xlane.f32.xlu1 %v5543_v3  ;;  %v5789_v39 = vsub.f32 %v13081_v10, %v5769_v57 }
0x1ec1   : > { %v5784_v4 = vpop.xlane.xlu0 %5783  ;;  %v5558_v52 = vsel %vm1097_vm10, %v13336_v38, 0.0 }
0x1ec2   : > { %v13340_v46 = vpop.eup %10134  ;;  %10142 = vpow2.f32 %v5796_v60  ;;  %v5794_v47 = vsub.f32 %v13087_v28, %v5784_v4  ;;  %5559 = vadd.xlane.f32.xlu0 %v5558_v52  ;;  %v5798_v51 = vmul.f32 1.442695, %v5789_v39 }
0x1ec3   : > { %v5787_v15 = vpop.xlane.xlu1 %5786  ;;  %v5561_v24 = vsel %vm1097_vm10, %v13340_v46, 0.0  ;;  %10144 = vpow2.f32 %v5802_v14 }
0x1ec4   : > { %v13346_v2 = vpop.eup %10136  ;;  %v5808_v7 = vmul.f32 1.442695, %v5794_v47  ;;  %5562 = vadd.xlane.f32.xlu1 %v5561_v24  ;;  %v5795_v3 = vsub.f32 %v13093_v18, %v5787_v15 }
0x1ec5   : > { %v5778_v22 = vpop.xlane.xlu0 %5777  ;;  %v5552_v12 = vsel %vm1097_vm10, %v13346_v2, 0.0 }
0x1ec6   : > { %v13350_v36 = vpop.eup %10138  ;;  %10146 = vpow2.f32 %v5808_v7  ;;  %v5792_v10 = vsub.f32 %v13091_v6, %v5778_v22  ;;  %5553 = vadd.xlane.f32.xlu0 %v5552_v12  ;;  %v5810_v39 = vmul.f32 1.442695, %v5795_v3 }
0x1ec7   : > { %v5781_v28 = vpop.xlane.xlu1 %5780  ;;  %v5555_v44 = vsel %vm1097_vm10, %v13350_v36, 0.0  ;;  %10148 = vpow2.f32 %v5798_v51 }
0x1ec8   : > { %v13355_v48 = vpop.eup %10140  ;;  %v5804_v9 = vmul.f32 1.442695, %v5792_v10  ;;  %5556 = vadd.xlane.f32.xlu1 %v5555_v44  ;;  %v5793_v6 = vsub.f32 %v13097_v63, %v5781_v28 }
0x1ec9   : > { %v4999_v57 = vpop.xlane.xlu0 %4998  ;;  %v5818_v14 = vsel %vm1097_vm10, %v13355_v48, 0.0 }
0x1eca   : > { %10150 = vpow2.f32 %v5804_v9  ;;  %v5806_v7 = vmul.f32 1.442695, %v5793_v6 }
0x1ecb   : > { %v5002_v60 = vpop.xlane.xlu1 %5001 }
0x1ecc   : > { %v13360_v4 = vpop.eup %10142  ;;  %5819 = vadd.xlane.f32.xlu1 %v5818_v14  ;;  %10152 = vrcp.f32 %v5002_v60 }
0x1ecd   : > { %v4993_v52 = vpop.xlane.xlu0 %4992  ;;  %v13363_v47 = vpop.eup %10144  ;;  %v5812_v18 = vsel %vm1097_vm10, %v13360_v4, 0.0 }
0x1ece   : > { %10154 = vrcp.f32 %v4993_v52  ;;  %v5821_v10 = vsel %vm1097_vm10, %v13363_v47, 0.0 }
0x1ecf   : > { %10156 = vrcp.f32 %v4999_v57  ;;  %v4996_v24 = vpop.xlane.xlu1 %4995 }
0x1ed0   : > { %v13367_v15 = vpop.eup %10146  ;;  %10158 = vrcp.f32 %v4996_v24  ;;  %5813 = vadd.xlane.f32.xlu1 %v5812_v18 }
0x1ed1   : > { %v6044_v22 = vpop.xlane.xlu0 %6043  ;;  %v5830_v63 = vsel %vm1097_vm10, %v13367_v15, 0.0  ;;  %10160 = vpow2.f32 %v5810_v39  ;;  %v13374_v28 = vpop.eup %10148 }
0x1ed2   : > { %v6062_v12 = vsub.f32 %v13121_v11, %v6044_v22  ;;  %5831 = vadd.xlane.f32.xlu0 %v5830_v63  ;;  %10162 = vpow2.f32 %v5806_v7  ;;  %v5815_v52 = vsel %vm1097_vm10, %v13374_v28, 0.0 }
0x1ed3   : > { %v6047_v51 = vpop.xlane.xlu1 %6046 }
0x1ed4   : > { %v6072_v44 = vmul.f32 1.442695, %v6062_v12  ;;  %v6063_v9 = vsub.f32 %v13125_v19, %v6047_v51  ;;  %5822 = vadd.xlane.f32.xlu1 %v5821_v10  ;;  %v13377_v3 = vpop.eup %10150 }
0x1ed5   : > { %v6038_v57 = vpop.xlane.xlu0 %6037  ;;  %v5824_v51 = vsel %vm1097_vm10, %v13377_v3, 0.0 }
0x1ed6   : > { %10164 = vpow2.f32 %v6072_v44  ;;  %v6074_v60 = vmul.f32 1.442695, %v6063_v9  ;;  %v6060_v14 = vsub.f32 %v13129_v17, %v6038_v57  ;;  %v10153_v11 = vpop.eup %10152 }
0x1ed7   : > { %v6041_v6 = vpop.xlane.xlu1 %6040  ;;  %v5026_v63 = vmul.f32 %v10153_v11, %v13109_v34 }
0x1ed8   : > { %v10155_v39 = vpop.eup %10154  ;;  %10166 = vpow2.f32 %v6074_v60  ;;  %v6068_v24 = vmul.f32 1.442695, %v6060_v14  ;;  %v6061_v18 = vsub.f32 %v13133_v41, %v6041_v6  ;;  %5816 = vadd.xlane.f32.xlu1 %v5815_v52 }
0x1ed9   : > { %v10157_v19 = vpop.eup %10156  ;;  %v5011_v7 = vpop.xlane.xlu0 %5010  ;;  %v5023_v10 = vmul.f32 %v10155_v39, %v13114_v42 }
0x1eda   : > { %v10159_v22 = vpop.eup %10158  ;;  %10168 = vpow2.f32 %v6068_v24  ;;  %v6070_v12 = vmul.f32 1.442695, %v6061_v18  ;;  %v5025_v41 = vmul.f32 %v10157_v19, %v13104_v13  ;;  %v5327_v13 = vsel %vm5047_vm6, %v12951_v43, 0 }
0x1edb   : > { %10170 = vrcp.f32 %v5011_v7  ;;  %v5014_v17 = vpop.xlane.xlu1 %5013  ;;  %v5024_v44 = vmul.f32 %v10159_v22, %v13119_v35  ;;  %v13388_v9 = vpop.eup %10160 }
0x1edc   : > { %10172 = vpow2.f32 %v6070_v12  ;;  %5825 = vadd.xlane.f32.xlu1 %v5824_v51  ;;  %v5032_v60 = vpack.c.bf16 %v5026_v63, %v5025_v41  ;;  %v13391_v14 = vpop.eup %10162  ;;  %v5833_v42 = vsel %vm1097_vm10, %v13388_v9, 0.0 }
0x1edd   : > { %10174 = vrcp.f32 %v5014_v17  ;;  %v5005_v57 = vpop.xlane.xlu0 %5004  ;;  %v5031_v34 = vpack.c.bf16 %v5024_v44, %v5023_v10  ;;  %v5827_v19 = vsel %vm1097_vm10, %v13391_v14, 0.0 }
0x1ede   : > { %10176 = vrcp.f32 %v5005_v57 }
0x1edf   : > { %v5008_v11 = vpop.xlane.xlu1 %5007  ;;  %9140 = vmatprep.mubr.msk.bf16.mxu1 %vm1097_vm10, %v5031_v34 }
0x1ee0   : > { %v13396_v35 = vpop.eup %10164  ;;  %10178 = vrcp.f32 %v5008_v11  ;;  %5834 = vadd.xlane.f32.xlu1 %v5833_v42  ;;  %9141 = vmatmul.mubr.msk.bf16.vlgmr.msra.gmra.mrb[92].mxu1 %vm1097_vm10, %v5032_v60 }
0x1ee1   : > { %9159 = vmatpush3.bf16.msra.mxu1 %v5327_v13  ;;  %v6056_v6 = vpop.xlane.xlu0 %6055  ;;  %v6090_v52 = vsel %vm1097_vm10, %v13396_v35, 0.0 }
0x1ee2   : > { %v13403_v39 = vpop.eup %10166  ;;  %9357 = vmatprep.subr.msk.bf16.mxu1 %vm5047_vm6, %v13033_v45  ;;  %v6066_v24 = vsub.f32 %v13153_v8, %v6056_v6  ;;  %6091 = vadd.xlane.f32.xlu0 %v6090_v52 }
0x1ee3   : > { %v6059_v18 = vpop.xlane.xlu1 %6058  ;;  %v6093_v17 = vsel %vm1097_vm10, %v13403_v39, 0.0 }
0x1ee4   : > { %v13410_v7 = vpop.eup %10168  ;;  %v6080_v43 = vmul.f32 1.442695, %v6066_v24  ;;  %v6067_v22 = vsub.f32 %v13157_v16, %v6059_v18  ;;  %5828 = vadd.xlane.f32.xlu1 %v5827_v19 }
0x1ee5   : > { %v10171_v63 = vpop.eup %10170  ;;  %v6050_v12 = vpop.xlane.xlu0 %6049  ;;  %v6084_v41 = vsel %vm1097_vm10, %v13410_v7, 0.0 }
0x1ee6   : > { %v13415_v51 = vpop.eup %10172  ;;  %10180 = vpow2.f32 %v6080_v43  ;;  %v6064_v8 = vsub.f32 %v13161_v53, %v6050_v12  ;;  %6094 = vadd.xlane.f32.xlu0 %v6093_v17  ;;  %v6082_v34 = vmul.f32 1.442695, %v6067_v22  ;;  %v5029_v19 = vmul.f32 %v10171_v63, %v13139_v62  ;;  %v14395_v22 = vld [vmem:[#allocation39_spill] sm:$0xff]  ;;  %v14397_v62 = vld [vmem:[#allocation24_spill] sm:$0xff] }
0x1ee7   : > { %v10175_v10 = vpop.eup %10174  ;;  %v6053_v44 = vpop.xlane.xlu1 %6052  ;;  %v6087_v42 = vsel %vm1097_vm10, %v13415_v51, 0.0 }
0x1ee8   : > { %v10177_v57 = vpop.eup %10176  ;;  %v6076_v16 = vmul.f32 1.442695, %v6064_v8  ;;  %v6065_v60 = vsub.f32 %v13165_v26, %v6053_v44  ;;  %6085 = vadd.xlane.f32.xlu1 %v6084_v41  ;;  %v5030_v6 = vmul.f32 %v10175_v10, %v13143_v49  ;;  %v14396_v44 = vld [vmem:[#allocation22_spill] sm:$0xff] }
0x1ee9   : > { %v6316_v11 = vpop.xlane.xlu0 %6315  ;;  %v5027_v24 = vmul.f32 %v10177_v57, %v13147_v33 }
0x1eea   : > { %v10179_v13 = vpop.eup %10178  ;;  %10182 = vpow2.f32 %v6076_v16  ;;  %v6334_v53 = vsub.f32 %v13169_v32, %v6316_v11  ;;  %6088 = vadd.xlane.f32.xlu0 %v6087_v42  ;;  %v6078_v26 = vmul.f32 1.442695, %v6065_v60  ;;  %v5034_v41 = vpack.c.bf16 %v5030_v6, %v5029_v19 }
0x1eeb   : > { %v6319_v52 = vpop.xlane.xlu1 %6318  ;;  %v5028_v18 = vmul.f32 %v10179_v13, %v13151_v1  ;;  %10184 = vpow2.f32 %v6082_v34  ;;  %v14398_v34 = vld [vmem:[#allocation25_spill] sm:$0xff] }
0x1eec   : > { %v6344_v43 = vmul.f32 1.442695, %v6334_v53  ;;  %v6335_v12 = vsub.f32 %v14395_v22, %v6319_v52 }
0x1eed   : > { %v6310_v17 = vpop.xlane.xlu0 %6309  ;;  %v5033_v8 = vpack.c.bf16 %v5028_v18, %v5027_v24  ;;  %v14399_v18 = vld [vmem:[#allocation14_spill] sm:$0xff] }
0x1eee   : > { %10186 = vpow2.f32 %v6344_v43  ;;  %v6332_v32 = vsub.f32 %v14396_v44, %v6310_v17  ;;  %v6346_v33 = vmul.f32 1.442695, %v6335_v12 }
0x1eef   : > { %v6313_v16 = vpop.xlane.xlu1 %6312  ;;  %9144 = vmatprep.mubr.msk.bf16.mxu1 %vm1097_vm10, %v5033_v8  ;;  %10188 = vpow2.f32 %v6078_v26  ;;  %v14400_v26 = vld [vmem:[#allocation23_spill] sm:$0xff] }
0x1ef0   : > { %v13431_v49 = vpop.eup %10180  ;;  %v6340_v1 = vmul.f32 1.442695, %v6332_v32  ;;  %v6333_v63 = vsub.f32 %v14397_v62, %v6313_v16  ;;  %9145 = vmatmul.mubr.msk.bf16.gmra.mrb[96].mxu1 %vm1097_vm10, %v5034_v41  ;;  %v14401_v16 = vld [vmem:[#allocation15_spill] sm:$0xff]  ;;  %v14402_v62 = vld [vmem:[#allocation26_spill] sm:$0xff] }
0x1ef1   : > { %v6328_v10 = vpop.xlane.xlu0 %6327  ;;  %v6102_v57 = vsel %vm1097_vm10, %v13431_v49, 0.0 }
0x1ef2   : > { %10190 = vpow2.f32 %v6340_v1  ;;  %v6338_v60 = vsub.f32 %v14398_v34, %v6328_v10  ;;  %6103 = vadd.xlane.f32.xlu0 %v6102_v57  ;;  %v6342_v13 = vmul.f32 1.442695, %v6333_v63 }
0x1ef3   : > { %v6331_v11 = vpop.xlane.xlu1 %6330  ;;  %10192 = vpow2.f32 %v6346_v33 }
0x1ef4   : > { %v13438_v42 = vpop.eup %10182  ;;  %v6352_v53 = vmul.f32 1.442695, %v6338_v60  ;;  %v6339_v43 = vsub.f32 %v14400_v26, %v6331_v11 }
0x1ef5   : > { %v6322_v6 = vpop.xlane.xlu0 %6321  ;;  %v6096_v52 = vsel %vm1097_vm10, %v13438_v42, 0.0  ;;  %v13442_v24 = vpop.eup %10184 }
0x1ef6   : > { %10194 = vpow2.f32 %v6352_v53  ;;  %v6336_v19 = vsub.f32 %v14399_v18, %v6322_v6  ;;  %6097 = vadd.xlane.f32.xlu0 %v6096_v52  ;;  %v6105_v44 = vsel %vm1097_vm10, %v13442_v24, 0.0  ;;  %v6354_v1 = vmul.f32 1.442695, %v6339_v43 }
0x1ef7   : > { %v6325_v22 = vpop.xlane.xlu1 %6324  ;;  %10196 = vpow2.f32 %v6342_v13 }
0x1ef8   : > { %v13446_v12 = vpop.eup %10186  ;;  %v6348_v17 = vmul.f32 1.442695, %v6336_v19  ;;  %v6337_v63 = vsub.f32 %v14402_v62, %v6325_v22 }
0x1ef9   : > { %v6588_v8 = vpop.xlane.xlu0 %6587  ;;  %v6362_v32 = vsel %vm1097_vm10, %v13446_v12, 0.0  ;;  %v13452_v41 = vpop.eup %10188 }
0x1efa   : > { %v6606_v33 = vsub.f32 %v14401_v16, %v6588_v8  ;;  %6106 = vadd.xlane.f32.xlu0 %v6105_v44  ;;  %6363 = vadd.xlane.f32.xlu1 %v6362_v32  ;;  %10198 = vpow2.f32 %v6348_v17  ;;  %v6099_v13 = vsel %vm1097_vm10, %v13452_v41, 0.0  ;;  %v6350_v18 = vmul.f32 1.442695, %v6337_v63 }
0x1efb   : > { %v6591_v10 = vpop.xlane.xlu1 %6590 }
0x1efc   : > { %v13456_v57 = vpop.eup %10190  ;;  %v6616_v34 = vmul.f32 1.442695, %v6606_v33  ;;  %v6607_v60 = vsub.f32 %v13205_v21, %v6591_v10  ;;  %v14403_v21 = vld [vmem:[#allocation13_spill] sm:$0xff] }
0x1efd   : > { %v6582_v11 = vpop.xlane.xlu0 %6581  ;;  %v6356_v53 = vsel %vm1097_vm10, %v13456_v57, 0.0  ;;  %v13463_v6 = vpop.eup %10192  ;;  %v14404_v33 = vld [vmem:[#allocation17_spill] sm:$0xff] }
0x1efe   : > { %10200 = vpow2.f32 %v6616_v34  ;;  %v6618_v52 = vmul.f32 1.442695, %v6607_v60  ;;  %6100 = vadd.xlane.f32.xlu0 %v6099_v13  ;;  %6357 = vadd.xlane.f32.xlu1 %v6356_v53  ;;  %v6604_v19 = vsub.f32 %v13209_v23, %v6582_v11  ;;  %v6365_v8 = vsel %vm1097_vm10, %v13463_v6, 0.0 }
0x1eff   : > { %10202 = vpow2.f32 %v6354_v1  ;;  %v6585_v26 = vpop.xlane.xlu1 %6584 }
0x1f00   : > { %v13466_v43 = vpop.eup %10194  ;;  %10204 = vpow2.f32 %v6618_v52  ;;  %v6605_v22 = vsub.f32 %v14403_v21, %v6585_v26  ;;  %v6612_v23 = vmul.f32 1.442695, %v6604_v19 }
0x1f01   : > { %v6600_v17 = vpop.xlane.xlu0 %6599  ;;  %v6374_v44 = vsel %vm1097_vm10, %v13466_v43, 0.0  ;;  %v13473_v32 = vpop.eup %10196  ;;  %10206 = vpow2.f32 %v6350_v18 }
0x1f02   : > { %v6614_v16 = vmul.f32 1.442695, %v6605_v22  ;;  %v6610_v1 = vsub.f32 %v14404_v33, %v6600_v17  ;;  %6366 = vadd.xlane.f32.xlu1 %v6365_v8  ;;  %6375 = vadd.xlane.f32.xlu0 %v6374_v44  ;;  %v6359_v34 = vsel %vm1097_vm10, %v13473_v32, 0.0 }
0x1f03   : > { %v6603_v62 = vpop.xlane.xlu1 %6602 }
0x1f04   : > { %10208 = vpow2.f32 %v6614_v16  ;;  %v6624_v63 = vmul.f32 1.442695, %v6610_v1  ;;  %v13478_v60 = vpop.eup %10198  ;;  %v6611_v52 = vsub.f32 %v13221_v59, %v6603_v62 }
0x1f05   : > { %v6594_v10 = vpop.xlane.xlu0 %6593  ;;  %10210 = vpow2.f32 %v6612_v23  ;;  %v6368_v21 = vsel %vm1097_vm10, %v13478_v60, 0.0 }
0x1f06   : > { %v6608_v11 = vsub.f32 %v13225_v20, %v6594_v10  ;;  %6360 = vadd.xlane.f32.xlu1 %v6359_v34  ;;  %10212 = vpow2.f32 %v6624_v63  ;;  %v6626_v59 = vmul.f32 1.442695, %v6611_v52  ;;  %v14405_v10 = vld [vmem:[#allocation18_spill] sm:$0xff]  ;;  %v14406_v52 = vld [vmem:[#allocation9_spill] sm:$0xff] }
0x1f07   : > { %v6597_v13 = vpop.xlane.xlu1 %6596 }
0x1f08   : > { %v13481_v53 = vpop.eup %10200  ;;  %v6620_v18 = vmul.f32 1.442695, %v6608_v11  ;;  %v6609_v8 = vsub.f32 %v13229_v61, %v6597_v13 }
0x1f09   : > { %v13484_v19 = vpop.eup %10202  ;;  %v6860_v26 = vpop.xlane.xlu0 %6859  ;;  %v6634_v22 = vsel %vm1097_vm10, %v13481_v53, 0.0 }
0x1f0a   : > { %v13490_v17 = vpop.eup %10204  ;;  %v6878_v20 = vsub.f32 %v13233_v58, %v6860_v26  ;;  %6369 = vadd.xlane.f32.xlu1 %v6368_v21  ;;  %6635 = vadd.xlane.f32.xlu0 %v6634_v22  ;;  %10214 = vpow2.f32 %v6620_v18  ;;  %v6377_v62 = vsel %vm1097_vm10, %v13484_v19, 0.0  ;;  %v6622_v34 = vmul.f32 1.442695, %v6609_v8 }
0x1f0b   : > { %v6863_v44 = vpop.xlane.xlu1 %6862  ;;  %v13495_v1 = vpop.eup %10206  ;;  %v6637_v63 = vsel %vm1097_vm10, %v13490_v17, 0.0 }
0x1f0c   : > { %v6888_v16 = vmul.f32 1.442695, %v6878_v20  ;;  %v6879_v33 = vsub.f32 %v13237_v56, %v6863_v44  ;;  %v6371_v22 = vsel %vm1097_vm10, %v13495_v1, 0.0 }
0x1f0d   : > { %v6854_v23 = vpop.xlane.xlu0 %6853 }
0x1f0e   : > { %v13501_v58 = vpop.eup %10208  ;;  %10216 = vpow2.f32 %v6888_v16  ;;  %v6876_v61 = vsub.f32 %v14405_v10, %v6854_v23  ;;  %6378 = vadd.xlane.f32.xlu1 %v6377_v62  ;;  %6638 = vadd.xlane.f32.xlu0 %v6637_v63  ;;  %v6890_v56 = vmul.f32 1.442695, %v6879_v33 }
0x1f0f   : > { %v6857_v11 = vpop.xlane.xlu1 %6856  ;;  %10218 = vpow2.f32 %v6626_v59  ;;  %v13505_v26 = vpop.eup %10210  ;;  %v6631_v20 = vsel %vm1097_vm10, %v13501_v58, 0.0  ;;  %v14408_v59 = vld [vmem:[#allocation10_spill] sm:$0xff] }
0x1f10   : > { %v6884_v13 = vmul.f32 1.442695, %v6876_v61  ;;  %v6877_v18 = vsub.f32 %v14406_v52, %v6857_v11  ;;  %v13511_v44 = vpop.eup %10212  ;;  %v6628_v62 = vsel %vm1097_vm10, %v13505_v26, 0.0  ;;  %v14409_v61 = vld [vmem:[#allocation12_spill] sm:$0xff] }
0x1f11   : > { %v6872_v21 = vpop.xlane.xlu0 %6871  ;;  %14407 = vst [vmem:[#allocation20_spill] sm:$0xff] %v13511_v44  ;;  %v6646_v63 = vsel %vm1097_vm10, %v13511_v44, 0.0 }
0x1f12   : > { %10220 = vpow2.f32 %v6884_v13  ;;  %6372 = vadd.xlane.f32.xlu1 %v6371_v22  ;;  %6632 = vadd.xlane.f32.xlu0 %v6631_v20  ;;  %v6886_v8 = vmul.f32 1.442695, %v6877_v18  ;;  %v6882_v16 = vsub.f32 %v14408_v59, %v6872_v21 }
0x1f13   : > { %10222 = vpow2.f32 %v6622_v34  ;;  %v6875_v33 = vpop.xlane.xlu1 %6874 }
0x1f14   : > { %10224 = vpow2.f32 %v6890_v56  ;;  %v13518_v10 = vpop.eup %10214  ;;  %v6896_v34 = vmul.f32 1.442695, %v6882_v16  ;;  %v14411_v56 = vld [vmem:[#allocation11_spill] sm:$0xff] }
0x1f15   : > { %v6866_v23 = vpop.xlane.xlu0 %6865  ;;  %10226 = vpow2.f32 %v6886_v8  ;;  %v6883_v52 = vsub.f32 %v14411_v56, %v6875_v33  ;;  %v6640_v21 = vsel %vm1097_vm10, %v13518_v10, 0.0 }
0x1f16   : > { %v6880_v11 = vsub.f32 %v14409_v61, %v6866_v23  ;;  %6629 = vadd.xlane.f32.xlu1 %v6628_v62  ;;  %6647 = vadd.xlane.f32.xlu0 %v6646_v63 }
0x1f17   : > { %v6898_v23 = vmul.f32 1.442695, %v6883_v52 }
0x1f18   : > { %v13521_v13 = vpop.eup %10216  ;;  %v6892_v18 = vmul.f32 1.442695, %v6880_v11 }
0x1f19   : > { %14410 = vst [vmem:[#allocation39_spill] sm:$0xff] %v13521_v13  ;;  %v6906_v22 = vsel %vm1097_vm10, %v13521_v13, 0.0  ;;  %v13528_v20 = vpop.eup %10218 }
0x1f1a   : > { %14412 = vst [vmem:[#allocation22_spill] sm:$0xff] %v13528_v20  ;;  %10228 = vpow2.f32 %v6892_v18  ;;  %6641 = vadd.xlane.f32.xlu0 %v6640_v21  ;;  %6907 = vadd.xlane.f32.xlu1 %v6906_v22  ;;  %v6649_v16 = vsel %vm1097_vm10, %v13528_v20, 0.0 }
0x1f1b   : > { %10230 = vpow2.f32 %v6896_v34 }
0x1f1c   : > { %v13530_v59 = vpop.eup %10220  ;;  %10232 = vpow2.f32 %v6898_v23 }
0x1f1d   : > { %14413 = vst [vmem:[#allocation24_spill] sm:$0xff] %v13530_v59  ;;  %v13532_v8 = vpop.eup %10222  ;;  %v6900_v33 = vsel %vm1097_vm10, %v13530_v59, 0.0 }
0x1f1e   : > { %v13538_v62 = vpop.eup %10224  ;;  %6650 = vadd.xlane.f32.xlu0 %v6649_v16  ;;  %6901 = vadd.xlane.f32.xlu1 %v6900_v33  ;;  %v6643_v63 = vsel %vm1097_vm10, %v13532_v8, 0.0  ;;  %v6869_v16 = vpop.xlane.xlu1 %6868 }
0x1f1f   : > { %14414 = vst [vmem:[#allocation25_spill] sm:$0xff] %v13538_v62  ;;  %v6909_v61 = vsel %vm1097_vm10, %v13538_v62, 0.0  ;;  %v13544_v11 = vpop.eup %10226 }
0x1f20   : > { %14415 = vst [vmem:[#allocation14_spill] sm:$0xff] %v13544_v11  ;;  %v6903_v56 = vsel %vm1097_vm10, %v13544_v11, 0.0 }
0x1f22   : > { %6644 = vadd.xlane.f32.xlu0 %v6643_v63  ;;  %6910 = vadd.xlane.f32.xlu1 %v6909_v61  ;;  %v14419_v61 = vld [vmem:[#allocation34_spill] sm:$0xff] }
0x1f24   : > { %v13546_v34 = vpop.eup %10228 }
0x1f25   : > { %14416 = vst [vmem:[#allocation23_spill] sm:$0xff] %v13546_v34  ;;  %v6912_v52 = vsel %vm1097_vm10, %v13546_v34, 0.0  ;;  %v13552_v18 = vpop.eup %10230 }
0x1f26   : > { %14417 = vst [vmem:[#allocation15_spill] sm:$0xff] %v13552_v18  ;;  %6904 = vadd.xlane.f32.xlu1 %v6903_v56  ;;  %6913 = vadd.xlane.f32.xlu0 %v6912_v52  ;;  %v6918_v21 = vsel %vm1097_vm10, %v13552_v18, 0.0  ;;  %v13556_v22 = vpop.eup %10232 }
0x1f27   : > { %14418 = vst [vmem:[#allocation26_spill] sm:$0xff] %v13556_v22  ;;  %v6921_v23 = vsel %vm1097_vm10, %v13556_v22, 0.0  ;;  %v14420_v22 = vld [vmem:[#allocation19_spill] sm:$0xff] }
0x1f2a   : > { %6919 = vadd.xlane.f32.xlu0 %v6918_v21 }
0x1f2e   : > { %6922 = vadd.xlane.f32.xlu0 %v6921_v23  ;;  %v6881_v23 = vsub.f32 %v14420_v22, %v6869_v16 }
0x1f34   : > { %v5275_v33 = vpop.xlane.xlu0 %5274 }
0x1f36   : > { %v5278_v63 = vpop.xlane.xlu1 %5277 }
0x1f37   : > { %6672 = vrot.lane.b32.xlu1 %v14419_v61, %s14373_s15  ;;  %10234 = vrcp.f32 %v5278_v63  ;;  %v6894_v63 = vmul.f32 1.442695, %v6881_v23  ;;  %s14438_s15 = smov 56  }
0x1f38   : > { %v5269_v34 = vpop.xlane.xlu0 %5268 }
0x1f39   : > { %10236 = vrcp.f32 %v5269_v34 }
0x1f3a   : > { %10238 = vrcp.f32 %v5275_v33  ;;  %v5272_v56 = vpop.xlane.xlu1 %5271 }
0x1f3b   : > { %10240 = vrcp.f32 %v5272_v56 }
0x1f3c   : > { %v5287_v52 = vpop.xlane.xlu0 %5286 }
0x1f3e   : > { %v5290_v18 = vpop.xlane.xlu1 %5289 }
0x1f3f   : > { %10242 = vrcp.f32 %v5290_v18 }
0x1f40   : > { %v5281_v21 = vpop.xlane.xlu0 %5280 }
0x1f41   : > { %10244 = vrcp.f32 %v5281_v21  ;;  %v10235_v13 = vpop.eup %10234 }
0x1f42   : > { %10246 = vrcp.f32 %v5287_v52  ;;  %v5284_v62 = vpop.xlane.xlu1 %5283  ;;  %v5302_v33 = vmul.f32 %v10235_v13, %v13281_v37  ;;  %v5599_v37 = vsel %vm5047_vm6, %v13033_v45, 0 }
0x1f43   : > { %v10237_v59 = vpop.eup %10236  ;;  %10248 = vrcp.f32 %v5284_v62 }
0x1f44   : > { %v10239_v44 = vpop.eup %10238  ;;  %6944 = vrot.lane.b32.xlu0 %v14419_v61, %s14375_s28  ;;  %v5299_v56 = vmul.f32 %v10237_v59, %v13285_v55  ;;  %10250 = vpow2.f32 %v6894_v63 }
0x1f45   : > { %v10241_v34 = vpop.eup %10240  ;;  %v5301_v21 = vmul.f32 %v10239_v44, %v13276_v31 }
0x1f46   : > { %v5300_v18 = vmul.f32 %v10241_v34, %v13290_v50  ;;  %v14421_v50 = vld [vmem:[#allocation31_spill] sm:$0xff] }
0x1f47   : > { %v5548_v11 = vpop.xlane.xlu0 %5547  ;;  %v5308_v16 = vpack.c.bf16 %v5302_v33, %v5301_v21 }
0x1f48   : > { %v5307_v22 = vpack.c.bf16 %v5300_v18, %v5299_v56 }
0x1f49   : > { %v5551_v52 = vpop.xlane.xlu1 %5550  ;;  %v10243_v20 = vpop.eup %10242 }
0x1f4a   : > { %9160 = vmatprep.mubr.msk.bf16.mxu1 %vm1097_vm10, %v5307_v22  ;;  %10252 = vrcp.f32 %v5551_v52  ;;  %v5306_v59 = vmul.f32 %v10243_v20, %v13300_v25 }
0x1f4b   : > { %v10245_v62 = vpop.eup %10244  ;;  %9161 = vmatmul.mubr.msk.bf16.vlgmr.msra.gmra.mrb[100].mxu1 %vm1097_vm10, %v5308_v16  ;;  %v5542_v55 = vpop.xlane.xlu0 %5541 }
0x1f4c   : > { %v10247_v13 = vpop.eup %10246  ;;  %9179 = vmatpush3.bf16.msra.mxu1 %v5599_v37  ;;  %10254 = vrcp.f32 %v5542_v55  ;;  %v5303_v61 = vmul.f32 %v10245_v62, %v13305_v40 }
0x1f4d   : > { %v10249_v31 = vpop.eup %10248  ;;  %10256 = vrcp.f32 %v5548_v11  ;;  %9359 = vmatprep.subr.msk.bf16.mxu1 %vm5047_vm6, %v14421_v50  ;;  %v5545_v44 = vpop.xlane.xlu1 %5544  ;;  %v5305_v45 = vmul.f32 %v10247_v13, %v13295_v27 }
0x1f4e   : > { %10258 = vrcp.f32 %v5545_v44  ;;  %v5304_v23 = vmul.f32 %v10249_v31, %v13310_v30  ;;  %v13581_v18 = vpop.eup %10250 }
0x1f4f   : > { %v5560_v34 = vpop.xlane.xlu0 %5559  ;;  %v5310_v56 = vpack.c.bf16 %v5306_v59, %v5305_v45  ;;  %v6915_v37 = vsel %vm1097_vm10, %v13581_v18, 0.0 }
0x1f50   : > { %v5309_v33 = vpack.c.bf16 %v5304_v23, %v5303_v61 }
0x1f51   : > { %v5563_v63 = vpop.xlane.xlu1 %5562 }
0x1f52   : > { %9164 = vmatprep.mubr.msk.bf16.mxu1 %vm1097_vm10, %v5309_v33  ;;  %10260 = vrcp.f32 %v5563_v63 }
0x1f53   : > { %9165 = vmatmul.mubr.msk.bf16.gmra.mrb[104].mxu1 %vm1097_vm10, %v5310_v56  ;;  %v5554_v11 = vpop.xlane.xlu0 %5553 }
0x1f54   : > { %10262 = vrcp.f32 %v5554_v11  ;;  %v10253_v25 = vpop.eup %10252 }
0x1f55   : > { %10264 = vrcp.f32 %v5560_v34  ;;  %v5557_v40 = vpop.xlane.xlu1 %5556  ;;  %v5575_v27 = vmul.f32 %v10253_v25, %v13321_v0  ;;  %v5871_v0 = vsel %vm5047_vm6, %v14421_v50, 0 }
0x1f56   : > { %v10255_v20 = vpop.eup %10254  ;;  %10266 = vrcp.f32 %v5557_v40 }
0x1f57   : > { %v10257_v30 = vpop.eup %10256  ;;  %v5572_v16 = vmul.f32 %v10255_v20, %v13326_v5 }
0x1f58   : > { %v10259_v21 = vpop.eup %10258  ;;  %v5574_v62 = vmul.f32 %v10257_v30, %v13316_v29  ;;  %v14422_v29 = vld [vmem:[#allocation36_spill] sm:$0xff] }
0x1f59   : > { %v5820_v22 = vpop.xlane.xlu1 %5819  ;;  %v5573_v52 = vmul.f32 %v10259_v21, %v13331_v54 }
0x1f5a   : > { %v5581_v13 = vpack.c.bf16 %v5575_v27, %v5574_v62 }
0x1f5b   : > { %6916 = vadd.xlane.f32.xlu1 %v6915_v37  ;;  %v5580_v55 = vpack.c.bf16 %v5573_v52, %v5572_v16 }
0x1f5c   : > { %v10261_v31 = vpop.eup %10260 }
0x1f5d   : > { %v5814_v44 = vpop.xlane.xlu1 %5813  ;;  %9180 = vmatprep.mubr.msk.bf16.mxu1 %vm1097_vm10, %v5580_v55  ;;  %v5579_v61 = vmul.f32 %v10261_v31, %v13340_v46 }
0x1f5e   : > { %v10263_v59 = vpop.eup %10262  ;;  %9181 = vmatmul.mubr.msk.bf16.vlgmr.msra.gmra.mrb[108].mxu1 %vm1097_vm10, %v5581_v13  ;;  %v14423_v13 = vld [vmem:[#allocation38_spill] sm:$0xff] }
0x1f5f   : > { %v10265_v5 = vpop.eup %10264  ;;  %9199 = vmatpush3.bf16.msra.mxu1 %v5871_v0  ;;  %v5576_v34 = vmul.f32 %v10263_v59, %v13346_v2  ;;  %v5832_v46 = vpop.xlane.xlu0 %5831 }
0x1f60   : > { %v10267_v54 = vpop.eup %10266  ;;  %9361 = vmatprep.subr.msk.bf16.mxu1 %vm5047_vm6, %v14422_v29  ;;  %v5578_v33 = vmul.f32 %v10265_v5, %v13336_v38 }
0x1f61   : > { %v5823_v23 = vpop.xlane.xlu1 %5822  ;;  %v5577_v45 = vmul.f32 %v10267_v54, %v13350_v36 }
0x1f62   : > { %10268 = vrcp.f32 %v5823_v23  ;;  %v5583_v56 = vpack.c.bf16 %v5579_v61, %v5578_v33 }
0x1f63   : > { %v5582_v63 = vpack.c.bf16 %v5577_v45, %v5576_v34  ;;  %10270 = vrcp.f32 %v5814_v44 }
0x1f64   : > { %10272 = vrcp.f32 %v5820_v22 }
0x1f65   : > { %v5817_v50 = vpop.xlane.xlu1 %5816  ;;  %9184 = vmatprep.mubr.msk.bf16.mxu1 %vm1097_vm10, %v5582_v63 }
0x1f66   : > { %10274 = vrcp.f32 %v5817_v50  ;;  %9185 = vmatmul.mubr.msk.bf16.gmra.mrb[112].mxu1 %vm1097_vm10, %v5583_v56 }
0x1f69   : > { %v5826_v11 = vpop.xlane.xlu1 %5825 }
0x1f6c   : > { %v10269_v25 = vpop.eup %10268 }
0x1f6d   : > { %v5835_v40 = vpop.xlane.xlu1 %5834  ;;  %v10271_v2 = vpop.eup %10270  ;;  %v5847_v30 = vmul.f32 %v10269_v25, %v13363_v47  ;;  %v6143_v47 = vsel %vm5047_vm6, %v14422_v29, 0 }
0x1f6e   : > { %v10273_v20 = vpop.eup %10272  ;;  %10276 = vrcp.f32 %v5835_v40  ;;  %v5844_v27 = vmul.f32 %v10271_v2, %v13360_v4  ;;  %v6415_v40 = vsel %vm5047_vm6, %v14423_v13, 0 }
0x1f6f   : > { %v6092_v36 = vpop.xlane.xlu0 %6091  ;;  %10278 = vrcp.f32 %v5826_v11  ;;  %v5846_v16 = vmul.f32 %v10273_v20, %v13355_v48 }
0x1f70   : > { %v10275_v38 = vpop.eup %10274  ;;  %10280 = vrcp.f32 %v5832_v46 }
0x1f71   : > { %v5829_v21 = vpop.xlane.xlu1 %5828  ;;  %v5845_v22 = vmul.f32 %v10275_v38, %v13374_v28  ;;  %v5853_v37 = vpack.c.bf16 %v5847_v30, %v5846_v16 }
0x1f72   : > { %10282 = vrcp.f32 %v5829_v21 }
0x1f73   : > { %v6095_v52 = vpop.xlane.xlu0 %6094  ;;  %v5852_v62 = vpack.c.bf16 %v5845_v22, %v5844_v27 }
0x1f75   : > { %v6086_v55 = vpop.xlane.xlu1 %6085  ;;  %9200 = vmatprep.mubr.msk.bf16.mxu1 %vm1097_vm10, %v5852_v62 }
0x1f76   : > { %10284 = vrcp.f32 %v6086_v55  ;;  %9201 = vmatmul.mubr.msk.bf16.vlgmr.msra.gmra.mrb[116].mxu1 %vm1097_vm10, %v5853_v37 }
0x1f77   : > { %10286 = vrcp.f32 %v6095_v52  ;;  %9219 = vmatpush3.bf16.msra.mxu1 %v6143_v47  ;;  %v6089_v4 = vpop.xlane.xlu0 %6088 }
0x1f78   : > { %9363 = vmatprep.subr.msk.bf16.mxu1 %vm5047_vm6, %v14423_v13  ;;  %10288 = vrcp.f32 %v6089_v4  ;;  %v10277_v48 = vpop.eup %10276 }
0x1f79   : > { %10290 = vrcp.f32 %v6092_v36  ;;  %v10279_v28 = vpop.eup %10278  ;;  %v5851_v59 = vmul.f32 %v10277_v48, %v13388_v9 }
0x1f7a   : > { %v10281_v31 = vpop.eup %10280  ;;  %v5848_v0 = vmul.f32 %v10279_v28, %v13377_v3 }
0x1f7b   : > { %v5850_v54 = vmul.f32 %v10281_v31, %v13367_v15 }
0x1f7c   : > { %v10283_v44 = vpop.eup %10282 }
0x1f7d   : > { %v5849_v5 = vmul.f32 %v10283_v44, %v13391_v14  ;;  %v5855_v34 = vpack.c.bf16 %v5851_v59, %v5850_v54 }
0x1f7f   : > { %v6104_v29 = vpop.xlane.xlu0 %6103  ;;  %v5854_v61 = vpack.c.bf16 %v5849_v5, %v5848_v0 }
0x1f80   : > { %v10285_v23 = vpop.eup %10284 }
0x1f81   : > { %v10287_v45 = vpop.eup %10286  ;;  %9204 = vmatprep.mubr.msk.bf16.mxu1 %vm1097_vm10, %v5854_v61  ;;  %v6116_v9 = vmul.f32 %v10285_v23, %v13410_v7 }
0x1f82   : > { %v10289_v33 = vpop.eup %10288  ;;  %9205 = vmatmul.mubr.msk.bf16.gmra.mrb[120].mxu1 %vm1097_vm10, %v5855_v34  ;;  %v6119_v14 = vmul.f32 %v10287_v45, %v13403_v39 }
0x1f83   : > { %v10291_v63 = vpop.eup %10290  ;;  %v6098_v56 = vpop.xlane.xlu0 %6097  ;;  %v6117_v3 = vmul.f32 %v10289_v33, %v13415_v51 }
0x1f84   : > { %v6118_v15 = vmul.f32 %v10291_v63, %v13396_v35 }
0x1f85   : > { %v6124_v50 = vpack.c.bf16 %v6117_v3, %v6116_v9 }
0x1f86   : > { %v6125_v25 = vpack.c.bf16 %v6119_v14, %v6118_v15 }
0x1f87   : > { %v6364_v11 = vpop.xlane.xlu1 %6363  ;;  %9220 = vmatprep.mubr.msk.bf16.mxu1 %vm1097_vm10, %v6124_v50  ;;  %v6107_v46 = vpop.xlane.xlu0 %6106 }
0x1f88   : > { %10292 = vrcp.f32 %v6107_v46 }
0x1f89   : > { %10294 = vrcp.f32 %v6098_v56 }
0x1f8a   : > { %9221 = vmatmul.mubr.msk.bf16.vlgmr.msra.gmra.mrb[124].mxu1 %vm1097_vm10, %v6125_v25  ;;  %10296 = vrcp.f32 %v6104_v29 }
0x1f8b   : > { %9239 = vmatpush3.bf16.msra.mxu1 %v6415_v40  ;;  %v6358_v7 = vpop.xlane.xlu1 %6357  ;;  %v6101_v51 = vpop.xlane.xlu0 %6100 }
0x1f8c   : > { %10298 = vrcp.f32 %v6101_v51 }
0x1f8d   : > { %10300 = vrcp.f32 %v6358_v7 }
0x1f8f   : > { %v6367_v39 = vpop.xlane.xlu1 %6366  ;;  %v6376_v35 = vpop.xlane.xlu0 %6375 }
0x1f90   : > { %10302 = vrcp.f32 %v6367_v39 }
0x1f91   : > { %10304 = vrcp.f32 %v6364_v11 }
0x1f92   : > { %v10293_v20 = vpop.eup %10292 }
0x1f93   : > { %v6361_v2 = vpop.xlane.xlu1 %6360  ;;  %v10295_v36 = vpop.eup %10294  ;;  %v6123_v22 = vmul.f32 %v10293_v20, %v13442_v24 }
0x1f94   : > { %10306 = vrcp.f32 %v6361_v2  ;;  %v10297_v38 = vpop.eup %10296  ;;  %v6120_v16 = vmul.f32 %v10295_v36, %v13438_v42 }
0x1f95   : > { %v6122_v62 = vmul.f32 %v10297_v38, %v13431_v49 }
0x1f96   : > { %v10299_v30 = vpop.eup %10298 }
0x1f97   : > { %v6370_v21 = vpop.xlane.xlu1 %6369  ;;  %v6636_v27 = vpop.xlane.xlu0 %6635  ;;  %v6121_v52 = vmul.f32 %v10299_v30, %v13452_v41  ;;  %v6127_v13 = vpack.c.bf16 %v6123_v22, %v6122_v62 }
0x1f98   : > { %v10301_v55 = vpop.eup %10300 }
0x1f99   : > { %v6126_v37 = vpack.c.bf16 %v6121_v52, %v6120_v16  ;;  %v6388_v49 = vmul.f32 %v10301_v55, %v13456_v57 }
0x1f9a   : > { %v10303_v48 = vpop.eup %10302 }
0x1f9b   : > { %v6379_v47 = vpop.xlane.xlu1 %6378  ;;  %v6639_v4 = vpop.xlane.xlu0 %6638  ;;  %9224 = vmatprep.mubr.msk.bf16.mxu1 %vm1097_vm10, %v6126_v37  ;;  %v6391_v42 = vmul.f32 %v10303_v48, %v13463_v6 }
0x1f9c   : > { %v10305_v28 = vpop.eup %10304  ;;  %10308 = vrcp.f32 %v6379_v47  ;;  %9225 = vmatmul.mubr.msk.bf16.gmra.mrb[128].mxu1 %vm1097_vm10, %v6127_v13  ;;  %v14424_v47 = vld [vmem:[#allocation22_spill] sm:$0xff] }
0x1f9d   : > { %10310 = vrcp.f32 %v6370_v21  ;;  %v6390_v59 = vmul.f32 %v10305_v28, %v13446_v12  ;;  %v14425_v13 = vld [vmem:[#allocation14_spill] sm:$0xff] }
0x1f9e   : > { %v10307_v31 = vpop.eup %10306  ;;  %10312 = vrcp.f32 %v6376_v35 }
0x1f9f   : > { %v6373_v24 = vpop.xlane.xlu1 %6372  ;;  %v6633_v41 = vpop.xlane.xlu0 %6632  ;;  %v6389_v44 = vmul.f32 %v10307_v31, %v13473_v32  ;;  %v6397_v5 = vpack.c.bf16 %v6391_v42, %v6390_v59  ;;  %v14426_v31 = vld [vmem:[#allocation20_spill] sm:$0xff] }
0x1fa0   : > { %10314 = vrcp.f32 %v6373_v24 }
0x1fa1   : > { %v6396_v0 = vpack.c.bf16 %v6389_v44, %v6388_v49  ;;  %10316 = vrcp.f32 %v6633_v41  ;;  %v14427_v41 = vld [vmem:[#allocation24_spill] sm:$0xff] }
0x1fa3   : > { %v6630_v54 = vpop.xlane.xlu1 %6629  ;;  %9240 = vmatprep.mubr.msk.bf16.mxu1 %vm1097_vm10, %v6396_v0  ;;  %v6648_v29 = vpop.xlane.xlu0 %6647 }
0x1fa4   : > { %10318 = vrcp.f32 %v6630_v54  ;;  %9241 = vmatmul.mubr.msk.bf16.vlgmr.msra.gmra.mrb[132].mxu1 %vm1097_vm10, %v6397_v5 }
0x1fa5   : > { %10320 = vrcp.f32 %v6639_v4 }
0x1fa6   : > { %v10309_v6 = vpop.eup %10308  ;;  %10322 = vrcp.f32 %v6636_v27 }
0x1fa7   : > { %v6908_v61 = vpop.xlane.xlu1 %6907  ;;  %v6642_v23 = vpop.xlane.xlu0 %6641  ;;  %v6395_v45 = vmul.f32 %v10309_v6, %v13484_v19 }
0x1fa8   : > { %v10311_v34 = vpop.eup %10310  ;;  %10324 = vrcp.f32 %v6642_v23  ;;  %v14429_v23 = vld [vmem:[#allocation39_spill] sm:$0xff] }
0x1fa9   : > { %v10313_v57 = vpop.eup %10312  ;;  %v6392_v63 = vmul.f32 %v10311_v34, %v13478_v60 }
0x1faa   : > { %v10315_v32 = vpop.eup %10314  ;;  %v6394_v3 = vmul.f32 %v10313_v57, %v13466_v43 }
0x1fab   : > { %v6902_v12 = vpop.xlane.xlu1 %6901  ;;  %v6651_v33 = vpop.xlane.xlu0 %6650  ;;  %v6393_v56 = vmul.f32 %v10315_v32, %v13495_v1 }
0x1fac   : > { %v10317_v9 = vpop.eup %10316  ;;  %v6399_v15 = vpack.c.bf16 %v6395_v45, %v6394_v3  ;;  %10326 = vrcp.f32 %v6651_v33  ;;  %v14431_v3 = vld [vmem:[#allocation23_spill] sm:$0xff] }
0x1fad   : > { %v6398_v14 = vpack.c.bf16 %v6393_v56, %v6392_v63  ;;  %v6661_v25 = vmul.f32 %v10317_v9, %v13501_v58  ;;  %v14430_v56 = vld [vmem:[#allocation26_spill] sm:$0xff] }
0x1fae   : > { %v10319_v50 = vpop.eup %10318 }
0x1faf   : > { %v6911_v11 = vpop.xlane.xlu1 %6910  ;;  %9244 = vmatprep.mubr.msk.bf16.mxu1 %vm1097_vm10, %v6398_v14  ;;  %v6645_v46 = vpop.xlane.xlu0 %6644  ;;  %v6660_v19 = vmul.f32 %v10319_v50, %v13505_v26 }
0x1fb0   : > { %9245 = vmatmul.mubr.msk.bf16.gmra.mrb[136].mxu1 %vm1097_vm10, %v6399_v15  ;;  %10328 = vrcp.f32 %v6645_v46  ;;  %v10321_v1 = vpop.eup %10320  ;;  %v14432_v15 = vld [vmem:[#allocation15_spill] sm:$0xff] }
0x1fb1   : > { %v6668_v60 = vpack.c.bf16 %v6661_v25, %v6660_v19  ;;  %10330 = vrcp.f32 %v6648_v29  ;;  %v10323_v26 = vpop.eup %10322  ;;  %v6663_v58 = vmul.f32 %v10321_v1, %v13490_v17  ;;  %v14428_v29 = vld [vmem:[#allocation25_spill] sm:$0xff] }
0x1fb2   : > { %10332 = vrcp.f32 %v6902_v12  ;;  %v6662_v20 = vmul.f32 %v10323_v26, %v13481_v53  ;;  %v10325_v30 = vpop.eup %10324 }
0x1fb3   : > { %v13645_v43 = vpop.f32.mrb[92].mxu1  ;;  %v6905_v40 = vpop.xlane.xlu1 %6904  ;;  %9260 = vmatprep.mubr.msk.bf16.mxu1 %vm1097_vm10, %v6668_v60  ;;  %v6664_v17 = vmul.f32 %v10325_v30, %v13518_v10 }
0x1fb4   : > { %10334 = vrcp.f32 %v6905_v40  ;;  %v6914_v7 = vpop.xlane.xlu0 %6913  ;;  %v13648_v51 = vpop.f32.mrb[93].mxu1  ;;  %v6669_v27 = vpack.c.bf16 %v6663_v58, %v6662_v20 }
0x1fb5   : > { %v13650_v39 = vpop.f32.mrb[94].mxu1  ;;  %10336 = vrcp.f32 %v6911_v11 }
0x1fb6   : > { %v13653_v35 = vpop.f32.mrb[95].mxu1  ;;  %v10327_v21 = vpop.eup %10326  ;;  %10338 = vrcp.f32 %v6908_v61 }
0x1fb7   : > { %v6673_v2 = vpop.permute.xlu1 %6672  ;;  %v6667_v4 = vmul.f32 %v10327_v21, %v14424_v47 }
0x1fb8   : > { %v6687_v36 = vsel %vm5047_vm6, %v6673_v2, 0  ;;  %v6920_v38 = vpop.xlane.xlu0 %6919  ;;  %9365 = vmatprep.subr.msk.bf16.mxu1 %vm5047_vm6, %v6673_v2 }
0x1fb9   : > { %9259 = vmatpush3.bf16.msra.mxu1 %v6687_v36 }
0x1fba   : > { %v10329_v22 = vpop.eup %10328 }
0x1fbb   : > { %v10331_v16 = vpop.eup %10330  ;;  %v6665_v53 = vmul.f32 %v10329_v22, %v13532_v8 }
0x1fbc   : > { %v6923_v52 = vpop.xlane.xlu0 %6922  ;;  %9261 = vmatmul.mubr.msk.bf16.vlgmr.msra.gmra.mrb[140].mxu1 %vm1097_vm10, %v6669_v27  ;;  %v10333_v62 = vpop.eup %10332  ;;  %v6666_v42 = vmul.f32 %v10331_v16, %v14426_v31 }
0x1fbd   : > { %v6670_v55 = vpack.c.bf16 %v6665_v53, %v6664_v17  ;;  %v6932_v10 = vmul.f32 %v10333_v62, %v14427_v41  ;;  %10340 = vrcp.f32 %v6923_v52 }
0x1fbe   : > { %v10335_v37 = vpop.eup %10334  ;;  %v6671_v8 = vpack.c.bf16 %v6667_v4, %v6666_v42  ;;  %10342 = vrcp.f32 %v6914_v7 }
0x1fbf   : > { %v6933_v48 = vmul.f32 %v10335_v37, %v14425_v13  ;;  %9264 = vmatprep.mubr.msk.bf16.mxu1 %vm1097_vm10, %v6670_v55  ;;  %v10337_v49 = vpop.eup %10336  ;;  %10344 = vrcp.f32 %v6920_v38 }
0x1fc0   : > { %v6945_v28 = vpop.permute.xlu0 %6944  ;;  %v10339_v5 = vpop.eup %10338  ;;  %v6935_v6 = vmul.f32 %v10337_v49, %v14428_v29 }
0x1fc1   : > { %v6959_v24 = vsel %vm5047_vm6, %v6945_v28, 0  ;;  %9367 = vmatprep.subr.msk.bf16.mxu1 %vm5047_vm6, %v6945_v28  ;;  %v6940_v59 = vpack.c.bf16 %v6933_v48, %v6932_v10  ;;  %v6934_v34 = vmul.f32 %v10339_v5, %v14429_v23 }
0x1fc2   : > { %9279 = vmatpush3.bf16.msra.mxu1 %v6959_v24 }
0x1fc3   : > { %v13668_v44 = vpop.f32.mrb[96].mxu1  ;;  %v6941_v57 = vpack.c.bf16 %v6935_v6, %v6934_v34 }
0x1fc4   : > { %v13670_v0 = vpop.f32.mrb[97].mxu1  ;;  %9265 = vmatmul.mubr.msk.bf16.gmra.mrb[144].mxu1 %vm1097_vm10, %v6671_v8 }
0x1fc5   : > { %v13673_v54 = vpop.f32.mrb[98].mxu1  ;;  %9280 = vmatprep.mubr.msk.bf16.mxu1 %vm1097_vm10, %v6940_v59 }
0x1fc6   : > { %v13677_v61 = vpop.f32.mrb[99].mxu1 }
0x1fc7   : > { %v10341_v45 = vpop.eup %10340 }
0x1fc8   : > { %v10343_v12 = vpop.eup %10342  ;;  %v6939_v9 = vmul.f32 %v10341_v45, %v14430_v56 }
0x1fc9   : > { %v10345_v33 = vpop.eup %10344  ;;  %v6936_v14 = vmul.f32 %v10343_v12, %v14431_v3 }
0x1fca   : > { %v6938_v11 = vmul.f32 %v10345_v33, %v14432_v15 }
0x1fcc   : > { %9281 = vmatmul.mubr.msk.bf16.vlgmr.msra.gmra.mrb[148].mxu1 %vm1097_vm10, %v6941_v57  ;;  %v6943_v19 = vpack.c.bf16 %v6939_v9, %v6938_v11 }
0x1fe8   : > { %v6917_v32 = vpop.xlane.xlu1 %6916 }
0x1fe9   : > { %10346 = vrcp.f32 %v6917_v32 }
0x1ff3   : > { %v10347_v63 = vpop.eup %10346 }
0x1ff4   : > { %v6937_v50 = vmul.f32 %v10347_v63, %v13581_v18 }
0x1ff6   : > { %v6942_v46 = vpack.c.bf16 %v6937_v50, %v6936_v14 }
0x1ff8   : > { %9284 = vmatprep.mubr.msk.bf16.mxu1 %vm1097_vm10, %v6942_v46 }
0x1ff9   : > { %9285 = vmatmul.mubr.msk.bf16.gmra.mrb[152].mxu1 %vm1097_vm10, %v6943_v19 }
0x201e   : > { %v9162_v25 = vpop.f32.mrb[100].mxu1 }
0x201f   : > { %v5363_v60 = vpop.f32.mrb[101].mxu1 }
0x2020   : > { %v9163_v1 = vpop.f32.mrb[102].mxu1 }
0x2021   : > { %v9583_v40 = vpack.i.bf16 %v9163_v1, %v9162_v25  ;;  %v5366_v7 = vpop.f32.mrb[103].mxu1 }
0x2022   : > { %v9588_v26 = vpack.i.bf16 %v5366_v7, %v5363_v60  ;;  %v9752_v7 = vld [vmem:[%s14101_s4 + $0xa0] sm:$0xff]  }
0x2023   : > { %9584 = vrot.lane.b32.xlu0 %v9583_v40, %s14433_s22  ;;  %9288 = vmatprep.subr.bf16.mxu0 %v9752_v7 }
0x2024   : > { %9589 = vrot.lane.b32.xlu1 %v9588_v26, %s14433_s22  ;;  %v9753_v26 = vld [vmem:[%s14101_s4 + $0xa8] sm:$0xff]   ;;  %9289 = vmatpush3.bf16.msra.mxu0 %v9752_v7 }
0x2025   : > { %9290 = vmatprep.subr.bf16.mxu0 %v9753_v26 }
0x2026   : > { %v9166_v58 = vpop.f32.mrb[104].mxu1 }
0x2027   : > { %v5379_v18 = vpop.f32.mrb[105].mxu1 }
0x2028   : > { %v9167_v2 = vpop.f32.mrb[106].mxu1  ;;  %9291 = vmatpush3.bf16.msra.mxu0 %v9753_v26 }
0x2029   : > { %v9593_v20 = vpack.i.bf16 %v9167_v2, %v9166_v58  ;;  %v5382_v36 = vpop.f32.mrb[107].mxu1  ;;  %v9754_v58 = vld [vmem:[%s14101_s4 + $0xb0] sm:$0xff]  }
0x202a   : > { %v9598_v38 = vpack.i.bf16 %v5382_v36, %v5379_v18  ;;  %9292 = vmatprep.subr.bf16.mxu0 %v9754_v58 }
0x202b   : > { %9594 = vrot.lane.b32.xlu1 %v9593_v20, %s14433_s22 }
0x202c   : > { %9599 = vrot.lane.b32.xlu0 %v9598_v38, %s14433_s22  ;;  %9293 = vmatpush3.bf16.msra.mxu0 %v9754_v58 }
0x2031   : > { %v9182_v30 = vpop.f32.mrb[108].mxu1 }
0x2032   : > { %v5635_v21 = vpop.f32.mrb[109].mxu1 }
0x2033   : > { %v9183_v27 = vpop.f32.mrb[110].mxu1 }
0x2034   : > { %v9603_v22 = vpack.i.bf16 %v9183_v27, %v9182_v30  ;;  %v5638_v16 = vpop.f32.mrb[111].mxu1 }
0x2035   : > { %v9608_v52 = vpack.i.bf16 %v5638_v16, %v5635_v21 }
0x2036   : > { %9604 = vrot.lane.b32.xlu1 %v9603_v22, %s14434_s17 }
0x2037   : > { %9609 = vrot.lane.b32.xlu0 %v9608_v52, %s14434_s17  ;;  %v9755_v52 = vld [vmem:[%s14101_s4 + $0xb8] sm:$0xff]  }
0x2038   : > { %9294 = vmatprep.subr.bf16.mxu0 %v9755_v52 }
0x2039   : > { %v9186_v17 = vpop.f32.mrb[112].mxu1  ;;  %9295 = vmatpush3.bf16.msra.mxu0 %v9755_v52 }
0x203a   : > { %v5651_v53 = vpop.f32.mrb[113].mxu1 }
0x203b   : > { %v9187_v62 = vpop.f32.mrb[114].mxu1 }
0x203c   : > { %v9613_v37 = vpack.i.bf16 %v9187_v62, %v9186_v17  ;;  %v5654_v55 = vpop.f32.mrb[115].mxu1 }
0x203d   : > { %v9618_v47 = vpack.i.bf16 %v5654_v55, %v5651_v53 }
0x203e   : > { %9614 = vrot.lane.b32.xlu1 %v9613_v37, %s14434_s17 }
0x203f   : > { %9619 = vrot.lane.b32.xlu0 %v9618_v47, %s14434_s17 }
0x2049   : > { %v9202_v4 = vpop.f32.mrb[116].mxu1 }
0x204a   : > { %v5907_v13 = vpop.f32.mrb[117].mxu1 }
0x204b   : > { %v9203_v48 = vpop.f32.mrb[118].mxu1 }
0x204c   : > { %v9623_v28 = vpack.i.bf16 %v9203_v48, %v9202_v4  ;;  %v5910_v31 = vpop.f32.mrb[119].mxu1 }
0x204d   : > { %v9628_v42 = vpack.i.bf16 %v5910_v31, %v5907_v13 }
0x204e   : > { %9624 = vrot.lane.b32.xlu1 %v9623_v28, %s14435_s30 }
0x204f   : > { %9629 = vrot.lane.b32.xlu0 %v9628_v42, %s14435_s30 }
0x2055   : > { %v9206_v24 = vpop.f32.mrb[120].mxu1 }
0x2056   : > { %v5923_v41 = vpop.f32.mrb[121].mxu1 }
0x2057   : > { %v9207_v10 = vpop.f32.mrb[122].mxu1 }
0x2058   : > { %v9633_v8 = vpack.i.bf16 %v9207_v10, %v9206_v24  ;;  %v5926_v49 = vpop.f32.mrb[123].mxu1 }
0x2059   : > { %v9638_v59 = vpack.i.bf16 %v5926_v49, %v5923_v41 }
0x205a   : > { %9634 = vrot.lane.b32.xlu1 %v9633_v8, %s14435_s30 }
0x205b   : > { %9639 = vrot.lane.b32.xlu0 %v9638_v59, %s14435_s30 }
0x205d   : > { %v9222_v5 = vpop.f32.mrb[124].mxu1 }
0x205e   : > { %v6179_v29 = vpop.f32.mrb[125].mxu1 }
0x205f   : > { %v9223_v6 = vpop.f32.mrb[126].mxu1 }
0x2060   : > { %v9643_v23 = vpack.i.bf16 %v9223_v6, %v9222_v5  ;;  %v6182_v34 = vpop.f32.mrb[127].mxu1 }
0x2061   : > { %v9648_v57 = vpack.i.bf16 %v6182_v34, %v6179_v29 }
0x2062   : > { %9644 = vrot.lane.b32.xlu1 %v9643_v23, %s14436_s19 }
0x2063   : > { %9649 = vrot.lane.b32.xlu0 %v9648_v57, %s14436_s19 }
0x206f   : > { %v13701_v32 = vpop.f32.mrb[128].mxu1 }
0x2070   : > { %v13703_v45 = vpop.f32.mrb[129].mxu1 }
0x2071   : > { %v13705_v12 = vpop.f32.mrb[130].mxu1 }
0x2072   : > { %v9688_v33 = vpack.i.bf16 %v13705_v12, %v13701_v32  ;;  %v13709_v63 = vpop.f32.mrb[131].mxu1 }
0x2073   : > { %v9683_v56 = vpack.i.bf16 %v13709_v63, %v13703_v45 }
0x2077   : > { %v9242_v9 = vpop.f32.mrb[132].mxu1 }
0x2078   : > { %v6451_v3 = vpop.f32.mrb[133].mxu1 }
0x2079   : > { %v9243_v14 = vpop.f32.mrb[134].mxu1 }
0x207a   : > { %v9653_v50 = vpack.i.bf16 %v9243_v14, %v9242_v9  ;;  %v6454_v15 = vpop.f32.mrb[135].mxu1 }
0x207b   : > { %v9658_v11 = vpack.i.bf16 %v6454_v15, %v6451_v3 }
0x207c   : > { %9654 = vrot.lane.b32.xlu1 %v9653_v50, %s14437_s18 }
0x207d   : > { %9659 = vrot.lane.b32.xlu0 %v9658_v11, %s14437_s18 }
0x2083   : > { %v9246_v46 = vpop.f32.mrb[136].mxu1 }
0x2084   : > { %v6467_v19 = vpop.f32.mrb[137].mxu1 }
0x2085   : > { %v9247_v25 = vpop.f32.mrb[138].mxu1 }
0x2086   : > { %v9698_v60 = vpack.i.bf16 %v9247_v25, %v9246_v46  ;;  %v6470_v1 = vpop.f32.mrb[139].mxu1 }
0x2087   : > { %v9693_v40 = vpack.i.bf16 %v6470_v1, %v6467_v19 }
0x208f   : > { %v9262_v18 = vpop.f32.mrb[140].mxu1 }
0x2090   : > { %v6723_v2 = vpop.f32.mrb[141].mxu1 }
0x2091   : > { %v9263_v20 = vpop.f32.mrb[142].mxu1 }
0x2092   : > { %v9663_v36 = vpack.i.bf16 %v9263_v20, %v9262_v18  ;;  %v6726_v38 = vpop.f32.mrb[143].mxu1 }
0x2093   : > { %v9668_v30 = vpack.i.bf16 %v6726_v38, %v6723_v2 }
0x2094   : > { %9664 = vrot.lane.b32.xlu1 %v9663_v36, %s10503_s29 }
0x2095   : > { %9669 = vrot.lane.b32.xlu0 %v9668_v30, %s10503_s29  ;;  %v13731_v17 = vpop.permute.xlu0 %9584 }
0x2096   : > { %v13726_v22 = vpop.permute.xlu1 %9589  ;;  %v9586_v1 = vunpack.i.l.bf16 %v13731_v17 }
0x2097   : > { %v9266_v21 = vpop.f32.mrb[144].mxu1  ;;  %v9592_v7 = vunpack.i.h.bf16 %v13726_v22  ;;  %v9591_v26 = vunpack.i.l.bf16 %v13726_v22 }
0x2098   : > { %v6739_v27 = vpop.f32.mrb[145].mxu1  ;;  %v7252_v30 = vsel %vm1097_vm10, %v13645_v43, %v9586_v1 }
0x2099   : > { %v9267_v16 = vpop.f32.mrb[146].mxu1 }
0x209a   : > { %v9708_v53 = vpack.i.bf16 %v9267_v16, %v9266_v21  ;;  %v6742_v62 = vpop.f32.mrb[147].mxu1  ;;  %v7250_v16 = vsel %vm1097_vm10, %v13648_v51, %v9591_v26 }
0x209b   : > { %v9703_v37 = vpack.i.bf16 %v6742_v62, %v6739_v27  ;;  %v7251_v27 = vsel %vm1097_vm10, %v13653_v35, %v9592_v7 }
0x209d   : > { %v9595_v55 = vpop.permute.xlu1 %9594 }
0x209e   : > { %v9597_v47 = vunpack.i.h.bf16 %v9595_v55  ;;  %v9596_v4 = vunpack.i.l.bf16 %v9595_v55  ;;  %v9600_v13 = vpop.permute.xlu0 %9599 }
0x209f   : > { %v9602_v48 = vunpack.i.h.bf16 %v9600_v13  ;;  %v9601_v28 = vunpack.i.l.bf16 %v9600_v13  ;;  %v9282_v31 = vpop.f32.mrb[148].mxu1 }
0x20a0   : > { %v7257_v42 = vsel %vm1097_vm10, %v13673_v54, %v9597_v47  ;;  %v7256_v24 = vsel %vm1097_vm10, %v13668_v44, %v9596_v4  ;;  %v6995_v41 = vpop.f32.mrb[149].mxu1 }
0x20a1   : > { %v7255_v10 = vsel %vm1097_vm10, %v13677_v61, %v9602_v48  ;;  %v7254_v8 = vsel %vm1097_vm10, %v13670_v0, %v9601_v28  ;;  %v9283_v49 = vpop.f32.mrb[150].mxu1 }
0x20a2   : > { %v9673_v59 = vpack.i.bf16 %v9283_v49, %v9282_v31  ;;  %v6998_v5 = vpop.f32.mrb[151].mxu1 }
0x20a3   : > { %v9678_v29 = vpack.i.bf16 %v6998_v5, %v6995_v41 }
0x20a4   : > { %9674 = vrot.lane.b32.xlu1 %v9673_v59, %s14438_s15 }
0x20a5   : > { %9679 = vrot.lane.b32.xlu0 %v9678_v29, %s14438_s15 }
0x20a8   : > { %9689 = vrot.lane.b32.xlu1 %v9688_v33, %s14436_s19  ;;  %v9605_v44 = vpop.permute.xlu1 %9604 }
0x20a9   : > { %9684 = vrot.lane.b32.xlu0 %v9683_v56, %s14436_s19  ;;  %v9610_v54 = vpop.permute.xlu0 %9609  ;;  %v9607_v58 = vunpack.i.h.bf16 %v9605_v44  ;;  %v9606_v18 = vunpack.i.l.bf16 %v9605_v44 }
0x20aa   : > { %v9612_v2 = vunpack.i.h.bf16 %v9610_v54  ;;  %v9611_v20 = vunpack.i.l.bf16 %v9610_v54 }
0x20ac   : > { %9699 = vrot.lane.b32.xlu1 %v9698_v60, %s14437_s18  ;;  %v9587_v60 = vunpack.i.h.bf16 %v13731_v17  ;;  %v7260_v17 = vsel %vm1173_vm14, %v7252_v30, %v9606_v18  ;;  %v7258_v55 = vsel %vm1173_vm14, %v7250_v16, %v9611_v20 }
0x20ad   : > { %9694 = vrot.lane.b32.xlu0 %v9693_v40, %s14437_s18 }
0x20ae   : > { %v7253_v38 = vsel %vm1097_vm10, %v13650_v39, %v9587_v60  ;;  %v7259_v39 = vsel %vm1173_vm14, %v7251_v27, %v9612_v2 }
0x20b0   : > { %v9615_v61 = vpop.permute.xlu1 %9614  ;;  %9709 = vrot.lane.b32.xlu1 %v9708_v53, %s10503_s29  ;;  %v7261_v53 = vsel %vm1173_vm14, %v7253_v38, %v9607_v58 }
0x20b1   : > { %v9617_v0 = vunpack.i.h.bf16 %v9615_v61  ;;  %v9616_v6 = vunpack.i.l.bf16 %v9615_v61  ;;  %9704 = vrot.lane.b32.xlu0 %v9703_v37, %s10503_s29  ;;  %v9620_v23 = vpop.permute.xlu0 %9619 }
0x20b2   : > { %v9622_v34 = vunpack.i.h.bf16 %v9620_v23  ;;  %v9621_v57 = vunpack.i.l.bf16 %v9620_v23 }
0x20b3   : > { %v13750_v32 = vsel %vm1173_vm14, %v7257_v42, %v9617_v0  ;;  %v13753_v45 = vsel %vm1173_vm14, %v7256_v24, %v9616_v6 }
0x20b4   : > { %v13756_v12 = vsel %vm1173_vm14, %v7254_v8, %v9621_v57  ;;  %v13759_v33 = vsel %vm1173_vm14, %v7255_v10, %v9622_v34 }
0x20c0   : > { %v9625_v15 = vpop.permute.xlu1 %9624 }
0x20c1   : > { %v9630_v11 = vpop.permute.xlu0 %9629  ;;  %v9627_v52 = vunpack.i.h.bf16 %v9625_v15  ;;  %v9626_v22 = vunpack.i.l.bf16 %v9625_v15 }
0x20c2   : > { %v9632_v62 = vunpack.i.h.bf16 %v9630_v11  ;;  %v9631_v37 = vunpack.i.l.bf16 %v9630_v11 }
0x20c3   : > { %v7268_v31 = vsel %vm4322_vm0, %v7260_v17, %v9626_v22  ;;  %v7269_v42 = vsel %vm4322_vm0, %v7261_v53, %v9627_v52 }
0x20c4   : > { %v7266_v10 = vsel %vm4322_vm0, %v7258_v55, %v9631_v37  ;;  %v7267_v8 = vsel %vm4322_vm0, %v7259_v39, %v9632_v62 }
0x20cc   : > { %v9286_v63 = vpop.f32.mrb[152].mxu1  ;;  %v13763_v46 = vpop.permute.xlu1 %9634 }
0x20cd   : > { %v7011_v56 = vpop.f32.mrb[153].mxu1  ;;  %v13765_v19 = vpop.permute.xlu0 %9639  ;;  %v9637_v30 = vunpack.i.h.bf16 %v13763_v46 }
0x20ce   : > { %v9287_v9 = vpop.f32.mrb[154].mxu1  ;;  %v9642_v27 = vunpack.i.h.bf16 %v13765_v19  ;;  %v9641_v16 = vunpack.i.l.bf16 %v13765_v19 }
0x20cf   : > { %v9718_v3 = vpack.i.bf16 %v9287_v9, %v9286_v63  ;;  %v7014_v14 = vpop.f32.mrb[155].mxu1 }
0x20d0   : > { %v9713_v50 = vpack.i.bf16 %v7014_v14, %v7011_v56  ;;  %v7271_v19 = vsel %vm4322_vm0, %v13759_v33, %v9642_v27  ;;  %v14444_v27 = vld [vmem:[#allocation30_spill] sm:$0xff] }
0x20d1   : > { %9719 = vrot.lane.b32.xlu1 %v9718_v3, %s14438_s15 }
0x20d2   : > { %9714 = vrot.lane.b32.xlu0 %v9713_v50, %s14438_s15 }
0x20d4   : > { %v9645_v25 = vpop.permute.xlu1 %9644 }
0x20d5   : > { %v9650_v40 = vpop.permute.xlu0 %9649  ;;  %v9647_v43 = vunpack.i.h.bf16 %v9645_v25  ;;  %v9646_v47 = vunpack.i.l.bf16 %v9645_v25 }
0x20d6   : > { %v9652_v13 = vunpack.i.h.bf16 %v9650_v40  ;;  %v9651_v35 = vunpack.i.l.bf16 %v9650_v40 }
0x20d7   : > { %v7276_v5 = vsel %vm4331_vm1, %v7268_v31, %v9646_v47  ;;  %v7277_v29 = vsel %vm4331_vm1, %v7269_v42, %v9647_v43  ;;  %v7273_v43 = vsel %vm4322_vm0, %v13750_v32, %v9637_v30 }
0x20d8   : > { %v7274_v61 = vsel %vm4331_vm1, %v7266_v10, %v9651_v35  ;;  %v7275_v0 = vsel %vm4331_vm1, %v7267_v8, %v9652_v13  ;;  %v7270_v13 = vsel %vm4322_vm0, %v13756_v12, %v9641_v16 }
0x20ee   : > { %v9655_v36 = vpop.permute.xlu1 %9654 }
0x20ef   : > { %v9660_v21 = vpop.permute.xlu0 %9659  ;;  %v9657_v48 = vunpack.i.h.bf16 %v9655_v36  ;;  %v9656_v28 = vunpack.i.l.bf16 %v9655_v36 }
0x20f0   : > { %v9662_v24 = vunpack.i.h.bf16 %v9660_v21  ;;  %v9661_v41 = vunpack.i.l.bf16 %v9660_v21  ;;  %v9636_v21 = vunpack.i.l.bf16 %v13763_v46 }
0x20f1   : > { %v7284_v6 = vsel %vm4340_vm2, %v7276_v5, %v9656_v28  ;;  %v7285_v23 = vsel %vm4340_vm2, %v7277_v29, %v9657_v48 }
0x20f2   : > { %v7282_v57 = vsel %vm4340_vm2, %v7274_v61, %v9661_v41  ;;  %v7283_v63 = vsel %vm4340_vm2, %v7275_v0, %v9662_v24  ;;  %v7272_v47 = vsel %vm4322_vm0, %v13753_v45, %v9636_v21 }
0x2106   : > { %v9665_v4 = vpop.permute.xlu1 %9664 }
0x2107   : > { %v9670_v51 = vpop.permute.xlu0 %9669  ;;  %v9667_v49 = vunpack.i.h.bf16 %v9665_v4  ;;  %v9666_v59 = vunpack.i.l.bf16 %v9665_v4 }
0x2108   : > { %v9672_v44 = vunpack.i.h.bf16 %v9670_v51  ;;  %v9671_v54 = vunpack.i.l.bf16 %v9670_v51 }
0x2109   : > { %v7292_v14 = vsel %vm4349_vm3, %v7284_v6, %v9666_v59  ;;  %v7293_v50 = vsel %vm4349_vm3, %v7285_v23, %v9667_v49 }
0x210a   : > { %v7290_v25 = vsel %vm4349_vm3, %v7282_v57, %v9671_v54  ;;  %v7291_v60 = vsel %vm4349_vm3, %v7283_v63, %v9672_v44 }
0x2116   : > { %v9675_v34 = vpop.permute.xlu1 %9674 }
0x2117   : > { %v9677_v56 = vunpack.i.h.bf16 %v9675_v34  ;;  %v9676_v9 = vunpack.i.l.bf16 %v9675_v34  ;;  %v9680_v3 = vpop.permute.xlu0 %9679 }
0x2118   : > { %v9682_v15 = vunpack.i.h.bf16 %v9680_v3  ;;  %v9681_v11 = vunpack.i.l.bf16 %v9680_v3  ;;  %v14439_v3 = vld [vmem:[#allocation33_spill] sm:$0xff] }
0x2119   : > { %v7300_v1 = vsel %vm4358_vm4, %v7292_v14, %v9676_v9  ;;  %v7301_v40 = vsel %vm4358_vm4, %v7293_v50, %v9677_v56  ;;  %v13835_v9 = vld [vmem:[#allocation4 + $0x10] sm:$0x3f]  ;;  %v14440_v14 = vsub.s32 2, %v14439_v3 }
0x211a   : > { %v7307_v7 = vpack.c.bf16 %v7301_v40, %v7300_v1  ;;  %v7298_v26 = vsel %vm4358_vm4, %v7290_v25, %v9681_v11  ;;  %v7299_v58 = vsel %vm4358_vm4, %v7291_v60, %v9682_v15  ;;  %v9690_v2 = vpop.permute.xlu1 %9689 }
0x211b   : > { %v7306_v18 = vpack.c.bf16 %v7299_v58, %v7298_v26  ;;  %v9685_v20 = vpop.permute.xlu0 %9684  ;;  %v9692_v52 = vunpack.i.h.bf16 %v9690_v2  ;;  %v9691_v22 = vunpack.i.l.bf16 %v9690_v2  ;;  %v7313_v50 = vrot.slane %v13835_v9, %v14440_v14  ;;  %v9758_v14 = vld [vmem:[%s14103_s6 + $0x4] ss:$8 sps:$4 sm:$0xff]  }
0x211c   : > { %v9687_v53 = vunpack.i.h.bf16 %v9685_v20  ;;  %v9686_v62 = vunpack.i.l.bf16 %v9685_v20  ;;  %7623 = vmatprep.subr.bf16.mxu1 %v9758_v14 }
0x211d   : > { %9296 = vmatprep.mubr.msk.bf16.mxu0 %vm1321_vm15, %v7306_v18  ;;  %v7281_v28 = vsel %vm4331_vm1, %v7273_v43, %v9692_v52  ;;  %v7280_v51 = vsel %vm4331_vm1, %v7272_v47, %v9691_v22  ;;  %v14442_v18 = vld [vmem:[#allocation16_spill] sm:$0xff]  ;;  %v14445_v43 = vld [vmem:[#allocation29_spill] sm:$0xff] }
0x211e   : > { %9297 = vmatmul.mubr.msk.bf16.vlgmr.msra.gmra.mrb[156].mxu0 %vm1321_vm15, %v7307_v7  ;;  %v9700_v36 = vpop.permute.xlu1 %9699  ;;  %v7278_v32 = vsel %vm4331_vm1, %v7270_v13, %v9686_v62  ;;  %v7279_v45 = vsel %vm4331_vm1, %v7271_v19, %v9687_v53  ;;  %v14441_v7 = vld [vmem:[#allocation27_spill] sm:$0xff]  ;;  %v14446_v13 = vld [vmem:[#allocation28_spill] sm:$0xff] }
0x211f   : > { %v9695_v38 = vpop.permute.xlu0 %9694  ;;  %v9702_v37 = vunpack.i.h.bf16 %v9700_v36  ;;  %v9701_v39 = vunpack.i.l.bf16 %v9700_v36  ;;  %v14443_v36 = vld [vmem:[#allocation32_spill] sm:$0xff] }
0x2120   : > { %v9697_v4 = vunpack.i.h.bf16 %v9695_v38  ;;  %v9696_v46 = vunpack.i.l.bf16 %v9695_v38 }
0x2121   : > { %v7288_v24 = vsel %vm4340_vm2, %v7280_v51, %v9701_v39  ;;  %v7289_v41 = vsel %vm4340_vm2, %v7281_v28, %v9702_v37  ;;  %v14448_v51 = vld [vmem:[#allocation35_spill] sm:$0xff] }
0x2122   : > { %v9710_v17 = vpop.permute.xlu1 %9709  ;;  %v7286_v10 = vsel %vm4340_vm2, %v7278_v32, %v9696_v46  ;;  %v7287_v33 = vsel %vm4340_vm2, %v7279_v45, %v9697_v4 }
0x2123   : > { %v9705_v55 = vpop.permute.xlu0 %9704  ;;  %v9712_v35 = vunpack.i.h.bf16 %v9710_v17  ;;  %v9711_v48 = vunpack.i.l.bf16 %v9710_v17 }
0x2124   : > { %v9707_v31 = vunpack.i.h.bf16 %v9705_v55  ;;  %v9706_v42 = vunpack.i.l.bf16 %v9705_v55 }
0x2125   : > { %v7296_v5 = vsel %vm4349_vm3, %v7288_v24, %v9711_v48  ;;  %v7297_v29 = vsel %vm4349_vm3, %v7289_v41, %v9712_v35  ;;  %v14447_v35 = vld [vmem:[#allocation37_spill] sm:$0xff] }
0x2126   : > { %v7294_v61 = vsel %vm4349_vm3, %v7286_v10, %v9706_v42  ;;  %v7295_v0 = vsel %vm4349_vm3, %v7287_v33, %v9707_v31 }
0x2143   : > { %v9720_v12 = vpop.permute.xlu1 %9719 }
0x2144   : > { %v9722_v8 = vunpack.i.h.bf16 %v9720_v12  ;;  %v9721_v49 = vunpack.i.l.bf16 %v9720_v12  ;;  %v9715_v59 = vpop.permute.xlu0 %9714 }
0x2145   : > { %v9717_v44 = vunpack.i.h.bf16 %v9715_v59  ;;  %v9716_v54 = vunpack.i.l.bf16 %v9715_v59 }
0x2146   : > { %v7305_v6 = vsel %vm4358_vm4, %v7297_v29, %v9722_v8  ;;  %v7304_v23 = vsel %vm4358_vm4, %v7296_v5, %v9721_v49 }
0x2147   : > { %v7309_v34 = vpack.c.bf16 %v7305_v6, %v7304_v23  ;;  %v7302_v57 = vsel %vm4358_vm4, %v7294_v61, %v9716_v54  ;;  %v7303_v63 = vsel %vm4358_vm4, %v7295_v0, %v9717_v44 }
0x2148   : > { %v7308_v56 = vpack.c.bf16 %v7303_v63, %v7302_v57 }
0x214a   : > { %9300 = vmatprep.mubr.msk.bf16.mxu0 %vm1321_vm15, %v7308_v56 }
0x214b   : > { %9301 = vmatmul.mubr.msk.bf16.gmra.mrb[160].mxu0 %vm1321_vm15, %v7309_v34 }
0x21f1   : > { %v9298_v15 = vpop.f32.mrb[156].mxu0 }
0x21f2   : > { %v7384_v11 = vpop.f32.mrb[157].mxu0  ;;  %v7393_v25 = vadd.f32 %v9298_v15, %v7313_v50  ;;  %v9761_v15 = vld [vmem:[%s14103_s6 + $0x14] ss:$8 sps:$4 sm:$0xff]  }
0x21f3   : > { %v7385_v60 = vadd.f32 %v7384_v11, %v7313_v50  ;;  %v9299_v1 = vpop.f32.mrb[158].mxu0  ;;  %v9759_v11 = vld [vmem:[%s14103_s6 + $0x10] ss:$8 sps:$4 sm:$0xff]  }
0x21f4   : > { %v7387_v40 = vpop.f32.mrb[159].mxu0  ;;  %v13844_v2 = vadd.f32 %v7393_v25, %v14442_v18  ;;  %v7396_v20 = vadd.f32 %v9299_v1, %v7313_v50  ;;  %v9764_v25 = vld [vmem:[%s14103_s6 + $0x24] ss:$8 sps:$4 sm:$0xff]   ;;  %v9767_v1 = vld [vmem:[%s14103_s6 + $0x34] ss:$8 sps:$4 sm:$0xff]   ;;  %v10507_v18 = vmov 0  }
0x21f5   : > { %v13841_v26 = vadd.f32 %v7385_v60, %v14441_v7  ;;  %v7388_v58 = vadd.f32 %v7387_v40, %v7313_v50  ;;  %v9762_v60 = vld [vmem:[%s14103_s6 + $0x20] ss:$8 sps:$4 sm:$0xff]   ;;  %v9765_v40 = vld [vmem:[%s14103_s6 + $0x30] ss:$8 sps:$4 sm:$0xff]   ;;  %7655 = vmatprep.mubr.bf16.mxu1 %v10507_v18 }
0x21f6   : > { %v13854_v16 = vadd.f32 %v7396_v20, %v14444_v27  ;;  %v7429_v52 = vsel %vm1321_vm15, %v13844_v2, 0.0 }
0x21f7   : > { %v13847_v38 = vadd.f32 %v7388_v58, %v14443_v36  ;;  %v7423_v30 = vsel %vm1321_vm15, %v13841_v26, 0.0 }
0x21f8   : > { %7424 = vadd.xlane.f32.xlu0 %v7423_v30  ;;  %v7432_v22 = vsel %vm1321_vm15, %v13854_v16, 0.0 }
0x21f9   : > { %v7426_v21 = vsel %vm1321_vm15, %v13847_v38, 0.0 }
0x21fa   : > { %7427 = vadd.xlane.f32.xlu1 %v7426_v21 }
0x21fc   : > { %7430 = vadd.xlane.f32.xlu0 %v7429_v52 }
0x2200   : > { %7433 = vadd.xlane.f32.xlu0 %v7432_v22 }
0x221e   : > { %v9302_v17 = vpop.f32.mrb[160].mxu0 }
0x221f   : > { %v7400_v53 = vpop.f32.mrb[161].mxu0  ;;  %v7409_v62 = vadd.f32 %v9302_v17, %v7313_v50 }
0x2220   : > { %v7401_v37 = vadd.f32 %v7400_v53, %v7313_v50  ;;  %v9303_v39 = vpop.f32.mrb[162].mxu0 }
0x2221   : > { %v7403_v55 = vpop.f32.mrb[163].mxu0  ;;  %v7412_v4 = vadd.f32 %v9303_v39, %v7313_v50  ;;  %v13864_v19 = vadd.f32 %v7409_v62, %v14446_v13 }
0x2222   : > { %v13861_v47 = vadd.f32 %v7401_v37, %v14445_v43  ;;  %v7404_v46 = vadd.f32 %v7403_v55, %v7313_v50  ;;  %v9756_v50 = vld [vmem:[%s14103_s6] ss:$8 sps:$4 sm:$0xff]  }
0x2223   : > { %v13872_v31 = vadd.f32 %v7412_v4, %v14448_v51  ;;  %v7441_v32 = vsel %vm1321_vm15, %v13864_v19, 0.0  ;;  %7624 = vmatpush1.bf16.msra.mxu1 %v9756_v50  ;;  %v9769_v51 = vld [vmem:[%s14104_s7] sm:$0xff]   ;;  %v7529_v50 = vsub.s32 7, %v14439_v3 }
0x2224   : > { %v13867_v48 = vadd.f32 %v7404_v46, %v14447_v35  ;;  %v7435_v28 = vsel %vm1321_vm15, %v13861_v47, 0.0  ;;  %7625 = vmatprep.subr.bf16.mxu1 %v9761_v15 }
0x2225   : > { %7436 = vadd.xlane.f32.xlu1 %v7435_v28  ;;  %v7444_v45 = vsel %vm1321_vm15, %v13872_v31, 0.0  ;;  %v9768_v28 = vld [vmem:[%s14104_s7 + $0x40] sm:$0xff]  }
0x2226   : > { %v7438_v42 = vsel %vm1321_vm15, %v13867_v48, 0.0  ;;  %8710 = vmatprep.subr.bf16.mxu0 %v9768_v28 }
0x2227   : > { %7439 = vadd.xlane.f32.xlu0 %v7438_v42  ;;  %7626 = vmatpush1.bf16.msra.mxu1 %v9759_v11  ;;  %v9770_v42 = vld [vmem:[%s14104_s7 + $0x48] sm:$0xff]   ;;  %v10374_v11 = vld [vmem:[#allocation4] sm:$0xff] }
0x2228   : > { %7627 = vmatprep.subr.bf16.mxu1 %v9764_v25  ;;  %8711 = vmatpush3.bf16.msra.mxu0 %v9769_v51  ;;  %v7530_v25 = vrot.slane %v10374_v11, %v7529_v50 }
0x2229   : > { %7442 = vadd.xlane.f32.xlu1 %v7441_v32  ;;  %v9771_v32 = vld [vmem:[%s14104_s7 + $0x8] sm:$0xff]   ;;  %8712 = vmatprep.subr.bf16.mxu0 %v9770_v42 }
0x222b   : > { %7445 = vadd.xlane.f32.xlu0 %v7444_v45  ;;  %7628 = vmatpush1.bf16.msra.mxu1 %v9762_v60  ;;  %v9772_v45 = vld [vmem:[%s14104_s7 + $0x50] sm:$0xff]  }
0x222c   : > { %7629 = vmatprep.subr.bf16.mxu1 %v9767_v1  ;;  %8713 = vmatpush3.bf16.msra.mxu0 %v9771_v32 }
0x222d   : > { %8714 = vmatprep.subr.bf16.mxu0 %v9772_v45 }
0x222f   : > { %7630 = vmatpush1.bf16.msra.mxu1 %v9765_v40 }
0x2285   : > { %v7425_v24 = vpop.xlane.xlu0 %7424 }
0x2286   : > { %v7447_v41 = vmul.f32 0.015625, %v7425_v24  ;;  %v9773_v24 = vld [vmem:[%s14104_s7 + $0x10] sm:$0xff]  }
0x2287   : > { %v7428_v12 = vpop.xlane.xlu1 %7427  ;;  %8715 = vmatpush3.bf16.msra.mxu0 %v9773_v24 }
0x2288   : > { %v13881_v10 = vsub.f32 %v13841_v26, %v7447_v41  ;;  %v7448_v33 = vmul.f32 0.015625, %v7428_v12  ;;  %v9774_v41 = vld [vmem:[%s14104_s7 + $0x58] sm:$0xff]  }
0x2289   : > { %v7431_v8 = vpop.xlane.xlu0 %7430  ;;  %v9775_v12 = vld [vmem:[%s14104_s7 + $0x18] sm:$0xff]   ;;  %8716 = vmatprep.subr.bf16.mxu0 %v9774_v41 }
0x228a   : > { %v13884_v49 = vsub.f32 %v13847_v38, %v7448_v33  ;;  %v7449_v59 = vmul.f32 0.015625, %v7431_v8  ;;  %v7463_v5 = vmul.f32 %v13881_v10, %v13881_v10  ;;  %v9776_v33 = vld [vmem:[%s14104_s7 + $0x60] sm:$0xff]  }
0x228b   : > { %8717 = vmatpush3.bf16.msra.mxu0 %v9775_v12  ;;  %v9777_v8 = vld [vmem:[%s14104_s7 + $0x20] sm:$0xff]  }
0x228c   : > { %v13889_v29 = vsub.f32 %v13844_v2, %v7449_v59  ;;  %v7471_v44 = vsel %vm1321_vm15, %v7463_v5, 0.0  ;;  %v7464_v54 = vmul.f32 %v13884_v49, %v13884_v49  ;;  %8718 = vmatprep.subr.bf16.mxu0 %v9776_v33  ;;  %v9778_v59 = vld [vmem:[%s14104_s7 + $0x68] sm:$0xff]  }
0x228d   : > { %7472 = vadd.xlane.f32.xlu1 %v7471_v44  ;;  %v7434_v61 = vpop.xlane.xlu0 %7433 }
0x228e   : > { %v7450_v0 = vmul.f32 0.015625, %v7434_v61  ;;  %v7474_v6 = vsel %vm1321_vm15, %v7464_v54, 0.0  ;;  %v7465_v23 = vmul.f32 %v13889_v29, %v13889_v29 }
0x228f   : > { %7475 = vadd.xlane.f32.xlu0 %v7474_v6  ;;  %8719 = vmatpush3.bf16.msra.mxu0 %v9777_v8 }
0x2290   : > { %v13898_v34 = vsub.f32 %v13854_v16, %v7450_v0  ;;  %v7477_v57 = vsel %vm1321_vm15, %v7465_v23, 0.0  ;;  %8720 = vmatprep.subr.bf16.mxu0 %v9778_v59 }
0x2291   : > { %7478 = vadd.xlane.f32.xlu1 %v7477_v57 }
0x2292   : > { %v7466_v63 = vmul.f32 %v13898_v34, %v13898_v34 }
0x2294   : > { %v7480_v56 = vsel %vm1321_vm15, %v7466_v63, 0.0 }
0x2295   : > { %7481 = vadd.xlane.f32.xlu0 %v7480_v56 }
0x22b2   : > { %v7437_v7 = vpop.xlane.xlu1 %7436 }
0x22b3   : > { %v7451_v58 = vmul.f32 0.015625, %v7437_v7  ;;  %v14449_v7 = vsub.s32 0, %v14439_v3 }
0x22b4   : > { %v7440_v20 = vpop.xlane.xlu0 %7439 }
0x22b5   : > { %v13930_v36 = vsub.f32 %v13861_v47, %v7451_v58  ;;  %v7452_v30 = vmul.f32 0.015625, %v7440_v20  ;;  %v7542_v58 = vrot.slane %v13835_v9, %v14449_v7 }
0x22b6   : > { %v7443_v21 = vpop.xlane.xlu1 %7442 }
0x22b7   : > { %v13933_v27 = vsub.f32 %v13867_v48, %v7452_v30  ;;  %v7453_v52 = vmul.f32 0.015625, %v7443_v21  ;;  %v7467_v22 = vmul.f32 %v13930_v36, %v13930_v36 }
0x22b8   : > { %v7446_v17 = vpop.xlane.xlu0 %7445 }
0x22b9   : > { %v13938_v53 = vsub.f32 %v13864_v19, %v7453_v52  ;;  %v7454_v62 = vmul.f32 0.015625, %v7446_v17  ;;  %v7483_v37 = vsel %vm1321_vm15, %v7467_v22, 0.0  ;;  %v7468_v39 = vmul.f32 %v13933_v27, %v13933_v27 }
0x22ba   : > { %7484 = vadd.xlane.f32.xlu1 %v7483_v37 }
0x22bb   : > { %v13944_v55 = vsub.f32 %v13872_v31, %v7454_v62  ;;  %v7486_v43 = vsel %vm1321_vm15, %v7468_v39, 0.0  ;;  %v7469_v4 = vmul.f32 %v13938_v53, %v13938_v53 }
0x22bc   : > { %7487 = vadd.xlane.f32.xlu0 %v7486_v43 }
0x22bd   : > { %v7489_v46 = vsel %vm1321_vm15, %v7469_v4, 0.0  ;;  %v7470_v13 = vmul.f32 %v13944_v55, %v13944_v55 }
0x22be   : > { %7490 = vadd.xlane.f32.xlu1 %v7489_v46 }
0x22bf   : > { %v7492_v35 = vsel %vm1321_vm15, %v7470_v13, 0.0 }
0x22c0   : > { %7493 = vadd.xlane.f32.xlu0 %v7492_v35 }
0x231a   : > { %v7473_v5 = vpop.xlane.xlu1 %7472 }
0x231b   : > { %v7495_v44 = vmul.f32 0.015625, %v7473_v5 }
0x231c   : > { %v7476_v54 = vpop.xlane.xlu0 %7475 }
0x231d   : > { %v7503_v61 = vadd.f32 1e-05, %v7495_v44  ;;  %v7496_v0 = vmul.f32 0.015625, %v7476_v54 }
0x231e   : > { %v7479_v6 = vpop.xlane.xlu1 %7478 }
0x231f   : > { %10348 = vrsqrt.f32 %v7503_v61  ;;  %v7504_v23 = vadd.f32 1e-05, %v7496_v0  ;;  %v7497_v57 = vmul.f32 0.015625, %v7479_v6 }
0x2321   : > { %10350 = vrsqrt.f32 %v7504_v23  ;;  %v7505_v63 = vadd.f32 1e-05, %v7497_v57 }
0x2322   : > { %v7482_v56 = vpop.xlane.xlu0 %7481 }
0x2323   : > { %10352 = vrsqrt.f32 %v7505_v63  ;;  %v7498_v14 = vmul.f32 0.015625, %v7482_v56 }
0x2325   : > { %v7506_v15 = vadd.f32 1e-05, %v7498_v14 }
0x2327   : > { %10354 = vrsqrt.f32 %v7506_v15 }
0x2329   : > { %v10349_v60 = vpop.eup %10348 }
0x232a   : > { %v7519_v1 = vmul.f32 %v10349_v60, %v13881_v10  ;;  %v9783_v60 = vld [vmem:[%s14104_s7 + $0x38] sm:$0xff]  }
0x232b   : > { %v10351_v40 = vpop.eup %10350 }
0x232c   : > { %v7531_v20 = vmul.f32 %v7530_v25, %v7519_v1  ;;  %v7520_v30 = vmul.f32 %v10351_v40, %v13884_v49  ;;  %v397_v1 = vld [vmem:[#allocation4 + $0x18] sm:$0x3f]  ;;  %v14450_v40 = vld [vmem:[#allocation21_spill] sm:$0xff] }
0x232d   : > { %v10353_v21 = vpop.eup %10352  ;;  %v7566_v7 = vrot.slane %v13835_v9, %v14450_v40 }
0x232e   : > { %v7532_v52 = vmul.f32 %v7530_v25, %v7520_v30  ;;  %v7543_v22 = vadd.f32 %v7542_v58, %v7531_v20  ;;  %v7521_v62 = vmul.f32 %v10353_v21, %v13889_v29 }
0x2330   : > { %v7544_v17 = vadd.f32 %v7542_v58, %v7532_v52  ;;  %v7533_v10 = vmul.f32 %v7530_v25, %v7521_v62 }
0x2331   : > { %v10355_v37 = vpop.eup %10354 }
0x2332   : > { %v7522_v39 = vmul.f32 %v10355_v37, %v13898_v34  ;;  %v7551_v43 = vpack.c.bf16 %v7544_v17, %v7543_v22  ;;  %v7545_v13 = vadd.f32 %v7542_v58, %v7533_v10 }
0x2334   : > { %8407 = vmatmul.mubr.msk.bf16.vlgmr.msra.gmra.mrb[156].mxu1 %vm1321_vm15, %v7551_v43  ;;  %v7534_v4 = vmul.f32 %v7530_v25, %v7522_v39 }
0x2335   : > { %7665 = vmatprep.mubr.bf16.mxu1 %v10507_v18 }
0x2336   : > { %v7546_v46 = vadd.f32 %v7542_v58, %v7534_v4 }
0x2338   : > { %v7552_v35 = vpack.c.bf16 %v7546_v46, %v7545_v13 }
0x233c   : > { %8408 = vmatmul.mubr.msk.bf16.gmra.mrb[160].mxu1 %vm1321_vm15, %v7552_v35 }
0x233d   : > { %7675 = vmatprep.mubr.bf16.mxu1 %v10507_v18 }
0x2347   : > { %v7485_v49 = vpop.xlane.xlu1 %7484 }
0x2348   : > { %v7499_v28 = vmul.f32 0.015625, %v7485_v49 }
0x2349   : > { %v7488_v29 = vpop.xlane.xlu0 %7487 }
0x234a   : > { %v7507_v51 = vadd.f32 1e-05, %v7499_v28  ;;  %v7500_v42 = vmul.f32 0.015625, %v7488_v29 }
0x234b   : > { %v7491_v34 = vpop.xlane.xlu1 %7490 }
0x234c   : > { %10356 = vrsqrt.f32 %v7507_v51  ;;  %v7508_v32 = vadd.f32 1e-05, %v7500_v42  ;;  %v7501_v45 = vmul.f32 0.015625, %v7491_v34 }
0x234d   : > { %v7494_v24 = vpop.xlane.xlu0 %7493 }
0x234e   : > { %10358 = vrsqrt.f32 %v7508_v32  ;;  %v7509_v41 = vadd.f32 1e-05, %v7501_v45  ;;  %v7502_v12 = vmul.f32 0.015625, %v7494_v24 }
0x2350   : > { %10360 = vrsqrt.f32 %v7509_v41  ;;  %v7510_v33 = vadd.f32 1e-05, %v7502_v12 }
0x2352   : > { %10362 = vrsqrt.f32 %v7510_v33 }
0x2356   : > { %v10357_v8 = vpop.eup %10356 }
0x2357   : > { %v7523_v59 = vmul.f32 %v10357_v8, %v13930_v36 }
0x2358   : > { %v10359_v5 = vpop.eup %10358 }
0x2359   : > { %v7524_v44 = vmul.f32 %v10359_v5, %v13933_v27  ;;  %v7535_v54 = vmul.f32 %v7530_v25, %v7523_v59 }
0x235a   : > { %v10361_v61 = vpop.eup %10360 }
0x235b   : > { %v7536_v0 = vmul.f32 %v7530_v25, %v7524_v44  ;;  %v7525_v23 = vmul.f32 %v10361_v61, %v13938_v53  ;;  %v7547_v63 = vadd.f32 %v7542_v58, %v7535_v54  ;;  %v9779_v53 = vld [vmem:[%s14104_s7 + $0x28] sm:$0xff]  }
0x235c   : > { %v10363_v6 = vpop.eup %10362  ;;  %8721 = vmatpush3.bf16.msra.mxu0 %v9779_v53 }
0x235d   : > { %v7526_v57 = vmul.f32 %v10363_v6, %v13944_v55  ;;  %v7548_v56 = vadd.f32 %v7542_v58, %v7536_v0  ;;  %v7537_v15 = vmul.f32 %v7530_v25, %v7525_v23  ;;  %v9780_v55 = vld [vmem:[%s14104_s7 + $0x70] sm:$0xff]  }
0x235e   : > { %8722 = vmatprep.subr.bf16.mxu0 %v9780_v55 }
0x235f   : > { %v7553_v14 = vpack.c.bf16 %v7548_v56, %v7547_v63  ;;  %v7538_v50 = vmul.f32 %v7530_v25, %v7526_v57  ;;  %v7549_v11 = vadd.f32 %v7542_v58, %v7537_v15  ;;  %v9781_v25 = vld [vmem:[%s14104_s7 + $0x30] sm:$0xff]  }
0x2360   : > { %8723 = vmatpush3.bf16.msra.mxu0 %v9781_v25 }
0x2361   : > { %8409 = vmatmul.mubr.msk.bf16.gmra.mrb[164].mxu1 %vm1321_vm15, %v7553_v14  ;;  %v7550_v36 = vadd.f32 %v7542_v58, %v7538_v50  ;;  %v7570_v58 = vrot.slane %v397_v1, %v14450_v40 }
0x2362   : > { %7685 = vmatprep.mubr.bf16.mxu1 %v10507_v18  ;;  %v9782_v18 = vld [vmem:[%s14104_s7 + $0x78] sm:$0xff]  }
0x2363   : > { %v7554_v27 = vpack.c.bf16 %v7550_v36, %v7549_v11  ;;  %8724 = vmatprep.subr.bf16.mxu0 %v9782_v18 }
0x2364   : > { %8725 = vmatpush3.bf16.msra.mxu0 %v9783_v60 }
0x2369   : > { %8410 = vmatmul.mubr.msk.bf16.gmra.mrb[168].mxu1 %vm1321_vm15, %v7554_v27 }
0x2407   : > { %v7657_v20 = vpop.f32.mrb[156].mxu1 }
0x2408   : > { %v7658_v30 = vadd.f32 %v7657_v20, %v7566_v7  ;;  %v7659_v21 = vpop.f32.mrb[157].mxu1 }
0x2409   : > { %v7660_v52 = vadd.f32 %v7659_v21, %v7570_v58  ;;  %v7661_v22 = vpop.f32.mrb[158].mxu1 }
0x240a   : > { %v7662_v17 = vadd.f32 %v7661_v22, %v7566_v7  ;;  %v7663_v62 = vpop.f32.mrb[159].mxu1  ;;  %v7696_v39 = vmax.f32 %v7658_v30, 0.0  ;;  %v9784_v22 = vld [vmem:[%s14105_s8] sm:$0xff]  }
0x240b   : > { %v7664_v37 = vadd.f32 %v7663_v62, %v7570_v58  ;;  %v7697_v10 = vmax.f32 %v7660_v52, 0.0  ;;  %9304 = vmatprep.subr.bf16.mxu1 %v9784_v22 }
0x240c   : > { %v7698_v43 = vmax.f32 %v7662_v17, 0.0  ;;  %9305 = vmatpush3.bf16.msra.mxu1 %v9784_v22  ;;  %v9787_v17 = vld [vmem:[%s14105_s8 + $0x18] sm:$0xff]  }
0x240d   : > { %v7699_v4 = vmax.f32 %v7664_v37, 0.0  ;;  %v14451_v37 = vsub.s32 4, %v14439_v3  ;;  %v10377_v22 = vld [vmem:[%s10692_s14 + $0x18] sm:$0xff] }
0x240e   : > { %v7712_v46 = vpack.c.bf16 %v7698_v43, %v7696_v39 }
0x240f   : > { %v7713_v13 = vpack.c.bf16 %v7699_v4, %v7697_v10  ;;  %v7667_v35 = vpop.f32.mrb[160].mxu1  ;;  %v7755_v39 = vrot.slane %v13835_v9, %v14451_v37 }
0x2410   : > { %v7668_v49 = vadd.f32 %v7667_v35, %v7566_v7  ;;  %v7669_v28 = vpop.f32.mrb[161].mxu1 }
0x2411   : > { %v7670_v29 = vadd.f32 %v7669_v28, %v7570_v58  ;;  %v7671_v51 = vpop.f32.mrb[162].mxu1  ;;  %7884 = vmatprep.mubr.bf16.mxu0 %v7713_v13 }
0x2412   : > { %v7672_v42 = vadd.f32 %v7671_v51, %v7566_v7  ;;  %v7673_v34 = vpop.f32.mrb[163].mxu1  ;;  %7885 = vmatmul.mubr.bf16.vlgmr.msra.gmra.mrb[164].mxu0 %v7712_v46  ;;  %v7700_v45 = vmax.f32 %v7668_v49, 0.0 }
0x2413   : > { %v7674_v32 = vadd.f32 %v7673_v34, %v7570_v58  ;;  %v7701_v41 = vmax.f32 %v7670_v29, 0.0 }
0x2414   : > { %v7702_v24 = vmax.f32 %v7672_v42, 0.0 }
0x2415   : > { %v7703_v12 = vmax.f32 %v7674_v32, 0.0 }
0x2416   : > { %v7714_v33 = vpack.c.bf16 %v7702_v24, %v7700_v45 }
0x2417   : > { %v7715_v8 = vpack.c.bf16 %v7703_v12, %v7701_v41 }
0x2419   : > { %7892 = vmatprep.mubr.bf16.mxu0 %v7715_v8 }
0x241a   : > { %7893 = vmatmul.mubr.bf16.gmra.mrb[168].mxu0 %v7714_v33 }
0x2434   : > { %v7677_v59 = vpop.f32.mrb[164].mxu1 }
0x2435   : > { %v7678_v5 = vadd.f32 %v7677_v59, %v7566_v7  ;;  %v7679_v44 = vpop.f32.mrb[165].mxu1 }
0x2436   : > { %v7680_v54 = vadd.f32 %v7679_v44, %v7570_v58  ;;  %v7681_v61 = vpop.f32.mrb[166].mxu1 }
0x2437   : > { %v7682_v0 = vadd.f32 %v7681_v61, %v7566_v7  ;;  %v7683_v6 = vpop.f32.mrb[167].mxu1  ;;  %v7704_v57 = vmax.f32 %v7678_v5, 0.0 }
0x2438   : > { %v7684_v23 = vadd.f32 %v7683_v6, %v7570_v58  ;;  %v7705_v56 = vmax.f32 %v7680_v54, 0.0 }
0x2439   : > { %v7706_v63 = vmax.f32 %v7682_v0, 0.0 }
0x243a   : > { %v7707_v14 = vmax.f32 %v7684_v23, 0.0 }
0x243b   : > { %v7716_v50 = vpack.c.bf16 %v7706_v63, %v7704_v57 }
0x243c   : > { %v7717_v15 = vpack.c.bf16 %v7707_v14, %v7705_v56  ;;  %v7687_v36 = vpop.f32.mrb[168].mxu1 }
0x243d   : > { %v7688_v11 = vadd.f32 %v7687_v36, %v7566_v7  ;;  %v7689_v27 = vpop.f32.mrb[169].mxu1 }
0x243e   : > { %v7690_v53 = vadd.f32 %v7689_v27, %v7570_v58  ;;  %v7691_v55 = vpop.f32.mrb[170].mxu1  ;;  %7900 = vmatprep.mubr.bf16.mxu0 %v7717_v15 }
0x243f   : > { %v7692_v25 = vadd.f32 %v7691_v55, %v7566_v7  ;;  %v7693_v18 = vpop.f32.mrb[171].mxu1  ;;  %7901 = vmatmul.mubr.bf16.gmra.mrb[172].mxu0 %v7716_v50  ;;  %v7708_v1 = vmax.f32 %v7688_v11, 0.0  ;;  %v9785_v7 = vld [vmem:[%s14105_s8 + $0x8] sm:$0xff]  }
0x2440   : > { %v7694_v60 = vadd.f32 %v7693_v18, %v7570_v58  ;;  %v7709_v20 = vmax.f32 %v7690_v53, 0.0  ;;  %9306 = vmatprep.subr.bf16.mxu1 %v9785_v7  ;;  %v9786_v58 = vld [vmem:[%s14105_s8 + $0x10] sm:$0xff]  }
0x2441   : > { %v7710_v40 = vmax.f32 %v7692_v25, 0.0  ;;  %9307 = vmatpush3.bf16.msra.mxu1 %v9785_v7 }
0x2442   : > { %v7711_v30 = vmax.f32 %v7694_v60, 0.0  ;;  %9308 = vmatprep.subr.bf16.mxu1 %v9786_v58 }
0x2443   : > { %v7718_v21 = vpack.c.bf16 %v7710_v40, %v7708_v1 }
0x2444   : > { %v7719_v52 = vpack.c.bf16 %v7711_v30, %v7709_v20  ;;  %v10376_v30 = vld [vmem:[%s10692_s14] sm:$0xff] }
0x2445   : > { %9309 = vmatpush3.bf16.msra.mxu1 %v9786_v58  ;;  %v10378_v58 = vld [vmem:[%s10692_s14 + $0x8] sm:$0xff] }
0x2446   : > { %7908 = vmatprep.mubr.bf16.mxu0 %v7719_v52  ;;  %9310 = vmatprep.subr.bf16.mxu1 %v9787_v17 }
0x2447   : > { %7909 = vmatmul.mubr.bf16.gmra.mrb[176].mxu0 %v7718_v21 }
0x2449   : > { %9311 = vmatpush3.bf16.msra.mxu1 %v9787_v17 }
0x24e5   : > { %v8726_v62 = vpop.f32.mrb[164].mxu0 }
0x24e6   : > { %v8727_v43 = vpop.f32.mrb[165].mxu0 }
0x24e7   : > { %v8728_v10 = vadd.f32 %v8727_v43, %v8726_v62  ;;  %v8729_v4 = vpop.f32.mrb[166].mxu0 }
0x24e8   : > { %v8730_v46 = vpop.f32.mrb[167].mxu0 }
0x24e9   : > { %v7887_v13 = vadd.f32 %v8728_v10, %v7755_v39  ;;  %v8731_v35 = vadd.f32 %v8730_v46, %v8729_v4  ;;  %v10379_v4 = vld [vmem:[%s10692_s14 + $0x30] sm:$0xff] }
0x24eb   : > { %v7890_v49 = vadd.f32 %v8731_v35, %v7755_v39  ;;  %v7917_v28 = vadd.f32 %v7887_v13, %v13841_v26 }
0x24ed   : > { %v7918_v29 = vadd.f32 %v7890_v49, %v13847_v38  ;;  %v8732_v51 = vpop.f32.mrb[168].mxu0  ;;  %v10380_v49 = vld [vmem:[%s10692_s14 + $0x20] sm:$0xff] }
0x24ee   : > { %v8733_v42 = vpop.f32.mrb[169].mxu0 }
0x24ef   : > { %v7925_v34 = vpack.c.bf16 %v7918_v29, %v7917_v28  ;;  %v8734_v32 = vadd.f32 %v8733_v42, %v8732_v51  ;;  %v8735_v45 = vpop.f32.mrb[170].mxu0  ;;  %v10381_v51 = vld [vmem:[%s10692_s14 + $0x38] sm:$0xff] }
0x24f0   : > { %v8736_v24 = vpop.f32.mrb[171].mxu0 }
0x24f1   : > { %v7895_v41 = vadd.f32 %v8734_v32, %v7755_v39  ;;  %v8737_v12 = vadd.f32 %v8736_v24, %v8735_v45  ;;  %9312 = vmatprep.mubr.msk.bf16.mxu1 %vm1321_vm15, %v7925_v34  ;;  %v10382_v34 = vld [vmem:[%s10692_s14 + $0x28] sm:$0xff] }
0x24f3   : > { %v7898_v33 = vadd.f32 %v8737_v12, %v7755_v39  ;;  %v7919_v8 = vadd.f32 %v7895_v41, %v13844_v2 }
0x24f5   : > { %v7920_v59 = vadd.f32 %v7898_v33, %v13854_v16 }
0x24f7   : > { %v7926_v5 = vpack.c.bf16 %v7920_v59, %v7919_v8 }
0x24f9   : > { %9313 = vmatmul.mubr.msk.bf16.vlgmr.msra.gmra.mrb[172].mxu1 %vm1321_vm15, %v7926_v5 }
0x2512   : > { %v8738_v26 = vpop.f32.mrb[172].mxu0 }
0x2513   : > { %v8739_v38 = vpop.f32.mrb[173].mxu0 }
0x2514   : > { %v8740_v44 = vadd.f32 %v8739_v38, %v8738_v26  ;;  %v8741_v54 = vpop.f32.mrb[174].mxu0 }
0x2515   : > { %v8742_v61 = vpop.f32.mrb[175].mxu0 }
0x2516   : > { %v7903_v0 = vadd.f32 %v8740_v44, %v7755_v39  ;;  %v8743_v6 = vadd.f32 %v8742_v61, %v8741_v54 }
0x2518   : > { %v7906_v23 = vadd.f32 %v8743_v6, %v7755_v39  ;;  %v7921_v57 = vadd.f32 %v7903_v0, %v13861_v47 }
0x251a   : > { %v7922_v63 = vadd.f32 %v7906_v23, %v13867_v48  ;;  %v8744_v56 = vpop.f32.mrb[176].mxu0  ;;  %v14452_v48 = vsub.s32 5, %v14439_v3  ;;  %v10375_v3 = vld [vmem:[%s10692_s14 + $0x10] sm:$0xff] }
0x251b   : > { %v8745_v14 = vpop.f32.mrb[177].mxu0 }
0x251c   : > { %v7927_v2 = vpack.c.bf16 %v7922_v63, %v7921_v57  ;;  %v8746_v16 = vadd.f32 %v8745_v14, %v8744_v56  ;;  %v8747_v50 = vpop.f32.mrb[178].mxu0  ;;  %v7940_v25 = vrot.slane %v13835_v9, %v14452_v48 }
0x251d   : > { %v8748_v15 = vpop.f32.mrb[179].mxu0 }
0x251e   : > { %v7911_v36 = vadd.f32 %v8746_v16, %v7755_v39  ;;  %v8749_v11 = vadd.f32 %v8748_v15, %v8747_v50  ;;  %9316 = vmatprep.mubr.msk.bf16.mxu1 %vm1321_vm15, %v7927_v2 }
0x2520   : > { %v7914_v27 = vadd.f32 %v8749_v11, %v7755_v39  ;;  %v7923_v53 = vadd.f32 %v7911_v36, %v13864_v19 }
0x2522   : > { %v7924_v47 = vadd.f32 %v7914_v27, %v13872_v31 }
0x2524   : > { %v7928_v55 = vpack.c.bf16 %v7924_v47, %v7923_v53 }
0x2526   : > { %9317 = vmatmul.mubr.msk.bf16.gmra.mrb[176].mxu1 %vm1321_vm15, %v7928_v55 }
0x25cc   : > { %v9314_v18 = vpop.f32.mrb[172].mxu1 }
0x25cd   : > { %v8020_v60 = vadd.f32 %v9314_v18, %v7940_v25  ;;  %v8011_v1 = vpop.f32.mrb[173].mxu1 }
0x25ce   : > { %v8012_v19 = vadd.f32 %v8011_v1, %v7940_v25  ;;  %v9315_v31 = vpop.f32.mrb[174].mxu1 }
0x25cf   : > { %v8044_v40 = vadd.f32 %v10375_v3, %v8020_v60  ;;  %v8023_v20 = vadd.f32 %v9315_v31, %v7940_v25  ;;  %v8014_v9 = vpop.f32.mrb[175].mxu1 }
0x25d0   : > { %v8042_v21 = vadd.f32 %v10376_v30, %v8012_v19  ;;  %v8015_v52 = vadd.f32 %v8014_v9, %v7940_v25 }
0x25d1   : > { %8052 = vst.msk [vmem:[%s14058_s23 + $0x10] sm:$0xff] %vm1173_vm14, %v8044_v40  ;;  %v8045_v7 = vadd.f32 %v10377_v22, %v8023_v20 }
0x25d2   : > { %8050 = vst.msk [vmem:[%s14058_s23] sm:$0xff] %vm1173_vm14, %v8042_v21  ;;  %v8043_v17 = vadd.f32 %v10378_v58, %v8015_v52 }
0x25d3   : > { %8053 = vst.msk [vmem:[%s14058_s23 + $0x18] sm:$0xff] %vm1173_vm14, %v8045_v7 }
0x25d4   : > { %8051 = vst.msk [vmem:[%s14058_s23 + $0x8] sm:$0xff] %vm1173_vm14, %v8043_v17 }
0x25f9   : > { %v9318_v62 = vpop.f32.mrb[176].mxu1 }
0x25fa   : > { %v8036_v37 = vadd.f32 %v9318_v62, %v7940_v25  ;;  %v8027_v39 = vpop.f32.mrb[177].mxu1 }
0x25fb   : > { %v8028_v43 = vadd.f32 %v8027_v39, %v7940_v25  ;;  %v9319_v10 = vpop.f32.mrb[178].mxu1 }
0x25fc   : > { %v8048_v46 = vadd.f32 %v10379_v4, %v8036_v37  ;;  %v8039_v13 = vadd.f32 %v9319_v10, %v7940_v25  ;;  %v8030_v35 = vpop.f32.mrb[179].mxu1 }
0x25fd   : > { %v8046_v28 = vadd.f32 %v10380_v49, %v8028_v43  ;;  %v8031_v29 = vadd.f32 %v8030_v35, %v7940_v25 }
0x25fe   : > { %8056 = vst.msk [vmem:[%s14058_s23 + $0x30] sm:$0xff] %vm1173_vm14, %v8048_v46  ;;  %v8049_v42 = vadd.f32 %v10381_v51, %v8039_v13 }
0x25ff   : > { %8054 = vst.msk [vmem:[%s14058_s23 + $0x20] sm:$0xff] %vm1173_vm14, %v8046_v28  ;;  %v8047_v32 = vadd.f32 %v10382_v34, %v8031_v29 }
0x2600   : > { %8057 = vst.msk [vmem:[%s14058_s23 + $0x38] sm:$0xff] %vm1173_vm14, %v8049_v42 }
0x2601   : > { %8055 = vst.msk [vmem:[%s14058_s23 + $0x28] sm:$0xff] %vm1173_vm14, %v8047_v32 }
0x2602 PF: > { %s14454_s12 = sld [smem:[#allocation8_spill]]  ;;  %s14455_s30 = smov %s10471_s10 }
0x2603   : > { %s14456_s10 = smov %s10475_s11  ;;  %s14457_s11 = smov %s10628_s24 }
0x2608   : > { %p20_p8 = scmp.ge.s32.totalorder %s14454_s12, 4  }
0x260a   :  { %22 = sbr.rel (!%p20_p8) target bundleno = 4 (0x4), region = 109 }
0x2611   :  { %8079 = vsyncpa [#allocation3], 1 }
0x2612   :  { %8081 = vsyncpa [#allocation3 + $0x1], 1 }
0x2613   :  { %8082 = vsyncpa [#allocation5], 1 }

</bundles_post_ra>
